<compile_context>
chip_gen: v7x
topology: tpu7x:2x2x1
jax: 0.10.0
libtpu: 0.0.40
codegen_flags: <defaults>
</compile_context>

<pallas_src>
import functools

import jax
import jax.numpy as jnp
from jax.experimental import pallas as pl
from jax.experimental.pallas import tpu as pltpu


# ---------------------------------------------------------------------------
# Shared compute bodies
# ---------------------------------------------------------------------------
def _point_mlp(x, w1, b1, w2, b2, w3, b3):
    # x: (k, TN) bf16.  conv1 contracts dim 0 of the native-layout block so
    # the point axis stays lane-dense.  (If Mosaic emits a per-tile transpose
    # for the MXU it is XLU work hidden under conv3 — conv1 is ~3% of FLOPs.)
    h = jax.lax.dot_general(
        x, w1, dimension_numbers=(((0,), (0,)), ((), ())),
        preferred_element_type=jnp.float32)
    h = jnp.maximum(h + b1, 0.0)                                   # (TN, 64)
    h = jnp.dot(h.astype(jnp.bfloat16), w2, preferred_element_type=jnp.float32)
    h = jnp.maximum(h + b2, 0.0)                                   # (TN, 128)
    h = jnp.dot(h.astype(jnp.bfloat16), w3, preferred_element_type=jnp.float32)
    h = jnp.maximum(h + b3, 0.0)                                   # (TN, 1024)
    return h


def _fc_head(f, w4, b4, w5, b5, w6, b6i):
    g = jnp.dot(f.astype(jnp.bfloat16), w4, preferred_element_type=jnp.float32)
    g = jnp.maximum(g + b4, 0.0)                                   # (B, 512)
    g = jnp.dot(g.astype(jnp.bfloat16), w5, preferred_element_type=jnp.float32)
    g = jnp.maximum(g + b5, 0.0)                                   # (B, 256)
    g = jnp.dot(g.astype(jnp.bfloat16), w6, preferred_element_type=jnp.float32)
    return g + b6i                                                 # (B, k*k)


def _tile_max(h, n, tn, n_true, needs_mask):
    # Mask padded points (rows) to -inf before the max; only traced when
    # padding exists (static condition).
    if needs_mask:
        valid = n_true - n * tn                                    # scalar
        rows = jax.lax.broadcasted_iota(jnp.int32, (tn, 1), 0)
        h = jnp.where(rows < valid, h, -jnp.inf)
    return jnp.max(h, axis=0, keepdims=True)                       # (1, 1024)


# ---------------------------------------------------------------------------
# Kernels
# ---------------------------------------------------------------------------
def _fused_kernel(x_ref, w1, b1, w2, b2, w3, b3, w4, b4, w5, b5, w6, b6i,
                  out_ref, feat_ref, *, tn, n_true, needs_mask):
    b = pl.program_id(0)
    n = pl.program_id(1)

    # Keep the resident output block defined on every step (it is only
    # meaningfully written on the final step).
    @pl.when(jnp.logical_and(b == 0, n == 0))
    def _():
        out_ref[...] = jnp.zeros_like(out_ref)

    h = _point_mlp(x_ref[0], w1[...], b1[...], w2[...], b2[...],
                   w3[...], b3[...])
    tile_max = _tile_max(h, n, tn, n_true, needs_mask)

    @pl.when(n == 0)
    def _():
        feat_ref[pl.ds(b, 1), :] = tile_max

    @pl.when(n > 0)
    def _():
        feat_ref[pl.ds(b, 1), :] = jnp.maximum(feat_ref[pl.ds(b, 1), :],
                                               tile_max)

    is_last = jnp.logical_and(b == pl.num_programs(0) - 1,
                              n == pl.num_programs(1) - 1)

    @pl.when(is_last)
    def _():
        out_ref[...] = _fc_head(feat_ref[...], w4[...], b4[...],
                                w5[...], b5[...], w6[...], b6i[...])


def _conv_max_kernel(x_ref, w1, b1, w2, b2, w3, b3, feat_ref, *,
                     tn, n_true, needs_mask):
    n = pl.program_id(1)
    h = _point_mlp(x_ref[0], w1[...], b1[...], w2[...], b2[...],
                   w3[...], b3[...])
    tile_max = _tile_max(h, n, tn, n_true, needs_mask)

    @pl.when(n == 0)
    def _():
        feat_ref[0] = tile_max

    @pl.when(n > 0)
    def _():
        feat_ref[0] = jnp.maximum(feat_ref[0], tile_max)


def _head_kernel(f_ref, w4, b4, w5, b5, w6, b6i, out_ref):
    out_ref[...] = _fc_head(f_ref[...], w4[...], b4[...], w5[...], b5[...],
                            w6[...], b6i[...])


# ---------------------------------------------------------------------------
# Wrapper
# ---------------------------------------------------------------------------
def _is_v7x():
    try:
        kind = jax.devices()[0].device_kind.lower()
    except Exception:
        return False
    return ("v7" in kind) or ("7x" in kind)


def stnkd_forward(x, p, *, tn=None, fuse_head=None):
    """x: (B, k, N) (PyTorch NCL layout). Returns (B, k, k) float32."""
    B, k, N = x.shape
    kk = k * k
    assert p["b6i"].shape[-1] == kk

    is_v7 = _is_v7x()
    if fuse_head is None:
        # Fuse the head on single-TC parts (v5e/v6e); un-fuse on v7x so the
        # dominant conv stage can shard its batch axis across both TCs.
        fuse_head = not is_v7
    vmem_limit = (32 if is_v7 else 64) * 1024 * 1024

    # Point-tile selection (prefer big, lane-aligned tiles) + padding.
    if tn is None:
        tn = 1024 if N >= 1024 else max(128, pl.cdiv(N, 128) * 128)
    n_pad = pl.cdiv(N, tn) * tn
    nt = n_pad // tn
    needs_mask = (n_pad != N)

    x = x.astype(jnp.bfloat16)               # stream x in bf16
    if needs_mask:
        x = jnp.pad(x, ((0, 0), (0, 0), (0, n_pad - N)))

    def const(arr):                          # grid-invariant 2-D parameter
        return pl.BlockSpec(arr.shape, lambda b, n: (0, 0))

    x_spec = pl.BlockSpec((1, k, tn), lambda b, n: (b, 0, n))
    conv_w = (p["w1"], p["b1"], p["w2"], p["b2"], p["w3"], p["b3"])
    head_w = (p["w4"], p["b4"], p["w5"], p["b5"], p["w6"], p["b6i"])

    if fuse_head:
        kernel = functools.partial(_fused_kernel, tn=tn, n_true=N,
                                   needs_mask=needs_mask)
        out = pl.pallas_call(
            kernel,
            out_shape=jax.ShapeDtypeStruct((B, kk), jnp.float32),
            grid=(B, nt),
            in_specs=[x_spec] + [const(a) for a in conv_w + head_w],
            out_specs=pl.BlockSpec((B, kk), lambda b, n: (0, 0)),
            scratch_shapes=[pltpu.VMEM((B, 1024), jnp.float32)],
            compiler_params=pltpu.CompilerParams(
                # The fused head reads every batch's pooled feature, so the
                # whole grid must run sequentially.
                dimension_semantics=("arbitrary", "arbitrary"),
                vmem_limit_bytes=vmem_limit),
        )(x, *conv_w, *head_w)
    else:
        kernel = functools.partial(_conv_max_kernel, tn=tn, n_true=N,
                                   needs_mask=needs_mask)
        # (B, 1, 1024) keeps the per-batch output block's last two dims equal
        # to the array dims (layout-friendly single-row blocks).
        feat = pl.pallas_call(
            kernel,
            out_shape=jax.ShapeDtypeStruct((B, 1, 1024), jnp.float32),
            grid=(B, nt),
            in_specs=[x_spec] + [const(a) for a in conv_w],
            out_specs=pl.BlockSpec((1, 1, 1024), lambda b, n: (b, 0, 0)),
            compiler_params=pltpu.CompilerParams(
                dimension_semantics=("parallel", "arbitrary"),
                vmem_limit_bytes=vmem_limit),
        )(x, *conv_w)
        out = pl.pallas_call(
            _head_kernel,
            out_shape=jax.ShapeDtypeStruct((B, kk), jnp.float32),
        )(feat.reshape(B, 1024), *head_w)

    return out.reshape(B, k, k)


# ---------------------------------------------------------------------------
# Deterministic parameter construction (eval-mode BN folded into weights).
# ---------------------------------------------------------------------------
def init_params(key, k=64, eps=1e-5):
    ks = jax.random.split(key, 17)

    def lin(kw, kb, c_out, c_in, scale=0.05):
        w = scale * jax.random.normal(kw, (c_out, c_in), dtype=jnp.float32)
        b = scale * jax.random.normal(kb, (c_out,), dtype=jnp.float32)
        return w, b

    def bn(kk_, c):
        g, bt, mu, vr = jax.random.split(kk_, 4)
        gamma = 1.0 + 0.1 * jax.random.normal(g, (c,), dtype=jnp.float32)
        beta = 0.1 * jax.random.normal(bt, (c,), dtype=jnp.float32)
        mean = 0.1 * jax.random.normal(mu, (c,), dtype=jnp.float32)
        var = jax.random.uniform(vr, (c,), jnp.float32, 0.5, 1.5)
        return gamma, beta, mean, var

    def fold(w, b, gamma, beta, mean, var):
        s = gamma / jnp.sqrt(var + eps)
        w_f = (w.T * s[None, :]).astype(jnp.bfloat16)        # (Cin, Cout)
        shift = ((b - mean) * s + beta).reshape(1, -1)       # f32
        return w_f, shift

    p = {}
    w, b = lin(ks[0], ks[1], 64, k)
    p["w1"], p["b1"] = fold(w, b, *bn(ks[2], 64))
    w, b = lin(ks[3], ks[4], 128, 64)
    p["w2"], p["b2"] = fold(w, b, *bn(ks[5], 128))
    w, b = lin(ks[6], ks[7], 1024, 128)
    p["w3"], p["b3"] = fold(w, b, *bn(ks[8], 1024))
    w, b = lin(ks[9], ks[10], 512, 1024)
    p["w4"], p["b4"] = fold(w, b, *bn(ks[11], 512))
    w, b = lin(ks[12], ks[13], 256, 512)
    p["w5"], p["b5"] = fold(w, b, *bn(ks[14], 256))
    w, b = lin(ks[15], ks[16], k * k, 256)
    p["w6"] = w.T.astype(jnp.bfloat16)
    # fc3 has no BN; fold its bias together with the identity offset.
    p["b6i"] = (b + jnp.eye(k, dtype=jnp.float32).reshape(-1)).reshape(1, k * k)
    return p


# Pure-JAX reference with the same precision policy (bf16 matmul operands,
# f32 accumulation) for correctness checking.
def stnkd_reference(x, p):
    B, k, N = x.shape
    xt = jnp.transpose(x, (0, 2, 1)).astype(jnp.float32)     # (B, N, k)

    def mm(a, w):
        return jax.lax.dot_general(
            a.astype(jnp.bfloat16), w,
            dimension_numbers=(((a.ndim - 1,), (0,)), ((), ())),
            preferred_element_type=jnp.float32)

    h = jnp.maximum(mm(xt, p["w1"]) + p["b1"], 0.0)
    h = jnp.maximum(mm(h, p["w2"]) + p["b2"], 0.0)
    h = jnp.maximum(mm(h, p["w3"]) + p["b3"], 0.0)
    f = jnp.max(h, axis=1)                                   # (B, 1024)
    g = jnp.maximum(mm(f, p["w4"]) + p["b4"], 0.0)
    g = jnp.maximum(mm(g, p["w5"]) + p["b5"], 0.0)
    g = mm(g, p["w6"]) + p["b6i"]
    return g.reshape(B, k, k)


if __name__ == "__main__":
    key = jax.random.PRNGKey(0)
    ka, kb, kc, kd = jax.random.split(key, 4)

    def check(x, params, **kw):
        out = jax.block_until_ready(stnkd_forward(x, params, **kw))
        ref = stnkd_reference(x, params)
        B, k, _ = x.shape
        assert out.shape == (B, k, k), out.shape
        if not bool(jnp.allclose(out, ref, atol=2e-2, rtol=2e-2)):
            err = float(jnp.max(jnp.abs(out - ref)))
            raise AssertionError(f"mismatch (max abs err {err}) for {kw}")

    # Case 1: k=64, N a multiple of the tile.  Exercise both head paths and
    # the multi-tile running max (tn=128 -> 4 point tiles), plus default tile.
    B, k, N = 2, 64, 512
    x1 = jax.random.normal(ka, (B, k, N), dtype=jnp.float32)   # NCL layout
    p1 = init_params(kb, k=k)
    check(x1, p1, fuse_head=True, tn=128)
    check(x1, p1, fuse_head=False, tn=128)
    check(x1, p1, fuse_head=False)

    # Case 2: N not a multiple of the tile -> pad + mask path (both heads).
    B2, k2, N2 = 2, 16, 200
    x2 = jax.random.normal(kc, (B2, k2, N2), dtype=jnp.float32)
    p2 = init_params(kd, k=k2)
    check(x2, p2, fuse_head=True, tn=128)
    check(x2, p2, fuse_head=False, tn=128)

    print("KERNEL_OK")
</pallas_src>

<mosaic_0001>
module attributes {stable_mosaic.version = 11 : i64} {
  func.func @_fused_kernel(%arg0: i32, %arg1: i32, %arg2: memref<1x64x128xbf16, #tpu.memory_space<vmem>>, %arg3: memref<64x64xbf16, #tpu.memory_space<vmem>>, %arg4: memref<1x64xf32, #tpu.memory_space<vmem>>, %arg5: memref<64x128xbf16, #tpu.memory_space<vmem>>, %arg6: memref<1x128xf32, #tpu.memory_space<vmem>>, %arg7: memref<128x1024xbf16, #tpu.memory_space<vmem>>, %arg8: memref<1x1024xf32, #tpu.memory_space<vmem>>, %arg9: memref<1024x512xbf16, #tpu.memory_space<vmem>>, %arg10: memref<1x512xf32, #tpu.memory_space<vmem>>, %arg11: memref<512x256xbf16, #tpu.memory_space<vmem>>, %arg12: memref<1x256xf32, #tpu.memory_space<vmem>>, %arg13: memref<256x4096xbf16, #tpu.memory_space<vmem>>, %arg14: memref<1x4096xf32, #tpu.memory_space<vmem>>, %arg15: memref<2x4096xf32, #tpu.memory_space<vmem>>, %arg16: memref<2x1024xf32, #tpu.memory_space<vmem>>) attributes {dimension_semantics = [#tpu.dimension_semantics<arbitrary>, #tpu.dimension_semantics<arbitrary>], iteration_bounds = array<i64: 2, 4>, scalar_prefetch = 0 : i64, scratch_operands = 1 : i64, tpu.core_type = #tpu.core_type<tc>, window_params = [{transform_indices = @transform_0, window_bounds = array<i64: 1, 64, 128>}, {pipeline_mode = #tpu.pipeline_mode<synchronous>, transform_indices = @transform_1, window_bounds = array<i64: 64, 64>}, {pipeline_mode = #tpu.pipeline_mode<synchronous>, transform_indices = @transform_2, window_bounds = array<i64: 1, 64>}, {pipeline_mode = #tpu.pipeline_mode<synchronous>, transform_indices = @transform_3, window_bounds = array<i64: 64, 128>}, {pipeline_mode = #tpu.pipeline_mode<synchronous>, transform_indices = @transform_4, window_bounds = array<i64: 1, 128>}, {pipeline_mode = #tpu.pipeline_mode<synchronous>, transform_indices = @transform_5, window_bounds = array<i64: 128, 1024>}, {pipeline_mode = #tpu.pipeline_mode<synchronous>, transform_indices = @transform_6, window_bounds = array<i64: 1, 1024>}, {pipeline_mode = #tpu.pipeline_mode<synchronous>, transform_indices = @transform_7, window_bounds = array<i64: 1024, 512>}, {pipeline_mode = #tpu.pipeline_mode<synchronous>, transform_indices = @transform_8, window_bounds = array<i64: 1, 512>}, {pipeline_mode = #tpu.pipeline_mode<synchronous>, transform_indices = @transform_9, window_bounds = array<i64: 512, 256>}, {pipeline_mode = #tpu.pipeline_mode<synchronous>, transform_indices = @transform_10, window_bounds = array<i64: 1, 256>}, {pipeline_mode = #tpu.pipeline_mode<synchronous>, transform_indices = @transform_11, window_bounds = array<i64: 256, 4096>}, {pipeline_mode = #tpu.pipeline_mode<synchronous>, transform_indices = @transform_12, window_bounds = array<i64: 1, 4096>}, {pipeline_mode = #tpu.pipeline_mode<synchronous>, transform_indices = @transform_13, window_bounds = array<i64: 2, 4096>}]} {
    %c0_i32 = arith.constant 0 : i32
    %0 = arith.cmpi eq, %arg0, %c0_i32 : i32
    %c0_i32_0 = arith.constant 0 : i32
    %1 = arith.cmpi eq, %arg1, %c0_i32_0 : i32
    %2 = arith.andi %0, %1 : i1
    %3 = arith.extui %2 : i1 to i32
    %c0_i32_1 = arith.constant 0 : i32
    %4 = arith.cmpi ne, %3, %c0_i32_1 : i32
    scf.if %4 {
      %cst_27 = arith.constant 0.000000e+00 : f32
      %43 = vector.broadcast %cst_27 : f32 to vector<2x4096xf32>
      %c0_28 = arith.constant 0 : index
      %c0_29 = arith.constant 0 : index
      %44 = vector.load %arg15[%c0_28, %c0_29] : memref<2x4096xf32, #tpu.memory_space<vmem>>, vector<2x4096xf32>
      tpu.vector_store %arg15[%c0_28, %c0_29], %43 {strides = array<i32>} : memref<2x4096xf32, #tpu.memory_space<vmem>>, vector<2x4096xf32>,
    } else {
    }
    %c0 = arith.constant 0 : index
    %c0_2 = arith.constant 0 : index
    %c0_3 = arith.constant 0 : index
    %5 = vector.load %arg2[%c0, %c0_2, %c0_3] : memref<1x64x128xbf16, #tpu.memory_space<vmem>>, vector<1x64x128xbf16>
    %6 = vector.shape_cast %5 : vector<1x64x128xbf16> to vector<64x128xbf16>
    %c0_4 = arith.constant 0 : index
    %c0_5 = arith.constant 0 : index
    %7 = vector.load %arg3[%c0_4, %c0_5] : memref<64x64xbf16, #tpu.memory_space<vmem>>, vector<64x64xbf16>
    %c0_6 = arith.constant 0 : index
    %c0_7 = arith.constant 0 : index
    %8 = vector.load %arg4[%c0_6, %c0_7] : memref<1x64xf32, #tpu.memory_space<vmem>>, vector<1x64xf32>
    %c0_8 = arith.constant 0 : index
    %c0_9 = arith.constant 0 : index
    %9 = vector.load %arg5[%c0_8, %c0_9] : memref<64x128xbf16, #tpu.memory_space<vmem>>, vector<64x128xbf16>
    %c0_10 = arith.constant 0 : index
    %c0_11 = arith.constant 0 : index
    %10 = vector.load %arg6[%c0_10, %c0_11] : memref<1x128xf32, #tpu.memory_space<vmem>>, vector<1x128xf32>
    %c0_12 = arith.constant 0 : index
    %c0_13 = arith.constant 0 : index
    %11 = vector.load %arg7[%c0_12, %c0_13] : memref<128x1024xbf16, #tpu.memory_space<vmem>>, vector<128x1024xbf16>
    %c0_14 = arith.constant 0 : index
    %c0_15 = arith.constant 0 : index
    %12 = vector.load %arg8[%c0_14, %c0_15] : memref<1x1024xf32, #tpu.memory_space<vmem>>, vector<1x1024xf32>
    %cst = arith.constant dense<0.000000e+00> : vector<128x64xf32>
    %13 = tpu.matmul %6, %7, %cst {dimension_numbers = #tpu.dot_dimension_numbers<[0], [0], [1], [1], [0, 1, 1, 1], [], []>} : vector<64x128xbf16>, vector<64x64xbf16>, vector<128x64xf32> -> vector<128x64xf32>
    %14 = vector.broadcast %8 : vector<1x64xf32> to vector<128x64xf32>
    %15 = arith.addf %13, %14 : vector<128x64xf32>
    %cst_16 = arith.constant 0.000000e+00 : f32
    %16 = vector.broadcast %cst_16 : f32 to vector<128x64xf32>
    %17 = arith.maximumf %15, %16 : vector<128x64xf32>
    %18 = arith.truncf %17 : vector<128x64xf32> to vector<128x64xbf16>
    %cst_17 = arith.constant dense<0.000000e+00> : vector<128x128xf32>
    %19 = tpu.matmul %18, %9, %cst_17 {dimension_numbers = #tpu.dot_dimension_numbers<[1], [0], [0], [1], [0, 0, 1, 1], [], []>} : vector<128x64xbf16>, vector<64x128xbf16>, vector<128x128xf32> -> vector<128x128xf32>
    %20 = vector.broadcast %10 : vector<1x128xf32> to vector<128x128xf32>
    %21 = arith.addf %19, %20 : vector<128x128xf32>
    %cst_18 = arith.constant 0.000000e+00 : f32
    %22 = vector.broadcast %cst_18 : f32 to vector<128x128xf32>
    %23 = arith.maximumf %21, %22 : vector<128x128xf32>
    %24 = arith.truncf %23 : vector<128x128xf32> to vector<128x128xbf16>
    %cst_19 = arith.constant dense<0.000000e+00> : vector<128x1024xf32>
    %25 = tpu.matmul %24, %11, %cst_19 {dimension_numbers = #tpu.dot_dimension_numbers<[1], [0], [0], [1], [0, 0, 1, 1], [], []>} : vector<128x128xbf16>, vector<128x1024xbf16>, vector<128x1024xf32> -> vector<128x1024xf32>
    %26 = vector.broadcast %12 : vector<1x1024xf32> to vector<128x1024xf32>
    %27 = arith.addf %25, %26 : vector<128x1024xf32>
    %cst_20 = arith.constant 0.000000e+00 : f32
    %28 = vector.broadcast %cst_20 : f32 to vector<128x1024xf32>
    %29 = arith.maximumf %27, %28 : vector<128x1024xf32>
    %cst_21 = arith.constant dense<0xFF800000> : vector<1024xf32>
    %30 = vector.multi_reduction <maximumf>, %29, %cst_21 [0] : vector<128x1024xf32> to vector<1024xf32>
    %31 = vector.shape_cast %30 : vector<1024xf32> to vector<1x1024xf32>
    %c0_i32_22 = arith.constant 0 : i32
    %32 = arith.cmpi eq, %arg1, %c0_i32_22 : i32
    %33 = arith.extui %32 : i1 to i32
    %c0_i32_23 = arith.constant 0 : i32
    %34 = arith.cmpi ne, %33, %c0_i32_23 : i32
    scf.if %34 {
      %43 = arith.index_cast %arg0 : i32 to index
      %c0_27 = arith.constant 0 : index
      %44 = vector.load %arg16[%43, %c0_27] : memref<2x1024xf32, #tpu.memory_space<vmem>>, vector<1x1024xf32>
      tpu.vector_store %arg16[%43, %c0_27], %31 {strides = array<i32>} : memref<2x1024xf32, #tpu.memory_space<vmem>>, vector<1x1024xf32>,
    } else {
    }
    %c0_i32_24 = arith.constant 0 : i32
    %35 = arith.cmpi sgt, %arg1, %c0_i32_24 : i32
    %36 = arith.extui %35 : i1 to i32
    %c0_i32_25 = arith.constant 0 : i32
    %37 = arith.cmpi ne, %36, %c0_i32_25 : i32
    scf.if %37 {
      %43 = arith.index_cast %arg0 : i32 to index
      %c0_27 = arith.constant 0 : index
      %44 = vector.load %arg16[%43, %c0_27] : memref<2x1024xf32, #tpu.memory_space<vmem>>, vector<1x1024xf32>
      %45 = arith.maximumf %44, %31 : vector<1x1024xf32>
      %46 = arith.index_cast %arg0 : i32 to index
      %c0_28 = arith.constant 0 : index
      %47 = vector.load %arg16[%46, %c0_28] : memref<2x1024xf32, #tpu.memory_space<vmem>>, vector<1x1024xf32>
      tpu.vector_store %arg16[%46, %c0_28], %45 {strides = array<i32>} : memref<2x1024xf32, #tpu.memory_space<vmem>>, vector<1x1024xf32>,
    } else {
    }
    %c1_i32 = arith.constant 1 : i32
    %38 = arith.cmpi eq, %arg0, %c1_i32 : i32
    %c3_i32 = arith.constant 3 : i32
    %39 = arith.cmpi eq, %arg1, %c3_i32 : i32
    %40 = arith.andi %38, %39 : i1
    %41 = arith.extui %40 : i1 to i32
    %c0_i32_26 = arith.constant 0 : i32
    %42 = arith.cmpi ne, %41, %c0_i32_26 : i32
    scf.if %42 {
      %c0_27 = arith.constant 0 : index
      %c0_28 = arith.constant 0 : index
      %43 = vector.load %arg16[%c0_27, %c0_28] : memref<2x1024xf32, #tpu.memory_space<vmem>>, vector<2x1024xf32>
      %c0_29 = arith.constant 0 : index
      %c0_30 = arith.constant 0 : index
      %44 = vector.load %arg9[%c0_29, %c0_30] : memref<1024x512xbf16, #tpu.memory_space<vmem>>, vector<1024x512xbf16>
      %c0_31 = arith.constant 0 : index
      %c0_32 = arith.constant 0 : index
      %45 = vector.load %arg10[%c0_31, %c0_32] : memref<1x512xf32, #tpu.memory_space<vmem>>, vector<1x512xf32>
      %c0_33 = arith.constant 0 : index
      %c0_34 = arith.constant 0 : index
      %46 = vector.load %arg11[%c0_33, %c0_34] : memref<512x256xbf16, #tpu.memory_space<vmem>>, vector<512x256xbf16>
      %c0_35 = arith.constant 0 : index
      %c0_36 = arith.constant 0 : index
      %47 = vector.load %arg12[%c0_35, %c0_36] : memref<1x256xf32, #tpu.memory_space<vmem>>, vector<1x256xf32>
      %c0_37 = arith.constant 0 : index
      %c0_38 = arith.constant 0 : index
      %48 = vector.load %arg13[%c0_37, %c0_38] : memref<256x4096xbf16, #tpu.memory_space<vmem>>, vector<256x4096xbf16>
      %c0_39 = arith.constant 0 : index
      %c0_40 = arith.constant 0 : index
      %49 = vector.load %arg14[%c0_39, %c0_40] : memref<1x4096xf32, #tpu.memory_space<vmem>>, vector<1x4096xf32>
      %50 = arith.truncf %43 : vector<2x1024xf32> to vector<2x1024xbf16>
      %cst_41 = arith.constant dense<0.000000e+00> : vector<2x512xf32>
      %51 = tpu.matmul %50, %44, %cst_41 {dimension_numbers = #tpu.dot_dimension_numbers<[1], [0], [0], [1], [0, 0, 1, 1], [], []>} : vector<2x1024xbf16>, vector<1024x512xbf16>, vector<2x512xf32> -> vector<2x512xf32>
      %52 = vector.broadcast %45 : vector<1x512xf32> to vector<2x512xf32>
      %53 = arith.addf %51, %52 : vector<2x512xf32>
      %cst_42 = arith.constant 0.000000e+00 : f32
      %54 = vector.broadcast %cst_42 : f32 to vector<2x512xf32>
      %55 = arith.maximumf %53, %54 : vector<2x512xf32>
      %56 = arith.truncf %55 : vector<2x512xf32> to vector<2x512xbf16>
      %cst_43 = arith.constant dense<0.000000e+00> : vector<2x256xf32>
      %57 = tpu.matmul %56, %46, %cst_43 {dimension_numbers = #tpu.dot_dimension_numbers<[1], [0], [0], [1], [0, 0, 1, 1], [], []>} : vector<2x512xbf16>, vector<512x256xbf16>, vector<2x256xf32> -> vector<2x256xf32>
      %58 = vector.broadcast %47 : vector<1x256xf32> to vector<2x256xf32>
      %59 = arith.addf %57, %58 : vector<2x256xf32>
      %cst_44 = arith.constant 0.000000e+00 : f32
      %60 = vector.broadcast %cst_44 : f32 to vector<2x256xf32>
      %61 = arith.maximumf %59, %60 : vector<2x256xf32>
      %62 = arith.truncf %61 : vector<2x256xf32> to vector<2x256xbf16>
      %cst_45 = arith.constant dense<0.000000e+00> : vector<2x4096xf32>
      %63 = tpu.matmul %62, %48, %cst_45 {dimension_numbers = #tpu.dot_dimension_numbers<[1], [0], [0], [1], [0, 0, 1, 1], [], []>} : vector<2x256xbf16>, vector<256x4096xbf16>, vector<2x4096xf32> -> vector<2x4096xf32>
      %64 = vector.broadcast %49 : vector<1x4096xf32> to vector<2x4096xf32>
      %65 = arith.addf %63, %64 : vector<2x4096xf32>
      %c0_46 = arith.constant 0 : index
      %c0_47 = arith.constant 0 : index
      %66 = vector.load %arg15[%c0_46, %c0_47] : memref<2x4096xf32, #tpu.memory_space<vmem>>, vector<2x4096xf32>
      tpu.vector_store %arg15[%c0_46, %c0_47], %65 {strides = array<i32>} : memref<2x4096xf32, #tpu.memory_space<vmem>>, vector<2x4096xf32>,
    } else {
    }
    return
  }
  func.func @transform_0(%arg0: i32, %arg1: i32) -> (i32, i32, i32) {
    %c0_i32 = arith.constant 0 : i32
    %c0_i32_0 = arith.constant 0 : i32
    return %arg0, %c0_i32, %arg1 : i32, i32, i32
  }
  func.func @transform_1(%arg0: i32, %arg1: i32) -> (i32, i32) {
    %c0_i32 = arith.constant 0 : i32
    %c0_i32_0 = arith.constant 0 : i32
    %c0_i32_1 = arith.constant 0 : i32
    return %c0_i32, %c0_i32_0 : i32, i32
  }
  func.func @transform_2(%arg0: i32, %arg1: i32) -> (i32, i32) {
    %c0_i32 = arith.constant 0 : i32
    %c0_i32_0 = arith.constant 0 : i32
    %c0_i32_1 = arith.constant 0 : i32
    return %c0_i32, %c0_i32_0 : i32, i32
  }
  func.func @transform_3(%arg0: i32, %arg1: i32) -> (i32, i32) {
    %c0_i32 = arith.constant 0 : i32
    %c0_i32_0 = arith.constant 0 : i32
    %c0_i32_1 = arith.constant 0 : i32
    return %c0_i32, %c0_i32_0 : i32, i32
  }
  func.func @transform_4(%arg0: i32, %arg1: i32) -> (i32, i32) {
    %c0_i32 = arith.constant 0 : i32
    %c0_i32_0 = arith.constant 0 : i32
    %c0_i32_1 = arith.constant 0 : i32
    return %c0_i32, %c0_i32_0 : i32, i32
  }
  func.func @transform_5(%arg0: i32, %arg1: i32) -> (i32, i32) {
    %c0_i32 = arith.constant 0 : i32
    %c0_i32_0 = arith.constant 0 : i32
    %c0_i32_1 = arith.constant 0 : i32
    return %c0_i32, %c0_i32_0 : i32, i32
  }
  func.func @transform_6(%arg0: i32, %arg1: i32) -> (i32, i32) {
    %c0_i32 = arith.constant 0 : i32
    %c0_i32_0 = arith.constant 0 : i32
    %c0_i32_1 = arith.constant 0 : i32
    return %c0_i32, %c0_i32_0 : i32, i32
  }
  func.func @transform_7(%arg0: i32, %arg1: i32) -> (i32, i32) {
    %c0_i32 = arith.constant 0 : i32
    %c0_i32_0 = arith.constant 0 : i32
    %c0_i32_1 = arith.constant 0 : i32
    return %c0_i32, %c0_i32_0 : i32, i32
  }
  func.func @transform_8(%arg0: i32, %arg1: i32) -> (i32, i32) {
    %c0_i32 = arith.constant 0 : i32
    %c0_i32_0 = arith.constant 0 : i32
    %c0_i32_1 = arith.constant 0 : i32
    return %c0_i32, %c0_i32_0 : i32, i32
  }
  func.func @transform_9(%arg0: i32, %arg1: i32) -> (i32, i32) {
    %c0_i32 = arith.constant 0 : i32
    %c0_i32_0 = arith.constant 0 : i32
    %c0_i32_1 = arith.constant 0 : i32
    return %c0_i32, %c0_i32_0 : i32, i32
  }
  func.func @transform_10(%arg0: i32, %arg1: i32) -> (i32, i32) {
    %c0_i32 = arith.constant 0 : i32
    %c0_i32_0 = arith.constant 0 : i32
    %c0_i32_1 = arith.constant 0 : i32
    return %c0_i32, %c0_i32_0 : i32, i32
  }
  func.func @transform_11(%arg0: i32, %arg1: i32) -> (i32, i32) {
    %c0_i32 = arith.constant 0 : i32
    %c0_i32_0 = arith.constant 0 : i32
    %c0_i32_1 = arith.constant 0 : i32
    return %c0_i32, %c0_i32_0 : i32, i32
  }
  func.func @transform_12(%arg0: i32, %arg1: i32) -> (i32, i32) {
    %c0_i32 = arith.constant 0 : i32
    %c0_i32_0 = arith.constant 0 : i32
    %c0_i32_1 = arith.constant 0 : i32
    return %c0_i32, %c0_i32_0 : i32, i32
  }
  func.func @transform_13(%arg0: i32, %arg1: i32) -> (i32, i32) {
    %c0_i32 = arith.constant 0 : i32
    %c0_i32_0 = arith.constant 0 : i32
    %c0_i32_1 = arith.constant 0 : i32
    return %c0_i32, %c0_i32_0 : i32, i32
  }
}

</mosaic_0001>

<bundles_post_ra>
// kernel: tpu_custom_call.1
= control target key start
LH: loop header
LB: loop body
LE: loop exit
PB: predicated region body
PF: predicated region fallthrough
CT: control target
= control target key end

     0   :  { %s12501_s0 = inlined_call_operand.hbm [shape: bf16[2,64,512], index: 0, kind: input, shape index: {}]   ;;  %s12502_s1 = inlined_call_operand.hbm [shape: bf16[64,64], index: 1, kind: input, shape index: {}]   ;;  %s12503_s2 = inlined_call_operand.hbm [shape: f32[1,64], index: 2, kind: input, shape index: {}]   ;;  %s12504_s3 = inlined_call_operand.hbm [shape: bf16[64,128], index: 3, kind: input, shape index: {}]   ;;  %s12505_s4 = inlined_call_operand.hbm [shape: f32[1,128], index: 4, kind: input, shape index: {}]   ;;  %s12506_s5 = inlined_call_operand.hbm [shape: bf16[128,1024], index: 5, kind: input, shape index: {}]   ;;  %s12507_s6 = inlined_call_operand.hbm [shape: f32[1,1024], index: 6, kind: input, shape index: {}]   ;;  %s12508_s7 = inlined_call_operand.hbm [shape: bf16[1024,512], index: 7, kind: input, shape index: {}]   ;;  %s12509_s8 = inlined_call_operand.hbm [shape: f32[1,512], index: 8, kind: input, shape index: {}]   ;;  %s12510_s9 = inlined_call_operand.hbm [shape: bf16[512,256], index: 9, kind: input, shape index: {}]   ;;  %s12511_s10 = inlined_call_operand.hbm [shape: f32[1,256], index: 10, kind: input, shape index: {}]   ;;  %s12512_s11 = inlined_call_operand.hbm [shape: bf16[256,4096], index: 11, kind: input, shape index: {}]   ;;  %s12513_s12 = inlined_call_operand.hbm [shape: f32[1,4096], index: 12, kind: input, shape index: {}]   ;;  %s12514_s13 = inlined_call_operand.hbm [shape: f32[2,4096], index: 13, kind: output, shape index: {}]  }
   0x1   :  { %12532 = sst [smem:[#allocation40_spill]] %s12501_s0 }
   0x2   :  { %12533 = sst [smem:[#allocation41_spill]] %s12502_s1 }
   0x3   :  { %12534 = sst [smem:[#allocation42_spill]] %s12503_s2 }
   0x4   :  { %12535 = sst [smem:[#allocation43_spill]] %s12504_s3 }
   0x5   :  { %12536 = sst [smem:[#allocation44_spill]] %s12505_s4 }
   0x6   :  { %12537 = sst [smem:[#allocation45_spill]] %s12514_s13 }
   0x7   :  { %18 = vsyncpa [#allocation4], 0 }
   0x8   :  { %20 = vsyncpa [#allocation4 + $0x1], 0 }
   0x9   :  { %21 = vsyncpa [#allocation7], 0 }
   0xa   :  { %22 = vsyncpa [#allocation10], 0 }
   0xb   :  { %23 = vsyncpa [#allocation13], 0 }
   0xc   :  { %24 = vsyncpa [#allocation16], 0 }
   0xd   :  { %25 = vsyncpa [#allocation19], 0 }
   0xe   :  { %26 = vsyncpa [#allocation22], 0 }
   0xf   :  { %27 = vsyncpa [#allocation5], 0  ;;  %s11450_s25 = smov 0   ;;  %s11452_s26 = smov 0  }
  0x10   :  { %s11454_s27 = smov 0   ;;  %s11456_s28 = smov 0  }
  0x11   :  { %s11458_s29 = smov 0   ;;  %s11460_s30 = smov 0  }
  0x12   :  { %s11462_s14 = smov 0   ;;  %s11464_s15 = smov 0  }
  0x13 LB: > { %12538 = sst [smem:[#allocation33_spill]] %s11322_s25  ;;  %s12515_s16 = sadd.s32 4294967295, %s11350_s15   ;;  %s11350_s15 = sphi %s11464_s15, %s33_s15   ;;  %s11346_s14 = sphi %s11462_s14, %s12591_s14   ;;  %s11342_s30 = sphi %s11460_s30, %s12590_s30   ;;  %s11338_s29 = sphi %s11458_s29, %s12589_s29   ;;  %s11334_s28 = sphi %s11456_s28, %s12588_s28   ;;  %s11330_s27 = sphi %s11454_s27, %s12587_s27   ;;  %s11326_s26 = sphi %s11452_s26, %s12586_s26   ;;  %s11322_s25 = sphi %s11450_s25, %s12584_s25  }
  0x14   : > { %12539 = sst [smem:[#allocation34_spill]] %s11326_s26  ;;  %p9081_p0 = scmp.ge.s32.totalorder %s11350_s15, 1 }
  0x15   : > { %12540 = sst [smem:[#allocation35_spill]] %s11334_s28  ;;  %p11494_p1 = scmp.eq.s32.totalorder %s12515_s16, 0 }
  0x16   : > { %12541 = sst [smem:[#allocation36_spill]] %s11338_s29  ;;  %p351_p2 = scmp.lt.s32.totalorder %s11350_s15, 9 }
  0x17   : > { %12542 = sst [smem:[#allocation37_spill]] %s11350_s15  ;;  %s11352_s19 = smov [#allocation6]  }
  0x18   : > { %s12543_s17 = scalar_select %p11494_p1, 1, 0 }
  0x19   : > { %p11499_p3 = pnand %p9081_p0, %p351_p2  ;;  %s363_s20 = sshll.u32 %s11352_s19, 4  ;;  %s11503_s20 = int_to_ptr.vmem [resolvable:$true] %s363_s20 }
  0x1a   : > { %12544 = sst [smem:[#allocation38_spill]] %s12543_s17  ;;  %s11353_s22 = smov [#allocation9]  }
  0x1b   : > { %s12545_s18 = scalar_select %p11499_p3, 1, 0 }
  0x1c   : > { %p10210_p4 = pneg %p11499_p3  ;;  %s387_s23 = sshll.u32 %s11353_s22, 4  ;;  %s11513_s23 = int_to_ptr.vmem [resolvable:$true] %s387_s23 }
  0x1d   : > { %12546 = sst [smem:[#allocation39_spill]] %s12545_s18  ;;  %s11354_s24 = smov [#allocation12]  }
  0x1e   : > { %p11509_p5 = pnand %p10210_p4, %p11494_p1  ;;  %s11515_s16 = sshll.u32 %s11354_s24, 4  ;;  %s412_s16 = int_to_ptr.vmem [resolvable:$true] %s11515_s16 }
  0x1f   : > { %s12548_s1 = sld [smem:[#allocation41_spill]] }
  0x20   : > { %p11525_p7 = pneg %p11509_p5 }
  0x25   : > { %s10864_s19 = scalar_lea.hbm %s12548_s1, 512 }
  0x26   : > { %p10865_p6 = scmp.ne.s32.totalorder %s12548_s1, %s10864_s19  ;;  %p10871_p10 = scmp.lt.u32.totalorder %s10864_s19, %s12548_s1 }
  0x28   : > { %p10867_p8 = pnand %p11525_p7, %p10865_p6 }
  0x2a   : > { %p10868_p9 = pneg %p10867_p8 }
  0x2c   : > { %p10873_p11 = pnand %p10871_p10, %p10868_p9 }
  0x2e   : > { %10876 = shalt.err (!%p10873_p11)
}
  0x2f   : > { %s10877_s13 = scalar_lea.vmem %s11503_s20, 512  ;;  %p10885_p2 = scmp.lt.s32.totalorder %s11503_s20, %s11503_s20 }
  0x30   : > { %p10878_p12 = scmp.ne.s32.totalorder %s11503_s20, %s10877_s13  ;;  %p10886_p4 = scmp.lt.s32.totalorder %s10877_s13, %s10877_s13 }
  0x32   : > { %p10880_p13 = pnand %p10878_p12, %p11525_p7  ;;  %p10887_p6 = por %p10886_p4, %p10885_p2 }
  0x34   : > { %p10881_p0 = pneg %p10880_p13 }
  0x36   : > { %p10888_p8 = pnand %p10887_p6, %p10881_p0 }
  0x38   : > { %10891 = shalt.err (!%p10888_p8)
}
  0x39   : > { %s12529_s28 = smov 64   ;;  %s12530_s29 = smov 4  }
  0x3a   : > { %10213 = dma.hbm_to_vmem [thread:$0]  (!%p11509_p5), %s12548_s1, 512, %s11503_s20, [#allocation7], %s12529_s28, %s12529_s28, %s12530_s29  }
  0x3b   : > { %s12550_s3 = sld [smem:[#allocation43_spill]] }
  0x41   : > { %s10892_s13 = scalar_lea.hbm %s12550_s3, 512 }
  0x42   : > { %p10893_p9 = scmp.ne.s32.totalorder %s12550_s3, %s10892_s13  ;;  %p10899_p12 = scmp.lt.u32.totalorder %s10892_s13, %s12550_s3 }
  0x44   : > { %p10895_p10 = pnand %p10893_p9, %p11525_p7 }
  0x46   : > { %p10896_p11 = pneg %p10895_p10 }
  0x48   : > { %p10901_p13 = pnand %p10899_p12, %p10896_p11 }
  0x4a   : > { %10904 = shalt.err (!%p10901_p13)
}
  0x4b   : > { %s10905_s20 = scalar_lea.vmem %s11513_s23, 512  ;;  %p10913_p6 = scmp.lt.s32.totalorder %s11513_s23, %s11513_s23 }
  0x4c   : > { %p10906_p0 = scmp.ne.s32.totalorder %s11513_s23, %s10905_s20  ;;  %p10914_p8 = scmp.lt.s32.totalorder %s10905_s20, %s10905_s20 }
  0x4e   : > { %p10908_p2 = pnand %p10906_p0, %p11525_p7  ;;  %p10915_p9 = por %p10914_p8, %p10913_p6 }
  0x50   : > { %p10909_p4 = pneg %p10908_p2 }
  0x52   : > { %p10916_p10 = pnand %p10915_p9, %p10909_p4 }
  0x54   : > { %10919 = shalt.err (!%p10916_p10)
}
  0x55   : > { %10219 = dma.hbm_to_vmem [thread:$0]  (!%p11509_p5), %s12550_s3, 512, %s11513_s23, [#allocation10], %s12529_s28, %s12529_s28, %s12530_s29  }
  0x56   : > { %s10920_s18 = scalar_lea.hbm %s12506_s5, 8192 }
  0x57   : > { %p10921_p11 = scmp.ne.s32.totalorder %s12506_s5, %s10920_s18  ;;  %p10927_p0 = scmp.lt.u32.totalorder %s10920_s18, %s12506_s5 }
  0x59   : > { %p10923_p12 = pnand %p10921_p11, %p11525_p7 }
  0x5b   : > { %p10924_p13 = pneg %p10923_p12 }
  0x5d   : > { %p10929_p2 = pnand %p10927_p0, %p10924_p13 }
  0x5f   : > { %10932 = shalt.err (!%p10929_p2)
}
  0x60   : > { %s10933_s20 = scalar_lea.vmem %s412_s16, 8192  ;;  %p10941_p9 = scmp.lt.s32.totalorder %s412_s16, %s412_s16 }
  0x61   : > { %p10934_p4 = scmp.ne.s32.totalorder %s412_s16, %s10933_s20  ;;  %p10942_p10 = scmp.lt.s32.totalorder %s10933_s20, %s10933_s20 }
  0x63   : > { %p10936_p6 = pnand %p10934_p4, %p11525_p7  ;;  %p10943_p3 = por %p10942_p10, %p10941_p9 }
  0x65   : > { %p10937_p8 = pneg %p10936_p6 }
  0x67   : > { %p10944_p1 = pnand %p10943_p3, %p10937_p8 }
  0x69   : > { %10947 = shalt.err (!%p10944_p1)
}
  0x6a   : > { %s11357_s23 = smov 512   ;;  %s11358_s25 = smov 32  }
  0x6b   : > { %10225 = dma.hbm_to_vmem [thread:$0]  (!%p11509_p5), %s12506_s5, 8192, %s412_s16, [#allocation13], %s11357_s23, %s11357_s23, %s11358_s25  }
  0x6c   : > { %s11359_s17 = smov [#allocation15]   ;;  %s10948_s24 = scalar_lea.hbm %s12508_s7, 32768 }
  0x6d   : > { %s435_s18 = sshll.u32 %s11359_s17, 4  ;;  %p10949_p1 = scmp.ne.s32.totalorder %s12508_s7, %s10948_s24  ;;  %s436_s18 = int_to_ptr.vmem [resolvable:$true] %s435_s18 }
  0x6e   : > { %p10955_p12 = scmp.lt.u32.totalorder %s10948_s24, %s12508_s7 }
  0x6f   : > { %p10951_p3 = pnand %p10949_p1, %p11525_p7 }
  0x71   : > { %p10952_p11 = pneg %p10951_p3 }
  0x73   : > { %p10957_p13 = pnand %p10955_p12, %p10952_p11 }
  0x75   : > { %10960 = shalt.err (!%p10957_p13)
}
  0x76   : > { %s10961_s16 = scalar_lea.vmem %s436_s18, 32768  ;;  %p10969_p6 = scmp.lt.s32.totalorder %s436_s18, %s436_s18 }
  0x77   : > { %p10962_p0 = scmp.ne.s32.totalorder %s436_s18, %s10961_s16  ;;  %p10970_p8 = scmp.lt.s32.totalorder %s10961_s16, %s10961_s16 }
  0x79   : > { %p10964_p2 = pnand %p10962_p0, %p11525_p7  ;;  %p10971_p9 = por %p10970_p8, %p10969_p6 }
  0x7b   : > { %p10965_p4 = pneg %p10964_p2 }
  0x7d   : > { %p10972_p10 = pnand %p10971_p9, %p10965_p4 }
  0x7f   : > { %10975 = shalt.err (!%p10972_p10)
}
  0x80   : > { %s12531_s23 = smov 256   ;;  %s11361_s25 = smov 16  }
  0x81   : > { %10231 = dma.hbm_to_vmem [thread:$0]  (!%p11509_p5), %s12508_s7, 32768, %s436_s18, [#allocation16], %s12531_s23, %s12531_s23, %s11361_s25  }
  0x82   : > { %s11362_s26 = smov [#allocation18]   ;;  %s10976_s22 = scalar_lea.hbm %s12510_s9, 8192 }
  0x83   : > { %s459_s15 = sshll.u32 %s11362_s26, 4  ;;  %p10977_p1 = scmp.ne.s32.totalorder %s12510_s9, %s10976_s22  ;;  %s460_s15 = int_to_ptr.vmem [resolvable:$true] %s459_s15 }
  0x84   : > { %p10983_p12 = scmp.lt.u32.totalorder %s10976_s22, %s12510_s9 }
  0x85   : > { %p10979_p3 = pnand %p10977_p1, %p11525_p7 }
  0x87   : > { %p10980_p11 = pneg %p10979_p3 }
  0x89   : > { %p10985_p13 = pnand %p10983_p12, %p10980_p11 }
  0x8b   : > { %10988 = shalt.err (!%p10985_p13)
}
  0x8c   : > { %s10989_s18 = scalar_lea.vmem %s460_s15, 8192  ;;  %p10997_p6 = scmp.lt.s32.totalorder %s460_s15, %s460_s15 }
  0x8d   : > { %p10990_p0 = scmp.ne.s32.totalorder %s460_s15, %s10989_s18  ;;  %p10998_p8 = scmp.lt.s32.totalorder %s10989_s18, %s10989_s18 }
  0x8f   : > { %p10992_p2 = pnand %p10990_p0, %p11525_p7  ;;  %p10999_p9 = por %p10998_p8, %p10997_p6 }
  0x91   : > { %p10993_p4 = pneg %p10992_p2 }
  0x93   : > { %p11000_p10 = pnand %p10999_p9, %p10993_p4 }
  0x95   : > { %11003 = shalt.err (!%p11000_p10)
}
  0x96   : > { %s11363_s25 = smov 128   ;;  %s11364_s28 = smov 8  }
  0x97   : > { %10237 = dma.hbm_to_vmem [thread:$0]  (!%p11509_p5), %s12510_s9, 8192, %s460_s15, [#allocation19], %s11363_s25, %s11363_s25, %s11364_s28  }
  0x98   : > { %s11365_s17 = smov [#allocation21]   ;;  %s11004_s13 = scalar_lea.hbm %s12512_s11, 65536 }
  0x99   : > { %s483_s19 = sshll.u32 %s11365_s17, 4  ;;  %p11005_p1 = scmp.ne.s32.totalorder %s12512_s11, %s11004_s13  ;;  %s484_s19 = int_to_ptr.vmem [resolvable:$true] %s483_s19 }
  0x9a   : > { %p11011_p12 = scmp.lt.u32.totalorder %s11004_s13, %s12512_s11 }
  0x9b   : > { %p11007_p3 = pnand %p11005_p1, %p11525_p7 }
  0x9d   : > { %p11008_p11 = pneg %p11007_p3 }
  0x9f   : > { %p11013_p13 = pnand %p11011_p12, %p11008_p11 }
  0xa1   : > { %11016 = shalt.err (!%p11013_p13)
}
  0xa2   : > { %s11017_s15 = scalar_lea.vmem %s484_s19, 65536  ;;  %p11025_p6 = scmp.lt.s32.totalorder %s484_s19, %s484_s19 }
  0xa3   : > { %p11018_p0 = scmp.ne.s32.totalorder %s484_s19, %s11017_s15  ;;  %p11026_p8 = scmp.lt.s32.totalorder %s11017_s15, %s11017_s15 }
  0xa5   : > { %p11020_p2 = pnand %p11018_p0, %p11525_p7  ;;  %p11027_p9 = por %p11026_p8, %p11025_p6 }
  0xa7   : > { %p11021_p4 = pneg %p11020_p2 }
  0xa9   : > { %p11028_p10 = pnand %p11027_p9, %p11021_p4 }
  0xab   : > { %11031 = shalt.err (!%p11028_p10)
}
  0xac   : > { %s11366_s28 = smov 2048   ;;  %s11367_s23 = smov [#allocation8]  }
  0xad   : > { %10243 = dma.hbm_to_vmem [thread:$0]  (!%p11509_p5), %s12512_s11, 65536, %s484_s19, [#allocation22], %s11366_s28, %s11366_s28, %s11363_s25  }
  0xae   : > { %s377_s17 = sshll.u32 %s11367_s23, 4  ;;  %s11368_s22 = smov [#allocation11]   ;;  %s378_s17 = int_to_ptr.vmem [resolvable:$true] %s377_s17 }
  0xaf   : > { %s401_s24 = sshll.u32 %s11368_s22, 4  ;;  %s12551_s2 = sld [smem:[#allocation42_spill]]  ;;  %s402_s24 = int_to_ptr.vmem [resolvable:$true] %s401_s24 }
  0xb5   : > { %s11032_s16 = scalar_lea.hbm %s12551_s2, 16 }
  0xb6   : > { %p11033_p1 = scmp.ne.s32.totalorder %s12551_s2, %s11032_s16  ;;  %p11039_p12 = scmp.lt.u32.totalorder %s11032_s16, %s12551_s2 }
  0xb8   : > { %p11035_p3 = pnand %p11033_p1, %p11525_p7 }
  0xba   : > { %p11036_p11 = pneg %p11035_p3 }
  0xbc   : > { %p11041_p13 = pnand %p11039_p12, %p11036_p11 }
  0xbe   : > { %11044 = shalt.err (!%p11041_p13)
}
  0xbf   : > { %s11045_s25 = scalar_lea.vmem %s378_s17, 16  ;;  %s11052_s19 = scalar_lea.vmem %s378_s17, 32 }
  0xc0   : > { %p11046_p0 = scmp.ne.s32.totalorder %s378_s17, %s11045_s25  ;;  %p11053_p6 = scmp.lt.s32.totalorder %s378_s17, %s378_s17 }
  0xc1   : > { %p11054_p8 = scmp.lt.s32.totalorder %s11052_s19, %s11045_s25 }
  0xc2   : > { %p11048_p2 = pnand %p11046_p0, %p11525_p7 }
  0xc3   : > { %p11055_p9 = por %p11054_p8, %p11053_p6 }
  0xc4   : > { %p11049_p4 = pneg %p11048_p2 }
  0xc6   : > { %p11056_p10 = pnand %p11055_p9, %p11049_p4 }
  0xc8   : > { %11059 = shalt.err (!%p11056_p10)
}
  0xc9   : > { %10216 = dma.hbm_to_vmem [thread:$0]  (!%p11509_p5), %s12551_s2, 16, %s378_s17, [#allocation7]  }
  0xca   : > { %s12552_s4 = sld [smem:[#allocation44_spill]] }
  0xd0   : > { %s11060_s22 = scalar_lea.hbm %s12552_s4, 16 }
  0xd1   : > { %p11061_p1 = scmp.ne.s32.totalorder %s12552_s4, %s11060_s22  ;;  %p11067_p12 = scmp.lt.u32.totalorder %s11060_s22, %s12552_s4 }
  0xd3   : > { %p11063_p3 = pnand %p11061_p1, %p11525_p7 }
  0xd5   : > { %p11064_p11 = pneg %p11063_p3 }
  0xd7   : > { %p11069_p13 = pnand %p11067_p12, %p11064_p11 }
  0xd9   : > { %11072 = shalt.err (!%p11069_p13)
}
  0xda   : > { %s11073_s15 = scalar_lea.vmem %s402_s24, 16  ;;  %s11080_s17 = scalar_lea.vmem %s402_s24, 32 }
  0xdb   : > { %p11074_p0 = scmp.ne.s32.totalorder %s402_s24, %s11073_s15  ;;  %p11081_p6 = scmp.lt.s32.totalorder %s402_s24, %s402_s24 }
  0xdc   : > { %p11082_p8 = scmp.lt.s32.totalorder %s11080_s17, %s11073_s15 }
  0xdd   : > { %p11076_p2 = pnand %p11074_p0, %p11525_p7 }
  0xde   : > { %p11083_p9 = por %p11082_p8, %p11081_p6 }
  0xdf   : > { %p11077_p4 = pneg %p11076_p2 }
  0xe1   : > { %p11084_p10 = pnand %p11083_p9, %p11077_p4 }
  0xe3   : > { %11087 = shalt.err (!%p11084_p10)
}
  0xe4   : > { %10222 = dma.hbm_to_vmem [thread:$0]  (!%p11509_p5), %s12552_s4, 16, %s402_s24, [#allocation10]  }
  0xe5   : > { %s11369_s19 = smov [#allocation14]   ;;  %s11370_s26 = smov [#allocation17]  }
  0xe6   : > { %s425_s28 = sshll.u32 %s11369_s19, 4  ;;  %s449_s1 = sshll.u32 %s11370_s26, 4  ;;  %s426_s28 = int_to_ptr.vmem [resolvable:$true] %s425_s28  ;;  %s450_s1 = int_to_ptr.vmem [resolvable:$true] %s449_s1 }
  0xe7   : > { %s11088_s13 = scalar_lea.hbm %s12507_s6, 128 }
  0xe8   : > { %p11089_p1 = scmp.ne.s32.totalorder %s12507_s6, %s11088_s13  ;;  %p11095_p12 = scmp.lt.u32.totalorder %s11088_s13, %s12507_s6 }
  0xea   : > { %p11091_p3 = pnand %p11089_p1, %p11525_p7 }
  0xec   : > { %p11092_p11 = pneg %p11091_p3 }
  0xee   : > { %p11097_p13 = pnand %p11095_p12, %p11092_p11 }
  0xf0   : > { %11100 = shalt.err (!%p11097_p13)
}
  0xf1   : > { %s11101_s24 = scalar_lea.vmem %s426_s28, 128  ;;  %p11109_p6 = scmp.lt.s32.totalorder %s426_s28, %s426_s28 }
  0xf2   : > { %p11102_p0 = scmp.ne.s32.totalorder %s426_s28, %s11101_s24  ;;  %p11110_p8 = scmp.lt.s32.totalorder %s11101_s24, %s11101_s24 }
  0xf4   : > { %p11104_p2 = pnand %p11102_p0, %p11525_p7  ;;  %p11111_p9 = por %p11110_p8, %p11109_p6 }
  0xf6   : > { %p11105_p4 = pneg %p11104_p2 }
  0xf8   : > { %p11112_p10 = pnand %p11111_p9, %p11105_p4 }
  0xfa   : > { %11115 = shalt.err (!%p11112_p10)
}
  0xfb   : > { %10228 = dma.hbm_to_vmem [thread:$0]  (!%p11509_p5), %s12507_s6, 128, %s426_s28, [#allocation13]  }
  0xfc   : > { %s11116_s26 = scalar_lea.hbm %s12509_s8, 64 }
  0xfd   : > { %p11117_p1 = scmp.ne.s32.totalorder %s12509_s8, %s11116_s26  ;;  %p11123_p12 = scmp.lt.u32.totalorder %s11116_s26, %s12509_s8 }
  0xff   : > { %p11119_p3 = pnand %p11117_p1, %p11525_p7 }
 0x101   : > { %p11120_p11 = pneg %p11119_p3 }
 0x103   : > { %p11125_p13 = pnand %p11123_p12, %p11120_p11 }
 0x105   : > { %11128 = shalt.err (!%p11125_p13)
}
 0x106   : > { %s11129_s16 = scalar_lea.vmem %s450_s1, 64  ;;  %p11137_p6 = scmp.lt.s32.totalorder %s450_s1, %s450_s1 }
 0x107   : > { %p11130_p0 = scmp.ne.s32.totalorder %s450_s1, %s11129_s16  ;;  %p11138_p8 = scmp.lt.s32.totalorder %s11129_s16, %s11129_s16 }
 0x109   : > { %p11132_p2 = pnand %p11130_p0, %p11525_p7  ;;  %p11139_p9 = por %p11138_p8, %p11137_p6 }
 0x10b   : > { %p11133_p4 = pneg %p11132_p2 }
 0x10d   : > { %p11140_p10 = pnand %p11139_p9, %p11133_p4 }
 0x10f   : > { %11143 = shalt.err (!%p11140_p10)
}
 0x110   : > { %10234 = dma.hbm_to_vmem [thread:$0]  (!%p11509_p5), %s12509_s8, 64, %s450_s1, [#allocation16]  }
 0x111   : > { %s11371_s15 = smov [#allocation20]   ;;  %s11372_s17 = smov [#allocation23]  }
 0x112   : > { %s473_s24 = sshll.u32 %s11371_s15, 4  ;;  %s497_s29 = sshll.u32 %s11372_s17, 4  ;;  %s474_s24 = int_to_ptr.vmem [resolvable:$true] %s473_s24  ;;  %s498_s29 = int_to_ptr.vmem [resolvable:$true] %s497_s29 }
 0x113   : > { %s11144_s26 = scalar_lea.hbm %s12511_s10, 32 }
 0x114   : > { %p11145_p1 = scmp.ne.s32.totalorder %s12511_s10, %s11144_s26  ;;  %p11151_p12 = scmp.lt.u32.totalorder %s11144_s26, %s12511_s10 }
 0x116   : > { %p11147_p3 = pnand %p11145_p1, %p11525_p7 }
 0x118   : > { %p11148_p11 = pneg %p11147_p3 }
 0x11a   : > { %p11153_p13 = pnand %p11151_p12, %p11148_p11 }
 0x11c   : > { %11156 = shalt.err (!%p11153_p13)
}
 0x11d   : > { %s11157_s1 = scalar_lea.vmem %s474_s24, 32  ;;  %p11165_p6 = scmp.lt.s32.totalorder %s474_s24, %s474_s24 }
 0x11e   : > { %p11158_p0 = scmp.ne.s32.totalorder %s474_s24, %s11157_s1  ;;  %p11166_p8 = scmp.lt.s32.totalorder %s11157_s1, %s11157_s1 }
 0x120   : > { %p11160_p2 = pnand %p11158_p0, %p11525_p7  ;;  %p11167_p9 = por %p11166_p8, %p11165_p6 }
 0x122   : > { %p11161_p4 = pneg %p11160_p2 }
 0x124   : > { %p11168_p10 = pnand %p11167_p9, %p11161_p4 }
 0x126   : > { %11171 = shalt.err (!%p11168_p10)
}
 0x127   : > { %10240 = dma.hbm_to_vmem [thread:$0]  (!%p11509_p5), %s12511_s10, 32, %s474_s24, [#allocation19]  }
 0x128   : > { %s11172_s17 = scalar_lea.hbm %s12513_s12, 512 }
 0x129   : > { %p11173_p1 = scmp.ne.s32.totalorder %s12513_s12, %s11172_s17  ;;  %p11179_p12 = scmp.lt.u32.totalorder %s11172_s17, %s12513_s12 }
 0x12b   : > { %p11175_p3 = pnand %p11173_p1, %p11525_p7 }
 0x12d   : > { %p11176_p11 = pneg %p11175_p3 }
 0x12f   : > { %p11181_p13 = pnand %p11179_p12, %p11176_p11 }
 0x131   : > { %11184 = shalt.err (!%p11181_p13)
}
 0x132   : > { %s11185_s22 = scalar_lea.vmem %s498_s29, 512  ;;  %p11193_p6 = scmp.lt.s32.totalorder %s498_s29, %s498_s29 }
 0x133   : > { %p11186_p0 = scmp.ne.s32.totalorder %s498_s29, %s11185_s22  ;;  %p11194_p8 = scmp.lt.s32.totalorder %s11185_s22, %s11185_s22 }
 0x135   : > { %p11188_p2 = pnand %p11186_p0, %p11525_p7  ;;  %p11195_p9 = por %p11194_p8, %p11193_p6 }
 0x137   : > { %p11189_p4 = pneg %p11188_p2 }
 0x139   : > { %p11196_p10 = pnand %p11195_p9, %p11189_p4 }
 0x13b   : > { %11199 = shalt.err (!%p11196_p10)
}
 0x13c   : > { %s12553_s20 = sld [smem:[#allocation34_spill]]  ;;  %s12554_s0 = sld [smem:[#allocation37_spill]] }
 0x13d   : > { %s12555_s1 = sld [smem:[#allocation33_spill]]  ;;  %s12556_s16 = sld [smem:[#allocation38_spill]] }
 0x13e   : > { %10246 = dma.hbm_to_vmem [thread:$0]  (!%p11509_p5), %s12513_s12, 512, %s498_s29, [#allocation22]  }
 0x13f   : > { %s42_s28 = sadd.s32 1, %s11342_s30  ;;  %s45_s21 = sadd.s32 1, %s11346_s14 }
 0x140   : > { %p43_p7 = scmp.ge.s32.totalorder %s42_s28, 4  ;;  %s54_s18 = sadd.s32 1, %s11330_s27 }
 0x141   : > { %s508_s25 = sand.u32 1, %s11330_s27   ;;  %s9096_s22 = sshll.u32 %s11346_s14, 5 }
 0x142   : > { %p61_p1 = scmp.ne.s32.totalorder %s11330_s27, %s12553_s20  ;;  %s12593_s28 = smov (%p43_p7, %s42_s28), 0 }
 0x143   : > { %s12595_s21 = smov (!%p43_p7, %s45_s21), %s11346_s14  ;;  %s50_s15 = ssub.s32 %s11342_s30, %s12593_s28 }
 0x144   : > { %p62_p3 = scmp.eq.s32.totalorder %s12554_s0, 0  ;;  %p47_p11 = scmp.ge.s32.totalorder %s12595_s21, 2 }
 0x145   : > { %p67_p12 = scmp.ne.s32.totalorder %s12553_s20, %s12555_s1  ;;  %p10263_p5 = scmp.lt.s32.totalorder %s12554_s0, 8 }
 0x146   : > { %p11771_p13 = por %p62_p3, %p61_p1  ;;  %s12597_s21 = smov (%p47_p11, %s12595_s21), 0 }
 0x147   : > { %p12558_p0 = scmp.ne.s32.totalorder %s12556_s16, 0  ;;  %s49_s19 = ssub.s32 %s11346_s14, %s12597_s21 }
 0x148   : > { %s51_s26 = sor.u32 %s50_s15, %s49_s19  ;;  %s9095_s23 = sshll.u32 %s508_s25, 5 }
 0x149   : > { %p11780_p2 = por %p12558_p0, %p67_p12  ;;  %p52_p4 = scmp.eq.s32.totalorder %s51_s26, 0 }
 0x14a   : > { %s512_s24 = scalar_lea.vmem [#allocation3], %s9095_s23  ;;  %s517_s1 = sadd.s32 %s11342_s30, %s9096_s22 }
 0x14b   : > { %s520_s13 = sshll.u32 %s512_s24, 4  ;;  %s9097_s2 = sshll.u32 %s517_s1, 6  ;;  %s11792_s13 = int_to_ptr.vmem [resolvable:$true] %s520_s13 }
 0x14c   : > { %s11789_s20 = scalar_select %p52_p4, %s11330_s27, %s54_s18  }
 0x14d   : > { %p11798_p6 = pnand %p10263_p5, %p11771_p13  ;;  %s12561_s15 = sld [smem:[#allocation40_spill]] }
 0x14e   : > { %s11807_s18 = scalar_lea.sflag [#allocation4], %s508_s25 }
 0x14f   : > { %p11202_p9 = pneg %p11798_p6 }
 0x153   : > { %s12562_s19 = smov %s12561_s15  ;;  %s11805_s26 = scalar_lea.hbm %s12561_s15, %s9097_s2 }
 0x154   : > { %s11200_s23 = scalar_lea.hbm %s11805_s26, 512  ;;  %s11205_s4 = scalar_lea.hbm %s12562_s19, 4096 }
 0x155   : > { %p11201_p8 = scmp.ne.s32.totalorder %s11805_s26, %s11200_s23  ;;  %p11206_p1 = scmp.lt.u32.totalorder %s11805_s26, %s12562_s19 }
 0x156   : > { %p11207_p3 = scmp.lt.u32.totalorder %s11205_s4, %s11200_s23  ;;  %p11209_p12 = scmp.lt.u32.totalorder %s11200_s23, %s11805_s26 }
 0x157   : > { %p11203_p10 = pnand %p11202_p9, %p11201_p8 }
 0x158   : > { %p11208_p11 = por %p11207_p3, %p11206_p1 }
 0x159   : > { %p11204_p7 = pneg %p11203_p10 }
 0x15a   : > { %p11210_p13 = por %p11209_p12, %p11208_p11 }
 0x15c   : > { %p11211_p5 = pnand %p11210_p13, %p11204_p7 }
 0x15e   : > { %11214 = shalt.err (!%p11211_p5)
}
 0x15f   : > { %s11215_s25 = scalar_lea.vmem %s11792_s13, 512  ;;  %s11373_s22 = smov [#allocation3]  }
 0x160   : > { %p11216_p0 = scmp.ne.s32.totalorder %s11792_s13, %s11215_s25  ;;  %s11220_s24 = sshll.u32 %s11373_s22, 4  ;;  %s11221_s24 = int_to_ptr.vmem [resolvable:$false] %s11220_s24 }
 0x161   : > { %s11222_s1 = scalar_lea.vmem %s11221_s24, 1024  ;;  %p11223_p10 = scmp.lt.s32.totalorder %s11792_s13, %s11221_s24 }
 0x162   : > { %p11218_p4 = pnand %p11216_p0, %p11202_p9  ;;  %p11224_p1 = scmp.lt.s32.totalorder %s11222_s1, %s11215_s25 }
 0x164   : > { %p11219_p8 = pneg %p11218_p4  ;;  %p11225_p3 = por %p11224_p1, %p11223_p10 }
 0x166   : > { %p11226_p11 = pnand %p11225_p3, %p11219_p8 }
 0x168   : > { %11229 = shalt.err (!%p11226_p11)
}
 0x169   : > { %s12563_s15 = smov 4   ;;  %s12564_s23 = smov 64  }
 0x16a   : > { %s12565_s0 = smov 256   ;;  %s12566_s3 = sld [smem:[#allocation39_spill]] }
 0x16b   : > { %10250 = dma.hbm_to_vmem [thread:$0]  (!%p11798_p6), %s11805_s26, 512, %s11792_s13, %s11807_s18, %s12565_s0, %s12564_s23, %s12563_s15  }
 0x170   : > { %p12567_p9 = scmp.ne.s32.totalorder %s12566_s3, 0 }
 0x171   : > { %s12568_s4 = sld [smem:[#allocation34_spill]] (!%p12567_p9) }
 0x172   : > { %532 = sbr.rel (%p12567_p9) target bundleno = 2894 (0xb4e), region = 72 }
 0x177   : > { %s534_s2 = sand.u32 (!%p12567_p9), 1, %s12568_s4  }
 0x178   : > { %s9099_s29 = sshll.u32 (!%p12567_p9), %s534_s2, 5  ;;  %s535_s25 = scalar_lea.sflag (!%p12567_p9), [#allocation4], %s534_s2 }
 0x179   : > { %s11841_s22 = scalar_lea.vmem [#allocation3], %s9099_s29 }
 0x17a   : > { %11289 = dma.done.wait (%p11780_p2), %s535_s25, 512  }
 0x17b   : > { %11291 = vsyncadd (%p11780_p2), %s535_s25, 4294966784  ;;  %s12569_s16 = sld [smem:[#allocation38_spill]] }
 0x181   : > { %p12570_p7 = scmp.ne.s32.totalorder %s12569_s16, 0 }
 0x183   : > { %11293 = dma.done.wait (%p12570_p7), [#allocation7], 528  }
 0x184   : > { %11295 = vsyncadd (%p12570_p7), [#allocation7], 4294966768 }
 0x185   : > { %11297 = dma.done.wait (%p12570_p7), [#allocation10], 528  }
 0x186   : > { %11299 = vsyncadd (%p12570_p7), [#allocation10], 4294966768 }
 0x187   : > { %11301 = dma.done.wait (%p12570_p7), [#allocation13], 8320  }
 0x188   : > { %11303 = vsyncadd (%p12570_p7), [#allocation13], 4294958976 }
 0x189   : > { %11305 = dma.done.wait (%p12570_p7), [#allocation16], 32832  }
 0x18a   : > { %11307 = vsyncadd (%p12570_p7), [#allocation16], 4294934464 }
 0x18b   : > { %11309 = dma.done.wait (%p12570_p7), [#allocation19], 8224  }
 0x18c   : > { %11311 = vsyncadd (%p12570_p7), [#allocation19], 4294959072 }
 0x18d   : > { %11313 = dma.done.wait (%p12570_p7), [#allocation22], 66048  }
 0x18e   : > { %11315 = vsyncadd (%p12570_p7), [#allocation22], 4294901248  ;;  %s12571_s17 = sld [smem:[#allocation36_spill]]  ;;  %s12572_s13 = sld [smem:[#allocation35_spill]] }
 0x194   : > { %p625_p2 = scmp.eq.s32.totalorder %s12571_s17, 0  ;;  %p626_p6 = scmp.eq.s32.totalorder %s12572_s13, 0 }
 0x196   : > { %p627_p12 = pnand %p626_p6, %p625_p2 }
 0x197   : > { %v11374_v0 = vmov (!%p627_p12), 0.0  }
 0x198   : > { %630 = sbr.rel (%p627_p12) target bundleno = 415 (0x19f), region = 128  ;;  %631 = vst [vmem:[#allocation24] sm:$0xff] (!%p627_p12), %v11374_v0  ;;  %632 = vst [vmem:[#allocation24 + $0x8] sm:$0xff] (!%p627_p12), %v11374_v0 }
 0x199   : > { %633 = vst [vmem:[#allocation24 + $0x10] sm:$0xff] (!%p627_p12), %v11374_v0  ;;  %634 = vst [vmem:[#allocation24 + $0x18] sm:$0xff] (!%p627_p12), %v11374_v0 }
 0x19a   : > { %635 = vst [vmem:[#allocation24 + $0x20] sm:$0xff] (!%p627_p12), %v11374_v0  ;;  %636 = vst [vmem:[#allocation24 + $0x28] sm:$0xff] (!%p627_p12), %v11374_v0 }
 0x19b   : > { %637 = vst [vmem:[#allocation24 + $0x30] sm:$0xff] (!%p627_p12), %v11374_v0  ;;  %638 = vst [vmem:[#allocation24 + $0x38] sm:$0xff] (!%p627_p12), %v11374_v0 }
 0x19f PF: > { %v10369_v1 = vld [vmem:[%s11841_s22] sm:$0xff]   ;;  %v10370_v2 = vld [vmem:[%s11841_s22 + $0x8] sm:$0xff]   ;;  %v10371_v5 = vld [vmem:[%s11841_s22 + $0x10] sm:$0xff]   ;;  %vm800_vm0 = vcmask 523264   ;;  %s12573_s26 = sld [smem:[#allocation35_spill]] }
 0x1a0   : > { %760 = vxpose.xlu0.c.b16.start [1/4] (short) %v10369_v1, 128  ;;  %v10373_v3 = vld [vmem:[#allocation6] sm:$0xff]   ;;  %v10374_v4 = vld [vmem:[#allocation6 + $0x8] sm:$0xff]   ;;  %v10375_v6 = vld [vmem:[#allocation6 + $0x10] sm:$0xff]  }
 0x1a1   : > { %10074 = vmatprep.subr.bf16.mxu0 %v10373_v3  ;;  %v10372_v7 = vld [vmem:[%s11841_s22 + $0x18] sm:$0xff]   ;;  %v10377_v8 = vld [vmem:[#allocation9] sm:$0xff]   ;;  %v10378_v9 = vld [vmem:[#allocation9 + $0x8] sm:$0xff]  }
 0x1a2   : > { %10075 = vmatpush3.bf16.msra.mxu0 %v10373_v3  ;;  %10098 = vmatprep.subr.bf16.mxu1 %v10377_v8  ;;  %v10376_v10 = vld [vmem:[#allocation6 + $0x18] sm:$0xff]   ;;  %v665_v21 = vld [vmem:[#allocation12] sm:$0xff]  ;;  %v11885_v23 = vld [vmem:[#allocation12 + $0x8] sm:$0xff] }
 0x1a3   : > { %10076 = vmatprep.subr.bf16.mxu0 %v10374_v4  ;;  %10099 = vmatpush3.bf16.msra.mxu1 %v10377_v8  ;;  %v10379_v19 = vld [vmem:[#allocation9 + $0x10] sm:$0xff]   ;;  %v10380_v20 = vld [vmem:[#allocation9 + $0x18] sm:$0xff]   ;;  %v669_v22 = vld [vmem:[#allocation12 + $0x20] sm:$0xff] }
 0x1a4   : > { %761 = vxpose.xlu0.c.b16.cont [2/4] (short) %v10370_v2, 128  ;;  %10100 = vmatprep.subr.bf16.mxu1 %v10378_v9  ;;  %v9142_v24 = vcombine.low %v665_v21, %v669_v22  ;;  %v9143_v25 = vcombine.high %v665_v21, %v669_v22  ;;  %v11887_v26 = vld [vmem:[#allocation12 + $0x28] sm:$0xff]  ;;  %v673_v27 = vld [vmem:[#allocation12 + $0x40] sm:$0xff]  ;;  %v11893_v49 = vld [vmem:[#allocation8] ss:$0 sm:$0xff] }
 0x1a5   : > { %v677_v28 = vld [vmem:[#allocation12 + $0x60] sm:$0xff]  ;;  %v9144_v29 = vcombine.low %v11885_v23, %v11887_v26  ;;  %v9145_v30 = vcombine.high %v11885_v23, %v11887_v26  ;;  %v674_v62 = vld [vmem:[#allocation12 + $0x48] sm:$0xff]  ;;  %p9206_p13 = scmp.ne.s32.totalorder %s12573_s26, 0 }
 0x1a6   : > { %10077 = vmatpush3.bf16.msra.mxu0 %v10374_v4  ;;  %v9151_v31 = vcombine.high %v673_v27, %v677_v28  ;;  %v681_v32 = vld [vmem:[#allocation12 + $0x80] sm:$0xff]  ;;  %v9150_v34 = vcombine.low %v673_v27, %v677_v28  ;;  %v678_v63 = vld [vmem:[#allocation12 + $0x68] sm:$0xff]  ;;  %s12574_s18 = sld [smem:[#allocation36_spill]] (!%p9206_p13) }
 0x1a7   : > { %10078 = vmatprep.subr.bf16.mxu0 %v10375_v6  ;;  %10101 = vmatpush3.bf16.msra.mxu1 %v10378_v9  ;;  %v685_v33 = vld [vmem:[#allocation12 + $0xa0] sm:$0xff]  ;;  %v682_v8 = vld [vmem:[#allocation12 + $0x88] sm:$0xff] }
 0x1a8   : > { %762 = vxpose.xlu0.c.b16.cont [3/4] (short) %v10371_v5, 128  ;;  %10102 = vmatprep.subr.bf16.mxu1 %v10379_v19  ;;  %v9159_v35 = vcombine.high %v681_v32, %v685_v33  ;;  %v689_v36 = vld [vmem:[#allocation12 + $0xc0] sm:$0xff]  ;;  %v9158_v38 = vcombine.low %v681_v32, %v685_v33  ;;  %v9153_v5 = vcombine.high %v674_v62, %v678_v63  ;;  %v686_v9 = vld [vmem:[#allocation12 + $0xa8] sm:$0xff] }
 0x1a9   : > { %v693_v37 = vld [vmem:[#allocation12 + $0xe0] sm:$0xff] }
 0x1aa   : > { %10079 = vmatpush3.bf16.msra.mxu0 %v10375_v6  ;;  %v9167_v39 = vcombine.high %v689_v36, %v693_v37  ;;  %v697_v40 = vld [vmem:[#allocation12 + $0x100] sm:$0xff]  ;;  %v9166_v42 = vcombine.low %v689_v36, %v693_v37 }
 0x1ab   : > { %10080 = vmatprep.subr.bf16.mxu0 %v10376_v10  ;;  %10103 = vmatpush3.bf16.msra.mxu1 %v10379_v19  ;;  %v701_v41 = vld [vmem:[#allocation12 + $0x120] sm:$0xff]  ;;  %v690_v19 = vld [vmem:[#allocation12 + $0xc8] sm:$0xff] }
 0x1ac   : > { %763 = vxpose.xlu0.c.b16.end [4/4] (short) %v10372_v7, 128  ;;  %10104 = vmatprep.subr.bf16.mxu1 %v10380_v20  ;;  %v9175_v43 = vcombine.high %v697_v40, %v701_v41  ;;  %v705_v44 = vld [vmem:[#allocation12 + $0x140] sm:$0xff]  ;;  %v9174_v46 = vcombine.low %v697_v40, %v701_v41  ;;  %v706_v41 = vld [vmem:[#allocation12 + $0x148] sm:$0xff]  ;;  %s2291_s24 = sshra.s32 (!%p9206_p13), %s12574_s18, 1  ;;  %s2294_s1 = sand.u32 (!%p9206_p13), 1, %s12574_s18 }
 0x1ad   : > { %v709_v45 = vld [vmem:[#allocation12 + $0x160] sm:$0xff]  ;;  %s10048_s15 = sshll.u32 (!%p9206_p13), %s2291_s24, 4 }
 0x1ae   : > { %10081 = vmatpush3.bf16.msra.mxu0 %v10376_v10  ;;  %v9183_v47 = vcombine.high %v705_v44, %v709_v45  ;;  %v9182_v48 = vcombine.low %v705_v44, %v709_v45  ;;  %s2297_s23 = sadd.s32 (!%p9206_p13), %s10048_s15, %s2294_s1 }
 0x1af   : > { %10105 = vmatpush3.bf16.msra.mxu1 %v10380_v20  ;;  %1482 = vmatprep.subr.bf16.mxu0 %v9143_v25  ;;  %v694_v20 = vld [vmem:[#allocation12 + $0xe8] sm:$0xff]  ;;  %v9160_v25 = vcombine.low %v682_v8, %v686_v9  ;;  %s2298_s0 = scalar_lea.vmem (!%p9206_p13), [#allocation2], %s2297_s23 }
 0x1b0   : > { %1595 = vmatprep.subr.bf16.mxu1 %v9145_v30  ;;  %v9169_v30 = vcombine.high %v690_v19, %v694_v20  ;;  %v9168_v37 = vcombine.low %v690_v19, %v694_v20  ;;  %v672_v20 = vld [vmem:[#allocation12 + $0x38] sm:$0xff] }
 0x206   : > { %v768_v11 = vpop.trf.xlu0 }
 0x207   : > { %10082 = vmatprep.mubr.msk.bf16.mxu0 %vm800_vm0, %v768_v11 }
 0x20a   : > { %v769_v12 = vpop.trf.xlu0 }
 0x20b   : > { %10083 = vmatmul.mubr.msk.bf16.vlgmr.msra.gmra.mrb[0].mxu0 %vm800_vm0, %v769_v12 }
 0x20c   : > { %1483 = vmatpush1.bf16.msra.mxu0 %v9142_v24 }
 0x20d   : > { %1484 = vmatprep.subr.bf16.mxu0 %v9151_v31  ;;  %v702_v31 = vld [vmem:[#allocation12 + $0x128] sm:$0xff] }
 0x20e   : > { %v770_v13 = vpop.trf.xlu0 }
 0x20f   : > { %10086 = vmatprep.mubr.msk.bf16.mxu0 %vm800_vm0, %v770_v13 }
 0x210   : > { %1485 = vmatpush1.bf16.msra.mxu0 %v9150_v34 }
 0x211   : > { %1486 = vmatprep.subr.bf16.mxu0 %v9159_v35 }
 0x212   : > { %v771_v14 = vpop.trf.xlu0 }
 0x213   : > { %10087 = vmatmul.mubr.msk.bf16.gmra.mrb[4].mxu0 %vm800_vm0, %v771_v14 }
 0x214   : > { %1487 = vmatpush1.bf16.msra.mxu0 %v9158_v38 }
 0x215   : > { %1488 = vmatprep.subr.bf16.mxu0 %v9167_v39 }
 0x216   : > { %v772_v15 = vpop.trf.xlu0 }
 0x217   : > { %10090 = vmatprep.mubr.msk.bf16.mxu0 %vm800_vm0, %v772_v15  ;;  %v9152_v15 = vcombine.low %v674_v62, %v678_v63  ;;  %v713_v63 = vld [vmem:[#allocation12 + $0x180] sm:$0xff] }
 0x218   : > { %1489 = vmatpush1.bf16.msra.mxu0 %v9166_v42  ;;  %v710_v42 = vld [vmem:[#allocation12 + $0x168] sm:$0xff] }
 0x219   : > { %1490 = vmatprep.subr.bf16.mxu0 %v9175_v43 }
 0x21a   : > { %v773_v16 = vpop.trf.xlu0 }
 0x21b   : > { %10091 = vmatmul.mubr.msk.bf16.gmra.mrb[8].mxu0 %vm800_vm0, %v773_v16 }
 0x21c   : > { %1491 = vmatpush1.bf16.msra.mxu0 %v9174_v46 }
 0x21d   : > { %1492 = vmatprep.subr.bf16.mxu0 %v9183_v47 }
 0x21e   : > { %v774_v17 = vpop.trf.xlu0 }
 0x21f   : > { %10094 = vmatprep.mubr.msk.bf16.mxu0 %vm800_vm0, %v774_v17  ;;  %v9161_v17 = vcombine.high %v682_v8, %v686_v9  ;;  %v722_v8 = vld [vmem:[#allocation12 + $0x1c8] sm:$0xff] }
 0x220   : > { %1493 = vmatpush1.bf16.msra.mxu0 %v9182_v48 }
 0x222   : > { %v775_v18 = vpop.trf.xlu0 }
 0x223   : > { %10095 = vmatmul.mubr.msk.bf16.gmra.mrb[12].mxu0 %vm800_vm0, %v775_v18 }
 0x2de   : > { %v10084_v50 = vpop.f32.mrb[0].mxu0 }
 0x2df   : > { %v868_v51 = vadd.f32 %v10084_v50, %v11893_v49  ;;  %v859_v52 = vpop.f32.mrb[1].mxu0  ;;  %v9185_v50 = vcombine.high %v706_v41, %v710_v42 }
 0x2e0   : > { %v860_v53 = vadd.f32 %v11893_v49, %v859_v52  ;;  %v10085_v54 = vpop.f32.mrb[2].mxu0 }
 0x2e1   : > { %v871_v55 = vadd.f32 %v10085_v54, %v11893_v49  ;;  %v862_v56 = vpop.f32.mrb[3].mxu0  ;;  %v924_v58 = vmax.f32 %v868_v51, 0.0 }
 0x2e2   : > { %v863_v57 = vadd.f32 %v11893_v49, %v862_v56  ;;  %v922_v60 = vmax.f32 %v860_v53, 0.0 }
 0x2e3   : > { %v925_v59 = vmax.f32 %v871_v55, 0.0 }
 0x2e4   : > { %v923_v61 = vmax.f32 %v863_v57, 0.0 }
 0x2e5   : > { %v939_v0 = vpack.c.bf16 %v925_v59, %v924_v58  ;;  %v9184_v58 = vcombine.low %v706_v41, %v710_v42 }
 0x2e6   : > { %v10088_v1 = vpop.f32.mrb[4].mxu0  ;;  %v938_v2 = vpack.c.bf16 %v923_v61, %v922_v60 }
 0x2e7   : > { %v884_v3 = vadd.f32 %v10088_v1, %v11893_v49  ;;  %v875_v4 = vpop.f32.mrb[5].mxu0  ;;  %v714_v1 = vld [vmem:[#allocation12 + $0x188] sm:$0xff] }
 0x2e8   : > { %v876_v6 = vadd.f32 %v11893_v49, %v875_v4  ;;  %10106 = vmatprep.mubr.msk.bf16.mxu1 %vm800_vm0, %v938_v2  ;;  %v10089_v7 = vpop.f32.mrb[6].mxu0 }
 0x2e9   : > { %v928_v10 = vmax.f32 %v884_v3, 0.0  ;;  %v887_v11 = vadd.f32 %v10089_v7, %v11893_v49  ;;  %10107 = vmatmul.mubr.msk.bf16.vlgmr.msra.gmra.mrb[0].mxu1 %vm800_vm0, %v939_v0  ;;  %v878_v12 = vpop.f32.mrb[7].mxu0  ;;  %v717_v0 = vld [vmem:[#allocation12 + $0x1a0] sm:$0xff]  ;;  %v718_v3 = vld [vmem:[#allocation12 + $0x1a8] sm:$0xff] }
 0x2ea   : > { %v926_v13 = vmax.f32 %v876_v6, 0.0  ;;  %v879_v14 = vadd.f32 %v11893_v49, %v878_v12  ;;  %1596 = vmatpush1.bf16.msra.mxu1 %v9144_v29  ;;  %v698_v29 = vld [vmem:[#allocation12 + $0x108] sm:$0xff]  ;;  %v9191_v2 = vcombine.high %v713_v63, %v717_v0  ;;  %v9190_v4 = vcombine.low %v713_v63, %v717_v0  ;;  %v721_v6 = vld [vmem:[#allocation12 + $0x1c0] sm:$0xff]  ;;  %v691_v0 = vld [vmem:[#allocation12 + $0xd0] sm:$0xff] }
 0x2eb   : > { %v929_v16 = vmax.f32 %v887_v11, 0.0  ;;  %1597 = vmatprep.subr.bf16.mxu1 %v9153_v5  ;;  %v9177_v39 = vcombine.high %v698_v29, %v702_v31  ;;  %v9176_v46 = vcombine.low %v698_v29, %v702_v31  ;;  %v9192_v5 = vcombine.low %v714_v1, %v718_v3  ;;  %v725_v7 = vld [vmem:[#allocation12 + $0x1e0] sm:$0xff] }
 0x2ec   : > { %v927_v18 = vmax.f32 %v879_v14, 0.0  ;;  %1494 = vmatprep.subr.bf16.mxu0 %v9191_v2  ;;  %v9199_v9 = vcombine.high %v721_v6, %v725_v7  ;;  %v9198_v11 = vcombine.low %v721_v6, %v725_v7  ;;  %v11375_v14 = vmov 0   ;;  %v695_v2 = vld [vmem:[#allocation12 + $0xf0] sm:$0xff] }
 0x2ed   : > { %v941_v21 = vpack.c.bf16 %v929_v16, %v928_v10  ;;  %1495 = vmatpush1.bf16.msra.mxu0 %v9190_v4  ;;  %v726_v10 = vld [vmem:[#allocation12 + $0x1e8] sm:$0xff]  ;;  %1514 = vmatprep.mubr.bf16.mxu0 %v11375_v14  ;;  %v671_v16 = vld [vmem:[#allocation12 + $0x30] sm:$0xff]  ;;  %v696_v4 = vld [vmem:[#allocation12 + $0xf8] sm:$0xff] }
 0x2ee   : > { %v940_v22 = vpack.c.bf16 %v927_v18, %v926_v13  ;;  %v10092_v24 = vpop.f32.mrb[8].mxu0  ;;  %1598 = vmatpush1.bf16.msra.mxu1 %v9152_v15  ;;  %v9200_v12 = vcombine.low %v722_v8, %v726_v10  ;;  %v9201_v13 = vcombine.high %v722_v8, %v726_v10  ;;  %1496 = vmatprep.subr.bf16.mxu0 %v9199_v9  ;;  %v667_v15 = vld [vmem:[#allocation12 + $0x10] sm:$0xff] }
 0x2ef   : > { %v900_v27 = vadd.f32 %v10092_v24, %v11893_v49  ;;  %v891_v28 = vpop.f32.mrb[9].mxu0  ;;  %1599 = vmatprep.subr.bf16.mxu1 %v9161_v17  ;;  %v668_v17 = vld [vmem:[#allocation12 + $0x18] sm:$0xff]  ;;  %v9146_v18 = vcombine.low %v667_v15, %v671_v16  ;;  %v9147_v19 = vcombine.high %v667_v15, %v671_v16 }
 0x2f0   : > { %10110 = vmatprep.mubr.msk.bf16.mxu1 %vm800_vm0, %v940_v22  ;;  %v892_v23 = vadd.f32 %v11893_v49, %v891_v28  ;;  %v10093_v26 = vpop.f32.mrb[10].mxu0  ;;  %v9149_v22 = vcombine.high %v668_v17, %v672_v20  ;;  %v11924_v24 = vld [vmem:[#allocation11] ss:$0 sm:$0xff] }
 0x2f1   : > { %10111 = vmatmul.mubr.msk.bf16.gmra.mrb[4].mxu1 %vm800_vm0, %v941_v21  ;;  %v932_v32 = vmax.f32 %v900_v27, 0.0  ;;  %v903_v33 = vadd.f32 %v10093_v26, %v11893_v49  ;;  %v894_v34 = vpop.f32.mrb[11].mxu0  ;;  %1497 = vmatpush1.bf16.msra.mxu0 %v9198_v11  ;;  %v9148_v21 = vcombine.low %v668_v17, %v672_v20  ;;  %v9171_v11 = vcombine.high %v691_v0, %v695_v2  ;;  %v703_v17 = vld [vmem:[#allocation12 + $0x130] sm:$0xff] }
 0x2f2   : > { %v930_v35 = vmax.f32 %v892_v23, 0.0  ;;  %v895_v36 = vadd.f32 %v11893_v49, %v894_v34  ;;  %1600 = vmatpush1.bf16.msra.mxu1 %v9160_v25  ;;  %1708 = vmatprep.subr.bf16.mxu0 %v9147_v19  ;;  %v675_v34 = vld [vmem:[#allocation12 + $0x50] sm:$0xff]  ;;  %v704_v19 = vld [vmem:[#allocation12 + $0x138] sm:$0xff] }
 0x2f3   : > { %v933_v38 = vmax.f32 %v903_v33, 0.0  ;;  %1601 = vmatprep.subr.bf16.mxu1 %v9169_v30 }
 0x2f4   : > { %v931_v40 = vmax.f32 %v895_v36, 0.0 }
 0x2f5   : > { %v943_v43 = vpack.c.bf16 %v933_v38, %v932_v32  ;;  %v676_v38 = vld [vmem:[#allocation12 + $0x58] sm:$0xff] }
 0x2f6   : > { %v942_v44 = vpack.c.bf16 %v931_v40, %v930_v35  ;;  %v10096_v45 = vpop.f32.mrb[12].mxu0  ;;  %1602 = vmatpush1.bf16.msra.mxu1 %v9168_v37  ;;  %v679_v37 = vld [vmem:[#allocation12 + $0x70] sm:$0xff] }
 0x2f7   : > { %v916_v47 = vadd.f32 %v10096_v45, %v11893_v49  ;;  %v907_v48 = vpop.f32.mrb[13].mxu0  ;;  %1603 = vmatprep.subr.bf16.mxu1 %v9177_v39  ;;  %v680_v39 = vld [vmem:[#allocation12 + $0x78] sm:$0xff] }
 0x2f8   : > { %10114 = vmatprep.mubr.msk.bf16.mxu1 %vm800_vm0, %v942_v44  ;;  %v908_v51 = vadd.f32 %v11893_v49, %v907_v48  ;;  %v10097_v52 = vpop.f32.mrb[14].mxu0  ;;  %v687_v48 = vld [vmem:[#allocation12 + $0xb0] sm:$0xff] }
 0x2f9   : > { %10115 = vmatmul.mubr.msk.bf16.gmra.mrb[8].mxu1 %vm800_vm0, %v943_v43  ;;  %v936_v53 = vmax.f32 %v916_v47, 0.0  ;;  %v919_v54 = vadd.f32 %v10097_v52, %v11893_v49  ;;  %v910_v55 = vpop.f32.mrb[15].mxu0  ;;  %v683_v43 = vld [vmem:[#allocation12 + $0x90] sm:$0xff]  ;;  %v9157_v47 = vcombine.high %v676_v38, %v680_v39 }
 0x2fa   : > { %v934_v56 = vmax.f32 %v908_v51, 0.0  ;;  %v911_v57 = vadd.f32 %v11893_v49, %v910_v55  ;;  %1604 = vmatpush1.bf16.msra.mxu1 %v9176_v46  ;;  %v9193_v49 = vcombine.high %v714_v1, %v718_v3  ;;  %v9155_v46 = vcombine.high %v675_v34, %v679_v37  ;;  %v688_v51 = vld [vmem:[#allocation12 + $0xb8] sm:$0xff] }
 0x2fb   : > { %v937_v59 = vmax.f32 %v919_v54, 0.0  ;;  %1605 = vmatprep.subr.bf16.mxu1 %v9185_v50  ;;  %v684_v50 = vld [vmem:[#allocation12 + $0x98] sm:$0xff]  ;;  %v9162_v7 = vcombine.low %v683_v43, %v687_v48 }
 0x2fc   : > { %v935_v60 = vmax.f32 %v911_v57, 0.0  ;;  %v9154_v57 = vcombine.low %v675_v34, %v679_v37  ;;  %v692_v3 = vld [vmem:[#allocation12 + $0xd8] sm:$0xff]  ;;  %v9164_v8 = vcombine.low %v684_v50, %v688_v51 }
 0x2fd   : > { %v945_v61 = vpack.c.bf16 %v937_v59, %v936_v53  ;;  %v708_v34 = vld [vmem:[#allocation12 + $0x158] sm:$0xff] }
 0x2fe   : > { %v944_v62 = vpack.c.bf16 %v935_v60, %v934_v56  ;;  %1606 = vmatpush1.bf16.msra.mxu1 %v9184_v58  ;;  %v9156_v58 = vcombine.low %v676_v38, %v680_v39 }
 0x2ff   : > { %1607 = vmatprep.subr.bf16.mxu1 %v9193_v49 }
 0x300   : > { %10118 = vmatprep.mubr.msk.bf16.mxu1 %vm800_vm0, %v944_v62  ;;  %v9165_v62 = vcombine.high %v684_v50, %v688_v51  ;;  %v719_v51 = vld [vmem:[#allocation12 + $0x1b0] sm:$0xff] }
 0x301   : > { %10119 = vmatmul.mubr.msk.bf16.gmra.mrb[12].mxu1 %vm800_vm0, %v945_v61  ;;  %v9163_v61 = vcombine.high %v683_v43, %v687_v48 }
 0x302   : > { %1608 = vmatpush1.bf16.msra.mxu1 %v9192_v5  ;;  %1627 = vmatprep.mubr.bf16.mxu1 %v11375_v14 }
 0x303   : > { %1609 = vmatprep.subr.bf16.mxu1 %v9201_v13  ;;  %v699_v13 = vld [vmem:[#allocation12 + $0x110] sm:$0xff] }
 0x304   : > { %v9178_v39 = vcombine.low %v699_v13, %v703_v17 }
 0x306   : > { %1610 = vmatpush1.bf16.msra.mxu1 %v9200_v12  ;;  %v9173_v12 = vcombine.high %v692_v3, %v696_v4 }
 0x307   : > { %1821 = vmatprep.subr.bf16.mxu1 %v9149_v22 }
 0x3bc   : > { %v10108_v25 = vpop.f32.mrb[0].mxu1 }
 0x3bd   : > { %v1043_v27 = vadd.f32 %v10108_v25, %v11924_v24  ;;  %v1034_v28 = vpop.f32.mrb[1].mxu1 }
 0x3be   : > { %v1035_v30 = vadd.f32 %v11924_v24, %v1034_v28  ;;  %v10109_v23 = vpop.f32.mrb[2].mxu1  ;;  %v9170_v28 = vcombine.low %v691_v0, %v695_v2  ;;  %v723_v0 = vld [vmem:[#allocation12 + $0x1d0] sm:$0xff] }
 0x3bf   : > { %v1046_v26 = vadd.f32 %v10109_v23, %v11924_v24  ;;  %v1037_v29 = vpop.f32.mrb[3].mxu1  ;;  %v1099_v32 = vmax.f32 %v1043_v27, 0.0  ;;  %v727_v2 = vld [vmem:[#allocation12 + $0x1f0] sm:$0xff] }
 0x3c0   : > { %v1038_v31 = vadd.f32 %v11924_v24, %v1037_v29  ;;  %v1097_v35 = vmax.f32 %v1035_v30, 0.0  ;;  %v9172_v30 = vcombine.low %v692_v3, %v696_v4  ;;  %v724_v3 = vld [vmem:[#allocation12 + $0x1d8] sm:$0xff] }
 0x3c1   : > { %v1100_v33 = vmax.f32 %v1046_v26, 0.0  ;;  %v9179_v26 = vcombine.high %v699_v13, %v703_v17  ;;  %v728_v4 = vld [vmem:[#allocation12 + $0x1f8] sm:$0xff]  ;;  %v12022_v13 = vld [vmem:[#allocation14] sm:$0xff] }
 0x3c2   : > { %v1098_v36 = vmax.f32 %v1038_v31, 0.0  ;;  %v707_v31 = vld [vmem:[#allocation12 + $0x150] sm:$0xff] }
 0x3c3   : > { %v11930_v40 = vpack.c.bf16 %v1100_v33, %v1099_v32  ;;  %v711_v33 = vld [vmem:[#allocation12 + $0x170] sm:$0xff] }
 0x3c4   : > { %v11932_v41 = vpack.c.bf16 %v1098_v36, %v1097_v35  ;;  %v10112_v42 = vpop.f32.mrb[4].mxu1  ;;  %v712_v35 = vld [vmem:[#allocation12 + $0x178] sm:$0xff] }
 0x3c5   : > { %v1059_v44 = vadd.f32 %v10112_v42, %v11924_v24  ;;  %v1050_v45 = vpop.f32.mrb[5].mxu1 }
 0x3c6   : > { %v1051_v52 = vadd.f32 %v11924_v24, %v1050_v45  ;;  %1515 = vmatmul.mubr.bf16.vlgmr.msra.gmra.mrb[16].mxu0 %v11932_v41  ;;  %1628 = vmatmul.mubr.bf16.vlgmr.msra.gmra.mrb[16].mxu1 %v11932_v41  ;;  %v10113_v53 = vpop.f32.mrb[6].mxu1  ;;  %v9187_v45 = vcombine.high %v707_v31, %v711_v33 }
 0x3c7   : > { %v1103_v54 = vmax.f32 %v1059_v44, 0.0  ;;  %1709 = vmatpush1.bf16.msra.mxu0 %v9146_v18  ;;  %1822 = vmatpush1.bf16.msra.mxu1 %v9148_v21  ;;  %v1062_v55 = vadd.f32 %v10113_v53, %v11924_v24  ;;  %v1053_v56 = vpop.f32.mrb[7].mxu1  ;;  %v700_v18 = vld [vmem:[#allocation12 + $0x118] sm:$0xff] }
 0x3c8   : > { %v1101_v59 = vmax.f32 %v1051_v52, 0.0  ;;  %v1054_v60 = vadd.f32 %v11924_v24, %v1053_v56  ;;  %1524 = vmatprep.mubr.bf16.mxu0 %v11375_v14  ;;  %1637 = vmatprep.mubr.bf16.mxu1 %v11375_v14  ;;  %v9181_v29 = vcombine.high %v700_v18, %v704_v19  ;;  %v9180_v42 = vcombine.low %v700_v18, %v704_v19  ;;  %v716_v52 = vld [vmem:[#allocation12 + $0x198] sm:$0xff] }
 0x3c9   : > { %v1104_v63 = vmax.f32 %v1062_v55, 0.0  ;;  %1710 = vmatprep.subr.bf16.mxu0 %v9155_v46  ;;  %1823 = vmatprep.subr.bf16.mxu1 %v9157_v47  ;;  %v9189_v46 = vcombine.high %v708_v34, %v712_v35  ;;  %v715_v47 = vld [vmem:[#allocation12 + $0x190] sm:$0xff]  ;;  %v720_v53 = vld [vmem:[#allocation12 + $0x1b8] sm:$0xff] }
 0x3ca   : > { %v1102_v1 = vmax.f32 %v1054_v60, 0.0  ;;  %v9188_v60 = vcombine.low %v708_v34, %v712_v35 }
 0x3cb   : > { %v11942_v5 = vpack.c.bf16 %v1104_v63, %v1103_v54  ;;  %1711 = vmatpush1.bf16.msra.mxu0 %v9154_v57  ;;  %1824 = vmatpush1.bf16.msra.mxu1 %v9156_v58  ;;  %v9197_v63 = vcombine.high %v716_v52, %v720_v53 }
 0x3cc   : > { %v11944_v49 = vpack.c.bf16 %v1102_v1, %v1101_v59  ;;  %v10116_v6 = vpop.f32.mrb[8].mxu1  ;;  %1712 = vmatprep.subr.bf16.mxu0 %v9163_v61  ;;  %1825 = vmatprep.subr.bf16.mxu1 %v9165_v62  ;;  %v9186_v59 = vcombine.low %v707_v31, %v711_v33  ;;  %v9195_v62 = vcombine.high %v715_v47, %v719_v51 }
 0x3cd   : > { %v1075_v9 = vadd.f32 %v10116_v6, %v11924_v24  ;;  %v1066_v10 = vpop.f32.mrb[9].mxu1 }
 0x3ce   : > { %1525 = vmatmul.mubr.bf16.gmra.mrb[20].mxu0 %v11930_v40  ;;  %1638 = vmatmul.mubr.bf16.gmra.mrb[20].mxu1 %v11930_v40  ;;  %v1067_v15 = vadd.f32 %v11924_v24, %v1066_v10  ;;  %v10117_v16 = vpop.f32.mrb[10].mxu1  ;;  %v9205_v10 = vcombine.high %v724_v3, %v728_v4 }
 0x3cf   : > { %v1107_v20 = vmax.f32 %v1075_v9, 0.0  ;;  %1534 = vmatprep.mubr.bf16.mxu0 %v11375_v14  ;;  %1647 = vmatprep.mubr.bf16.mxu1 %v11375_v14  ;;  %v1078_v21 = vadd.f32 %v10117_v16, %v11924_v24  ;;  %v1069_v22 = vpop.f32.mrb[11].mxu1  ;;  %v9196_v9 = vcombine.low %v716_v52, %v720_v53 }
 0x3d0   : > { %v1105_v25 = vmax.f32 %v1067_v15, 0.0  ;;  %1713 = vmatpush1.bf16.msra.mxu0 %v9162_v7  ;;  %1826 = vmatpush1.bf16.msra.mxu1 %v9164_v8  ;;  %v1070_v27 = vadd.f32 %v11924_v24, %v1069_v22  ;;  %v9194_v8 = vcombine.low %v715_v47, %v719_v51 }
 0x3d1   : > { %v1108_v23 = vmax.f32 %v1078_v21, 0.0  ;;  %1714 = vmatprep.subr.bf16.mxu0 %v9171_v11  ;;  %1827 = vmatprep.subr.bf16.mxu1 %v9173_v12  ;;  %v9202_v11 = vcombine.low %v723_v0, %v727_v2  ;;  %v9204_v12 = vcombine.low %v724_v3, %v728_v4 }
 0x3d2   : > { %v1106_v32 = vmax.f32 %v1070_v27, 0.0 }
 0x3d3   : > { %v11954_v36 = vpack.c.bf16 %v1108_v23, %v1107_v20 }
 0x3d4   : > { %v11956_v37 = vpack.c.bf16 %v1106_v32, %v1105_v25  ;;  %1715 = vmatpush1.bf16.msra.mxu0 %v9170_v28  ;;  %1828 = vmatpush1.bf16.msra.mxu1 %v9172_v30  ;;  %v10120_v38 = vpop.f32.mrb[12].mxu1 }
 0x3d5   : > { %v1091_v43 = vadd.f32 %v10120_v38, %v11924_v24  ;;  %1716 = vmatprep.subr.bf16.mxu0 %v9179_v26  ;;  %1829 = vmatprep.subr.bf16.mxu1 %v9181_v29  ;;  %v1082_v44 = vpop.f32.mrb[13].mxu1 }
 0x3d6   : > { %1535 = vmatmul.mubr.bf16.gmra.mrb[24].mxu0 %v11944_v49  ;;  %1648 = vmatmul.mubr.bf16.gmra.mrb[24].mxu1 %v11944_v49  ;;  %v1083_v48 = vadd.f32 %v11924_v24, %v1082_v44  ;;  %v10121_v50 = vpop.f32.mrb[14].mxu1 }
 0x3d7   : > { %1544 = vmatprep.mubr.bf16.mxu0 %v11375_v14  ;;  %1657 = vmatprep.mubr.bf16.mxu1 %v11375_v14  ;;  %v1111_v54 = vmax.f32 %v1091_v43, 0.0  ;;  %v1094_v55 = vadd.f32 %v10121_v50, %v11924_v24  ;;  %v1085_v56 = vpop.f32.mrb[15].mxu1 }
 0x3d8   : > { %v1109_v57 = vmax.f32 %v1083_v48, 0.0  ;;  %1717 = vmatpush1.bf16.msra.mxu0 %v9178_v39  ;;  %1830 = vmatpush1.bf16.msra.mxu1 %v9180_v42  ;;  %v1086_v58 = vadd.f32 %v11924_v24, %v1085_v56  ;;  %v9203_v24 = vcombine.high %v723_v0, %v727_v2 }
 0x3d9   : > { %v1112_v61 = vmax.f32 %v1094_v55, 0.0  ;;  %1718 = vmatprep.subr.bf16.mxu0 %v9187_v45  ;;  %1831 = vmatprep.subr.bf16.mxu1 %v9189_v46 }
 0x3da   : > { %v1110_v1 = vmax.f32 %v1086_v58, 0.0 }
 0x3db   : > { %v11966_v6 = vpack.c.bf16 %v1112_v61, %v1111_v54 }
 0x3dc   : > { %v1119_v7 = vpack.c.bf16 %v1110_v1, %v1109_v57  ;;  %1719 = vmatpush1.bf16.msra.mxu0 %v9186_v59  ;;  %1832 = vmatpush1.bf16.msra.mxu1 %v9188_v60 }
 0x3dd   : > { %1720 = vmatprep.subr.bf16.mxu0 %v9195_v62  ;;  %1833 = vmatprep.subr.bf16.mxu1 %v9197_v63 }
 0x3de   : > { %1545 = vmatmul.mubr.bf16.gmra.mrb[28].mxu0 %v11942_v5  ;;  %1658 = vmatmul.mubr.bf16.gmra.mrb[28].mxu1 %v11942_v5 }
 0x3df   : > { %1554 = vmatprep.mubr.bf16.mxu0 %v11375_v14  ;;  %1667 = vmatprep.mubr.bf16.mxu1 %v11375_v14 }
 0x3e0   : > { %1721 = vmatpush1.bf16.msra.mxu0 %v9194_v8  ;;  %1834 = vmatpush1.bf16.msra.mxu1 %v9196_v9 }
 0x3e1   : > { %1722 = vmatprep.subr.bf16.mxu0 %v9203_v24  ;;  %1835 = vmatprep.subr.bf16.mxu1 %v9205_v10 }
 0x3e4   : > { %1723 = vmatpush1.bf16.msra.mxu0 %v9202_v11  ;;  %1836 = vmatpush1.bf16.msra.mxu1 %v9204_v12 }
 0x3e6   : > { %1555 = vmatmul.mubr.bf16.gmra.mrb[32].mxu0 %v11956_v37  ;;  %1668 = vmatmul.mubr.bf16.gmra.mrb[32].mxu1 %v11956_v37 }
 0x3e7   : > { %1564 = vmatprep.mubr.bf16.mxu0 %v11375_v14  ;;  %1677 = vmatprep.mubr.bf16.mxu1 %v11375_v14 }
 0x3ee   : > { %1565 = vmatmul.mubr.bf16.gmra.mrb[36].mxu0 %v11954_v36  ;;  %1678 = vmatmul.mubr.bf16.gmra.mrb[36].mxu1 %v11954_v36 }
 0x3ef   : > { %1574 = vmatprep.mubr.bf16.mxu0 %v11375_v14  ;;  %1687 = vmatprep.mubr.bf16.mxu1 %v11375_v14 }
 0x3f6   : > { %1575 = vmatmul.mubr.bf16.gmra.mrb[40].mxu0 %v1119_v7  ;;  %1688 = vmatmul.mubr.bf16.gmra.mrb[40].mxu1 %v1119_v7 }
 0x3f7   : > { %1584 = vmatprep.mubr.bf16.mxu0 %v11375_v14  ;;  %1697 = vmatprep.mubr.bf16.mxu1 %v11375_v14 }
 0x3fe   : > { %1585 = vmatmul.mubr.bf16.gmra.mrb[44].mxu0 %v11966_v6  ;;  %1698 = vmatmul.mubr.bf16.gmra.mrb[44].mxu1 %v11966_v6 }
 0x3ff   : > { %1740 = vmatprep.mubr.bf16.mxu0 %v11375_v14  ;;  %1853 = vmatprep.mubr.bf16.mxu1 %v11375_v14 }
 0x406   : > { %1741 = vmatmul.mubr.bf16.vlgmr.msra.gmra.mrb[48].mxu0 %v11932_v41  ;;  %1854 = vmatmul.mubr.bf16.vlgmr.msra.gmra.mrb[48].mxu1 %v11932_v41 }
 0x407   : > { %1750 = vmatprep.mubr.bf16.mxu0 %v11375_v14  ;;  %1863 = vmatprep.mubr.bf16.mxu1 %v11375_v14 }
 0x40e   : > { %1751 = vmatmul.mubr.bf16.gmra.mrb[52].mxu0 %v11930_v40  ;;  %1864 = vmatmul.mubr.bf16.gmra.mrb[52].mxu1 %v11930_v40  ;;  %v1122_v40 = vlaneseq }
 0x40f   : > { %1760 = vmatprep.mubr.bf16.mxu0 %v11375_v14  ;;  %1873 = vmatprep.mubr.bf16.mxu1 %v11375_v14 }
 0x410   : > { %v12014_v41 = vshrl.u32 %v1122_v40, 7 }
 0x412   : > { %v12025_v15 = vsub.s32 1, %v12014_v41 }
 0x414   : > { %v12040_v18 = vrot.slane %v12022_v13, %v12025_v15 }
 0x416   : > { %1761 = vmatmul.mubr.bf16.gmra.mrb[56].mxu0 %v11944_v49  ;;  %1874 = vmatmul.mubr.bf16.gmra.mrb[56].mxu1 %v11944_v49  ;;  %v12020_v49 = vsub.s32 2, %v12014_v41 }
 0x417   : > { %1770 = vmatprep.mubr.bf16.mxu0 %v11375_v14  ;;  %1883 = vmatprep.mubr.bf16.mxu1 %v11375_v14 }
 0x418   : > { %v12036_v17 = vrot.slane %v12022_v13, %v12020_v49 }
 0x41e   : > { %1771 = vmatmul.mubr.bf16.gmra.mrb[60].mxu0 %v11942_v5  ;;  %1884 = vmatmul.mubr.bf16.gmra.mrb[60].mxu1 %v11942_v5  ;;  %v12017_v5 = vsub.s32 0, %v12014_v41 }
 0x41f   : > { %1780 = vmatprep.mubr.bf16.mxu0 %v11375_v14  ;;  %1893 = vmatprep.mubr.bf16.mxu1 %v11375_v14 }
 0x420   : > { %v12032_v16 = vrot.slane %v12022_v13, %v12017_v5 }
 0x426   : > { %1781 = vmatmul.mubr.bf16.gmra.mrb[64].mxu0 %v11956_v37  ;;  %1894 = vmatmul.mubr.bf16.gmra.mrb[64].mxu1 %v11956_v37 }
 0x427   : > { %1790 = vmatprep.mubr.bf16.mxu0 %v11375_v14  ;;  %1903 = vmatprep.mubr.bf16.mxu1 %v11375_v14 }
 0x42e   : > { %1791 = vmatmul.mubr.bf16.gmra.mrb[68].mxu0 %v11954_v36  ;;  %1904 = vmatmul.mubr.bf16.gmra.mrb[68].mxu1 %v11954_v36 }
 0x42f   : > { %1800 = vmatprep.mubr.bf16.mxu0 %v11375_v14  ;;  %1913 = vmatprep.mubr.bf16.mxu1 %v11375_v14 }
 0x436   : > { %1801 = vmatmul.mubr.bf16.gmra.mrb[72].mxu0 %v1119_v7  ;;  %1914 = vmatmul.mubr.bf16.gmra.mrb[72].mxu1 %v1119_v7 }
 0x437   : > { %1810 = vmatprep.mubr.bf16.mxu0 %v11375_v14  ;;  %1923 = vmatprep.mubr.bf16.mxu1 %v11375_v14  ;;  %v12028_v14 = vsub.s32 3, %v12014_v41 }
 0x439   : > { %v12044_v19 = vrot.slane %v12022_v13, %v12028_v14 }
 0x43e   : > { %1811 = vmatmul.mubr.bf16.gmra.mrb[76].mxu0 %v11966_v6  ;;  %1924 = vmatmul.mubr.bf16.gmra.mrb[76].mxu1 %v11966_v6 }
 0x499   : > { %v1516_v20 = vpop.f32.mrb[16].mxu0  ;;  %v1629_v21 = vpop.f32.mrb[16].mxu1 }
 0x49a   : > { %v1517_v22 = vadd.f32 %v1516_v20, %v12032_v16  ;;  %v1630_v25 = vadd.f32 %v1629_v21, %v12036_v17  ;;  %v1518_v27 = vpop.f32.mrb[17].mxu0  ;;  %v1631_v28 = vpop.f32.mrb[17].mxu1 }
 0x49b   : > { %v1519_v30 = vadd.f32 %v1518_v27, %v12040_v18  ;;  %v1632_v23 = vadd.f32 %v1631_v28, %v12044_v19  ;;  %v1520_v26 = vpop.f32.mrb[18].mxu0  ;;  %v1633_v29 = vpop.f32.mrb[18].mxu1 }
 0x49c   : > { %v1521_v31 = vadd.f32 %v1520_v26, %v12032_v16  ;;  %v1634_v32 = vadd.f32 %v1633_v29, %v12036_v17  ;;  %v1522_v33 = vpop.f32.mrb[19].mxu0  ;;  %v1635_v34 = vpop.f32.mrb[19].mxu1  ;;  %v1934_v37 = vmax.f32 %v1517_v22, 0.0  ;;  %v1936_v38 = vmax.f32 %v1630_v25, 0.0 }
 0x49d   : > { %v1523_v35 = vadd.f32 %v1522_v33, %v12040_v18  ;;  %v1636_v36 = vadd.f32 %v1635_v34, %v12044_v19  ;;  %v1935_v43 = vmax.f32 %v1519_v30, 0.0  ;;  %v1937_v44 = vmax.f32 %v1632_v23, 0.0 }
 0x49e   : > { %v1942_v39 = vmax.f32 %v1521_v31, 0.0  ;;  %v1944_v42 = vmax.f32 %v1634_v32, 0.0 }
 0x49f   : > { %v1943_v45 = vmax.f32 %v1523_v35, 0.0  ;;  %v1945_v46 = vmax.f32 %v1636_v36, 0.0 }
 0x4a0   : > { %v2062_v47 = vmax.f32 %v1934_v37, %v1942_v39  ;;  %v2104_v48 = vmax.f32 %v1936_v38, %v1944_v42 }
 0x4a1   : > { %v2083_v50 = vmax.f32 %v1935_v43, %v1943_v45  ;;  %v2125_v51 = vmax.f32 %v1937_v44, %v1945_v46  ;;  %v1526_v52 = vpop.f32.mrb[20].mxu0  ;;  %v1639_v53 = vpop.f32.mrb[20].mxu1 }
 0x4a2   : > { %v1527_v54 = vadd.f32 %v1526_v52, %v12032_v16  ;;  %v1640_v55 = vadd.f32 %v1639_v53, %v12036_v17  ;;  %v1528_v56 = vpop.f32.mrb[21].mxu0  ;;  %v1641_v57 = vpop.f32.mrb[21].mxu1 }
 0x4a3   : > { %v1529_v58 = vadd.f32 %v1528_v56, %v12040_v18  ;;  %v1642_v59 = vadd.f32 %v1641_v57, %v12044_v19  ;;  %v1530_v60 = vpop.f32.mrb[22].mxu0  ;;  %v1643_v61 = vpop.f32.mrb[22].mxu1 }
 0x4a4   : > { %v1950_v62 = vmax.f32 %v1527_v54, 0.0  ;;  %v1952_v63 = vmax.f32 %v1640_v55, 0.0  ;;  %v1531_v0 = vadd.f32 %v1530_v60, %v12032_v16  ;;  %v1644_v1 = vadd.f32 %v1643_v61, %v12036_v17  ;;  %v1532_v2 = vpop.f32.mrb[23].mxu0  ;;  %v1645_v3 = vpop.f32.mrb[23].mxu1 }
 0x4a5   : > { %v1951_v4 = vmax.f32 %v1529_v58, 0.0  ;;  %v1953_v6 = vmax.f32 %v1642_v59, 0.0  ;;  %v1533_v7 = vadd.f32 %v1532_v2, %v12040_v18  ;;  %v1646_v8 = vadd.f32 %v1645_v3, %v12044_v19 }
 0x4a6   : > { %v2063_v9 = vmax.f32 %v2062_v47, %v1950_v62  ;;  %v2105_v24 = vmax.f32 %v2104_v48, %v1952_v63  ;;  %v1958_v10 = vmax.f32 %v1531_v0, 0.0  ;;  %v1960_v11 = vmax.f32 %v1644_v1, 0.0 }
 0x4a7   : > { %v2084_v12 = vmax.f32 %v2083_v50, %v1951_v4  ;;  %v2126_v40 = vmax.f32 %v2125_v51, %v1953_v6  ;;  %v1959_v20 = vmax.f32 %v1533_v7, 0.0  ;;  %v1961_v21 = vmax.f32 %v1646_v8, 0.0 }
 0x4a8   : > { %v2064_v22 = vmax.f32 %v2063_v9, %v1958_v10  ;;  %v2106_v25 = vmax.f32 %v2105_v24, %v1960_v11 }
 0x4a9   : > { %v2085_v27 = vmax.f32 %v2084_v12, %v1959_v20  ;;  %v2127_v28 = vmax.f32 %v2126_v40, %v1961_v21  ;;  %v1536_v30 = vpop.f32.mrb[24].mxu0  ;;  %v1649_v23 = vpop.f32.mrb[24].mxu1 }
 0x4aa   : > { %v1537_v26 = vadd.f32 %v1536_v30, %v12032_v16  ;;  %v1650_v29 = vadd.f32 %v1649_v23, %v12036_v17  ;;  %v1538_v31 = vpop.f32.mrb[25].mxu0  ;;  %v1651_v32 = vpop.f32.mrb[25].mxu1 }
 0x4ab   : > { %v1539_v33 = vadd.f32 %v1538_v31, %v12040_v18  ;;  %v1652_v34 = vadd.f32 %v1651_v32, %v12044_v19  ;;  %v1540_v35 = vpop.f32.mrb[26].mxu0  ;;  %v1653_v36 = vpop.f32.mrb[26].mxu1 }
 0x4ac   : > { %v1966_v37 = vmax.f32 %v1537_v26, 0.0  ;;  %v1968_v38 = vmax.f32 %v1650_v29, 0.0  ;;  %v1541_v39 = vadd.f32 %v1540_v35, %v12032_v16  ;;  %v1654_v42 = vadd.f32 %v1653_v36, %v12036_v17  ;;  %v1542_v43 = vpop.f32.mrb[27].mxu0  ;;  %v1655_v44 = vpop.f32.mrb[27].mxu1 }
 0x4ad   : > { %v1967_v45 = vmax.f32 %v1539_v33, 0.0  ;;  %v1969_v46 = vmax.f32 %v1652_v34, 0.0  ;;  %v1543_v47 = vadd.f32 %v1542_v43, %v12040_v18  ;;  %v1656_v48 = vadd.f32 %v1655_v44, %v12044_v19 }
 0x4ae   : > { %v2065_v50 = vmax.f32 %v2064_v22, %v1966_v37  ;;  %v2107_v51 = vmax.f32 %v2106_v25, %v1968_v38  ;;  %v1974_v52 = vmax.f32 %v1541_v39, 0.0  ;;  %v1976_v53 = vmax.f32 %v1654_v42, 0.0 }
 0x4af   : > { %v2086_v54 = vmax.f32 %v2085_v27, %v1967_v45  ;;  %v2128_v55 = vmax.f32 %v2127_v28, %v1969_v46  ;;  %v1975_v56 = vmax.f32 %v1543_v47, 0.0  ;;  %v1977_v57 = vmax.f32 %v1656_v48, 0.0 }
 0x4b0   : > { %v2066_v58 = vmax.f32 %v2065_v50, %v1974_v52  ;;  %v2108_v59 = vmax.f32 %v2107_v51, %v1976_v53 }
 0x4b1   : > { %v2087_v60 = vmax.f32 %v2086_v54, %v1975_v56  ;;  %v2129_v61 = vmax.f32 %v2128_v55, %v1977_v57  ;;  %v1546_v62 = vpop.f32.mrb[28].mxu0  ;;  %v1659_v63 = vpop.f32.mrb[28].mxu1 }
 0x4b2   : > { %v1547_v0 = vadd.f32 %v1546_v62, %v12032_v16  ;;  %v1660_v1 = vadd.f32 %v1659_v63, %v12036_v17  ;;  %v1548_v2 = vpop.f32.mrb[29].mxu0  ;;  %v1661_v3 = vpop.f32.mrb[29].mxu1 }
 0x4b3   : > { %v1549_v4 = vadd.f32 %v1548_v2, %v12040_v18  ;;  %v1662_v6 = vadd.f32 %v1661_v3, %v12044_v19  ;;  %v1550_v7 = vpop.f32.mrb[30].mxu0  ;;  %v1663_v8 = vpop.f32.mrb[30].mxu1 }
 0x4b4   : > { %v1982_v9 = vmax.f32 %v1547_v0, 0.0  ;;  %v1984_v24 = vmax.f32 %v1660_v1, 0.0  ;;  %v1551_v10 = vadd.f32 %v1550_v7, %v12032_v16  ;;  %v1664_v11 = vadd.f32 %v1663_v8, %v12036_v17  ;;  %v1552_v12 = vpop.f32.mrb[31].mxu0  ;;  %v1665_v40 = vpop.f32.mrb[31].mxu1 }
 0x4b5   : > { %v1983_v20 = vmax.f32 %v1549_v4, 0.0  ;;  %v1985_v21 = vmax.f32 %v1662_v6, 0.0  ;;  %v1553_v22 = vadd.f32 %v1552_v12, %v12040_v18  ;;  %v1666_v25 = vadd.f32 %v1665_v40, %v12044_v19 }
 0x4b6   : > { %v2067_v27 = vmax.f32 %v2066_v58, %v1982_v9  ;;  %v2109_v28 = vmax.f32 %v2108_v59, %v1984_v24  ;;  %v1990_v30 = vmax.f32 %v1551_v10, 0.0  ;;  %v1992_v23 = vmax.f32 %v1664_v11, 0.0 }
 0x4b7   : > { %v2088_v26 = vmax.f32 %v2087_v60, %v1983_v20  ;;  %v2130_v29 = vmax.f32 %v2129_v61, %v1985_v21  ;;  %v1991_v31 = vmax.f32 %v1553_v22, 0.0  ;;  %v1993_v32 = vmax.f32 %v1666_v25, 0.0 }
 0x4b8   : > { %v2068_v33 = vmax.f32 %v2067_v27, %v1990_v30  ;;  %v2110_v34 = vmax.f32 %v2109_v28, %v1992_v23 }
 0x4b9   : > { %v2089_v35 = vmax.f32 %v2088_v26, %v1991_v31  ;;  %v2131_v36 = vmax.f32 %v2130_v29, %v1993_v32  ;;  %v1556_v37 = vpop.f32.mrb[32].mxu0  ;;  %v1669_v38 = vpop.f32.mrb[32].mxu1 }
 0x4ba   : > { %v1557_v39 = vadd.f32 %v1556_v37, %v12032_v16  ;;  %v1670_v42 = vadd.f32 %v1669_v38, %v12036_v17  ;;  %v1558_v43 = vpop.f32.mrb[33].mxu0  ;;  %v1671_v44 = vpop.f32.mrb[33].mxu1 }
 0x4bb   : > { %v1559_v45 = vadd.f32 %v1558_v43, %v12040_v18  ;;  %v1672_v46 = vadd.f32 %v1671_v44, %v12044_v19  ;;  %v1560_v47 = vpop.f32.mrb[34].mxu0  ;;  %v1673_v48 = vpop.f32.mrb[34].mxu1 }
 0x4bc   : > { %v1998_v50 = vmax.f32 %v1557_v39, 0.0  ;;  %v2000_v51 = vmax.f32 %v1670_v42, 0.0  ;;  %v1561_v52 = vadd.f32 %v1560_v47, %v12032_v16  ;;  %v1674_v53 = vadd.f32 %v1673_v48, %v12036_v17  ;;  %v1562_v54 = vpop.f32.mrb[35].mxu0  ;;  %v1675_v55 = vpop.f32.mrb[35].mxu1 }
 0x4bd   : > { %v1999_v56 = vmax.f32 %v1559_v45, 0.0  ;;  %v2001_v57 = vmax.f32 %v1672_v46, 0.0  ;;  %v1563_v58 = vadd.f32 %v1562_v54, %v12040_v18  ;;  %v1676_v59 = vadd.f32 %v1675_v55, %v12044_v19 }
 0x4be   : > { %v2069_v60 = vmax.f32 %v2068_v33, %v1998_v50  ;;  %v2111_v61 = vmax.f32 %v2110_v34, %v2000_v51  ;;  %v2006_v62 = vmax.f32 %v1561_v52, 0.0  ;;  %v2008_v63 = vmax.f32 %v1674_v53, 0.0 }
 0x4bf   : > { %v2090_v0 = vmax.f32 %v2089_v35, %v1999_v56  ;;  %v2132_v1 = vmax.f32 %v2131_v36, %v2001_v57  ;;  %v2007_v2 = vmax.f32 %v1563_v58, 0.0  ;;  %v2009_v3 = vmax.f32 %v1676_v59, 0.0 }
 0x4c0   : > { %v2070_v4 = vmax.f32 %v2069_v60, %v2006_v62  ;;  %v2112_v6 = vmax.f32 %v2111_v61, %v2008_v63  ;;  %v12097_v56 = vsub.s32 4, %v12014_v41  ;;  %v12100_v57 = vsub.s32 6, %v12014_v41 }
 0x4c1   : > { %v2091_v7 = vmax.f32 %v2090_v0, %v2007_v2  ;;  %v2133_v8 = vmax.f32 %v2132_v1, %v2009_v3  ;;  %v1566_v9 = vpop.f32.mrb[36].mxu0  ;;  %v1679_v24 = vpop.f32.mrb[36].mxu1  ;;  %v12105_v62 = vsub.s32 5, %v12014_v41  ;;  %v12108_v63 = vsub.s32 7, %v12014_v41 }
 0x4c2   : > { %v1567_v10 = vadd.f32 %v1566_v9, %v12032_v16  ;;  %v1680_v11 = vadd.f32 %v1679_v24, %v12036_v17  ;;  %v1568_v12 = vpop.f32.mrb[37].mxu0  ;;  %v1681_v40 = vpop.f32.mrb[37].mxu1 }
 0x4c3   : > { %v1569_v20 = vadd.f32 %v1568_v12, %v12040_v18  ;;  %v1682_v21 = vadd.f32 %v1681_v40, %v12044_v19  ;;  %v1570_v22 = vpop.f32.mrb[38].mxu0  ;;  %v1683_v25 = vpop.f32.mrb[38].mxu1 }
 0x4c4   : > { %v2014_v27 = vmax.f32 %v1567_v10, 0.0  ;;  %v2016_v28 = vmax.f32 %v1680_v11, 0.0  ;;  %v1571_v30 = vadd.f32 %v1570_v22, %v12032_v16  ;;  %v1684_v23 = vadd.f32 %v1683_v25, %v12036_v17  ;;  %v1572_v26 = vpop.f32.mrb[39].mxu0  ;;  %v1685_v29 = vpop.f32.mrb[39].mxu1 }
 0x4c5   : > { %v2015_v31 = vmax.f32 %v1569_v20, 0.0  ;;  %v2017_v32 = vmax.f32 %v1682_v21, 0.0  ;;  %v1573_v33 = vadd.f32 %v1572_v26, %v12040_v18  ;;  %v1686_v34 = vadd.f32 %v1685_v29, %v12044_v19 }
 0x4c6   : > { %v2071_v35 = vmax.f32 %v2070_v4, %v2014_v27  ;;  %v2113_v36 = vmax.f32 %v2112_v6, %v2016_v28  ;;  %v2022_v37 = vmax.f32 %v1571_v30, 0.0  ;;  %v2024_v38 = vmax.f32 %v1684_v23, 0.0 }
 0x4c7   : > { %v2092_v39 = vmax.f32 %v2091_v7, %v2015_v31  ;;  %v2134_v42 = vmax.f32 %v2133_v8, %v2017_v32  ;;  %v2023_v43 = vmax.f32 %v1573_v33, 0.0  ;;  %v2025_v44 = vmax.f32 %v1686_v34, 0.0 }
 0x4c8   : > { %v2072_v45 = vmax.f32 %v2071_v35, %v2022_v37  ;;  %v2114_v46 = vmax.f32 %v2113_v36, %v2024_v38  ;;  %v12118_v35 = vrot.slane %v12022_v13, %v12097_v56  ;;  %v12122_v36 = vrot.slane %v12022_v13, %v12100_v57 }
 0x4c9   : > { %v2093_v47 = vmax.f32 %v2092_v39, %v2023_v43  ;;  %v2135_v48 = vmax.f32 %v2134_v42, %v2025_v44  ;;  %v1576_v50 = vpop.f32.mrb[40].mxu0  ;;  %v1689_v51 = vpop.f32.mrb[40].mxu1  ;;  %v12128_v43 = vrot.slane %v12022_v13, %v12105_v62  ;;  %v12132_v44 = vrot.slane %v12022_v13, %v12108_v63 }
 0x4ca   : > { %v1577_v52 = vadd.f32 %v1576_v50, %v12032_v16  ;;  %v1690_v53 = vadd.f32 %v1689_v51, %v12036_v17  ;;  %v1578_v54 = vpop.f32.mrb[41].mxu0  ;;  %v1691_v55 = vpop.f32.mrb[41].mxu1 }
 0x4cb   : > { %v1579_v58 = vadd.f32 %v1578_v54, %v12040_v18  ;;  %v1692_v59 = vadd.f32 %v1691_v55, %v12044_v19  ;;  %v1580_v60 = vpop.f32.mrb[42].mxu0  ;;  %v1693_v61 = vpop.f32.mrb[42].mxu1 }
 0x4cc   : > { %v2030_v0 = vmax.f32 %v1577_v52, 0.0  ;;  %v2032_v1 = vmax.f32 %v1690_v53, 0.0  ;;  %v1581_v2 = vadd.f32 %v1580_v60, %v12032_v16  ;;  %v1694_v3 = vadd.f32 %v1693_v61, %v12036_v17  ;;  %v1582_v4 = vpop.f32.mrb[43].mxu0  ;;  %v1695_v6 = vpop.f32.mrb[43].mxu1 }
 0x4cd   : > { %v2031_v7 = vmax.f32 %v1579_v58, 0.0  ;;  %v2033_v8 = vmax.f32 %v1692_v59, 0.0  ;;  %v1583_v9 = vadd.f32 %v1582_v4, %v12040_v18  ;;  %v1696_v24 = vadd.f32 %v1695_v6, %v12044_v19 }
 0x4ce   : > { %v2073_v10 = vmax.f32 %v2072_v45, %v2030_v0  ;;  %v2115_v11 = vmax.f32 %v2114_v46, %v2032_v1  ;;  %v2038_v12 = vmax.f32 %v1581_v2, 0.0  ;;  %v2040_v40 = vmax.f32 %v1694_v3, 0.0 }
 0x4cf   : > { %v2094_v20 = vmax.f32 %v2093_v47, %v2031_v7  ;;  %v2136_v21 = vmax.f32 %v2135_v48, %v2033_v8  ;;  %v2039_v22 = vmax.f32 %v1583_v9, 0.0  ;;  %v2041_v25 = vmax.f32 %v1696_v24, 0.0 }
 0x4d0   : > { %v2074_v27 = vmax.f32 %v2073_v10, %v2038_v12  ;;  %v2116_v28 = vmax.f32 %v2115_v11, %v2040_v40 }
 0x4d1   : > { %v2095_v30 = vmax.f32 %v2094_v20, %v2039_v22  ;;  %v2137_v23 = vmax.f32 %v2136_v21, %v2041_v25  ;;  %v1586_v26 = vpop.f32.mrb[44].mxu0  ;;  %v1699_v29 = vpop.f32.mrb[44].mxu1 }
 0x4d2   : > { %v1587_v31 = vadd.f32 %v1586_v26, %v12032_v16  ;;  %v1700_v32 = vadd.f32 %v1699_v29, %v12036_v17  ;;  %v1588_v33 = vpop.f32.mrb[45].mxu0  ;;  %v1701_v34 = vpop.f32.mrb[45].mxu1 }
 0x4d3   : > { %v1589_v37 = vadd.f32 %v1588_v33, %v12040_v18  ;;  %v1702_v38 = vadd.f32 %v1701_v34, %v12044_v19  ;;  %v1590_v39 = vpop.f32.mrb[46].mxu0  ;;  %v1703_v42 = vpop.f32.mrb[46].mxu1 }
 0x4d4   : > { %v2046_v45 = vmax.f32 %v1587_v31, 0.0  ;;  %v2048_v46 = vmax.f32 %v1700_v32, 0.0  ;;  %v1591_v47 = vadd.f32 %v1590_v39, %v12032_v16  ;;  %v1704_v48 = vadd.f32 %v1703_v42, %v12036_v17  ;;  %v1592_v50 = vpop.f32.mrb[47].mxu0  ;;  %v1705_v51 = vpop.f32.mrb[47].mxu1 }
 0x4d5   : > { %v2047_v52 = vmax.f32 %v1589_v37, 0.0  ;;  %v2049_v53 = vmax.f32 %v1702_v38, 0.0  ;;  %v1593_v54 = vadd.f32 %v1592_v50, %v12040_v18  ;;  %v1706_v55 = vadd.f32 %v1705_v51, %v12044_v19 }
 0x4d6   : > { %v2075_v58 = vmax.f32 %v2074_v27, %v2046_v45  ;;  %v2117_v59 = vmax.f32 %v2116_v28, %v2048_v46  ;;  %v2054_v60 = vmax.f32 %v1591_v47, 0.0  ;;  %v2056_v61 = vmax.f32 %v1704_v48, 0.0 }
 0x4d7   : > { %v2096_v13 = vmax.f32 %v2095_v30, %v2047_v52  ;;  %v2138_v0 = vmax.f32 %v2137_v23, %v2049_v53  ;;  %v2055_v1 = vmax.f32 %v1593_v54, 0.0  ;;  %v2057_v2 = vmax.f32 %v1706_v55, 0.0 }
 0x4d8   : > { %v2076_v3 = vmax.f32 %v2075_v58, %v2054_v60  ;;  %v2118_v16 = vmax.f32 %v2117_v59, %v2056_v61 }
 0x4d9   : > { %v2097_v4 = vmax.f32 %v2096_v13, %v2055_v1  ;;  %v2139_v17 = vmax.f32 %v2138_v0, %v2057_v2  ;;  %v1742_v6 = vpop.f32.mrb[48].mxu0  ;;  %v1855_v7 = vpop.f32.mrb[48].mxu1 }
 0x4da   : > { %v2077_v8 = vrot.slane %v2076_v3, 4  ;;  %v2119_v9 = vrot.slane %v2118_v16, 4  ;;  %v1743_v18 = vadd.f32 %v1742_v6, %v12118_v35  ;;  %v1856_v19 = vadd.f32 %v1855_v7, %v12122_v36  ;;  %v1744_v24 = vpop.f32.mrb[49].mxu0  ;;  %v1857_v10 = vpop.f32.mrb[49].mxu1 }
 0x4db   : > { %v2098_v11 = vrot.slane %v2097_v4, 4  ;;  %v2140_v12 = vrot.slane %v2139_v17, 4  ;;  %v1745_v40 = vadd.f32 %v1744_v24, %v12128_v43  ;;  %v1858_v20 = vadd.f32 %v1857_v10, %v12132_v44  ;;  %v1746_v21 = vpop.f32.mrb[50].mxu0  ;;  %v1859_v22 = vpop.f32.mrb[50].mxu1 }
 0x4dc   : > { %v2078_v25 = vmax.f32 %v2076_v3, %v2077_v8  ;;  %v2120_v27 = vmax.f32 %v2118_v16, %v2119_v9  ;;  %v1938_v28 = vmax.f32 %v1743_v18, 0.0  ;;  %v1940_v30 = vmax.f32 %v1856_v19, 0.0  ;;  %v1748_v23 = vpop.f32.mrb[51].mxu0  ;;  %v1861_v26 = vpop.f32.mrb[51].mxu1 }
 0x4dd   : > { %v2099_v29 = vmax.f32 %v2097_v4, %v2098_v11  ;;  %v2141_v31 = vmax.f32 %v2139_v17, %v2140_v12  ;;  %v1939_v32 = vmax.f32 %v1745_v40, 0.0  ;;  %v1941_v33 = vmax.f32 %v1858_v20, 0.0 }
 0x4de   : > { %v2079_v34 = vrot.slane %v2078_v25, 2  ;;  %v2121_v37 = vrot.slane %v2120_v27, 2  ;;  %v1747_v38 = vadd.f32 %v1746_v21, %v12118_v35  ;;  %v1860_v39 = vadd.f32 %v1859_v22, %v12122_v36 }
 0x4df   : > { %v2100_v42 = vrot.slane %v2099_v29, 2  ;;  %v2142_v45 = vrot.slane %v2141_v31, 2  ;;  %v1749_v46 = vadd.f32 %v1748_v23, %v12128_v43  ;;  %v1862_v47 = vadd.f32 %v1861_v26, %v12132_v44 }
 0x4e0   : > { %v2080_v48 = vmax.f32 %v2078_v25, %v2079_v34  ;;  %v2122_v50 = vmax.f32 %v2120_v27, %v2121_v37  ;;  %v1946_v51 = vmax.f32 %v1747_v38, 0.0  ;;  %v1948_v52 = vmax.f32 %v1860_v39, 0.0 }
 0x4e1   : > { %v2101_v53 = vmax.f32 %v2099_v29, %v2100_v42  ;;  %v2143_v54 = vmax.f32 %v2141_v31, %v2142_v45  ;;  %v1947_v55 = vmax.f32 %v1749_v46, 0.0  ;;  %v1949_v58 = vmax.f32 %v1862_v47, 0.0  ;;  %v1752_v59 = vpop.f32.mrb[52].mxu0  ;;  %v1865_v60 = vpop.f32.mrb[52].mxu1 }
 0x4e2   : > { %v2081_v61 = vrot.slane %v2080_v48, 1  ;;  %v2123_v13 = vrot.slane %v2122_v50, 1  ;;  %v2146_v0 = vmax.f32 %v1938_v28, %v1946_v51  ;;  %v2188_v1 = vmax.f32 %v1940_v30, %v1948_v52  ;;  %v1754_v2 = vpop.f32.mrb[53].mxu0  ;;  %v1867_v3 = vpop.f32.mrb[53].mxu1 }
 0x4e3   : > { %v2102_v16 = vrot.slane %v2101_v53, 1  ;;  %v2144_v4 = vrot.slane %v2143_v54, 1  ;;  %v2167_v17 = vmax.f32 %v1939_v32, %v1947_v55  ;;  %v2209_v6 = vmax.f32 %v1941_v33, %v1949_v58  ;;  %v1756_v7 = vpop.f32.mrb[54].mxu0  ;;  %v1869_v8 = vpop.f32.mrb[54].mxu1 }
 0x4e4   : > { %v12146_v9 = vmax.f32 %v2080_v48, %v2081_v61  ;;  %v12148_v18 = vmax.f32 %v2122_v50, %v2123_v13  ;;  %v1753_v19 = vadd.f32 %v1752_v59, %v12118_v35  ;;  %v1866_v24 = vadd.f32 %v1865_v60, %v12122_v36  ;;  %v1758_v10 = vpop.f32.mrb[55].mxu0  ;;  %v1871_v11 = vpop.f32.mrb[55].mxu1 }
 0x4e5   : > { %v12152_v12 = vmax.f32 %v2101_v53, %v2102_v16  ;;  %v12154_v40 = vmax.f32 %v2143_v54, %v2144_v4  ;;  %v1755_v20 = vadd.f32 %v1754_v2, %v12128_v43  ;;  %v1868_v21 = vadd.f32 %v1867_v3, %v12132_v44 }
 0x4e6   : > { %v1954_v22 = vmax.f32 %v1753_v19, 0.0  ;;  %v1956_v25 = vmax.f32 %v1866_v24, 0.0  ;;  %v1757_v27 = vadd.f32 %v1756_v7, %v12118_v35  ;;  %v1870_v28 = vadd.f32 %v1869_v8, %v12122_v36 }
 0x4e7   : > { %v1955_v30 = vmax.f32 %v1755_v20, 0.0  ;;  %v1957_v23 = vmax.f32 %v1868_v21, 0.0  ;;  %v1759_v26 = vadd.f32 %v1758_v10, %v12128_v43  ;;  %v1872_v29 = vadd.f32 %v1871_v11, %v12132_v44 }
 0x4e8   : > { %v2147_v31 = vmax.f32 %v2146_v0, %v1954_v22  ;;  %v2189_v32 = vmax.f32 %v2188_v1, %v1956_v25  ;;  %v1962_v33 = vmax.f32 %v1757_v27, 0.0  ;;  %v1964_v34 = vmax.f32 %v1870_v28, 0.0 }
 0x4e9   : > { %v2168_v37 = vmax.f32 %v2167_v17, %v1955_v30  ;;  %v2210_v38 = vmax.f32 %v2209_v6, %v1957_v23  ;;  %v1963_v39 = vmax.f32 %v1759_v26, 0.0  ;;  %v1965_v42 = vmax.f32 %v1872_v29, 0.0  ;;  %v1762_v45 = vpop.f32.mrb[56].mxu0  ;;  %v1875_v46 = vpop.f32.mrb[56].mxu1 }
 0x4ea   : > { %v2148_v47 = vmax.f32 %v2147_v31, %v1962_v33  ;;  %v2190_v48 = vmax.f32 %v2189_v32, %v1964_v34  ;;  %v1763_v50 = vadd.f32 %v1762_v45, %v12118_v35  ;;  %v1876_v51 = vadd.f32 %v1875_v46, %v12122_v36  ;;  %v1764_v52 = vpop.f32.mrb[57].mxu0  ;;  %v1877_v53 = vpop.f32.mrb[57].mxu1 }
 0x4eb   : > { %v2169_v54 = vmax.f32 %v2168_v37, %v1963_v39  ;;  %v2211_v55 = vmax.f32 %v2210_v38, %v1965_v42  ;;  %v1765_v58 = vadd.f32 %v1764_v52, %v12128_v43  ;;  %v1878_v59 = vadd.f32 %v1877_v53, %v12132_v44  ;;  %v1766_v60 = vpop.f32.mrb[58].mxu0  ;;  %v1879_v61 = vpop.f32.mrb[58].mxu1 }
 0x4ec   : > { %v1970_v13 = vmax.f32 %v1763_v50, 0.0  ;;  %v1972_v0 = vmax.f32 %v1876_v51, 0.0  ;;  %v1767_v1 = vadd.f32 %v1766_v60, %v12118_v35  ;;  %v1880_v2 = vadd.f32 %v1879_v61, %v12122_v36  ;;  %v1768_v3 = vpop.f32.mrb[59].mxu0  ;;  %v1881_v16 = vpop.f32.mrb[59].mxu1 }
 0x4ed   : > { %v1971_v4 = vmax.f32 %v1765_v58, 0.0  ;;  %v1973_v17 = vmax.f32 %v1878_v59, 0.0  ;;  %v1769_v6 = vadd.f32 %v1768_v3, %v12128_v43  ;;  %v1882_v7 = vadd.f32 %v1881_v16, %v12132_v44 }
 0x4ee   : > { %v2149_v8 = vmax.f32 %v2148_v47, %v1970_v13  ;;  %v2191_v19 = vmax.f32 %v2190_v48, %v1972_v0  ;;  %v1978_v24 = vmax.f32 %v1767_v1, 0.0  ;;  %v1980_v10 = vmax.f32 %v1880_v2, 0.0 }
 0x4ef   : > { %v2170_v11 = vmax.f32 %v2169_v54, %v1971_v4  ;;  %v2212_v20 = vmax.f32 %v2211_v55, %v1973_v17  ;;  %v1979_v21 = vmax.f32 %v1769_v6, 0.0  ;;  %v1981_v22 = vmax.f32 %v1882_v7, 0.0 }
 0x4f0   : > { %v2150_v25 = vmax.f32 %v2149_v8, %v1978_v24  ;;  %v2192_v27 = vmax.f32 %v2191_v19, %v1980_v10 }
 0x4f1   : > { %v2171_v28 = vmax.f32 %v2170_v11, %v1979_v21  ;;  %v2213_v30 = vmax.f32 %v2212_v20, %v1981_v22  ;;  %v1772_v23 = vpop.f32.mrb[60].mxu0  ;;  %v1885_v26 = vpop.f32.mrb[60].mxu1 }
 0x4f2   : > { %v1773_v29 = vadd.f32 %v1772_v23, %v12118_v35  ;;  %v1886_v31 = vadd.f32 %v1885_v26, %v12122_v36  ;;  %v1774_v32 = vpop.f32.mrb[61].mxu0  ;;  %v1887_v33 = vpop.f32.mrb[61].mxu1 }
 0x4f3   : > { %v1775_v34 = vadd.f32 %v1774_v32, %v12128_v43  ;;  %v1888_v37 = vadd.f32 %v1887_v33, %v12132_v44  ;;  %v1776_v38 = vpop.f32.mrb[62].mxu0  ;;  %v1889_v39 = vpop.f32.mrb[62].mxu1 }
 0x4f4   : > { %v1986_v42 = vmax.f32 %v1773_v29, 0.0  ;;  %v1988_v45 = vmax.f32 %v1886_v31, 0.0  ;;  %v1777_v46 = vadd.f32 %v1776_v38, %v12118_v35  ;;  %v1890_v47 = vadd.f32 %v1889_v39, %v12122_v36  ;;  %v1778_v48 = vpop.f32.mrb[63].mxu0  ;;  %v1891_v50 = vpop.f32.mrb[63].mxu1 }
 0x4f5   : > { %v1987_v51 = vmax.f32 %v1775_v34, 0.0  ;;  %v1989_v52 = vmax.f32 %v1888_v37, 0.0  ;;  %v1779_v53 = vadd.f32 %v1778_v48, %v12128_v43  ;;  %v1892_v54 = vadd.f32 %v1891_v50, %v12132_v44 }
 0x4f6   : > { %v2151_v55 = vmax.f32 %v2150_v25, %v1986_v42  ;;  %v2193_v58 = vmax.f32 %v2192_v27, %v1988_v45  ;;  %v1994_v59 = vmax.f32 %v1777_v46, 0.0  ;;  %v1996_v60 = vmax.f32 %v1890_v47, 0.0 }
 0x4f7   : > { %v2172_v61 = vmax.f32 %v2171_v28, %v1987_v51  ;;  %v2214_v13 = vmax.f32 %v2213_v30, %v1989_v52  ;;  %v1995_v0 = vmax.f32 %v1779_v53, 0.0  ;;  %v1997_v1 = vmax.f32 %v1892_v54, 0.0 }
 0x4f8   : > { %v2152_v2 = vmax.f32 %v2151_v55, %v1994_v59  ;;  %v2194_v3 = vmax.f32 %v2193_v58, %v1996_v60 }
 0x4f9   : > { %v2173_v16 = vmax.f32 %v2172_v61, %v1995_v0  ;;  %v2215_v4 = vmax.f32 %v2214_v13, %v1997_v1  ;;  %v1782_v17 = vpop.f32.mrb[64].mxu0  ;;  %v1895_v6 = vpop.f32.mrb[64].mxu1 }
 0x4fa   : > { %v1783_v7 = vadd.f32 %v1782_v17, %v12118_v35  ;;  %v1896_v8 = vadd.f32 %v1895_v6, %v12122_v36  ;;  %v1784_v19 = vpop.f32.mrb[65].mxu0  ;;  %v1897_v24 = vpop.f32.mrb[65].mxu1 }
 0x4fb   : > { %v1785_v10 = vadd.f32 %v1784_v19, %v12128_v43  ;;  %v1898_v11 = vadd.f32 %v1897_v24, %v12132_v44  ;;  %v1786_v20 = vpop.f32.mrb[66].mxu0  ;;  %v1899_v21 = vpop.f32.mrb[66].mxu1 }
 0x4fc   : > { %v2002_v22 = vmax.f32 %v1783_v7, 0.0  ;;  %v2004_v25 = vmax.f32 %v1896_v8, 0.0  ;;  %v1787_v27 = vadd.f32 %v1786_v20, %v12118_v35  ;;  %v1900_v28 = vadd.f32 %v1899_v21, %v12122_v36  ;;  %v1788_v30 = vpop.f32.mrb[67].mxu0  ;;  %v1901_v23 = vpop.f32.mrb[67].mxu1 }
 0x4fd   : > { %v2003_v26 = vmax.f32 %v1785_v10, 0.0  ;;  %v2005_v29 = vmax.f32 %v1898_v11, 0.0  ;;  %v1789_v31 = vadd.f32 %v1788_v30, %v12128_v43  ;;  %v1902_v32 = vadd.f32 %v1901_v23, %v12132_v44 }
 0x4fe   : > { %v2153_v33 = vmax.f32 %v2152_v2, %v2002_v22  ;;  %v2195_v34 = vmax.f32 %v2194_v3, %v2004_v25  ;;  %v2010_v37 = vmax.f32 %v1787_v27, 0.0  ;;  %v2012_v38 = vmax.f32 %v1900_v28, 0.0 }
 0x4ff   : > { %v2174_v39 = vmax.f32 %v2173_v16, %v2003_v26  ;;  %v2216_v42 = vmax.f32 %v2215_v4, %v2005_v29  ;;  %v2011_v45 = vmax.f32 %v1789_v31, 0.0  ;;  %v2013_v46 = vmax.f32 %v1902_v32, 0.0 }
 0x500   : > { %v2154_v47 = vmax.f32 %v2153_v33, %v2010_v37  ;;  %v2196_v48 = vmax.f32 %v2195_v34, %v2012_v38 }
 0x501   : > { %v2175_v50 = vmax.f32 %v2174_v39, %v2011_v45  ;;  %v2217_v51 = vmax.f32 %v2216_v42, %v2013_v46  ;;  %v1792_v52 = vpop.f32.mrb[68].mxu0  ;;  %v1905_v53 = vpop.f32.mrb[68].mxu1 }
 0x502   : > { %v1793_v54 = vadd.f32 %v1792_v52, %v12118_v35  ;;  %v1906_v55 = vadd.f32 %v1905_v53, %v12122_v36  ;;  %v1794_v58 = vpop.f32.mrb[69].mxu0  ;;  %v1907_v59 = vpop.f32.mrb[69].mxu1 }
 0x503   : > { %v1795_v60 = vadd.f32 %v1794_v58, %v12128_v43  ;;  %v1908_v61 = vadd.f32 %v1907_v59, %v12132_v44  ;;  %v1796_v13 = vpop.f32.mrb[70].mxu0  ;;  %v1909_v0 = vpop.f32.mrb[70].mxu1 }
 0x504   : > { %v2018_v1 = vmax.f32 %v1793_v54, 0.0  ;;  %v2020_v2 = vmax.f32 %v1906_v55, 0.0  ;;  %v1797_v3 = vadd.f32 %v1796_v13, %v12118_v35  ;;  %v1910_v16 = vadd.f32 %v1909_v0, %v12122_v36  ;;  %v1798_v4 = vpop.f32.mrb[71].mxu0  ;;  %v1911_v17 = vpop.f32.mrb[71].mxu1 }
 0x505   : > { %v2019_v6 = vmax.f32 %v1795_v60, 0.0  ;;  %v2021_v7 = vmax.f32 %v1908_v61, 0.0  ;;  %v1799_v8 = vadd.f32 %v1798_v4, %v12128_v43  ;;  %v1912_v19 = vadd.f32 %v1911_v17, %v12132_v44 }
 0x506   : > { %v2155_v24 = vmax.f32 %v2154_v47, %v2018_v1  ;;  %v2197_v10 = vmax.f32 %v2196_v48, %v2020_v2  ;;  %v2026_v11 = vmax.f32 %v1797_v3, 0.0  ;;  %v2028_v20 = vmax.f32 %v1910_v16, 0.0 }
 0x507   : > { %v2176_v21 = vmax.f32 %v2175_v50, %v2019_v6  ;;  %v2218_v22 = vmax.f32 %v2217_v51, %v2021_v7  ;;  %v2027_v25 = vmax.f32 %v1799_v8, 0.0  ;;  %v2029_v27 = vmax.f32 %v1912_v19, 0.0 }
 0x508   : > { %v2156_v28 = vmax.f32 %v2155_v24, %v2026_v11  ;;  %v2198_v30 = vmax.f32 %v2197_v10, %v2028_v20 }
 0x509   : > { %v2177_v23 = vmax.f32 %v2176_v21, %v2027_v25  ;;  %v2219_v26 = vmax.f32 %v2218_v22, %v2029_v27  ;;  %v1802_v29 = vpop.f32.mrb[72].mxu0  ;;  %v1915_v31 = vpop.f32.mrb[72].mxu1 }
 0x50a   : > { %v1803_v32 = vadd.f32 %v1802_v29, %v12118_v35  ;;  %v1916_v33 = vadd.f32 %v1915_v31, %v12122_v36  ;;  %v1804_v34 = vpop.f32.mrb[73].mxu0  ;;  %v1917_v37 = vpop.f32.mrb[73].mxu1 }
 0x50b   : > { %v1805_v38 = vadd.f32 %v1804_v34, %v12128_v43  ;;  %v1918_v39 = vadd.f32 %v1917_v37, %v12132_v44  ;;  %v1806_v42 = vpop.f32.mrb[74].mxu0  ;;  %v1919_v45 = vpop.f32.mrb[74].mxu1 }
 0x50c   : > { %v2034_v46 = vmax.f32 %v1803_v32, 0.0  ;;  %v2036_v47 = vmax.f32 %v1916_v33, 0.0  ;;  %v1807_v48 = vadd.f32 %v1806_v42, %v12118_v35  ;;  %v1920_v50 = vadd.f32 %v1919_v45, %v12122_v36  ;;  %v1808_v51 = vpop.f32.mrb[75].mxu0  ;;  %v1921_v52 = vpop.f32.mrb[75].mxu1 }
 0x50d   : > { %v2035_v53 = vmax.f32 %v1805_v38, 0.0  ;;  %v2037_v54 = vmax.f32 %v1918_v39, 0.0  ;;  %v1809_v55 = vadd.f32 %v1808_v51, %v12128_v43  ;;  %v1922_v58 = vadd.f32 %v1921_v52, %v12132_v44 }
 0x50e   : > { %v2157_v59 = vmax.f32 %v2156_v28, %v2034_v46  ;;  %v2199_v60 = vmax.f32 %v2198_v30, %v2036_v47  ;;  %v2042_v61 = vmax.f32 %v1807_v48, 0.0  ;;  %v2044_v13 = vmax.f32 %v1920_v50, 0.0 }
 0x50f   : > { %v2178_v0 = vmax.f32 %v2177_v23, %v2035_v53  ;;  %v2220_v1 = vmax.f32 %v2219_v26, %v2037_v54  ;;  %v2043_v2 = vmax.f32 %v1809_v55, 0.0  ;;  %v2045_v3 = vmax.f32 %v1922_v58, 0.0 }
 0x510   : > { %v2158_v16 = vmax.f32 %v2157_v59, %v2042_v61  ;;  %v2200_v4 = vmax.f32 %v2199_v60, %v2044_v13 }
 0x511   : > { %v2179_v17 = vmax.f32 %v2178_v0, %v2043_v2  ;;  %v2221_v6 = vmax.f32 %v2220_v1, %v2045_v3  ;;  %v1812_v7 = vpop.f32.mrb[76].mxu0  ;;  %v1925_v8 = vpop.f32.mrb[76].mxu1 }
 0x512   : > { %v1813_v19 = vadd.f32 %v1812_v7, %v12118_v35  ;;  %v1926_v24 = vadd.f32 %v1925_v8, %v12122_v36  ;;  %v1814_v10 = vpop.f32.mrb[77].mxu0  ;;  %v1927_v11 = vpop.f32.mrb[77].mxu1 }
 0x513   : > { %v1815_v20 = vadd.f32 %v1814_v10, %v12128_v43  ;;  %v1928_v21 = vadd.f32 %v1927_v11, %v12132_v44  ;;  %v1816_v22 = vpop.f32.mrb[78].mxu0  ;;  %v1929_v25 = vpop.f32.mrb[78].mxu1  ;;  %v11376_v11 = vmov (!%p9206_p13), 1966171168  }
 0x514   : > { %v2050_v27 = vmax.f32 %v1813_v19, 0.0  ;;  %v2052_v28 = vmax.f32 %v1926_v24, 0.0  ;;  %v1817_v30 = vadd.f32 %v1816_v22, %v12118_v35  ;;  %v1930_v23 = vadd.f32 %v1929_v25, %v12122_v36  ;;  %v1818_v26 = vpop.f32.mrb[79].mxu0  ;;  %v1931_v29 = vpop.f32.mrb[79].mxu1 }
 0x515   : > { %v2051_v31 = vmax.f32 %v1815_v20, 0.0  ;;  %v2053_v32 = vmax.f32 %v1928_v21, 0.0  ;;  %v1819_v33 = vadd.f32 %v1818_v26, %v12128_v43  ;;  %v1932_v34 = vadd.f32 %v1931_v29, %v12132_v44 }
 0x516   : > { %v2159_v37 = vmax.f32 %v2158_v16, %v2050_v27  ;;  %v2201_v38 = vmax.f32 %v2200_v4, %v2052_v28  ;;  %v2058_v39 = vmax.f32 %v1817_v30, 0.0  ;;  %v2060_v42 = vmax.f32 %v1930_v23, 0.0 }
 0x517   : > { %v2180_v45 = vmax.f32 %v2179_v17, %v2051_v31  ;;  %v2222_v46 = vmax.f32 %v2221_v6, %v2053_v32  ;;  %v2059_v47 = vmax.f32 %v1819_v33, 0.0  ;;  %v2061_v48 = vmax.f32 %v1932_v34, 0.0 }
 0x518   : > { %v2160_v50 = vmax.f32 %v2159_v37, %v2058_v39  ;;  %v2202_v35 = vmax.f32 %v2201_v38, %v2060_v42  ;;  %v2246_v20 = vunpack.c.l.s4 (!%p9206_p13), %v11376_v11  ;;  %v2241_v21 = vcombine.low (!%p9206_p13), %v12146_v9, %v12152_v12 }
 0x519   : > { %v2181_v51 = vmax.f32 %v2180_v45, %v2059_v47  ;;  %v2223_v36 = vmax.f32 %v2222_v46, %v2061_v48  ;;  %v2242_v22 = vcombine.low (!%p9206_p13), %v12148_v18, %v12154_v40 }
 0x51a   : > { %v2161_v52 = vrot.slane %v2160_v50, 4  ;;  %v2203_v53 = vrot.slane %v2202_v35, 4  ;;  %v2247_v28 = vunpack.c.0.s8 (!%p9206_p13), %v2246_v20 }
 0x51b   : > { %v2182_v54 = vrot.slane %v2181_v51, 4  ;;  %v2224_v55 = vrot.slane %v2223_v36, 4 }
 0x51c   : > { %v2162_v58 = vmax.f32 %v2160_v50, %v2161_v52  ;;  %v2204_v43 = vmax.f32 %v2202_v35, %v2203_v53  ;;  %v2250_v30 = vsub.s32 (!%p9206_p13), %v2247_v28, %v12014_v41 }
 0x51d   : > { %v2183_v59 = vmax.f32 %v2181_v51, %v2182_v54  ;;  %v2225_v44 = vmax.f32 %v2223_v36, %v2224_v55 }
 0x51e   : > { %v2163_v60 = vrot.slane %v2162_v58, 2  ;;  %v2205_v61 = vrot.slane %v2204_v43, 2  ;;  %v2251_v23 = vrot.slane (!%p9206_p13), %v2241_v21, %v2250_v30  ;;  %v2258_v26 = vrot.slane (!%p9206_p13), %v2242_v22, %v2250_v30 }
 0x51f   : > { %v2184_v13 = vrot.slane %v2183_v59, 2  ;;  %v2226_v0 = vrot.slane %v2225_v44, 2  ;;  %2232 = sbr.rel (%p9206_p13) target bundleno = 1330 (0x532), region = 132 }
 0x520   : > { %v2164_v1 = vmax.f32 %v2162_v58, %v2163_v60  ;;  %v2206_v2 = vmax.f32 %v2204_v43, %v2205_v61  ;;  %v2273_v32 = vcombine.low (!%p9206_p13), %v2251_v23, %v2258_v26 }
 0x521   : > { %v2185_v3 = vmax.f32 %v2183_v59, %v2184_v13  ;;  %v2227_v16 = vmax.f32 %v2225_v44, %v2226_v0 }
 0x522   : > { %v2165_v4 = vrot.slane %v2164_v1, 1  ;;  %v2207_v17 = vrot.slane %v2206_v2, 1  ;;  %v2281_v34 = vrot.slane (!%p9206_p13), %v2273_v32, %v2250_v30 }
 0x523   : > { %v2186_v6 = vrot.slane %v2185_v3, 1  ;;  %v2228_v7 = vrot.slane %v2227_v16, 1 }
 0x524   : > { %v2166_v8 = vmax.f32 %v2164_v1, %v2165_v4  ;;  %v2208_v19 = vmax.f32 %v2206_v2, %v2207_v17 }
 0x525   : > { %v2187_v24 = vmax.f32 %v2185_v3, %v2186_v6  ;;  %v2229_v10 = vmax.f32 %v2227_v16, %v2228_v7 }
 0x527   : > { %v2243_v25 = vcombine.low %v2166_v8, %v2187_v24  ;;  %v2244_v27 = vcombine.low %v2208_v19, %v2229_v10 }
 0x529   : > { %v2265_v29 = vrot.slane %v2243_v25, %v2250_v30  ;;  %v2272_v31 = vrot.slane %v2244_v27, %v2250_v30 }
 0x52b   : > { %v2274_v33 = vcombine.low %v2265_v29, %v2272_v31 }
 0x52d   : > { %v2288_v37 = vrot.slane %v2274_v33, %v2250_v30 }
 0x52f   : > { %v2289_v38 = vcombine.low %v2281_v34, %v2288_v37 }
 0x531   : > { %2299 = vst [vmem:[%s2298_s0] ss:$2 sm:$0xff] %v2289_v38 }
 0x532 PF: > { %s12575_s3 = sld [smem:[#allocation35_spill]] }
 0x538   : > { %p9209_p5 = scmp.le.s32.totalorder %s12575_s3, 0 }
 0x539   : > { %s12576_s4 = sld [smem:[#allocation36_spill]] (!%p9209_p5)  ;;  %v11377_v39 = vmov (!%p9209_p5), 1966171168   ;;  %v2321_v45 = vcombine.low (!%p9209_p5), %v12146_v9, %v12152_v12  ;;  %v2322_v46 = vcombine.low (!%p9209_p5), %v12148_v18, %v12154_v40  ;;  %v2323_v47 = vcombine.low (!%p9209_p5), %v2166_v8, %v2187_v24 }
 0x53a   : > { %2303 = sbr.rel (%p9209_p5) target bundleno = 1355 (0x54b), region = 136  ;;  %v2326_v42 = vunpack.c.l.s4 (!%p9209_p5), %v11377_v39  ;;  %v2324_v48 = vcombine.low (!%p9209_p5), %v2208_v19, %v2229_v10 }
 0x53c   : > { %v2327_v50 = vunpack.c.0.s8 (!%p9209_p5), %v2326_v42 }
 0x53e   : > { %v2330_v35 = vsub.s32 (!%p9209_p5), %v2327_v50, %v12014_v41 }
 0x53f   : > { %s2304_s2 = sshra.s32 (!%p9209_p5), %s12576_s4, 1  ;;  %s2307_s29 = sand.u32 (!%p9209_p5), 1, %s12576_s4 }
 0x540   : > { %s10049_s25 = sshll.u32 (!%p9209_p5), %s2304_s2, 4  ;;  %v2331_v51 = vrot.slane (!%p9209_p5), %v2321_v45, %v2330_v35  ;;  %v2338_v36 = vrot.slane (!%p9209_p5), %v2322_v46, %v2330_v35  ;;  %v2345_v52 = vrot.slane (!%p9209_p5), %v2323_v47, %v2330_v35  ;;  %v2352_v53 = vrot.slane (!%p9209_p5), %v2324_v48, %v2330_v35 }
 0x541   : > { %s2310_s22 = sadd.s32 %s10049_s25, %s2307_s29 }
 0x542   : > { %v2353_v54 = vcombine.low %v2331_v51, %v2338_v36  ;;  %v2354_v55 = vcombine.low %v2345_v52, %v2352_v53  ;;  %s2311_s16 = scalar_lea.vmem [#allocation2], %s2310_s22 }
 0x543   : > { %v2312_v9 = vld [vmem:[%s2311_s16] ss:$2 sm:$0xff] }
 0x544   : > { %v2361_v58 = vrot.slane %v2353_v54, %v2330_v35  ;;  %v2368_v43 = vrot.slane %v2354_v55, %v2330_v35 }
 0x546   : > { %v2369_v12 = vcombine.low %v2361_v58, %v2368_v43 }
 0x548   : > { %v2371_v59 = vmax.f32 %v2312_v9, %v2369_v12 }
 0x54a   : > { %2372 = vst [vmem:[%s2311_s16] ss:$2 sm:$0xff] %v2371_v59 }
 0x54b PF: > { %s12577_s17 = sld [smem:[#allocation36_spill]]  ;;  %s12578_s13 = sld [smem:[#allocation35_spill]] }
 0x551   : > { %p2373_p0 = scmp.eq.s32.totalorder %s12577_s17, 1  ;;  %p2374_p4 = scmp.eq.s32.totalorder %s12578_s13, 3 }
 0x553   : > { %p2375_p8 = pnand %p2374_p4, %p2373_p0 }
 0x554   : > { %v10381_v18 = vld [vmem:[#allocation15 + $0x4] ss:$16 sps:$4 sm:$0xff] (!%p2375_p8)   ;;  %v10383_v40 = vld [vmem:[#allocation15 + $0xc] ss:$16 sps:$4 sm:$0xff] (!%p2375_p8)   ;;  %v10385_v44 = vld [vmem:[#allocation15] ss:$16 sps:$4 sm:$0xff] (!%p2375_p8)  }
 0x555   : > { %2378 = sbr.rel (%p2375_p8) target bundleno = 2859 (0xb2b), region = 140  ;;  %4572 = vmatprep.subr.bf16.mxu0 (!%p2375_p8), %v10381_v18  ;;  %v10386_v60 = vld [vmem:[#allocation15 + $0x8] ss:$16 sps:$4 sm:$0xff] (!%p2375_p8)   ;;  %4736 = vmatprep.subr.bf16.mxu1 (!%p2375_p8), %v10383_v40  ;;  %v10387_v61 = vld [vmem:[#allocation15 + $0x24] ss:$16 sps:$4 sm:$0xff] (!%p2375_p8)  }
 0x556   : > { %4573 = vmatpush1.bf16.msra.mxu0 (!%p2375_p8), %v10385_v44  ;;  %4737 = vmatpush1.bf16.msra.mxu1 (!%p2375_p8), %v10386_v60  ;;  %v10389_v13 = vld [vmem:[#allocation15 + $0x2c] ss:$16 sps:$4 sm:$0xff] (!%p2375_p8)   ;;  %v10391_v0 = vld [vmem:[#allocation15 + $0x20] ss:$16 sps:$4 sm:$0xff] (!%p2375_p8)   ;;  %v10392_v1 = vld [vmem:[#allocation15 + $0x28] ss:$16 sps:$4 sm:$0xff] (!%p2375_p8)  }
 0x557   : > { %4574 = vmatprep.subr.bf16.mxu0 (!%p2375_p8), %v10387_v61  ;;  %4738 = vmatprep.subr.bf16.mxu1 (!%p2375_p8), %v10389_v13  ;;  %v10393_v2 = vld [vmem:[#allocation15 + $0x44] ss:$16 sps:$4 sm:$0xff] (!%p2375_p8)   ;;  %v10395_v3 = vld [vmem:[#allocation15 + $0x4c] ss:$16 sps:$4 sm:$0xff] (!%p2375_p8)   ;;  %v10397_v16 = vld [vmem:[#allocation15 + $0x40] ss:$16 sps:$4 sm:$0xff] (!%p2375_p8)  }
 0x558   : > { %v10398_v4 = vld [vmem:[#allocation15 + $0x48] ss:$16 sps:$4 sm:$0xff] (!%p2375_p8)   ;;  %v10399_v17 = vld [vmem:[#allocation15 + $0x64] ss:$16 sps:$4 sm:$0xff] (!%p2375_p8)   ;;  %v10401_v6 = vld [vmem:[#allocation15 + $0x6c] ss:$16 sps:$4 sm:$0xff] (!%p2375_p8)  }
 0x559   : > { %v10403_v7 = vld [vmem:[#allocation15 + $0x60] ss:$16 sps:$4 sm:$0xff] (!%p2375_p8)   ;;  %v10404_v8 = vld [vmem:[#allocation15 + $0x68] ss:$16 sps:$4 sm:$0xff] (!%p2375_p8)   ;;  %v10405_v19 = vld [vmem:[#allocation15 + $0x84] ss:$16 sps:$4 sm:$0xff] (!%p2375_p8)  }
 0x55a   : > { %4575 = vmatpush1.bf16.msra.mxu0 (!%p2375_p8), %v10391_v0  ;;  %4739 = vmatpush1.bf16.msra.mxu1 (!%p2375_p8), %v10392_v1  ;;  %v10407_v24 = vld [vmem:[#allocation15 + $0x8c] ss:$16 sps:$4 sm:$0xff] (!%p2375_p8)   ;;  %v10409_v10 = vld [vmem:[#allocation15 + $0x80] ss:$16 sps:$4 sm:$0xff] (!%p2375_p8)   ;;  %v10410_v11 = vld [vmem:[#allocation15 + $0x88] ss:$16 sps:$4 sm:$0xff] (!%p2375_p8)  }
 0x55b   : > { %4576 = vmatprep.subr.bf16.mxu0 (!%p2375_p8), %v10393_v2  ;;  %4740 = vmatprep.subr.bf16.mxu1 (!%p2375_p8), %v10395_v3  ;;  %v10411_v20 = vld [vmem:[#allocation15 + $0xa4] ss:$16 sps:$4 sm:$0xff] (!%p2375_p8)   ;;  %v10413_v21 = vld [vmem:[#allocation15 + $0xac] ss:$16 sps:$4 sm:$0xff] (!%p2375_p8)   ;;  %v10415_v22 = vld [vmem:[#allocation15 + $0xa0] ss:$16 sps:$4 sm:$0xff] (!%p2375_p8)  }
 0x55c   : > { %v10416_v25 = vld [vmem:[#allocation15 + $0xa8] ss:$16 sps:$4 sm:$0xff]   ;;  %v10417_v27 = vld [vmem:[#allocation15 + $0xc4] ss:$16 sps:$4 sm:$0xff]   ;;  %v10419_v28 = vld [vmem:[#allocation15 + $0xcc] ss:$16 sps:$4 sm:$0xff]  }
 0x55d   : > { %v10421_v30 = vld [vmem:[#allocation15 + $0xc0] ss:$16 sps:$4 sm:$0xff]   ;;  %v10422_v23 = vld [vmem:[#allocation15 + $0xc8] ss:$16 sps:$4 sm:$0xff]   ;;  %v10423_v26 = vld [vmem:[#allocation15 + $0xe4] ss:$16 sps:$4 sm:$0xff]  }
 0x55e   : > { %4577 = vmatpush1.bf16.msra.mxu0 %v10397_v16  ;;  %4741 = vmatpush1.bf16.msra.mxu1 %v10398_v4  ;;  %v10425_v29 = vld [vmem:[#allocation15 + $0xec] ss:$16 sps:$4 sm:$0xff]   ;;  %v10427_v31 = vld [vmem:[#allocation15 + $0xe0] ss:$16 sps:$4 sm:$0xff]   ;;  %v10428_v32 = vld [vmem:[#allocation15 + $0xe8] ss:$16 sps:$4 sm:$0xff]  }
 0x55f   : > { %4578 = vmatprep.subr.bf16.mxu0 %v10399_v17  ;;  %4742 = vmatprep.subr.bf16.mxu1 %v10401_v6  ;;  %v10429_v33 = vld [vmem:[#allocation15 + $0x104] ss:$16 sps:$4 sm:$0xff]   ;;  %v10431_v34 = vld [vmem:[#allocation15 + $0x10c] ss:$16 sps:$4 sm:$0xff]   ;;  %v10433_v37 = vld [vmem:[#allocation15 + $0x100] ss:$16 sps:$4 sm:$0xff]  }
 0x560   : > { %v10434_v38 = vld [vmem:[#allocation15 + $0x108] ss:$16 sps:$4 sm:$0xff]   ;;  %v11378_v39 = vmov 1983009808   ;;  %v10435_v45 = vld [vmem:[#allocation15 + $0x124] ss:$16 sps:$4 sm:$0xff]  }
 0x561   : > { %v3223_v42 = vunpack.c.l.s4 %v11378_v39  ;;  %v10437_v46 = vld [vmem:[#allocation15 + $0x12c] ss:$16 sps:$4 sm:$0xff]   ;;  %v10439_v47 = vld [vmem:[#allocation15 + $0x120] ss:$16 sps:$4 sm:$0xff]   ;;  %v10440_v50 = vld [vmem:[#allocation15 + $0x128] ss:$16 sps:$4 sm:$0xff]  }
 0x562   : > { %4579 = vmatpush1.bf16.msra.mxu0 %v10403_v7  ;;  %4743 = vmatpush1.bf16.msra.mxu1 %v10404_v8  ;;  %v10441_v35 = vld [vmem:[#allocation15 + $0x144] ss:$16 sps:$4 sm:$0xff]   ;;  %v10443_v51 = vld [vmem:[#allocation15 + $0x14c] ss:$16 sps:$4 sm:$0xff]   ;;  %v10445_v36 = vld [vmem:[#allocation15 + $0x140] ss:$16 sps:$4 sm:$0xff]  }
 0x563   : > { %4580 = vmatprep.subr.bf16.mxu0 %v10405_v19  ;;  %4744 = vmatprep.subr.bf16.mxu1 %v10407_v24  ;;  %v3224_v48 = vunpack.c.0.s8 %v3223_v42  ;;  %v10446_v52 = vld [vmem:[#allocation15 + $0x148] ss:$16 sps:$4 sm:$0xff]   ;;  %v10447_v54 = vld [vmem:[#allocation15 + $0x164] ss:$16 sps:$4 sm:$0xff]   ;;  %v10449_v55 = vld [vmem:[#allocation15 + $0x16c] ss:$16 sps:$4 sm:$0xff]  }
 0x564   : > { %v2379_v58 = vld [vmem:[#allocation2] sm:$0xff]  ;;  %v10451_v43 = vld [vmem:[#allocation15 + $0x160] ss:$16 sps:$4 sm:$0xff]   ;;  %v10455_v18 = vld [vmem:[#allocation15 + $0x18c] ss:$16 sps:$4 sm:$0xff]  }
 0x565   : > { %v12229_v53 = vsub.s32 %v3224_v48, %v12014_v41  ;;  %v10452_v12 = vld [vmem:[#allocation15 + $0x168] ss:$16 sps:$4 sm:$0xff]   ;;  %v10453_v59 = vld [vmem:[#allocation15 + $0x184] ss:$16 sps:$4 sm:$0xff]   ;;  %v10457_v41 = vld [vmem:[#allocation15 + $0x180] ss:$16 sps:$4 sm:$0xff]   ;;  %v3221_v16 = vcombine.high %v2379_v58, %v2379_v58 }
 0x566   : > { %4581 = vmatpush1.bf16.msra.mxu0 %v10409_v10  ;;  %4745 = vmatpush1.bf16.msra.mxu1 %v10410_v11  ;;  %v10458_v60 = vld [vmem:[#allocation15 + $0x188] ss:$16 sps:$4 sm:$0xff]   ;;  %v10459_v61 = vld [vmem:[#allocation15 + $0x1a4] ss:$16 sps:$4 sm:$0xff]   ;;  %v10461_v13 = vld [vmem:[#allocation15 + $0x1ac] ss:$16 sps:$4 sm:$0xff]  }
 0x567   : > { %4582 = vmatprep.subr.bf16.mxu0 %v10411_v20  ;;  %4746 = vmatprep.subr.bf16.mxu1 %v10413_v21  ;;  %v3228_v9 = vrot.slane %v2379_v58, %v12229_v53  ;;  %v10463_v0 = vld [vmem:[#allocation15 + $0x1a0] ss:$16 sps:$4 sm:$0xff]   ;;  %v10464_v1 = vld [vmem:[#allocation15 + $0x1a8] ss:$16 sps:$4 sm:$0xff]   ;;  %v10465_v2 = vld [vmem:[#allocation15 + $0x1c4] ss:$16 sps:$4 sm:$0xff]   ;;  %v12233_v8 = vrot.slane %v3221_v16, %v12229_v53 }
 0x568   : > { %v10467_v3 = vld [vmem:[#allocation15 + $0x1cc] ss:$16 sps:$4 sm:$0xff]   ;;  %v10469_v4 = vld [vmem:[#allocation15 + $0x1c0] ss:$16 sps:$4 sm:$0xff]   ;;  %v10470_v17 = vld [vmem:[#allocation15 + $0x1c8] ss:$16 sps:$4 sm:$0xff]  }
 0x569   : > { %v3236_v40 = vcombine.high %v3228_v9, %v3228_v9  ;;  %v10471_v6 = vld [vmem:[#allocation15 + $0x1e4] ss:$16 sps:$4 sm:$0xff]   ;;  %v10473_v7 = vld [vmem:[#allocation15 + $0x1ec] ss:$16 sps:$4 sm:$0xff]   ;;  %v10475_v19 = vld [vmem:[#allocation15 + $0x1e0] ss:$16 sps:$4 sm:$0xff]   ;;  %v3237_v20 = vcombine.high %v12233_v8, %v12233_v8 }
 0x56a   : > { %4583 = vmatpush1.bf16.msra.mxu0 %v10415_v22  ;;  %4747 = vmatpush1.bf16.msra.mxu1 %v10416_v25  ;;  %v10476_v24 = vld [vmem:[#allocation15 + $0x1e8] ss:$16 sps:$4 sm:$0xff]   ;;  %v10480_v10 = vld [vmem:[#allocation15 + $0x204] ss:$16 sps:$4 sm:$0xff]   ;;  %v10483_v11 = vld [vmem:[#allocation15 + $0x20c] ss:$16 sps:$4 sm:$0xff]   ;;  %v3263_v22 = vpack.c.bf16 %v3228_v9, %v3228_v9 }
 0x56b   : > { %4584 = vmatprep.subr.bf16.mxu0 %v10417_v27  ;;  %4748 = vmatprep.subr.bf16.mxu1 %v10419_v28  ;;  %v3264_v44 = vpack.c.bf16 %v3236_v40, %v3236_v40  ;;  %v10478_v21 = vld [vmem:[#allocation15 + $0x200] ss:$16 sps:$4 sm:$0xff]   ;;  %v10481_v25 = vld [vmem:[#allocation15 + $0x208] ss:$16 sps:$4 sm:$0xff]   ;;  %v10486_v27 = vld [vmem:[#allocation15 + $0x224] ss:$16 sps:$4 sm:$0xff]  }
 0x56c   : > { %v10489_v28 = vld [vmem:[#allocation15 + $0x22c] ss:$16 sps:$4 sm:$0xff]   ;;  %v10499_v39 = vld [vmem:[#allocation15 + $0x268] ss:$16 sps:$4 sm:$0xff]   ;;  %v10504_v42 = vld [vmem:[#allocation15 + $0x284] ss:$16 sps:$4 sm:$0xff]  }
 0x56d   : > { %4604 = vmatprep.mubr.bf16.mxu0 %v3264_v44  ;;  %4768 = vmatprep.mubr.bf16.mxu1 %v3264_v44  ;;  %v10510_v48 = vld [vmem:[#allocation15 + $0x2a4] ss:$16 sps:$4 sm:$0xff]   ;;  %v10520_v9 = vld [vmem:[#allocation15 + $0x2e0] ss:$16 sps:$4 sm:$0xff]  }
 0x56e   : > { %4585 = vmatpush1.bf16.msra.mxu0 %v10421_v30  ;;  %4749 = vmatpush1.bf16.msra.mxu1 %v10422_v23  ;;  %v3266_v30 = vpack.c.bf16 %v3237_v20, %v3237_v20  ;;  %v10484_v23 = vld [vmem:[#allocation15 + $0x220] ss:$16 sps:$4 sm:$0xff]   ;;  %v10522_v58 = vld [vmem:[#allocation15 + $0x2e4] ss:$16 sps:$4 sm:$0xff]   ;;  %v10561_v20 = vld [vmem:[#allocation15 + $0x3ac] ss:$16 sps:$4 sm:$0xff]  }
 0x56f   : > { %4586 = vmatprep.subr.bf16.mxu0 %v10423_v26  ;;  %4750 = vmatprep.subr.bf16.mxu1 %v10425_v29  ;;  %v10487_v26 = vld [vmem:[#allocation15 + $0x228] ss:$16 sps:$4 sm:$0xff]   ;;  %v10492_v29 = vld [vmem:[#allocation15 + $0x244] ss:$16 sps:$4 sm:$0xff]   ;;  %v10526_v40 = vld [vmem:[#allocation15 + $0x300] ss:$16 sps:$4 sm:$0xff]  }
 0x570   : > { %v10534_v44 = vld [vmem:[#allocation15 + $0x324] ss:$16 sps:$4 sm:$0xff]  }
 0x571   : > { %v10546_v16 = vld [vmem:[#allocation15 + $0x364] ss:$16 sps:$4 sm:$0xff]  }
 0x572   : > { %4587 = vmatpush1.bf16.msra.mxu0 %v10427_v31  ;;  %4751 = vmatpush1.bf16.msra.mxu1 %v10428_v32  ;;  %v10495_v31 = vld [vmem:[#allocation15 + $0x24c] ss:$16 sps:$4 sm:$0xff]   ;;  %v10490_v32 = vld [vmem:[#allocation15 + $0x240] ss:$16 sps:$4 sm:$0xff]  }
 0x573   : > { %4588 = vmatprep.subr.bf16.mxu0 %v10429_v33  ;;  %4752 = vmatprep.subr.bf16.mxu1 %v10431_v34  ;;  %v10493_v33 = vld [vmem:[#allocation15 + $0x248] ss:$16 sps:$4 sm:$0xff]   ;;  %v10498_v34 = vld [vmem:[#allocation15 + $0x264] ss:$16 sps:$4 sm:$0xff]  }
 0x576   : > { %4589 = vmatpush1.bf16.msra.mxu0 %v10433_v37  ;;  %4753 = vmatpush1.bf16.msra.mxu1 %v10434_v38  ;;  %v10501_v37 = vld [vmem:[#allocation15 + $0x26c] ss:$16 sps:$4 sm:$0xff]   ;;  %v10496_v38 = vld [vmem:[#allocation15 + $0x260] ss:$16 sps:$4 sm:$0xff]  }
 0x577   : > { %4590 = vmatprep.subr.bf16.mxu0 %v10435_v45  ;;  %4754 = vmatprep.subr.bf16.mxu1 %v10437_v46  ;;  %v10507_v45 = vld [vmem:[#allocation15 + $0x28c] ss:$16 sps:$4 sm:$0xff]   ;;  %v10502_v46 = vld [vmem:[#allocation15 + $0x280] ss:$16 sps:$4 sm:$0xff]  }
 0x57a   : > { %4591 = vmatpush1.bf16.msra.mxu0 %v10439_v47  ;;  %4755 = vmatpush1.bf16.msra.mxu1 %v10440_v50  ;;  %v10505_v47 = vld [vmem:[#allocation15 + $0x288] ss:$16 sps:$4 sm:$0xff]   ;;  %v10513_v50 = vld [vmem:[#allocation15 + $0x2ac] ss:$16 sps:$4 sm:$0xff]  }
 0x57b   : > { %4592 = vmatprep.subr.bf16.mxu0 %v10441_v35  ;;  %4756 = vmatprep.subr.bf16.mxu1 %v10443_v51  ;;  %v10508_v35 = vld [vmem:[#allocation15 + $0x2a0] ss:$16 sps:$4 sm:$0xff]   ;;  %v10511_v51 = vld [vmem:[#allocation15 + $0x2a8] ss:$16 sps:$4 sm:$0xff]  }
 0x57e   : > { %4593 = vmatpush1.bf16.msra.mxu0 %v10445_v36  ;;  %4757 = vmatpush1.bf16.msra.mxu1 %v10446_v52  ;;  %v10516_v36 = vld [vmem:[#allocation15 + $0x2c4] ss:$16 sps:$4 sm:$0xff]   ;;  %v10519_v52 = vld [vmem:[#allocation15 + $0x2cc] ss:$16 sps:$4 sm:$0xff]  }
 0x57f   : > { %4594 = vmatprep.subr.bf16.mxu0 %v10447_v54  ;;  %4758 = vmatprep.subr.bf16.mxu1 %v10449_v55  ;;  %v10514_v54 = vld [vmem:[#allocation15 + $0x2c0] ss:$16 sps:$4 sm:$0xff]   ;;  %v10517_v55 = vld [vmem:[#allocation15 + $0x2c8] ss:$16 sps:$4 sm:$0xff]  }
 0x582   : > { %4595 = vmatpush1.bf16.msra.mxu0 %v10451_v43  ;;  %4759 = vmatpush1.bf16.msra.mxu1 %v10452_v12  ;;  %v10525_v43 = vld [vmem:[#allocation15 + $0x2ec] ss:$16 sps:$4 sm:$0xff]   ;;  %v10523_v12 = vld [vmem:[#allocation15 + $0x2e8] ss:$16 sps:$4 sm:$0xff]  }
 0x583   : > { %4596 = vmatprep.subr.bf16.mxu0 %v10453_v59  ;;  %4760 = vmatprep.subr.bf16.mxu1 %v10455_v18  ;;  %v10528_v59 = vld [vmem:[#allocation15 + $0x304] ss:$16 sps:$4 sm:$0xff]   ;;  %v10531_v18 = vld [vmem:[#allocation15 + $0x30c] ss:$16 sps:$4 sm:$0xff]  }
 0x586   : > { %4597 = vmatpush1.bf16.msra.mxu0 %v10457_v41  ;;  %4761 = vmatpush1.bf16.msra.mxu1 %v10458_v60  ;;  %v10529_v41 = vld [vmem:[#allocation15 + $0x308] ss:$16 sps:$4 sm:$0xff]   ;;  %v10537_v60 = vld [vmem:[#allocation15 + $0x32c] ss:$16 sps:$4 sm:$0xff]  }
 0x587   : > { %4598 = vmatprep.subr.bf16.mxu0 %v10459_v61  ;;  %4762 = vmatprep.subr.bf16.mxu1 %v10461_v13  ;;  %v10532_v61 = vld [vmem:[#allocation15 + $0x320] ss:$16 sps:$4 sm:$0xff]   ;;  %v10535_v13 = vld [vmem:[#allocation15 + $0x328] ss:$16 sps:$4 sm:$0xff]  }
 0x58a   : > { %4599 = vmatpush1.bf16.msra.mxu0 %v10463_v0  ;;  %4763 = vmatpush1.bf16.msra.mxu1 %v10464_v1  ;;  %v10540_v0 = vld [vmem:[#allocation15 + $0x344] ss:$16 sps:$4 sm:$0xff]   ;;  %v10543_v1 = vld [vmem:[#allocation15 + $0x34c] ss:$16 sps:$4 sm:$0xff]  }
 0x58b   : > { %4600 = vmatprep.subr.bf16.mxu0 %v10465_v2  ;;  %4764 = vmatprep.subr.bf16.mxu1 %v10467_v3  ;;  %v10538_v2 = vld [vmem:[#allocation15 + $0x340] ss:$16 sps:$4 sm:$0xff]   ;;  %v10541_v3 = vld [vmem:[#allocation15 + $0x348] ss:$16 sps:$4 sm:$0xff]  }
 0x58e   : > { %4601 = vmatpush1.bf16.msra.mxu0 %v10469_v4  ;;  %4765 = vmatpush1.bf16.msra.mxu1 %v10470_v17  ;;  %v10549_v4 = vld [vmem:[#allocation15 + $0x36c] ss:$16 sps:$4 sm:$0xff]   ;;  %v10544_v17 = vld [vmem:[#allocation15 + $0x360] ss:$16 sps:$4 sm:$0xff]  }
 0x58f   : > { %4602 = vmatprep.subr.bf16.mxu0 %v10471_v6  ;;  %4766 = vmatprep.subr.bf16.mxu1 %v10473_v7  ;;  %v10547_v6 = vld [vmem:[#allocation15 + $0x368] ss:$16 sps:$4 sm:$0xff]   ;;  %v10552_v7 = vld [vmem:[#allocation15 + $0x384] ss:$16 sps:$4 sm:$0xff]  }
 0x592   : > { %4603 = vmatpush1.bf16.msra.mxu0 %v10475_v19  ;;  %4767 = vmatpush1.bf16.msra.mxu1 %v10476_v24  ;;  %v10555_v19 = vld [vmem:[#allocation15 + $0x38c] ss:$16 sps:$4 sm:$0xff]   ;;  %v10550_v24 = vld [vmem:[#allocation15 + $0x380] ss:$16 sps:$4 sm:$0xff]  }
 0x593   : > { %4613 = vmatprep.subr.bf16.mxu0 %v10480_v10  ;;  %4777 = vmatprep.subr.bf16.mxu1 %v10483_v11  ;;  %v10553_v10 = vld [vmem:[#allocation15 + $0x388] ss:$16 sps:$4 sm:$0xff]   ;;  %v10558_v11 = vld [vmem:[#allocation15 + $0x3a4] ss:$16 sps:$4 sm:$0xff]  }
 0x595   : > { %4605 = vmatmul.mubr.bf16.vlgmr.msra.gmra.mrb[0].mxu0 %v3263_v22  ;;  %4769 = vmatmul.mubr.bf16.vlgmr.msra.gmra.mrb[0].mxu1 %v3263_v22  ;;  %v10559_v22 = vld [vmem:[#allocation15 + $0x3a8] ss:$16 sps:$4 sm:$0xff]  }
 0x596   : > { %4614 = vmatpush1.bf16.msra.mxu0 %v10478_v21  ;;  %4778 = vmatpush1.bf16.msra.mxu1 %v10481_v25  ;;  %v10556_v21 = vld [vmem:[#allocation15 + $0x3a0] ss:$16 sps:$4 sm:$0xff]   ;;  %v10564_v25 = vld [vmem:[#allocation15 + $0x3c4] ss:$16 sps:$4 sm:$0xff]  }
 0x597   : > { %4615 = vmatprep.subr.bf16.mxu0 %v10486_v27  ;;  %4779 = vmatprep.subr.bf16.mxu1 %v10489_v28  ;;  %v10567_v27 = vld [vmem:[#allocation15 + $0x3cc] ss:$16 sps:$4 sm:$0xff]   ;;  %v10562_v28 = vld [vmem:[#allocation15 + $0x3c0] ss:$16 sps:$4 sm:$0xff]  }
 0x598   : > { %4645 = vmatprep.mubr.bf16.mxu0 %v3266_v30  ;;  %4809 = vmatprep.mubr.bf16.mxu1 %v3266_v30  ;;  %v10565_v30 = vld [vmem:[#allocation15 + $0x3c8] ss:$16 sps:$4 sm:$0xff]  }
 0x59a   : > { %4616 = vmatpush1.bf16.msra.mxu0 %v10484_v23  ;;  %4780 = vmatpush1.bf16.msra.mxu1 %v10487_v26  ;;  %v10570_v23 = vld [vmem:[#allocation15 + $0x3e4] ss:$16 sps:$4 sm:$0xff]   ;;  %v10573_v26 = vld [vmem:[#allocation15 + $0x3ec] ss:$16 sps:$4 sm:$0xff]  }
 0x59b   : > { %4617 = vmatprep.subr.bf16.mxu0 %v10492_v29  ;;  %4781 = vmatprep.subr.bf16.mxu1 %v10495_v31  ;;  %v10568_v29 = vld [vmem:[#allocation15 + $0x3e0] ss:$16 sps:$4 sm:$0xff]   ;;  %v10571_v31 = vld [vmem:[#allocation15 + $0x3e8] ss:$16 sps:$4 sm:$0xff]  }
 0x59e   : > { %4618 = vmatpush1.bf16.msra.mxu0 %v10490_v32  ;;  %4782 = vmatpush1.bf16.msra.mxu1 %v10493_v33  ;;  %v10576_v32 = vld [vmem:[#allocation15 + $0x404] ss:$16 sps:$4 sm:$0xff]   ;;  %v10579_v33 = vld [vmem:[#allocation15 + $0x40c] ss:$16 sps:$4 sm:$0xff]  }
 0x59f   : > { %4619 = vmatprep.subr.bf16.mxu0 %v10498_v34  ;;  %4783 = vmatprep.subr.bf16.mxu1 %v10501_v37  ;;  %v10574_v34 = vld [vmem:[#allocation15 + $0x400] ss:$16 sps:$4 sm:$0xff]   ;;  %v3265_v37 = vpack.c.bf16 %v12233_v8, %v12233_v8 }
 0x5a0   : > { %v10580_v8 = vld [vmem:[#allocation15 + $0x420] ss:$16 sps:$4 sm:$0xff]  }
 0x5a2   : > { %4620 = vmatpush1.bf16.msra.mxu0 %v10496_v38  ;;  %4784 = vmatpush1.bf16.msra.mxu1 %v10499_v39  ;;  %v10577_v38 = vld [vmem:[#allocation15 + $0x408] ss:$16 sps:$4 sm:$0xff]   ;;  %v12239_v39 = vld [vmem:[#allocation2 + $0x8] sm:$0xff] }
 0x5a3   : > { %4621 = vmatprep.subr.bf16.mxu0 %v10504_v42  ;;  %4785 = vmatprep.subr.bf16.mxu1 %v10507_v45  ;;  %v10582_v42 = vld [vmem:[#allocation15 + $0x424] ss:$16 sps:$4 sm:$0xff]   ;;  %v10585_v45 = vld [vmem:[#allocation15 + $0x42c] ss:$16 sps:$4 sm:$0xff]  }
 0x5a6   : > { %4622 = vmatpush1.bf16.msra.mxu0 %v10502_v46  ;;  %4786 = vmatpush1.bf16.msra.mxu1 %v10505_v47  ;;  %v12243_v46 = vrot.slane %v12239_v39, %v12229_v53 }
 0x5a7   : > { %4623 = vmatprep.subr.bf16.mxu0 %v10510_v48  ;;  %4787 = vmatprep.subr.bf16.mxu1 %v10513_v50  ;;  %v10583_v48 = vld [vmem:[#allocation15 + $0x428] ss:$16 sps:$4 sm:$0xff]   ;;  %v10588_v50 = vld [vmem:[#allocation15 + $0x444] ss:$16 sps:$4 sm:$0xff]  }
 0x5a8   : > { %v3253_v47 = vcombine.high %v12243_v46, %v12243_v46 }
 0x5aa   : > { %4624 = vmatpush1.bf16.msra.mxu0 %v10508_v35  ;;  %4788 = vmatpush1.bf16.msra.mxu1 %v10511_v51  ;;  %v10591_v35 = vld [vmem:[#allocation15 + $0x44c] ss:$16 sps:$4 sm:$0xff]   ;;  %v3268_v51 = vpack.c.bf16 %v3253_v47, %v3253_v47 }
 0x5ab   : > { %4625 = vmatprep.subr.bf16.mxu0 %v10516_v36  ;;  %4789 = vmatprep.subr.bf16.mxu1 %v10519_v52  ;;  %v10586_v36 = vld [vmem:[#allocation15 + $0x440] ss:$16 sps:$4 sm:$0xff]   ;;  %v10589_v52 = vld [vmem:[#allocation15 + $0x448] ss:$16 sps:$4 sm:$0xff]   ;;  %v10663_v47 = vld [vmem:[#allocation15 + $0x5cc] ss:$16 sps:$4 sm:$0xff]  }
 0x5ae   : > { %4626 = vmatpush1.bf16.msra.mxu0 %v10514_v54  ;;  %4790 = vmatpush1.bf16.msra.mxu1 %v10517_v55  ;;  %v10594_v54 = vld [vmem:[#allocation15 + $0x464] ss:$16 sps:$4 sm:$0xff]   ;;  %v10597_v55 = vld [vmem:[#allocation15 + $0x46c] ss:$16 sps:$4 sm:$0xff]  }
 0x5af   : > { %4627 = vmatprep.subr.bf16.mxu0 %v10522_v58  ;;  %4791 = vmatprep.subr.bf16.mxu1 %v10525_v43  ;;  %v10592_v58 = vld [vmem:[#allocation15 + $0x460] ss:$16 sps:$4 sm:$0xff]   ;;  %v10595_v43 = vld [vmem:[#allocation15 + $0x468] ss:$16 sps:$4 sm:$0xff]  }
 0x5b2   : > { %4628 = vmatpush1.bf16.msra.mxu0 %v10520_v9  ;;  %4792 = vmatpush1.bf16.msra.mxu1 %v10523_v12  ;;  %v10600_v9 = vld [vmem:[#allocation15 + $0x484] ss:$16 sps:$4 sm:$0xff]   ;;  %v10603_v12 = vld [vmem:[#allocation15 + $0x48c] ss:$16 sps:$4 sm:$0xff]  }
 0x5b3   : > { %4629 = vmatprep.subr.bf16.mxu0 %v10528_v59  ;;  %4793 = vmatprep.subr.bf16.mxu1 %v10531_v18  ;;  %v10598_v59 = vld [vmem:[#allocation15 + $0x480] ss:$16 sps:$4 sm:$0xff]   ;;  %v10601_v18 = vld [vmem:[#allocation15 + $0x488] ss:$16 sps:$4 sm:$0xff]  }
 0x5b6   : > { %4630 = vmatpush1.bf16.msra.mxu0 %v10526_v40  ;;  %4794 = vmatpush1.bf16.msra.mxu1 %v10529_v41  ;;  %v10606_v40 = vld [vmem:[#allocation15 + $0x4a4] ss:$16 sps:$4 sm:$0xff]   ;;  %v10609_v41 = vld [vmem:[#allocation15 + $0x4ac] ss:$16 sps:$4 sm:$0xff]  }
 0x5b7   : > { %4631 = vmatprep.subr.bf16.mxu0 %v10534_v44  ;;  %4795 = vmatprep.subr.bf16.mxu1 %v10537_v60  ;;  %v10604_v44 = vld [vmem:[#allocation15 + $0x4a0] ss:$16 sps:$4 sm:$0xff]   ;;  %v10607_v60 = vld [vmem:[#allocation15 + $0x4a8] ss:$16 sps:$4 sm:$0xff]  }
 0x5ba   : > { %4632 = vmatpush1.bf16.msra.mxu0 %v10532_v61  ;;  %4796 = vmatpush1.bf16.msra.mxu1 %v10535_v13  ;;  %v10612_v61 = vld [vmem:[#allocation15 + $0x4c4] ss:$16 sps:$4 sm:$0xff]   ;;  %v10615_v13 = vld [vmem:[#allocation15 + $0x4cc] ss:$16 sps:$4 sm:$0xff]  }
 0x5bb   : > { %4633 = vmatprep.subr.bf16.mxu0 %v10540_v0  ;;  %4797 = vmatprep.subr.bf16.mxu1 %v10543_v1  ;;  %v10610_v0 = vld [vmem:[#allocation15 + $0x4c0] ss:$16 sps:$4 sm:$0xff]   ;;  %v10613_v1 = vld [vmem:[#allocation15 + $0x4c8] ss:$16 sps:$4 sm:$0xff]  }
 0x5be   : > { %4634 = vmatpush1.bf16.msra.mxu0 %v10538_v2  ;;  %4798 = vmatpush1.bf16.msra.mxu1 %v10541_v3  ;;  %v10618_v2 = vld [vmem:[#allocation15 + $0x4e4] ss:$16 sps:$4 sm:$0xff]   ;;  %v10621_v3 = vld [vmem:[#allocation15 + $0x4ec] ss:$16 sps:$4 sm:$0xff]  }
 0x5bf   : > { %4635 = vmatprep.subr.bf16.mxu0 %v10546_v16  ;;  %4799 = vmatprep.subr.bf16.mxu1 %v10549_v4  ;;  %v10616_v16 = vld [vmem:[#allocation15 + $0x4e0] ss:$16 sps:$4 sm:$0xff]   ;;  %v10619_v4 = vld [vmem:[#allocation15 + $0x4e8] ss:$16 sps:$4 sm:$0xff]  }
 0x5c2   : > { %4636 = vmatpush1.bf16.msra.mxu0 %v10544_v17  ;;  %4800 = vmatpush1.bf16.msra.mxu1 %v10547_v6  ;;  %v10624_v17 = vld [vmem:[#allocation15 + $0x504] ss:$16 sps:$4 sm:$0xff]   ;;  %v10627_v6 = vld [vmem:[#allocation15 + $0x50c] ss:$16 sps:$4 sm:$0xff]  }
 0x5c3   : > { %4637 = vmatprep.subr.bf16.mxu0 %v10552_v7  ;;  %4801 = vmatprep.subr.bf16.mxu1 %v10555_v19  ;;  %v10622_v7 = vld [vmem:[#allocation15 + $0x500] ss:$16 sps:$4 sm:$0xff]   ;;  %v10625_v19 = vld [vmem:[#allocation15 + $0x508] ss:$16 sps:$4 sm:$0xff]  }
 0x5c6   : > { %4638 = vmatpush1.bf16.msra.mxu0 %v10550_v24  ;;  %4802 = vmatpush1.bf16.msra.mxu1 %v10553_v10  ;;  %v10630_v24 = vld [vmem:[#allocation15 + $0x524] ss:$16 sps:$4 sm:$0xff]   ;;  %v10633_v10 = vld [vmem:[#allocation15 + $0x52c] ss:$16 sps:$4 sm:$0xff]  }
 0x5c7   : > { %4639 = vmatprep.subr.bf16.mxu0 %v10558_v11  ;;  %4803 = vmatprep.subr.bf16.mxu1 %v10561_v20  ;;  %v10628_v11 = vld [vmem:[#allocation15 + $0x520] ss:$16 sps:$4 sm:$0xff]   ;;  %v10631_v20 = vld [vmem:[#allocation15 + $0x528] ss:$16 sps:$4 sm:$0xff]  }
 0x5ca   : > { %4640 = vmatpush1.bf16.msra.mxu0 %v10556_v21  ;;  %4804 = vmatpush1.bf16.msra.mxu1 %v10559_v22  ;;  %v10636_v21 = vld [vmem:[#allocation15 + $0x544] ss:$16 sps:$4 sm:$0xff]   ;;  %v10639_v22 = vld [vmem:[#allocation15 + $0x54c] ss:$16 sps:$4 sm:$0xff]  }
 0x5cb   : > { %4641 = vmatprep.subr.bf16.mxu0 %v10564_v25  ;;  %4805 = vmatprep.subr.bf16.mxu1 %v10567_v27  ;;  %v10634_v25 = vld [vmem:[#allocation15 + $0x540] ss:$16 sps:$4 sm:$0xff]   ;;  %v10637_v27 = vld [vmem:[#allocation15 + $0x548] ss:$16 sps:$4 sm:$0xff]  }
 0x5ce   : > { %4642 = vmatpush1.bf16.msra.mxu0 %v10562_v28  ;;  %4806 = vmatpush1.bf16.msra.mxu1 %v10565_v30  ;;  %v10642_v28 = vld [vmem:[#allocation15 + $0x564] ss:$16 sps:$4 sm:$0xff]   ;;  %v10645_v30 = vld [vmem:[#allocation15 + $0x56c] ss:$16 sps:$4 sm:$0xff]  }
 0x5cf   : > { %4643 = vmatprep.subr.bf16.mxu0 %v10570_v23  ;;  %4807 = vmatprep.subr.bf16.mxu1 %v10573_v26  ;;  %v10640_v23 = vld [vmem:[#allocation15 + $0x560] ss:$16 sps:$4 sm:$0xff]   ;;  %v10643_v26 = vld [vmem:[#allocation15 + $0x568] ss:$16 sps:$4 sm:$0xff]  }
 0x5d2   : > { %4644 = vmatpush1.bf16.msra.mxu0 %v10568_v29  ;;  %4808 = vmatpush1.bf16.msra.mxu1 %v10571_v31  ;;  %v10648_v29 = vld [vmem:[#allocation15 + $0x584] ss:$16 sps:$4 sm:$0xff]   ;;  %v10651_v31 = vld [vmem:[#allocation15 + $0x58c] ss:$16 sps:$4 sm:$0xff]  }
 0x5d3   : > { %4654 = vmatprep.subr.bf16.mxu0 %v10576_v32  ;;  %4818 = vmatprep.subr.bf16.mxu1 %v10579_v33  ;;  %v10646_v32 = vld [vmem:[#allocation15 + $0x580] ss:$16 sps:$4 sm:$0xff]   ;;  %v10649_v33 = vld [vmem:[#allocation15 + $0x588] ss:$16 sps:$4 sm:$0xff]  }
 0x5d5   : > { %4646 = vmatmul.mubr.bf16.vlgmr.msra.gmra.mrb[0].mxu0 %v3265_v37  ;;  %4810 = vmatmul.mubr.bf16.vlgmr.msra.gmra.mrb[0].mxu1 %v3265_v37  ;;  %v10657_v37 = vld [vmem:[#allocation15 + $0x5ac] ss:$16 sps:$4 sm:$0xff]  }
 0x5d6   : > { %4655 = vmatpush1.bf16.msra.mxu0 %v10574_v34  ;;  %4819 = vmatpush1.bf16.msra.mxu1 %v10577_v38  ;;  %v10654_v34 = vld [vmem:[#allocation15 + $0x5a4] ss:$16 sps:$4 sm:$0xff]   ;;  %v10652_v38 = vld [vmem:[#allocation15 + $0x5a0] ss:$16 sps:$4 sm:$0xff]  }
 0x5d7   : > { %4656 = vmatprep.subr.bf16.mxu0 %v10582_v42  ;;  %4820 = vmatprep.subr.bf16.mxu1 %v10585_v45  ;;  %v10655_v42 = vld [vmem:[#allocation15 + $0x5a8] ss:$16 sps:$4 sm:$0xff]   ;;  %v10660_v45 = vld [vmem:[#allocation15 + $0x5c4] ss:$16 sps:$4 sm:$0xff]  }
 0x5d8   : > { %4686 = vmatprep.mubr.bf16.mxu0 %v3268_v51  ;;  %4850 = vmatprep.mubr.bf16.mxu1 %v3268_v51  ;;  %v10669_v51 = vld [vmem:[#allocation15 + $0x5ec] ss:$16 sps:$4 sm:$0xff]  }
 0x5da   : > { %4657 = vmatpush1.bf16.msra.mxu0 %v10580_v8  ;;  %4821 = vmatpush1.bf16.msra.mxu1 %v10583_v48  ;;  %v3238_v8 = vcombine.high %v12239_v39, %v12239_v39  ;;  %v10658_v48 = vld [vmem:[#allocation15 + $0x5c0] ss:$16 sps:$4 sm:$0xff]  }
 0x5db   : > { %4658 = vmatprep.subr.bf16.mxu0 %v10588_v50  ;;  %4822 = vmatprep.subr.bf16.mxu1 %v10591_v35  ;;  %v10661_v50 = vld [vmem:[#allocation15 + $0x5c8] ss:$16 sps:$4 sm:$0xff]   ;;  %v10666_v35 = vld [vmem:[#allocation15 + $0x5e4] ss:$16 sps:$4 sm:$0xff]   ;;  %v10670_v39 = vld [vmem:[#allocation15 + $0x600] ss:$16 sps:$4 sm:$0xff]  }
 0x5de   : > { %4659 = vmatpush1.bf16.msra.mxu0 %v10586_v36  ;;  %4823 = vmatpush1.bf16.msra.mxu1 %v10589_v52  ;;  %v12250_v36 = vrot.slane %v3238_v8, %v12229_v53  ;;  %v10664_v52 = vld [vmem:[#allocation15 + $0x5e0] ss:$16 sps:$4 sm:$0xff]   ;;  %v10738_v8 = vld [vmem:[#allocation15 + $0x764] ss:$16 sps:$4 sm:$0xff]  }
 0x5df   : > { %4660 = vmatprep.subr.bf16.mxu0 %v10594_v54  ;;  %4824 = vmatprep.subr.bf16.mxu1 %v10597_v55  ;;  %v10667_v54 = vld [vmem:[#allocation15 + $0x5e8] ss:$16 sps:$4 sm:$0xff]   ;;  %v10672_v55 = vld [vmem:[#allocation15 + $0x604] ss:$16 sps:$4 sm:$0xff]  }
 0x5e2   : > { %4661 = vmatpush1.bf16.msra.mxu0 %v10592_v58  ;;  %4825 = vmatpush1.bf16.msra.mxu1 %v10595_v43  ;;  %v10675_v58 = vld [vmem:[#allocation15 + $0x60c] ss:$16 sps:$4 sm:$0xff]   ;;  %v10673_v43 = vld [vmem:[#allocation15 + $0x608] ss:$16 sps:$4 sm:$0xff]  }
 0x5e3   : > { %4662 = vmatprep.subr.bf16.mxu0 %v10600_v9  ;;  %4826 = vmatprep.subr.bf16.mxu1 %v10603_v12  ;;  %v3254_v9 = vcombine.high %v12250_v36, %v12250_v36  ;;  %v3267_v12 = vpack.c.bf16 %v12243_v46, %v12243_v46  ;;  %v10690_v46 = vld [vmem:[#allocation15 + $0x664] ss:$16 sps:$4 sm:$0xff]  }
 0x5e6   : > { %4663 = vmatpush1.bf16.msra.mxu0 %v10598_v59  ;;  %4827 = vmatpush1.bf16.msra.mxu1 %v10601_v18  ;;  %v10678_v59 = vld [vmem:[#allocation15 + $0x624] ss:$16 sps:$4 sm:$0xff]   ;;  %v10681_v18 = vld [vmem:[#allocation15 + $0x62c] ss:$16 sps:$4 sm:$0xff]  }
 0x5e7   : > { %4664 = vmatprep.subr.bf16.mxu0 %v10606_v40  ;;  %4828 = vmatprep.subr.bf16.mxu1 %v10609_v41  ;;  %v10676_v40 = vld [vmem:[#allocation15 + $0x620] ss:$16 sps:$4 sm:$0xff]   ;;  %v10679_v41 = vld [vmem:[#allocation15 + $0x628] ss:$16 sps:$4 sm:$0xff]  }
 0x5ea   : > { %4665 = vmatpush1.bf16.msra.mxu0 %v10604_v44  ;;  %4829 = vmatpush1.bf16.msra.mxu1 %v10607_v60  ;;  %v3270_v44 = vpack.c.bf16 %v3254_v9, %v3254_v9  ;;  %v10684_v60 = vld [vmem:[#allocation15 + $0x644] ss:$16 sps:$4 sm:$0xff]   ;;  %v10751_v9 = vld [vmem:[#allocation15 + $0x7a8] ss:$16 sps:$4 sm:$0xff]  }
 0x5eb   : > { %4666 = vmatprep.subr.bf16.mxu0 %v10612_v61  ;;  %4830 = vmatprep.subr.bf16.mxu1 %v10615_v13  ;;  %v10687_v61 = vld [vmem:[#allocation15 + $0x64c] ss:$16 sps:$4 sm:$0xff]   ;;  %v10682_v13 = vld [vmem:[#allocation15 + $0x640] ss:$16 sps:$4 sm:$0xff]  }
 0x5ee   : > { %4667 = vmatpush1.bf16.msra.mxu0 %v10610_v0  ;;  %4831 = vmatpush1.bf16.msra.mxu1 %v10613_v1  ;;  %v10685_v0 = vld [vmem:[#allocation15 + $0x648] ss:$16 sps:$4 sm:$0xff]   ;;  %v10693_v1 = vld [vmem:[#allocation15 + $0x66c] ss:$16 sps:$4 sm:$0xff]  }
 0x5ef   : > { %4668 = vmatprep.subr.bf16.mxu0 %v10618_v2  ;;  %4832 = vmatprep.subr.bf16.mxu1 %v10621_v3  ;;  %v10688_v2 = vld [vmem:[#allocation15 + $0x660] ss:$16 sps:$4 sm:$0xff]   ;;  %v10691_v3 = vld [vmem:[#allocation15 + $0x668] ss:$16 sps:$4 sm:$0xff]  }
 0x5f2   : > { %4669 = vmatpush1.bf16.msra.mxu0 %v10616_v16  ;;  %4833 = vmatpush1.bf16.msra.mxu1 %v10619_v4  ;;  %v10696_v16 = vld [vmem:[#allocation15 + $0x684] ss:$16 sps:$4 sm:$0xff]   ;;  %v10699_v4 = vld [vmem:[#allocation15 + $0x68c] ss:$16 sps:$4 sm:$0xff]  }
 0x5f3   : > { %4670 = vmatprep.subr.bf16.mxu0 %v10624_v17  ;;  %4834 = vmatprep.subr.bf16.mxu1 %v10627_v6  ;;  %v10694_v17 = vld [vmem:[#allocation15 + $0x680] ss:$16 sps:$4 sm:$0xff]   ;;  %v10697_v6 = vld [vmem:[#allocation15 + $0x688] ss:$16 sps:$4 sm:$0xff]  }
 0x5f6   : > { %4671 = vmatpush1.bf16.msra.mxu0 %v10622_v7  ;;  %4835 = vmatpush1.bf16.msra.mxu1 %v10625_v19  ;;  %v10702_v7 = vld [vmem:[#allocation15 + $0x6a4] ss:$16 sps:$4 sm:$0xff]   ;;  %v10705_v19 = vld [vmem:[#allocation15 + $0x6ac] ss:$16 sps:$4 sm:$0xff]  }
 0x5f7   : > { %4672 = vmatprep.subr.bf16.mxu0 %v10630_v24  ;;  %4836 = vmatprep.subr.bf16.mxu1 %v10633_v10  ;;  %v10700_v24 = vld [vmem:[#allocation15 + $0x6a0] ss:$16 sps:$4 sm:$0xff]   ;;  %v10703_v10 = vld [vmem:[#allocation15 + $0x6a8] ss:$16 sps:$4 sm:$0xff]  }
 0x5fa   : > { %4673 = vmatpush1.bf16.msra.mxu0 %v10628_v11  ;;  %4837 = vmatpush1.bf16.msra.mxu1 %v10631_v20  ;;  %v10708_v11 = vld [vmem:[#allocation15 + $0x6c4] ss:$16 sps:$4 sm:$0xff]   ;;  %v10711_v20 = vld [vmem:[#allocation15 + $0x6cc] ss:$16 sps:$4 sm:$0xff]  }
 0x5fb   : > { %4674 = vmatprep.subr.bf16.mxu0 %v10636_v21  ;;  %4838 = vmatprep.subr.bf16.mxu1 %v10639_v22  ;;  %v10706_v21 = vld [vmem:[#allocation15 + $0x6c0] ss:$16 sps:$4 sm:$0xff]   ;;  %v10709_v22 = vld [vmem:[#allocation15 + $0x6c8] ss:$16 sps:$4 sm:$0xff]  }
 0x5fe   : > { %4675 = vmatpush1.bf16.msra.mxu0 %v10634_v25  ;;  %4839 = vmatpush1.bf16.msra.mxu1 %v10637_v27  ;;  %v10714_v25 = vld [vmem:[#allocation15 + $0x6e4] ss:$16 sps:$4 sm:$0xff]   ;;  %v10717_v27 = vld [vmem:[#allocation15 + $0x6ec] ss:$16 sps:$4 sm:$0xff]  }
 0x5ff   : > { %4676 = vmatprep.subr.bf16.mxu0 %v10642_v28  ;;  %4840 = vmatprep.subr.bf16.mxu1 %v10645_v30  ;;  %v10712_v28 = vld [vmem:[#allocation15 + $0x6e0] ss:$16 sps:$4 sm:$0xff]   ;;  %v10715_v30 = vld [vmem:[#allocation15 + $0x6e8] ss:$16 sps:$4 sm:$0xff]  }
 0x602   : > { %4677 = vmatpush1.bf16.msra.mxu0 %v10640_v23  ;;  %4841 = vmatpush1.bf16.msra.mxu1 %v10643_v26  ;;  %v10720_v23 = vld [vmem:[#allocation15 + $0x704] ss:$16 sps:$4 sm:$0xff]   ;;  %v10723_v26 = vld [vmem:[#allocation15 + $0x70c] ss:$16 sps:$4 sm:$0xff]  }
 0x603   : > { %4678 = vmatprep.subr.bf16.mxu0 %v10648_v29  ;;  %4842 = vmatprep.subr.bf16.mxu1 %v10651_v31  ;;  %v10718_v29 = vld [vmem:[#allocation15 + $0x700] ss:$16 sps:$4 sm:$0xff]   ;;  %v10721_v31 = vld [vmem:[#allocation15 + $0x708] ss:$16 sps:$4 sm:$0xff]  }
 0x606   : > { %4679 = vmatpush1.bf16.msra.mxu0 %v10646_v32  ;;  %4843 = vmatpush1.bf16.msra.mxu1 %v10649_v33  ;;  %v10726_v32 = vld [vmem:[#allocation15 + $0x724] ss:$16 sps:$4 sm:$0xff]   ;;  %v10729_v33 = vld [vmem:[#allocation15 + $0x72c] ss:$16 sps:$4 sm:$0xff]  }
 0x607   : > { %4680 = vmatprep.subr.bf16.mxu0 %v10654_v34  ;;  %4844 = vmatprep.subr.bf16.mxu1 %v10657_v37  ;;  %v10724_v34 = vld [vmem:[#allocation15 + $0x720] ss:$16 sps:$4 sm:$0xff]   ;;  %v10727_v37 = vld [vmem:[#allocation15 + $0x728] ss:$16 sps:$4 sm:$0xff]  }
 0x60a   : > { %4681 = vmatpush1.bf16.msra.mxu0 %v10652_v38  ;;  %4845 = vmatpush1.bf16.msra.mxu1 %v10655_v42  ;;  %v10732_v38 = vld [vmem:[#allocation15 + $0x744] ss:$16 sps:$4 sm:$0xff]   ;;  %v10735_v42 = vld [vmem:[#allocation15 + $0x74c] ss:$16 sps:$4 sm:$0xff]  }
 0x60b   : > { %4682 = vmatprep.subr.bf16.mxu0 %v10660_v45  ;;  %4846 = vmatprep.subr.bf16.mxu1 %v10663_v47  ;;  %v10730_v45 = vld [vmem:[#allocation15 + $0x740] ss:$16 sps:$4 sm:$0xff]   ;;  %v10733_v47 = vld [vmem:[#allocation15 + $0x748] ss:$16 sps:$4 sm:$0xff]  }
 0x60e   : > { %4683 = vmatpush1.bf16.msra.mxu0 %v10658_v48  ;;  %4847 = vmatpush1.bf16.msra.mxu1 %v10661_v50  ;;  %v10741_v48 = vld [vmem:[#allocation15 + $0x76c] ss:$16 sps:$4 sm:$0xff]   ;;  %v10736_v50 = vld [vmem:[#allocation15 + $0x760] ss:$16 sps:$4 sm:$0xff]  }
 0x60f   : > { %4684 = vmatprep.subr.bf16.mxu0 %v10666_v35  ;;  %4848 = vmatprep.subr.bf16.mxu1 %v10669_v51  ;;  %v10739_v35 = vld [vmem:[#allocation15 + $0x768] ss:$16 sps:$4 sm:$0xff]   ;;  %v10744_v51 = vld [vmem:[#allocation15 + $0x784] ss:$16 sps:$4 sm:$0xff]  }
 0x612   : > { %4685 = vmatpush1.bf16.msra.mxu0 %v10664_v52  ;;  %4849 = vmatpush1.bf16.msra.mxu1 %v10667_v54  ;;  %v10747_v52 = vld [vmem:[#allocation15 + $0x78c] ss:$16 sps:$4 sm:$0xff]   ;;  %v10742_v54 = vld [vmem:[#allocation15 + $0x780] ss:$16 sps:$4 sm:$0xff]  }
 0x613   : > { %4695 = vmatprep.subr.bf16.mxu0 %v10672_v55  ;;  %4859 = vmatprep.subr.bf16.mxu1 %v10675_v58  ;;  %v10745_v55 = vld [vmem:[#allocation15 + $0x788] ss:$16 sps:$4 sm:$0xff]   ;;  %v10750_v58 = vld [vmem:[#allocation15 + $0x7a4] ss:$16 sps:$4 sm:$0xff]  }
 0x615   : > { %4687 = vmatmul.mubr.bf16.vlgmr.msra.gmra.mrb[0].mxu0 %v3267_v12  ;;  %4851 = vmatmul.mubr.bf16.vlgmr.msra.gmra.mrb[0].mxu1 %v3267_v12  ;;  %v10756_v12 = vld [vmem:[#allocation15 + $0x7c4] ss:$16 sps:$4 sm:$0xff]  }
 0x616   : > { %4696 = vmatpush1.bf16.msra.mxu0 %v10670_v39  ;;  %4860 = vmatpush1.bf16.msra.mxu1 %v10673_v43  ;;  %v10753_v39 = vld [vmem:[#allocation15 + $0x7ac] ss:$16 sps:$4 sm:$0xff]   ;;  %v10748_v43 = vld [vmem:[#allocation15 + $0x7a0] ss:$16 sps:$4 sm:$0xff]  }
 0x617   : > { %4697 = vmatprep.subr.bf16.mxu0 %v10678_v59  ;;  %4861 = vmatprep.subr.bf16.mxu1 %v10681_v18  ;;  %v10759_v59 = vld [vmem:[#allocation15 + $0x7cc] ss:$16 sps:$4 sm:$0xff]   ;;  %v10754_v18 = vld [vmem:[#allocation15 + $0x7c0] ss:$16 sps:$4 sm:$0xff]  }
 0x618   : > { %4727 = vmatprep.mubr.bf16.mxu0 %v3270_v44  ;;  %4891 = vmatprep.mubr.bf16.mxu1 %v3270_v44  ;;  %v10765_v44 = vld [vmem:[#allocation15 + $0x7ec] ss:$16 sps:$4 sm:$0xff]  }
 0x61a   : > { %4698 = vmatpush1.bf16.msra.mxu0 %v10676_v40  ;;  %4862 = vmatpush1.bf16.msra.mxu1 %v10679_v41  ;;  %v10757_v40 = vld [vmem:[#allocation15 + $0x7c8] ss:$16 sps:$4 sm:$0xff]   ;;  %v10762_v41 = vld [vmem:[#allocation15 + $0x7e4] ss:$16 sps:$4 sm:$0xff]  }
 0x61b   : > { %4699 = vmatprep.subr.bf16.mxu0 %v10684_v60  ;;  %4863 = vmatprep.subr.bf16.mxu1 %v10687_v61  ;;  %v10760_v60 = vld [vmem:[#allocation15 + $0x7e0] ss:$16 sps:$4 sm:$0xff]   ;;  %v10763_v61 = vld [vmem:[#allocation15 + $0x7e8] ss:$16 sps:$4 sm:$0xff]  }
 0x61e   : > { %4700 = vmatpush1.bf16.msra.mxu0 %v10682_v13  ;;  %4864 = vmatpush1.bf16.msra.mxu1 %v10685_v0  ;;  %v10769_v13 = vld [vmem:[#allocation18 + $0x4] ss:$8 sps:$4 sm:$0xff]   ;;  %v3269_v0 = vpack.c.bf16 %v12250_v36, %v12250_v36  ;;  %v10779_v36 = vld [vmem:[#allocation18 + $0x40] ss:$8 sps:$4 sm:$0xff]  }
 0x61f   : > { %4701 = vmatprep.subr.bf16.mxu0 %v10690_v46  ;;  %4865 = vmatprep.subr.bf16.mxu1 %v10693_v1  ;;  %v10767_v46 = vld [vmem:[#allocation18] ss:$8 sps:$4 sm:$0xff]   ;;  %v10772_v1 = vld [vmem:[#allocation18 + $0x14] ss:$8 sps:$4 sm:$0xff]  }
 0x622   : > { %4702 = vmatpush1.bf16.msra.mxu0 %v10688_v2  ;;  %4866 = vmatpush1.bf16.msra.mxu1 %v10691_v3  ;;  %v10770_v2 = vld [vmem:[#allocation18 + $0x10] ss:$8 sps:$4 sm:$0xff]   ;;  %v10775_v3 = vld [vmem:[#allocation18 + $0x24] ss:$8 sps:$4 sm:$0xff]  }
 0x623   : > { %4703 = vmatprep.subr.bf16.mxu0 %v10696_v16  ;;  %4867 = vmatprep.subr.bf16.mxu1 %v10699_v4  ;;  %v10773_v16 = vld [vmem:[#allocation18 + $0x20] ss:$8 sps:$4 sm:$0xff]   ;;  %v10778_v4 = vld [vmem:[#allocation18 + $0x34] ss:$8 sps:$4 sm:$0xff]  }
 0x626   : > { %4704 = vmatpush1.bf16.msra.mxu0 %v10694_v17  ;;  %4868 = vmatpush1.bf16.msra.mxu1 %v10697_v6  ;;  %v10776_v17 = vld [vmem:[#allocation18 + $0x30] ss:$8 sps:$4 sm:$0xff]   ;;  %v10781_v6 = vld [vmem:[#allocation18 + $0x44] ss:$8 sps:$4 sm:$0xff]  }
 0x627   : > { %4705 = vmatprep.subr.bf16.mxu0 %v10702_v7  ;;  %4869 = vmatprep.subr.bf16.mxu1 %v10705_v19  ;;  %v10784_v7 = vld [vmem:[#allocation18 + $0x54] ss:$8 sps:$4 sm:$0xff]   ;;  %v10782_v19 = vld [vmem:[#allocation18 + $0x50] ss:$8 sps:$4 sm:$0xff]  }
 0x62a   : > { %4706 = vmatpush1.bf16.msra.mxu0 %v10700_v24  ;;  %4870 = vmatpush1.bf16.msra.mxu1 %v10703_v10  ;;  %v10787_v24 = vld [vmem:[#allocation18 + $0x64] ss:$8 sps:$4 sm:$0xff]   ;;  %v10785_v10 = vld [vmem:[#allocation18 + $0x60] ss:$8 sps:$4 sm:$0xff]  }
 0x62b   : > { %4707 = vmatprep.subr.bf16.mxu0 %v10708_v11  ;;  %4871 = vmatprep.subr.bf16.mxu1 %v10711_v20  ;;  %v10790_v11 = vld [vmem:[#allocation18 + $0x74] ss:$8 sps:$4 sm:$0xff]   ;;  %v10788_v20 = vld [vmem:[#allocation18 + $0x70] ss:$8 sps:$4 sm:$0xff]  }
 0x62e   : > { %4708 = vmatpush1.bf16.msra.mxu0 %v10706_v21  ;;  %4872 = vmatpush1.bf16.msra.mxu1 %v10709_v22  ;;  %v10793_v21 = vld [vmem:[#allocation18 + $0x84] ss:$8 sps:$4 sm:$0xff]   ;;  %v10791_v22 = vld [vmem:[#allocation18 + $0x80] ss:$8 sps:$4 sm:$0xff]  }
 0x62f   : > { %4709 = vmatprep.subr.bf16.mxu0 %v10714_v25  ;;  %4873 = vmatprep.subr.bf16.mxu1 %v10717_v27  ;;  %v10796_v25 = vld [vmem:[#allocation18 + $0x94] ss:$8 sps:$4 sm:$0xff]   ;;  %v10794_v27 = vld [vmem:[#allocation18 + $0x90] ss:$8 sps:$4 sm:$0xff]  }
 0x632   : > { %4710 = vmatpush1.bf16.msra.mxu0 %v10712_v28  ;;  %4874 = vmatpush1.bf16.msra.mxu1 %v10715_v30  ;;  %v10799_v28 = vld [vmem:[#allocation18 + $0xa4] ss:$8 sps:$4 sm:$0xff]   ;;  %v10797_v30 = vld [vmem:[#allocation18 + $0xa0] ss:$8 sps:$4 sm:$0xff]  }
 0x633   : > { %4711 = vmatprep.subr.bf16.mxu0 %v10720_v23  ;;  %4875 = vmatprep.subr.bf16.mxu1 %v10723_v26  ;;  %v10802_v23 = vld [vmem:[#allocation18 + $0xb4] ss:$8 sps:$4 sm:$0xff]   ;;  %v10800_v26 = vld [vmem:[#allocation18 + $0xb0] ss:$8 sps:$4 sm:$0xff]  }
 0x636   : > { %4712 = vmatpush1.bf16.msra.mxu0 %v10718_v29  ;;  %4876 = vmatpush1.bf16.msra.mxu1 %v10721_v31  ;;  %v10805_v29 = vld [vmem:[#allocation18 + $0xc4] ss:$8 sps:$4 sm:$0xff]   ;;  %v10803_v31 = vld [vmem:[#allocation18 + $0xc0] ss:$8 sps:$4 sm:$0xff]  }
 0x637   : > { %4713 = vmatprep.subr.bf16.mxu0 %v10726_v32  ;;  %4877 = vmatprep.subr.bf16.mxu1 %v10729_v33  ;;  %v10808_v32 = vld [vmem:[#allocation18 + $0xd4] ss:$8 sps:$4 sm:$0xff]   ;;  %v10806_v33 = vld [vmem:[#allocation18 + $0xd0] ss:$8 sps:$4 sm:$0xff]  }
 0x63a   : > { %4714 = vmatpush1.bf16.msra.mxu0 %v10724_v34  ;;  %4878 = vmatpush1.bf16.msra.mxu1 %v10727_v37  ;;  %v10811_v34 = vld [vmem:[#allocation18 + $0xe4] ss:$8 sps:$4 sm:$0xff]   ;;  %v10809_v37 = vld [vmem:[#allocation18 + $0xe0] ss:$8 sps:$4 sm:$0xff]  }
 0x63b   : > { %4715 = vmatprep.subr.bf16.mxu0 %v10732_v38  ;;  %4879 = vmatprep.subr.bf16.mxu1 %v10735_v42  ;;  %v10814_v38 = vld [vmem:[#allocation18 + $0xf4] ss:$8 sps:$4 sm:$0xff]   ;;  %v10812_v42 = vld [vmem:[#allocation18 + $0xf0] ss:$8 sps:$4 sm:$0xff]  }
 0x63e   : > { %4716 = vmatpush1.bf16.msra.mxu0 %v10730_v45  ;;  %4880 = vmatpush1.bf16.msra.mxu1 %v10733_v47  ;;  %v10817_v45 = vld [vmem:[#allocation18 + $0x104] ss:$8 sps:$4 sm:$0xff]  }
 0x63f   : > { %4717 = vmatprep.subr.bf16.mxu0 %v10738_v8  ;;  %4881 = vmatprep.subr.bf16.mxu1 %v10741_v48  ;;  %v2703_v47 = vld [vmem:[#allocation21] sm:$0xff] }
 0x640   : > { %v2719_v8 = vld [vmem:[#allocation21 + $0x80] sm:$0xff] }
 0x641   : > { %v9532_v48 = vcombine.low %v2703_v47, %v2719_v8 }
 0x642   : > { %4718 = vmatpush1.bf16.msra.mxu0 %v10736_v50  ;;  %4882 = vmatpush1.bf16.msra.mxu1 %v10739_v35  ;;  %v9533_v50 = vcombine.high %v2703_v47, %v2719_v8  ;;  %v2735_v35 = vld [vmem:[#allocation21 + $0x100] sm:$0xff] }
 0x643   : > { %4719 = vmatprep.subr.bf16.mxu0 %v10744_v51  ;;  %4883 = vmatprep.subr.bf16.mxu1 %v10747_v52  ;;  %v2751_v51 = vld [vmem:[#allocation21 + $0x180] sm:$0xff] }
 0x644   : > { %v9565_v52 = vcombine.high %v2735_v35, %v2751_v51 }
 0x646   : > { %4720 = vmatpush1.bf16.msra.mxu0 %v10742_v54  ;;  %4884 = vmatpush1.bf16.msra.mxu1 %v10745_v55  ;;  %v9564_v54 = vcombine.low %v2735_v35, %v2751_v51  ;;  %v2767_v55 = vld [vmem:[#allocation21 + $0x200] sm:$0xff] }
 0x647   : > { %4721 = vmatprep.subr.bf16.mxu0 %v10750_v58  ;;  %4885 = vmatprep.subr.bf16.mxu1 %v10753_v39  ;;  %v2783_v58 = vld [vmem:[#allocation21 + $0x280] sm:$0xff] }
 0x648   : > { %v9597_v39 = vcombine.high %v2767_v55, %v2783_v58 }
 0x64a   : > { %4722 = vmatpush1.bf16.msra.mxu0 %v10748_v43  ;;  %4886 = vmatpush1.bf16.msra.mxu1 %v10751_v9  ;;  %v9596_v43 = vcombine.low %v2767_v55, %v2783_v58  ;;  %v2799_v9 = vld [vmem:[#allocation21 + $0x300] sm:$0xff] }
 0x64b   : > { %4723 = vmatprep.subr.bf16.mxu0 %v10756_v12  ;;  %4887 = vmatprep.subr.bf16.mxu1 %v10759_v59  ;;  %v2815_v12 = vld [vmem:[#allocation21 + $0x380] sm:$0xff] }
 0x64c   : > { %v9629_v59 = vcombine.high %v2799_v9, %v2815_v12 }
 0x64e   : > { %4724 = vmatpush1.bf16.msra.mxu0 %v10754_v18  ;;  %4888 = vmatpush1.bf16.msra.mxu1 %v10757_v40  ;;  %v9628_v18 = vcombine.low %v2799_v9, %v2815_v12  ;;  %v2831_v40 = vld [vmem:[#allocation21 + $0x400] sm:$0xff] }
 0x64f   : > { %4725 = vmatprep.subr.bf16.mxu0 %v10762_v41  ;;  %4889 = vmatprep.subr.bf16.mxu1 %v10765_v44  ;;  %v2847_v41 = vld [vmem:[#allocation21 + $0x480] sm:$0xff] }
 0x650   : > { %v9661_v44 = vcombine.high %v2831_v40, %v2847_v41 }
 0x652   : > { %4726 = vmatpush1.bf16.msra.mxu0 %v10760_v60  ;;  %4890 = vmatpush1.bf16.msra.mxu1 %v10763_v61  ;;  %v9660_v60 = vcombine.low %v2831_v40, %v2847_v41  ;;  %v2863_v61 = vld [vmem:[#allocation21 + $0x500] sm:$0xff] }
 0x653   : > { %5239 = vmatprep.subr.bf16.mxu0 %v10769_v13  ;;  %8049 = vmatprep.subr.bf16.mxu1 %v9533_v50  ;;  %v2879_v13 = vld [vmem:[#allocation21 + $0x580] sm:$0xff] }
 0x655   : > { %4728 = vmatmul.mubr.bf16.vlgmr.msra.gmra.mrb[0].mxu0 %v3269_v0  ;;  %4892 = vmatmul.mubr.bf16.vlgmr.msra.gmra.mrb[0].mxu1 %v3269_v0  ;;  %v9693_v0 = vcombine.high %v2863_v61, %v2879_v13 }
 0x656   : > { %5240 = vmatpush1.bf16.msra.mxu0 %v10767_v46  ;;  %8050 = vmatpush1.bf16.msra.mxu1 %v9532_v48  ;;  %v9692_v46 = vcombine.low %v2863_v61, %v2879_v13  ;;  %v10815_v61 = vld [vmem:[#allocation18 + $0x100] ss:$8 sps:$4 sm:$0xff]  }
 0x657   : > { %5241 = vmatprep.subr.bf16.mxu0 %v10772_v1  ;;  %8051 = vmatprep.subr.bf16.mxu1 %v9565_v52  ;;  %v2895_v1 = vld [vmem:[#allocation21 + $0x600] sm:$0xff] }
 0x65a   : > { %5242 = vmatpush1.bf16.msra.mxu0 %v10770_v2  ;;  %8052 = vmatpush1.bf16.msra.mxu1 %v9564_v54  ;;  %v2911_v2 = vld [vmem:[#allocation21 + $0x680] sm:$0xff] }
 0x65b   : > { %5243 = vmatprep.subr.bf16.mxu0 %v10775_v3  ;;  %8053 = vmatprep.subr.bf16.mxu1 %v9597_v39  ;;  %v9725_v3 = vcombine.high %v2895_v1, %v2911_v2 }
 0x65e   : > { %5244 = vmatpush1.bf16.msra.mxu0 %v10773_v16  ;;  %8054 = vmatpush1.bf16.msra.mxu1 %v9596_v43  ;;  %v9724_v16 = vcombine.low %v2895_v1, %v2911_v2  ;;  %v10818_v1 = vld [vmem:[#allocation18 + $0x110] ss:$8 sps:$4 sm:$0xff]   ;;  %v10823_v2 = vld [vmem:[#allocation18 + $0x124] ss:$8 sps:$4 sm:$0xff]  }
 0x65f   : > { %5245 = vmatprep.subr.bf16.mxu0 %v10778_v4  ;;  %8055 = vmatprep.subr.bf16.mxu1 %v9629_v59  ;;  %v2927_v4 = vld [vmem:[#allocation21 + $0x700] sm:$0xff] }
 0x662   : > { %5246 = vmatpush1.bf16.msra.mxu0 %v10776_v17  ;;  %8056 = vmatpush1.bf16.msra.mxu1 %v9628_v18  ;;  %v2943_v17 = vld [vmem:[#allocation21 + $0x780] sm:$0xff] }
 0x663   : > { %5247 = vmatprep.subr.bf16.mxu0 %v10781_v6  ;;  %8057 = vmatprep.subr.bf16.mxu1 %v9661_v44  ;;  %v9757_v6 = vcombine.high %v2927_v4, %v2943_v17 }
 0x666   : > { %5248 = vmatpush1.bf16.msra.mxu0 %v10779_v36  ;;  %8058 = vmatpush1.bf16.msra.mxu1 %v9660_v60  ;;  %v9756_v36 = vcombine.low %v2927_v4, %v2943_v17  ;;  %v10824_v4 = vld [vmem:[#allocation18 + $0x130] ss:$8 sps:$4 sm:$0xff]   ;;  %v10829_v17 = vld [vmem:[#allocation18 + $0x144] ss:$8 sps:$4 sm:$0xff]  }
 0x667   : > { %5249 = vmatprep.subr.bf16.mxu0 %v10784_v7  ;;  %8059 = vmatprep.subr.bf16.mxu1 %v9693_v0  ;;  %v2959_v7 = vld [vmem:[#allocation21 + $0x800] sm:$0xff]  ;;  %v10820_v0 = vld [vmem:[#allocation18 + $0x114] ss:$8 sps:$4 sm:$0xff]  }
 0x66a   : > { %5250 = vmatpush1.bf16.msra.mxu0 %v10782_v19  ;;  %8060 = vmatpush1.bf16.msra.mxu1 %v9692_v46  ;;  %v2975_v19 = vld [vmem:[#allocation21 + $0x880] sm:$0xff] }
 0x66b   : > { %5251 = vmatprep.subr.bf16.mxu0 %v10787_v24  ;;  %8061 = vmatprep.subr.bf16.mxu1 %v9725_v3  ;;  %v9789_v24 = vcombine.high %v2959_v7, %v2975_v19  ;;  %v10821_v3 = vld [vmem:[#allocation18 + $0x120] ss:$8 sps:$4 sm:$0xff]  }
 0x66e   : > { %5252 = vmatpush1.bf16.msra.mxu0 %v10785_v10  ;;  %8062 = vmatpush1.bf16.msra.mxu1 %v9724_v16  ;;  %v9788_v10 = vcombine.low %v2959_v7, %v2975_v19  ;;  %v10826_v16 = vld [vmem:[#allocation18 + $0x134] ss:$8 sps:$4 sm:$0xff]   ;;  %v10830_v7 = vld [vmem:[#allocation18 + $0x150] ss:$8 sps:$4 sm:$0xff]   ;;  %v10835_v19 = vld [vmem:[#allocation18 + $0x164] ss:$8 sps:$4 sm:$0xff]  }
 0x66f   : > { %5253 = vmatprep.subr.bf16.mxu0 %v10790_v11  ;;  %8063 = vmatprep.subr.bf16.mxu1 %v9757_v6  ;;  %v2991_v11 = vld [vmem:[#allocation21 + $0x900] sm:$0xff] }
 0x670   : > { %v10827_v6 = vld [vmem:[#allocation18 + $0x140] ss:$8 sps:$4 sm:$0xff]  }
 0x672   : > { %5254 = vmatpush1.bf16.msra.mxu0 %v10788_v20  ;;  %8064 = vmatpush1.bf16.msra.mxu1 %v9756_v36  ;;  %v3007_v20 = vld [vmem:[#allocation21 + $0x980] sm:$0xff]  ;;  %v10832_v36 = vld [vmem:[#allocation18 + $0x154] ss:$8 sps:$4 sm:$0xff]  }
 0x673   : > { %5255 = vmatprep.subr.bf16.mxu0 %v10793_v21  ;;  %8065 = vmatprep.subr.bf16.mxu1 %v9789_v24  ;;  %v9821_v21 = vcombine.high %v2991_v11, %v3007_v20  ;;  %v10833_v24 = vld [vmem:[#allocation18 + $0x160] ss:$8 sps:$4 sm:$0xff]  }
 0x676   : > { %5256 = vmatpush1.bf16.msra.mxu0 %v10791_v22  ;;  %8066 = vmatpush1.bf16.msra.mxu1 %v9788_v10  ;;  %v9820_v22 = vcombine.low %v2991_v11, %v3007_v20  ;;  %v10838_v10 = vld [vmem:[#allocation18 + $0x174] ss:$8 sps:$4 sm:$0xff]   ;;  %v10836_v11 = vld [vmem:[#allocation18 + $0x170] ss:$8 sps:$4 sm:$0xff]   ;;  %v10841_v20 = vld [vmem:[#allocation18 + $0x184] ss:$8 sps:$4 sm:$0xff]  }
 0x677   : > { %5257 = vmatprep.subr.bf16.mxu0 %v10796_v25  ;;  %8067 = vmatprep.subr.bf16.mxu1 %v9821_v21  ;;  %v3023_v25 = vld [vmem:[#allocation21 + $0xa00] sm:$0xff] }
 0x678   : > { %v10839_v21 = vld [vmem:[#allocation18 + $0x180] ss:$8 sps:$4 sm:$0xff]  }
 0x67a   : > { %5258 = vmatpush1.bf16.msra.mxu0 %v10794_v27  ;;  %v3039_v27 = vld [vmem:[#allocation21 + $0xa80] sm:$0xff]  ;;  %8068 = vmatpush1.bf16.msra.mxu1 %v9820_v22  ;;  %v10844_v22 = vld [vmem:[#allocation18 + $0x194] ss:$8 sps:$4 sm:$0xff]  }
 0x67b   : > { %5259 = vmatprep.subr.bf16.mxu0 %v10799_v28  ;;  %v9853_v28 = vcombine.high %v3023_v25, %v3039_v27 }
 0x67d   : > { %8069 = vmatprep.subr.bf16.mxu1 %v9853_v28  ;;  %v10845_v28 = vld [vmem:[#allocation18 + $0x1a0] ss:$8 sps:$4 sm:$0xff]  }
 0x67e   : > { %5260 = vmatpush1.bf16.msra.mxu0 %v10797_v30  ;;  %v9852_v30 = vcombine.low %v3023_v25, %v3039_v27  ;;  %v10842_v25 = vld [vmem:[#allocation18 + $0x190] ss:$8 sps:$4 sm:$0xff]   ;;  %v10847_v27 = vld [vmem:[#allocation18 + $0x1a4] ss:$8 sps:$4 sm:$0xff]  }
 0x67f   : > { %5261 = vmatprep.subr.bf16.mxu0 %v10802_v23  ;;  %v3055_v23 = vld [vmem:[#allocation21 + $0xb00] sm:$0xff] }
 0x680   : > { %8070 = vmatpush1.bf16.msra.mxu1 %v9852_v30  ;;  %v10850_v30 = vld [vmem:[#allocation18 + $0x1b4] ss:$8 sps:$4 sm:$0xff]  }
 0x682   : > { %5262 = vmatpush1.bf16.msra.mxu0 %v10800_v26  ;;  %v3071_v26 = vld [vmem:[#allocation21 + $0xb80] sm:$0xff] }
 0x683   : > { %5263 = vmatprep.subr.bf16.mxu0 %v10805_v29  ;;  %v9885_v29 = vcombine.high %v3055_v23, %v3071_v26 }
 0x685   : > { %8071 = vmatprep.subr.bf16.mxu1 %v9885_v29  ;;  %v10851_v29 = vld [vmem:[#allocation18 + $0x1c0] ss:$8 sps:$4 sm:$0xff]  }
 0x686   : > { %5264 = vmatpush1.bf16.msra.mxu0 %v10803_v31  ;;  %v9884_v31 = vcombine.low %v3055_v23, %v3071_v26  ;;  %v10848_v23 = vld [vmem:[#allocation18 + $0x1b0] ss:$8 sps:$4 sm:$0xff]   ;;  %v10853_v26 = vld [vmem:[#allocation18 + $0x1c4] ss:$8 sps:$4 sm:$0xff]  }
 0x687   : > { %5265 = vmatprep.subr.bf16.mxu0 %v10808_v32  ;;  %v3087_v32 = vld [vmem:[#allocation21 + $0xc00] sm:$0xff] }
 0x688   : > { %8072 = vmatpush1.bf16.msra.mxu1 %v9884_v31  ;;  %v10856_v31 = vld [vmem:[#allocation18 + $0x1d4] ss:$8 sps:$4 sm:$0xff]  }
 0x68a   : > { %5266 = vmatpush1.bf16.msra.mxu0 %v10806_v33  ;;  %v3103_v33 = vld [vmem:[#allocation21 + $0xc80] sm:$0xff] }
 0x68b   : > { %5267 = vmatprep.subr.bf16.mxu0 %v10811_v34  ;;  %v9917_v34 = vcombine.high %v3087_v32, %v3103_v33 }
 0x68d   : > { %8073 = vmatprep.subr.bf16.mxu1 %v9917_v34  ;;  %v10859_v34 = vld [vmem:[#allocation18 + $0x1e4] ss:$8 sps:$4 sm:$0xff]  }
 0x68e   : > { %5268 = vmatpush1.bf16.msra.mxu0 %v10809_v37  ;;  %v9916_v37 = vcombine.low %v3087_v32, %v3103_v33  ;;  %v10854_v32 = vld [vmem:[#allocation18 + $0x1d0] ss:$8 sps:$4 sm:$0xff]  }
 0x68f   : > { %5269 = vmatprep.subr.bf16.mxu0 %v10814_v38  ;;  %v12258_v38 = vld [vmem:[#allocation17] sm:$0xf] }
 0x690   : > { %v3275_v8 = vrot.slane %v12258_v38, %v12017_v5  ;;  %8074 = vmatpush1.bf16.msra.mxu1 %v9916_v37  ;;  %v3279_v50 = vrot.slane %v12258_v38, %v12025_v15  ;;  %v3287_v35 = vrot.slane %v12258_v38, %v12028_v14  ;;  %v3283_v33 = vrot.slane %v12258_v38, %v12020_v49  ;;  %v10857_v37 = vld [vmem:[#allocation18 + $0x1e0] ss:$8 sps:$4 sm:$0xff]  }
 0x692   : > { %5270 = vmatpush1.bf16.msra.mxu0 %v10812_v42  ;;  %v3119_v42 = vld [vmem:[#allocation21 + $0xd00] sm:$0xff] }
 0x693   : > { %5280 = vmatprep.subr.bf16.mxu0 %v10817_v45  ;;  %v3135_v45 = vld [vmem:[#allocation21 + $0xd80] sm:$0xff] }
 0x694   : > { %v9949_v47 = vcombine.high %v3119_v42, %v3135_v45  ;;  %v9948_v48 = vcombine.low %v3119_v42, %v3135_v45  ;;  %v10862_v45 = vld [vmem:[#allocation18 + $0x1f4] ss:$8 sps:$4 sm:$0xff]  }
 0x696   : > { %8075 = vmatprep.subr.bf16.mxu1 %v9949_v47  ;;  %v2705_v47 = vld [vmem:[#allocation21 + $0x10] sm:$0xff] }
 0x697   : > { %8076 = vmatpush1.bf16.msra.mxu1 %v9948_v48  ;;  %v10860_v48 = vld [vmem:[#allocation18 + $0x1f0] ss:$8 sps:$4 sm:$0xff]  }
 0x728   : > { %v4729_v51 = vpop.f32.mrb[0].mxu0  ;;  %v12266_v52 = vpop.f32.mrb[0].mxu1 }
 0x729   : > { %v10122_v54 = vadd.f32 %v4729_v51, %v3275_v8  ;;  %v4731_v55 = vpop.f32.mrb[1].mxu0  ;;  %v4895_v58 = vpop.f32.mrb[1].mxu1  ;;  %v10124_v42 = vadd.f32 %v12266_v52, %v3283_v33  ;;  %v2721_v8 = vld [vmem:[#allocation21 + $0x90] sm:$0xff] }
 0x72a   : > { %v10123_v39 = vadd.f32 %v4731_v55, %v3279_v50  ;;  %v10125_v43 = vadd.f32 %v4895_v58, %v3287_v35  ;;  %v4733_v9 = vpop.f32.mrb[2].mxu0  ;;  %v4897_v12 = vpop.f32.mrb[2].mxu1  ;;  %v9537_v35 = vcombine.high %v2705_v47, %v2721_v8  ;;  %v2737_v51 = vld [vmem:[#allocation21 + $0x110] sm:$0xff]  ;;  %v9536_v55 = vcombine.low %v2705_v47, %v2721_v8 }
 0x72b   : > { %v4900_v59 = vmax.f32 %v10122_v54, 0.0  ;;  %v4734_v18 = vpop.f32.mrb[3].mxu0  ;;  %v4898_v40 = vpop.f32.mrb[3].mxu1  ;;  %v4902_v50 = vmax.f32 %v10124_v42, 0.0  ;;  %v2753_v54 = vld [vmem:[#allocation21 + $0x190] sm:$0xff] }
 0x72c   : > { %v4901_v41 = vmax.f32 %v10123_v39, 0.0  ;;  %v4903_v44 = vmax.f32 %v10125_v43, 0.0  ;;  %v9569_v58 = vcombine.high %v2737_v51, %v2753_v54  ;;  %v2769_v39 = vld [vmem:[#allocation21 + $0x210] sm:$0xff]  ;;  %v9568_v52 = vcombine.low %v2737_v51, %v2753_v54  ;;  %v3167_v51 = vld [vmem:[#allocation21 + $0xe80] sm:$0xff] }
 0x72d   : > { %v4904_v13 = vpack.c.bf16 %v4900_v59, %v4900_v59  ;;  %v4906_v38 = vpack.c.bf16 %v4902_v50, %v4902_v50  ;;  %v2785_v43 = vld [vmem:[#allocation21 + $0x290] sm:$0xff] }
 0x72e   : > { %v4905_v60 = vpack.c.bf16 %v4901_v41, %v4901_v41  ;;  %v4907_v46 = vpack.c.bf16 %v4903_v44, %v4903_v44  ;;  %v9601_v9 = vcombine.high %v2769_v39, %v2785_v43  ;;  %v2801_v12 = vld [vmem:[#allocation21 + $0x310] sm:$0xff]  ;;  %v9600_v18 = vcombine.low %v2769_v39, %v2785_v43 }
 0x72f   : > { %v2817_v59 = vld [vmem:[#allocation21 + $0x390] sm:$0xff] }
 0x730   : > { %5271 = vmatprep.mubr.bf16.mxu0 %v4905_v60  ;;  %v9633_v40 = vcombine.high %v2801_v12, %v2817_v59  ;;  %v2833_v41 = vld [vmem:[#allocation21 + $0x410] sm:$0xff]  ;;  %v9632_v60 = vcombine.low %v2801_v12, %v2817_v59 }
 0x731   : > { %5272 = vmatmul.mubr.bf16.vlgmr.msra.gmra.mrb[4].mxu0 %v4904_v13  ;;  %v2849_v44 = vld [vmem:[#allocation21 + $0x490] sm:$0xff] }
 0x732   : > { %5281 = vmatpush1.bf16.msra.mxu0 %v10815_v61  ;;  %5312 = vmatprep.mubr.bf16.mxu0 %v4907_v46  ;;  %v9665_v61 = vcombine.high %v2833_v41, %v2849_v44  ;;  %v2865_v13 = vld [vmem:[#allocation21 + $0x510] sm:$0xff]  ;;  %v9664_v46 = vcombine.low %v2833_v41, %v2849_v44 }
 0x733   : > { %5282 = vmatprep.subr.bf16.mxu0 %v10820_v0  ;;  %v2881_v0 = vld [vmem:[#allocation21 + $0x590] sm:$0xff] }
 0x734   : > { %v3089_v33 = vld [vmem:[#allocation21 + $0xc10] sm:$0xff] }
 0x735   : > { %v3137_v47 = vld [vmem:[#allocation21 + $0xd90] sm:$0xff] }
 0x736   : > { %5283 = vmatpush1.bf16.msra.mxu0 %v10818_v1  ;;  %v9697_v1 = vcombine.high %v2865_v13, %v2881_v0  ;;  %v3153_v54 = vld [vmem:[#allocation21 + $0xe10] sm:$0xff] }
 0x737   : > { %5284 = vmatprep.subr.bf16.mxu0 %v10823_v2  ;;  %v2897_v2 = vld [vmem:[#allocation21 + $0x610] sm:$0xff] }
 0x738   : > { %v3185_v12 = vld [vmem:[#allocation21 + $0xf10] sm:$0xff] }
 0x73a   : > { %5285 = vmatpush1.bf16.msra.mxu0 %v10821_v3  ;;  %v2913_v3 = vld [vmem:[#allocation21 + $0x690] sm:$0xff] }
 0x73b   : > { %5286 = vmatprep.subr.bf16.mxu0 %v10826_v16  ;;  %v9696_v16 = vcombine.low %v2865_v13, %v2881_v0  ;;  %v2707_v13 = vld [vmem:[#allocation21 + $0x20] sm:$0xff] }
 0x73e   : > { %5287 = vmatpush1.bf16.msra.mxu0 %v10824_v4  ;;  %v9729_v4 = vcombine.high %v2897_v2, %v2913_v3 }
 0x73f   : > { %5288 = vmatprep.subr.bf16.mxu0 %v10829_v17  ;;  %v2929_v17 = vld [vmem:[#allocation21 + $0x710] sm:$0xff] }
 0x742   : > { %5289 = vmatpush1.bf16.msra.mxu0 %v10827_v6  ;;  %v2945_v6 = vld [vmem:[#allocation21 + $0x790] sm:$0xff] }
 0x743   : > { %5290 = vmatprep.subr.bf16.mxu0 %v10832_v36  ;;  %v9728_v36 = vcombine.low %v2897_v2, %v2913_v3 }
 0x746   : > { %5291 = vmatpush1.bf16.msra.mxu0 %v10830_v7  ;;  %v9761_v7 = vcombine.high %v2929_v17, %v2945_v6 }
 0x747   : > { %5292 = vmatprep.subr.bf16.mxu0 %v10835_v19  ;;  %v2961_v19 = vld [vmem:[#allocation21 + $0x810] sm:$0xff] }
 0x74a   : > { %5293 = vmatpush1.bf16.msra.mxu0 %v10833_v24  ;;  %v2977_v24 = vld [vmem:[#allocation21 + $0x890] sm:$0xff] }
 0x74b   : > { %5294 = vmatprep.subr.bf16.mxu0 %v10838_v10  ;;  %v9760_v10 = vcombine.low %v2929_v17, %v2945_v6 }
 0x74e   : > { %5295 = vmatpush1.bf16.msra.mxu0 %v10836_v11  ;;  %v9793_v11 = vcombine.high %v2961_v19, %v2977_v24 }
 0x74f   : > { %5296 = vmatprep.subr.bf16.mxu0 %v10841_v20  ;;  %v2993_v20 = vld [vmem:[#allocation21 + $0x910] sm:$0xff] }
 0x752   : > { %5297 = vmatpush1.bf16.msra.mxu0 %v10839_v21  ;;  %v3009_v21 = vld [vmem:[#allocation21 + $0x990] sm:$0xff] }
 0x753   : > { %5298 = vmatprep.subr.bf16.mxu0 %v10844_v22  ;;  %v9792_v22 = vcombine.low %v2961_v19, %v2977_v24 }
 0x756   : > { %5299 = vmatpush1.bf16.msra.mxu0 %v10842_v25  ;;  %v9825_v25 = vcombine.high %v2993_v20, %v3009_v21 }
 0x757   : > { %5300 = vmatprep.subr.bf16.mxu0 %v10847_v27  ;;  %v3025_v27 = vld [vmem:[#allocation21 + $0xa10] sm:$0xff] }
 0x75a   : > { %5301 = vmatpush1.bf16.msra.mxu0 %v10845_v28  ;;  %v3041_v28 = vld [vmem:[#allocation21 + $0xa90] sm:$0xff] }
 0x75b   : > { %5302 = vmatprep.subr.bf16.mxu0 %v10850_v30  ;;  %v9824_v30 = vcombine.low %v2993_v20, %v3009_v21  ;;  %v2736_v21 = vld [vmem:[#allocation21 + $0x108] sm:$0xff] }
 0x75e   : > { %5303 = vmatpush1.bf16.msra.mxu0 %v10848_v23  ;;  %v9857_v23 = vcombine.high %v3025_v27, %v3041_v28 }
 0x75f   : > { %5304 = vmatprep.subr.bf16.mxu0 %v10853_v26  ;;  %v3057_v26 = vld [vmem:[#allocation21 + $0xb10] sm:$0xff] }
 0x762   : > { %5305 = vmatpush1.bf16.msra.mxu0 %v10851_v29  ;;  %v3073_v29 = vld [vmem:[#allocation21 + $0xb90] sm:$0xff] }
 0x763   : > { %5306 = vmatprep.subr.bf16.mxu0 %v10856_v31  ;;  %v9856_v31 = vcombine.low %v3025_v27, %v3041_v28  ;;  %v2755_v27 = vld [vmem:[#allocation21 + $0x1a0] sm:$0xff] }
 0x766   : > { %5307 = vmatpush1.bf16.msra.mxu0 %v10854_v32  ;;  %v9889_v32 = vcombine.high %v3057_v26, %v3073_v29 }
 0x767   : > { %5308 = vmatprep.subr.bf16.mxu0 %v10859_v34  ;;  %v3105_v34 = vld [vmem:[#allocation21 + $0xc90] sm:$0xff] }
 0x768   : > { %v9921_v42 = vcombine.high %v3089_v33, %v3105_v34  ;;  %v9920_v8 = vcombine.low %v3089_v33, %v3105_v34  ;;  %v2787_v33 = vld [vmem:[#allocation21 + $0x2a0] sm:$0xff] }
 0x76a   : > { %5309 = vmatpush1.bf16.msra.mxu0 %v10857_v37  ;;  %v9888_v37 = vcombine.low %v3057_v26, %v3073_v29 }
 0x76b   : > { %5310 = vmatprep.subr.bf16.mxu0 %v10862_v45  ;;  %v3121_v45 = vld [vmem:[#allocation21 + $0xd10] sm:$0xff] }
 0x76c   : > { %v9952_v50 = vcombine.low %v3121_v45, %v3137_v47 }
 0x76e   : > { %5311 = vmatpush1.bf16.msra.mxu0 %v10860_v48  ;;  %v9953_v48 = vcombine.high %v3121_v45, %v3137_v47  ;;  %v2800_v47 = vld [vmem:[#allocation21 + $0x308] sm:$0xff] }
 0x76f   : > { %8131 = vmatprep.subr.bf16.mxu0 %v9537_v35  ;;  %v3151_v35 = vld [vmem:[#allocation21 + $0xe00] sm:$0xff] }
 0x771   : > { %5313 = vmatmul.mubr.bf16.vlgmr.msra.gmra.mrb[4].mxu0 %v4906_v38  ;;  %v3169_v38 = vld [vmem:[#allocation21 + $0xe90] sm:$0xff] }
 0x772   : > { %8132 = vmatpush1.bf16.msra.mxu0 %v9536_v55  ;;  %v9981_v55 = vcombine.high %v3151_v35, %v3167_v51  ;;  %v9984_v39 = vcombine.low %v3153_v54, %v3169_v38  ;;  %v9985_v43 = vcombine.high %v3153_v54, %v3169_v38  ;;  %v2832_v38 = vld [vmem:[#allocation21 + $0x408] sm:$0xff] }
 0x773   : > { %8133 = vmatprep.subr.bf16.mxu0 %v9569_v58  ;;  %v9980_v58 = vcombine.low %v3151_v35, %v3167_v51 }
 0x774   : > { %8077 = vmatprep.subr.bf16.mxu1 %v9981_v55 }
 0x775   : > { %8078 = vmatpush1.bf16.msra.mxu1 %v9980_v58  ;;  %v2848_v58 = vld [vmem:[#allocation21 + $0x488] sm:$0xff] }
 0x776   : > { %8134 = vmatpush1.bf16.msra.mxu0 %v9568_v52  ;;  %v3183_v52 = vld [vmem:[#allocation21 + $0xf00] sm:$0xff] }
 0x777   : > { %8135 = vmatprep.subr.bf16.mxu0 %v9601_v9  ;;  %v3199_v9 = vld [vmem:[#allocation21 + $0xf80] sm:$0xff] }
 0x778   : > { %v10013_v59 = vcombine.high %v3183_v52, %v3199_v9 }
 0x77a   : > { %8136 = vmatpush1.bf16.msra.mxu0 %v9600_v18  ;;  %v3201_v18 = vld [vmem:[#allocation21 + $0xf90] sm:$0xff]  ;;  %8079 = vmatprep.subr.bf16.mxu1 %v10013_v59 }
 0x77b   : > { %8137 = vmatprep.subr.bf16.mxu0 %v9633_v40  ;;  %v10012_v40 = vcombine.low %v3183_v52, %v3199_v9  ;;  %v10016_v41 = vcombine.low %v3185_v12, %v3201_v18  ;;  %v10017_v44 = vcombine.high %v3185_v12, %v3201_v18  ;;  %v9663_v12 = vcombine.high %v2832_v38, %v2848_v58  ;;  %v2864_v18 = vld [vmem:[#allocation21 + $0x508] sm:$0xff] }
 0x77d   : > { %8080 = vmatpush1.bf16.msra.mxu1 %v10012_v40  ;;  %v2880_v40 = vld [vmem:[#allocation21 + $0x588] sm:$0xff] }
 0x77e   : > { %8138 = vmatpush1.bf16.msra.mxu0 %v9632_v60  ;;  %v2704_v60 = vld [vmem:[#allocation21 + $0x8] sm:$0xff] }
 0x77f   : > { %8139 = vmatprep.subr.bf16.mxu0 %v9665_v61  ;;  %v2720_v61 = vld [vmem:[#allocation21 + $0x88] sm:$0xff] }
 0x780   : > { %v9535_v0 = vcombine.high %v2704_v60, %v2720_v61 }
 0x782   : > { %8140 = vmatpush1.bf16.msra.mxu0 %v9664_v46  ;;  %v2723_v46 = vld [vmem:[#allocation21 + $0xa0] sm:$0xff]  ;;  %8090 = vmatprep.subr.bf16.mxu1 %v9535_v0 }
 0x783   : > { %8141 = vmatprep.subr.bf16.mxu0 %v9697_v1  ;;  %v9534_v1 = vcombine.low %v2704_v60, %v2720_v61  ;;  %v9540_v2 = vcombine.low %v2707_v13, %v2723_v46  ;;  %v9541_v3 = vcombine.high %v2707_v13, %v2723_v46  ;;  %v9662_v60 = vcombine.low %v2832_v38, %v2848_v58  ;;  %v2896_v46 = vld [vmem:[#allocation21 + $0x608] sm:$0xff] }
 0x784   : > { %v9695_v13 = vcombine.high %v2864_v18, %v2880_v40 }
 0x786   : > { %8142 = vmatpush1.bf16.msra.mxu0 %v9696_v16  ;;  %v2702_v16 = vld [vmem:[#allocation20] sm:$0x3] }
 0x787   : > { %8143 = vmatprep.subr.bf16.mxu0 %v9729_v4  ;;  %v4912_v4 = vrot.slane %v2702_v16, %v12017_v5  ;;  %v4916_v17 = vrot.slane %v2702_v16, %v12025_v15  ;;  %v9694_v16 = vcombine.low %v2864_v18, %v2880_v40 }
 0x78a   : > { %8144 = vmatpush1.bf16.msra.mxu0 %v9728_v36 }
 0x78b   : > { %8145 = vmatprep.subr.bf16.mxu0 %v9761_v7 }
 0x78e   : > { %8146 = vmatpush1.bf16.msra.mxu0 %v9760_v10 }
 0x78f   : > { %8147 = vmatprep.subr.bf16.mxu0 %v9793_v11 }
 0x792   : > { %8148 = vmatpush1.bf16.msra.mxu0 %v9792_v22  ;;  %v2752_v22 = vld [vmem:[#allocation21 + $0x188] sm:$0xff] }
 0x793   : > { %8149 = vmatprep.subr.bf16.mxu0 %v9825_v25  ;;  %v2739_v25 = vld [vmem:[#allocation21 + $0x120] sm:$0xff]  ;;  %v9567_v26 = vcombine.high %v2736_v21, %v2752_v22  ;;  %v9566_v34 = vcombine.low %v2736_v21, %v2752_v22  ;;  %v2960_v22 = vld [vmem:[#allocation21 + $0x808] sm:$0xff] }
 0x794   : > { %v9573_v29 = vcombine.high %v2739_v25, %v2755_v27 }
 0x796   : > { %8150 = vmatpush1.bf16.msra.mxu0 %v9824_v30 }
 0x797   : > { %8151 = vmatprep.subr.bf16.mxu0 %v9857_v23  ;;  %v2768_v23 = vld [vmem:[#allocation21 + $0x208] sm:$0xff] }
 0x79a   : > { %8152 = vmatpush1.bf16.msra.mxu0 %v9856_v31  ;;  %v2784_v31 = vld [vmem:[#allocation21 + $0x288] sm:$0xff] }
 0x79b   : > { %8153 = vmatprep.subr.bf16.mxu0 %v9889_v32  ;;  %v2771_v32 = vld [vmem:[#allocation21 + $0x220] sm:$0xff]  ;;  %v9598_v35 = vcombine.low %v2768_v23, %v2784_v31 }
 0x79c   : > { %v9605_v45 = vcombine.high %v2771_v32, %v2787_v33  ;;  %v9604_v51 = vcombine.low %v2771_v32, %v2787_v33  ;;  %v2992_v33 = vld [vmem:[#allocation21 + $0x908] sm:$0xff] }
 0x79e   : > { %8154 = vmatpush1.bf16.msra.mxu0 %v9888_v37  ;;  %v9572_v37 = vcombine.low %v2739_v25, %v2755_v27  ;;  %v2976_v25 = vld [vmem:[#allocation21 + $0x888] sm:$0xff]  ;;  %v2963_v27 = vld [vmem:[#allocation21 + $0x820] sm:$0xff] }
 0x79f   : > { %8155 = vmatprep.subr.bf16.mxu0 %v9921_v42  ;;  %v9599_v42 = vcombine.high %v2768_v23, %v2784_v31  ;;  %v2979_v23 = vld [vmem:[#allocation21 + $0x8a0] sm:$0xff]  ;;  %v9791_v31 = vcombine.high %v2960_v22, %v2976_v25 }
 0x7a0   : > { %v9797_v32 = vcombine.high %v2963_v27, %v2979_v23 }
 0x7a2   : > { %8156 = vmatpush1.bf16.msra.mxu0 %v9920_v8  ;;  %v2816_v8 = vld [vmem:[#allocation21 + $0x388] sm:$0xff] }
 0x7a3   : > { %8157 = vmatprep.subr.bf16.mxu0 %v9953_v48  ;;  %v2803_v48 = vld [vmem:[#allocation21 + $0x320] sm:$0xff]  ;;  %v9631_v54 = vcombine.high %v2800_v47, %v2816_v8  ;;  %v9630_v52 = vcombine.low %v2800_v47, %v2816_v8  ;;  %v9796_v47 = vcombine.low %v2963_v27, %v2979_v23  ;;  %v3184_v23 = vld [vmem:[#allocation21 + $0xf08] sm:$0xff] }
 0x7a6   : > { %8158 = vmatpush1.bf16.msra.mxu0 %v9952_v50  ;;  %v2819_v50 = vld [vmem:[#allocation21 + $0x3a0] sm:$0xff] }
 0x7a7   : > { %8159 = vmatprep.subr.bf16.mxu0 %v9985_v43  ;;  %v9637_v55 = vcombine.high %v2803_v48, %v2819_v50  ;;  %v2851_v43 = vld [vmem:[#allocation21 + $0x4a0] sm:$0xff]  ;;  %v9636_v9 = vcombine.low %v2803_v48, %v2819_v50  ;;  %v3024_v50 = vld [vmem:[#allocation21 + $0xa08] sm:$0xff] }
 0x7aa   : > { %8160 = vmatpush1.bf16.msra.mxu0 %v9984_v39  ;;  %v2835_v39 = vld [vmem:[#allocation21 + $0x420] sm:$0xff] }
 0x7ab   : > { %8161 = vmatprep.subr.bf16.mxu0 %v10017_v44  ;;  %v9669_v59 = vcombine.high %v2835_v39, %v2851_v43  ;;  %v2883_v44 = vld [vmem:[#allocation21 + $0x5a0] sm:$0xff]  ;;  %v9668_v61 = vcombine.low %v2835_v39, %v2851_v43  ;;  %v3056_v43 = vld [vmem:[#allocation21 + $0xb08] sm:$0xff] }
 0x7ae   : > { %8162 = vmatpush1.bf16.msra.mxu0 %v10016_v41  ;;  %v2867_v41 = vld [vmem:[#allocation21 + $0x520] sm:$0xff] }
 0x7af   : > { %8213 = vmatprep.subr.bf16.mxu0 %v9541_v3  ;;  %v9701_v0 = vcombine.high %v2867_v41, %v2883_v44  ;;  %v2915_v3 = vld [vmem:[#allocation21 + $0x6a0] sm:$0xff] }
 0x844   : > { %v5314_v6 = vpop.f32.mrb[4].mxu0 }
 0x845   : > { %v10126_v36 = vadd.f32 %v5314_v6, %v4912_v4  ;;  %v5316_v7 = vpop.f32.mrb[5].mxu0  ;;  %v9700_v4 = vcombine.low %v2867_v41, %v2883_v44  ;;  %v3088_v44 = vld [vmem:[#allocation21 + $0xc08] sm:$0xff] }
 0x846   : > { %v10127_v19 = vadd.f32 %v5316_v7, %v4916_v17  ;;  %v5318_v24 = vpop.f32.mrb[6].mxu0  ;;  %v2944_v7 = vld [vmem:[#allocation21 + $0x788] sm:$0xff] }
 0x847   : > { %v5321_v10 = vmax.f32 %v10126_v36, 0.0  ;;  %v5319_v11 = vpop.f32.mrb[7].mxu0  ;;  %v2928_v36 = vld [vmem:[#allocation21 + $0x708] sm:$0xff]  ;;  %v2947_v24 = vld [vmem:[#allocation21 + $0x7a0] sm:$0xff] }
 0x848   : > { %v5322_v20 = vmax.f32 %v10127_v19, 0.0  ;;  %v2931_v19 = vld [vmem:[#allocation21 + $0x720] sm:$0xff] }
 0x849   : > { %v12275_v30 = vpack.c.bf16 %v5321_v10, %v5321_v10  ;;  %v9765_v21 = vcombine.high %v2931_v19, %v2947_v24 }
 0x84a   : > { %v12273_v28 = vpack.c.bf16 %v5322_v20, %v5322_v20  ;;  %v9759_v20 = vcombine.high %v2928_v36, %v2944_v7 }
 0x84c   : > { %8081 = vmatprep.mubr.bf16.mxu1 %v12273_v28  ;;  %8163 = vmatprep.mubr.bf16.mxu0 %v12273_v28 }
 0x84d   : > { %8082 = vmatmul.mubr.bf16.vlgmr.msra.gmra.mrb[4].mxu1 %v12275_v30  ;;  %8164 = vmatmul.mubr.bf16.vlgmr.msra.gmra.mrb[8].mxu0 %v12275_v30 }
 0x84e   : > { %8091 = vmatpush1.bf16.msra.mxu1 %v9534_v1  ;;  %8214 = vmatpush1.bf16.msra.mxu0 %v9540_v2  ;;  %v2912_v1 = vld [vmem:[#allocation21 + $0x688] sm:$0xff]  ;;  %v2899_v2 = vld [vmem:[#allocation21 + $0x620] sm:$0xff] }
 0x84f   : > { %8122 = vmatprep.mubr.bf16.mxu1 %v12273_v28  ;;  %8245 = vmatprep.mubr.bf16.mxu0 %v12273_v28  ;;  %v9727_v17 = vcombine.high %v2896_v46, %v2912_v1  ;;  %v9733_v6 = vcombine.high %v2899_v2, %v2915_v3  ;;  %v9726_v10 = vcombine.low %v2896_v46, %v2912_v1 }
 0x850   : > { %8092 = vmatprep.subr.bf16.mxu1 %v9567_v26  ;;  %8215 = vmatprep.subr.bf16.mxu0 %v9573_v29  ;;  %v9732_v11 = vcombine.low %v2899_v2, %v2915_v3  ;;  %v9758_v26 = vcombine.low %v2928_v36, %v2944_v7  ;;  %v9764_v29 = vcombine.low %v2931_v19, %v2947_v24  ;;  %v3120_v3 = vld [vmem:[#allocation21 + $0xd08] sm:$0xff] }
 0x851   : > { %v3152_v24 = vld [vmem:[#allocation21 + $0xe08] sm:$0xff] }
 0x852   : > { %8093 = vmatpush1.bf16.msra.mxu1 %v9566_v34  ;;  %8216 = vmatpush1.bf16.msra.mxu0 %v9572_v37  ;;  %v3008_v34 = vld [vmem:[#allocation21 + $0x988] sm:$0xff]  ;;  %v2995_v37 = vld [vmem:[#allocation21 + $0x920] sm:$0xff] }
 0x853   : > { %8094 = vmatprep.subr.bf16.mxu1 %v9599_v42  ;;  %8217 = vmatprep.subr.bf16.mxu0 %v9605_v45  ;;  %v3011_v42 = vld [vmem:[#allocation21 + $0x9a0] sm:$0xff]  ;;  %v9790_v45 = vcombine.low %v2960_v22, %v2976_v25  ;;  %v9823_v8 = vcombine.high %v2992_v33, %v3008_v34 }
 0x854   : > { %v9829_v48 = vcombine.high %v2995_v37, %v3011_v42  ;;  %v9828_v38 = vcombine.low %v2995_v37, %v3011_v42  ;;  %v2706_v42 = vld [vmem:[#allocation21 + $0x18] sm:$0xff] }
 0x856   : > { %8095 = vmatpush1.bf16.msra.mxu1 %v9598_v35  ;;  %8218 = vmatpush1.bf16.msra.mxu0 %v9604_v51  ;;  %v3040_v35 = vld [vmem:[#allocation21 + $0xa88] sm:$0xff]  ;;  %v3027_v51 = vld [vmem:[#allocation21 + $0xa20] sm:$0xff] }
 0x857   : > { %8096 = vmatprep.subr.bf16.mxu1 %v9631_v54  ;;  %8219 = vmatprep.subr.bf16.mxu0 %v9637_v55  ;;  %v3043_v54 = vld [vmem:[#allocation21 + $0xaa0] sm:$0xff]  ;;  %v9822_v55 = vcombine.low %v2992_v33, %v3008_v34  ;;  %v9855_v58 = vcombine.high %v3024_v50, %v3040_v35 }
 0x858   : > { %v9861_v39 = vcombine.high %v3027_v51, %v3043_v54  ;;  %v9860_v18 = vcombine.low %v3027_v51, %v3043_v54  ;;  %v2738_v54 = vld [vmem:[#allocation21 + $0x118] sm:$0xff] }
 0x85a   : > { %8097 = vmatpush1.bf16.msra.mxu1 %v9630_v52  ;;  %8220 = vmatpush1.bf16.msra.mxu0 %v9636_v9  ;;  %v3072_v52 = vld [vmem:[#allocation21 + $0xb88] sm:$0xff]  ;;  %v3059_v9 = vld [vmem:[#allocation21 + $0xb20] sm:$0xff] }
 0x85b   : > { %8098 = vmatprep.subr.bf16.mxu1 %v9663_v12  ;;  %8221 = vmatprep.subr.bf16.mxu0 %v9669_v59  ;;  %v3075_v12 = vld [vmem:[#allocation21 + $0xba0] sm:$0xff]  ;;  %v9854_v59 = vcombine.low %v3024_v50, %v3040_v35  ;;  %v9887_v40 = vcombine.high %v3056_v43, %v3072_v52 }
 0x85c   : > { %v9893_v41 = vcombine.high %v3059_v9, %v3075_v12  ;;  %v9892_v46 = vcombine.low %v3059_v9, %v3075_v12  ;;  %v2770_v12 = vld [vmem:[#allocation21 + $0x218] sm:$0xff] }
 0x85e   : > { %8099 = vmatpush1.bf16.msra.mxu1 %v9662_v60  ;;  %8222 = vmatpush1.bf16.msra.mxu0 %v9668_v61  ;;  %v3104_v60 = vld [vmem:[#allocation21 + $0xc88] sm:$0xff]  ;;  %v3091_v61 = vld [vmem:[#allocation21 + $0xc20] sm:$0xff] }
 0x85f   : > { %8100 = vmatprep.subr.bf16.mxu1 %v9695_v13  ;;  %8223 = vmatprep.subr.bf16.mxu0 %v9701_v0  ;;  %v3107_v13 = vld [vmem:[#allocation21 + $0xca0] sm:$0xff]  ;;  %v9886_v0 = vcombine.low %v3056_v43, %v3072_v52  ;;  %v9919_v1 = vcombine.high %v3088_v44, %v3104_v60 }
 0x860   : > { %v9925_v2 = vcombine.high %v3091_v61, %v3107_v13  ;;  %v9924_v36 = vcombine.low %v3091_v61, %v3107_v13  ;;  %v2802_v13 = vld [vmem:[#allocation21 + $0x318] sm:$0xff] }
 0x862   : > { %8101 = vmatpush1.bf16.msra.mxu1 %v9694_v16  ;;  %8224 = vmatpush1.bf16.msra.mxu0 %v9700_v4  ;;  %v3136_v16 = vld [vmem:[#allocation21 + $0xd88] sm:$0xff]  ;;  %v3123_v4 = vld [vmem:[#allocation21 + $0xd20] sm:$0xff] }
 0x863   : > { %8102 = vmatprep.subr.bf16.mxu1 %v9727_v17  ;;  %8225 = vmatprep.subr.bf16.mxu0 %v9733_v6  ;;  %v3139_v17 = vld [vmem:[#allocation21 + $0xda0] sm:$0xff]  ;;  %v9918_v6 = vcombine.low %v3088_v44, %v3104_v60  ;;  %v9951_v7 = vcombine.high %v3120_v3, %v3136_v16 }
 0x864   : > { %v9957_v19 = vcombine.high %v3123_v4, %v3139_v17  ;;  %v9956_v22 = vcombine.low %v3123_v4, %v3139_v17  ;;  %v2834_v17 = vld [vmem:[#allocation21 + $0x418] sm:$0xff] }
 0x866   : > { %8103 = vmatpush1.bf16.msra.mxu1 %v9726_v10  ;;  %8226 = vmatpush1.bf16.msra.mxu0 %v9732_v11  ;;  %v3168_v10 = vld [vmem:[#allocation21 + $0xe88] sm:$0xff]  ;;  %v3155_v11 = vld [vmem:[#allocation21 + $0xe20] sm:$0xff] }
 0x867   : > { %8104 = vmatprep.subr.bf16.mxu1 %v9759_v20  ;;  %8227 = vmatprep.subr.bf16.mxu0 %v9765_v21  ;;  %v3171_v20 = vld [vmem:[#allocation21 + $0xea0] sm:$0xff]  ;;  %v9950_v21 = vcombine.low %v3120_v3, %v3136_v16  ;;  %v9983_v25 = vcombine.high %v3152_v24, %v3168_v10 }
 0x868   : > { %v9989_v27 = vcombine.high %v3155_v11, %v3171_v20  ;;  %v9988_v33 = vcombine.low %v3155_v11, %v3171_v20  ;;  %v2866_v20 = vld [vmem:[#allocation21 + $0x518] sm:$0xff] }
 0x86a   : > { %8105 = vmatpush1.bf16.msra.mxu1 %v9758_v26  ;;  %8228 = vmatpush1.bf16.msra.mxu0 %v9764_v29  ;;  %v3200_v26 = vld [vmem:[#allocation21 + $0xf88] sm:$0xff]  ;;  %v3187_v29 = vld [vmem:[#allocation21 + $0xf20] sm:$0xff] }
 0x86b   : > { %8106 = vmatprep.subr.bf16.mxu1 %v9791_v31  ;;  %8229 = vmatprep.subr.bf16.mxu0 %v9797_v32  ;;  %v3203_v31 = vld [vmem:[#allocation21 + $0xfa0] sm:$0xff]  ;;  %v9982_v32 = vcombine.low %v3152_v24, %v3168_v10  ;;  %v10015_v34 = vcombine.high %v3184_v23, %v3200_v26 }
 0x86c   : > { %v10021_v37 = vcombine.high %v3187_v29, %v3203_v31  ;;  %v10020_v50 = vcombine.low %v3187_v29, %v3203_v31  ;;  %v2898_v31 = vld [vmem:[#allocation21 + $0x618] sm:$0xff] }
 0x86e   : > { %8107 = vmatpush1.bf16.msra.mxu1 %v9790_v45  ;;  %8230 = vmatpush1.bf16.msra.mxu0 %v9796_v47  ;;  %v2722_v45 = vld [vmem:[#allocation21 + $0x98] sm:$0xff]  ;;  %v2709_v47 = vld [vmem:[#allocation21 + $0x30] sm:$0xff] }
 0x86f   : > { %8108 = vmatprep.subr.bf16.mxu1 %v9823_v8  ;;  %8231 = vmatprep.subr.bf16.mxu0 %v9829_v48  ;;  %v2725_v8 = vld [vmem:[#allocation21 + $0xb0] sm:$0xff]  ;;  %v10014_v48 = vcombine.low %v3184_v23, %v3200_v26  ;;  %v9539_v35 = vcombine.high %v2706_v42, %v2722_v45 }
 0x870   : > { %v9545_v51 = vcombine.high %v2709_v47, %v2725_v8  ;;  %v9544_v43 = vcombine.low %v2709_v47, %v2725_v8  ;;  %v2930_v8 = vld [vmem:[#allocation21 + $0x718] sm:$0xff] }
 0x872   : > { %8109 = vmatpush1.bf16.msra.mxu1 %v9822_v55  ;;  %8232 = vmatpush1.bf16.msra.mxu0 %v9828_v38  ;;  %v2754_v55 = vld [vmem:[#allocation21 + $0x198] sm:$0xff]  ;;  %v2741_v38 = vld [vmem:[#allocation21 + $0x130] sm:$0xff] }
 0x873   : > { %8110 = vmatprep.subr.bf16.mxu1 %v9855_v58  ;;  %8233 = vmatprep.subr.bf16.mxu0 %v9861_v39  ;;  %v2757_v58 = vld [vmem:[#allocation21 + $0x1b0] sm:$0xff]  ;;  %v9538_v39 = vcombine.low %v2706_v42, %v2722_v45  ;;  %v9571_v52 = vcombine.high %v2738_v54, %v2754_v55 }
 0x874   : > { %v9577_v9 = vcombine.high %v2741_v38, %v2757_v58  ;;  %v9576_v44 = vcombine.low %v2741_v38, %v2757_v58  ;;  %v2962_v58 = vld [vmem:[#allocation21 + $0x818] sm:$0xff] }
 0x876   : > { %8111 = vmatpush1.bf16.msra.mxu1 %v9854_v59  ;;  %8234 = vmatpush1.bf16.msra.mxu0 %v9860_v18  ;;  %v2786_v59 = vld [vmem:[#allocation21 + $0x298] sm:$0xff]  ;;  %v2773_v18 = vld [vmem:[#allocation21 + $0x230] sm:$0xff] }
 0x877   : > { %8112 = vmatprep.subr.bf16.mxu1 %v9887_v40  ;;  %8235 = vmatprep.subr.bf16.mxu0 %v9893_v41  ;;  %v2789_v40 = vld [vmem:[#allocation21 + $0x2b0] sm:$0xff]  ;;  %v9570_v41 = vcombine.low %v2738_v54, %v2754_v55  ;;  %v9603_v60 = vcombine.high %v2770_v12, %v2786_v59 }
 0x878   : > { %v9609_v61 = vcombine.high %v2773_v18, %v2789_v40  ;;  %v9608_v3 = vcombine.low %v2773_v18, %v2789_v40  ;;  %v2994_v40 = vld [vmem:[#allocation21 + $0x918] sm:$0xff] }
 0x87a   : > { %8113 = vmatpush1.bf16.msra.mxu1 %v9886_v0  ;;  %8236 = vmatpush1.bf16.msra.mxu0 %v9892_v46  ;;  %v2818_v0 = vld [vmem:[#allocation21 + $0x398] sm:$0xff]  ;;  %v2805_v46 = vld [vmem:[#allocation21 + $0x330] sm:$0xff] }
 0x87b   : > { %8114 = vmatprep.subr.bf16.mxu1 %v9919_v1  ;;  %8237 = vmatprep.subr.bf16.mxu0 %v9925_v2  ;;  %v2821_v1 = vld [vmem:[#allocation21 + $0x3b0] sm:$0xff]  ;;  %v9602_v2 = vcombine.low %v2770_v12, %v2786_v59  ;;  %v9635_v16 = vcombine.high %v2802_v13, %v2818_v0 }
 0x87c   : > { %v9641_v4 = vcombine.high %v2805_v46, %v2821_v1  ;;  %v9640_v24 = vcombine.low %v2805_v46, %v2821_v1  ;;  %v3026_v1 = vld [vmem:[#allocation21 + $0xa18] sm:$0xff] }
 0x87e   : > { %8115 = vmatpush1.bf16.msra.mxu1 %v9918_v6  ;;  %8238 = vmatpush1.bf16.msra.mxu0 %v9924_v36  ;;  %v2850_v6 = vld [vmem:[#allocation21 + $0x498] sm:$0xff]  ;;  %v2837_v36 = vld [vmem:[#allocation21 + $0x430] sm:$0xff] }
 0x87f   : > { %8116 = vmatprep.subr.bf16.mxu1 %v9951_v7  ;;  %8239 = vmatprep.subr.bf16.mxu0 %v9957_v19  ;;  %v2853_v7 = vld [vmem:[#allocation21 + $0x4b0] sm:$0xff]  ;;  %v9634_v19 = vcombine.low %v2802_v13, %v2818_v0  ;;  %v9667_v10 = vcombine.high %v2834_v17, %v2850_v6 }
 0x880   : > { %v9673_v11 = vcombine.high %v2837_v36, %v2853_v7  ;;  %v9672_v23 = vcombine.low %v2837_v36, %v2853_v7  ;;  %v3058_v7 = vld [vmem:[#allocation21 + $0xb18] sm:$0xff] }
 0x882   : > { %8117 = vmatpush1.bf16.msra.mxu1 %v9950_v21  ;;  %8240 = vmatpush1.bf16.msra.mxu0 %v9956_v22  ;;  %v2882_v21 = vld [vmem:[#allocation21 + $0x598] sm:$0xff]  ;;  %v2869_v22 = vld [vmem:[#allocation21 + $0x530] sm:$0xff] }
 0x883   : > { %8118 = vmatprep.subr.bf16.mxu1 %v9983_v25  ;;  %8241 = vmatprep.subr.bf16.mxu0 %v9989_v27  ;;  %v2885_v25 = vld [vmem:[#allocation21 + $0x5b0] sm:$0xff]  ;;  %v9666_v27 = vcombine.low %v2834_v17, %v2850_v6  ;;  %v9699_v26 = vcombine.high %v2866_v20, %v2882_v21 }
 0x884   : > { %v9705_v29 = vcombine.high %v2869_v22, %v2885_v25  ;;  %v9704_v42 = vcombine.low %v2869_v22, %v2885_v25  ;;  %v3090_v25 = vld [vmem:[#allocation21 + $0xc18] sm:$0xff] }
 0x886   : > { %8119 = vmatpush1.bf16.msra.mxu1 %v9982_v32  ;;  %8242 = vmatpush1.bf16.msra.mxu0 %v9988_v33  ;;  %v2914_v32 = vld [vmem:[#allocation21 + $0x698] sm:$0xff]  ;;  %v2901_v33 = vld [vmem:[#allocation21 + $0x630] sm:$0xff] }
 0x887   : > { %8120 = vmatprep.subr.bf16.mxu1 %v10015_v34  ;;  %8243 = vmatprep.subr.bf16.mxu0 %v10021_v37  ;;  %v2917_v34 = vld [vmem:[#allocation21 + $0x6b0] sm:$0xff]  ;;  %v9698_v37 = vcombine.low %v2866_v20, %v2882_v21  ;;  %v9731_v45 = vcombine.high %v2898_v31, %v2914_v32 }
 0x888   : > { %v9737_v47 = vcombine.high %v2901_v33, %v2917_v34  ;;  %v9736_v54 = vcombine.low %v2901_v33, %v2917_v34  ;;  %v3122_v34 = vld [vmem:[#allocation21 + $0xd18] sm:$0xff] }
 0x88a   : > { %8121 = vmatpush1.bf16.msra.mxu1 %v10014_v48  ;;  %8244 = vmatpush1.bf16.msra.mxu0 %v10020_v50  ;;  %v2946_v48 = vld [vmem:[#allocation21 + $0x798] sm:$0xff]  ;;  %v2933_v50 = vld [vmem:[#allocation21 + $0x730] sm:$0xff] }
 0x88b   : > { %8172 = vmatprep.subr.bf16.mxu1 %v9539_v35  ;;  %8295 = vmatprep.subr.bf16.mxu0 %v9545_v51  ;;  %v2949_v35 = vld [vmem:[#allocation21 + $0x7b0] sm:$0xff]  ;;  %v9730_v51 = vcombine.low %v2898_v31, %v2914_v32  ;;  %v9763_v55 = vcombine.high %v2930_v8, %v2946_v48 }
 0x88c   : > { %v9769_v38 = vcombine.high %v2933_v50, %v2949_v35  ;;  %v9768_v12 = vcombine.low %v2933_v50, %v2949_v35  ;;  %v3154_v35 = vld [vmem:[#allocation21 + $0xe18] sm:$0xff] }
 0x88d   : > { %8123 = vmatmul.mubr.bf16.vlgmr.msra.gmra.mrb[8].mxu1 %v12275_v30  ;;  %8246 = vmatmul.mubr.bf16.vlgmr.msra.gmra.mrb[12].mxu0 %v12275_v30 }
 0x88e   : > { %8173 = vmatpush1.bf16.msra.mxu1 %v9538_v39  ;;  %8204 = vmatprep.mubr.bf16.mxu1 %v12273_v28  ;;  %v2978_v39 = vld [vmem:[#allocation21 + $0x898] sm:$0xff] }
 0x88f   : > { %8296 = vmatpush1.bf16.msra.mxu0 %v9544_v43  ;;  %8327 = vmatprep.mubr.bf16.mxu0 %v12273_v28  ;;  %v2965_v43 = vld [vmem:[#allocation21 + $0x830] sm:$0xff]  ;;  %v9795_v59 = vcombine.high %v2962_v58, %v2978_v39 }
 0x890   : > { %8174 = vmatprep.subr.bf16.mxu1 %v9571_v52  ;;  %8297 = vmatprep.subr.bf16.mxu0 %v9577_v9  ;;  %v2981_v52 = vld [vmem:[#allocation21 + $0x8b0] sm:$0xff]  ;;  %v9762_v9 = vcombine.low %v2930_v8, %v2946_v48 }
 0x891   : > { %v9801_v18 = vcombine.high %v2965_v43, %v2981_v52  ;;  %v9800_v13 = vcombine.low %v2965_v43, %v2981_v52  ;;  %v3186_v52 = vld [vmem:[#allocation21 + $0xf18] sm:$0xff] }
 0x892   : > { %8175 = vmatpush1.bf16.msra.mxu1 %v9570_v41  ;;  %v3010_v41 = vld [vmem:[#allocation21 + $0x998] sm:$0xff] }
 0x893   : > { %8298 = vmatpush1.bf16.msra.mxu0 %v9576_v44  ;;  %8176 = vmatprep.subr.bf16.mxu1 %v9603_v60  ;;  %v2997_v44 = vld [vmem:[#allocation21 + $0x930] sm:$0xff]  ;;  %v9827_v0 = vcombine.high %v2994_v40, %v3010_v41 }
 0x894   : > { %8299 = vmatprep.subr.bf16.mxu0 %v9609_v61  ;;  %v3013_v60 = vld [vmem:[#allocation21 + $0x9b0] sm:$0xff]  ;;  %v9794_v61 = vcombine.low %v2962_v58, %v2978_v39 }
 0x895   : > { %v9833_v46 = vcombine.high %v2997_v44, %v3013_v60  ;;  %v9832_v17 = vcombine.low %v2997_v44, %v3013_v60  ;;  %v2708_v60 = vld [vmem:[#allocation21 + $0x28] sm:$0xff] }
 0x896   : > { %8177 = vmatpush1.bf16.msra.mxu1 %v9602_v2  ;;  %v3042_v2 = vld [vmem:[#allocation21 + $0xa98] sm:$0xff] }
 0x897   : > { %8300 = vmatpush1.bf16.msra.mxu0 %v9608_v3  ;;  %8178 = vmatprep.subr.bf16.mxu1 %v9635_v16  ;;  %v3029_v3 = vld [vmem:[#allocation21 + $0xa30] sm:$0xff]  ;;  %v9859_v6 = vcombine.high %v3026_v1, %v3042_v2 }
 0x898   : > { %8301 = vmatprep.subr.bf16.mxu0 %v9641_v4  ;;  %v3045_v16 = vld [vmem:[#allocation21 + $0xab0] sm:$0xff]  ;;  %v9826_v4 = vcombine.low %v2994_v40, %v3010_v41 }
 0x899   : > { %v9865_v36 = vcombine.high %v3029_v3, %v3045_v16  ;;  %v9864_v20 = vcombine.low %v3029_v3, %v3045_v16  ;;  %v2740_v16 = vld [vmem:[#allocation21 + $0x128] sm:$0xff] }
 0x89a   : > { %8179 = vmatpush1.bf16.msra.mxu1 %v9634_v19  ;;  %v3074_v19 = vld [vmem:[#allocation21 + $0xb98] sm:$0xff] }
 0x89b   : > { %8302 = vmatpush1.bf16.msra.mxu0 %v9640_v24  ;;  %8180 = vmatprep.subr.bf16.mxu1 %v9667_v10  ;;  %v3061_v24 = vld [vmem:[#allocation21 + $0xb30] sm:$0xff]  ;;  %v9891_v21 = vcombine.high %v3058_v7, %v3074_v19 }
 0x89c   : > { %8303 = vmatprep.subr.bf16.mxu0 %v9673_v11  ;;  %v3077_v10 = vld [vmem:[#allocation21 + $0xbb0] sm:$0xff]  ;;  %v9858_v11 = vcombine.low %v3026_v1, %v3042_v2 }
 0x89d   : > { %v9897_v22 = vcombine.high %v3061_v24, %v3077_v10  ;;  %v9896_v31 = vcombine.low %v3061_v24, %v3077_v10  ;;  %v2772_v24 = vld [vmem:[#allocation21 + $0x228] sm:$0xff] }
 0x89e   : > { %8181 = vmatpush1.bf16.msra.mxu1 %v9666_v27  ;;  %v3106_v27 = vld [vmem:[#allocation21 + $0xc98] sm:$0xff]  ;;  %v2788_v10 = vld [vmem:[#allocation21 + $0x2a8] sm:$0xff] }
 0x89f   : > { %8304 = vmatpush1.bf16.msra.mxu0 %v9672_v23  ;;  %8182 = vmatprep.subr.bf16.mxu1 %v9699_v26  ;;  %v3093_v23 = vld [vmem:[#allocation21 + $0xc30] sm:$0xff]  ;;  %v9923_v32 = vcombine.high %v3090_v25, %v3106_v27 }
 0x8a0   : > { %8305 = vmatprep.subr.bf16.mxu0 %v9705_v29  ;;  %v3109_v26 = vld [vmem:[#allocation21 + $0xcb0] sm:$0xff]  ;;  %v9890_v29 = vcombine.low %v3058_v7, %v3074_v19 }
 0x8a1   : > { %v9929_v33 = vcombine.high %v3093_v23, %v3109_v26  ;;  %v9928_v8 = vcombine.low %v3093_v23, %v3109_v26  ;;  %v2804_v26 = vld [vmem:[#allocation21 + $0x328] sm:$0xff] }
 0x8a2   : > { %8183 = vmatpush1.bf16.msra.mxu1 %v9698_v37  ;;  %v3138_v37 = vld [vmem:[#allocation21 + $0xd98] sm:$0xff] }
 0x8a3   : > { %8306 = vmatpush1.bf16.msra.mxu0 %v9704_v42  ;;  %8184 = vmatprep.subr.bf16.mxu1 %v9731_v45  ;;  %v3125_v42 = vld [vmem:[#allocation21 + $0xd30] sm:$0xff]  ;;  %v9955_v48 = vcombine.high %v3122_v34, %v3138_v37 }
 0x8a4   : > { %8307 = vmatprep.subr.bf16.mxu0 %v9737_v47  ;;  %v3141_v45 = vld [vmem:[#allocation21 + $0xdb0] sm:$0xff]  ;;  %v9922_v47 = vcombine.low %v3090_v25, %v3106_v27  ;;  %v9607_v27 = vcombine.high %v2772_v24, %v2788_v10 }
 0x8a5   : > { %v9961_v50 = vcombine.high %v3125_v42, %v3141_v45  ;;  %v9960_v58 = vcombine.low %v3125_v42, %v3141_v45  ;;  %v2836_v45 = vld [vmem:[#allocation21 + $0x428] sm:$0xff] }
 0x8a6   : > { %8185 = vmatpush1.bf16.msra.mxu1 %v9730_v51  ;;  %v3170_v51 = vld [vmem:[#allocation21 + $0xe98] sm:$0xff] }
 0x8a7   : > { %8308 = vmatpush1.bf16.msra.mxu0 %v9736_v54  ;;  %8186 = vmatprep.subr.bf16.mxu1 %v9763_v55  ;;  %v3157_v54 = vld [vmem:[#allocation21 + $0xe30] sm:$0xff]  ;;  %v9987_v39 = vcombine.high %v3154_v35, %v3170_v51 }
 0x8a8   : > { %8309 = vmatprep.subr.bf16.mxu0 %v9769_v38  ;;  %v3173_v55 = vld [vmem:[#allocation21 + $0xeb0] sm:$0xff]  ;;  %v9954_v38 = vcombine.low %v3122_v34, %v3138_v37 }
 0x8a9   : > { %v9993_v43 = vcombine.high %v3157_v54, %v3173_v55  ;;  %v9992_v40 = vcombine.low %v3157_v54, %v3173_v55  ;;  %v2868_v55 = vld [vmem:[#allocation21 + $0x528] sm:$0xff] }
 0x8aa   : > { %8187 = vmatpush1.bf16.msra.mxu1 %v9762_v9  ;;  %v3202_v9 = vld [vmem:[#allocation21 + $0xf98] sm:$0xff] }
 0x8ab   : > { %8310 = vmatpush1.bf16.msra.mxu0 %v9768_v12  ;;  %8188 = vmatprep.subr.bf16.mxu1 %v9795_v59  ;;  %v3189_v12 = vld [vmem:[#allocation21 + $0xf30] sm:$0xff]  ;;  %v10019_v41 = vcombine.high %v3186_v52, %v3202_v9 }
 0x8ac   : > { %8311 = vmatprep.subr.bf16.mxu0 %v9801_v18  ;;  %v3205_v59 = vld [vmem:[#allocation21 + $0xfb0] sm:$0xff]  ;;  %v9986_v18 = vcombine.low %v3154_v35, %v3170_v51 }
 0x8ad   : > { %v10025_v44 = vcombine.high %v3189_v12, %v3205_v59  ;;  %v10024_v1 = vcombine.low %v3189_v12, %v3205_v59  ;;  %v2900_v59 = vld [vmem:[#allocation21 + $0x628] sm:$0xff] }
 0x8ae   : > { %8189 = vmatpush1.bf16.msra.mxu1 %v9794_v61  ;;  %v2724_v61 = vld [vmem:[#allocation21 + $0xa8] sm:$0xff] }
 0x8af   : > { %8312 = vmatpush1.bf16.msra.mxu0 %v9800_v13  ;;  %8190 = vmatprep.subr.bf16.mxu1 %v9827_v0  ;;  %v2711_v13 = vld [vmem:[#allocation21 + $0x40] sm:$0xff]  ;;  %v9543_v2 = vcombine.high %v2708_v60, %v2724_v61 }
 0x8b0   : > { %8313 = vmatprep.subr.bf16.mxu0 %v9833_v46  ;;  %v2727_v0 = vld [vmem:[#allocation21 + $0xc0] sm:$0xff]  ;;  %v10018_v46 = vcombine.low %v3186_v52, %v3202_v9 }
 0x8b1   : > { %v9549_v3 = vcombine.high %v2711_v13, %v2727_v0  ;;  %v9548_v7 = vcombine.low %v2711_v13, %v2727_v0  ;;  %v2932_v0 = vld [vmem:[#allocation21 + $0x728] sm:$0xff] }
 0x8b2   : > { %8191 = vmatpush1.bf16.msra.mxu1 %v9826_v4  ;;  %v2756_v4 = vld [vmem:[#allocation21 + $0x1a8] sm:$0xff] }
 0x8b3   : > { %8314 = vmatpush1.bf16.msra.mxu0 %v9832_v17  ;;  %8192 = vmatprep.subr.bf16.mxu1 %v9859_v6  ;;  %v9542_v17 = vcombine.low %v2708_v60, %v2724_v61  ;;  %v2743_v6 = vld [vmem:[#allocation21 + $0x140] sm:$0xff]  ;;  %v9575_v19 = vcombine.high %v2740_v16, %v2756_v4 }
 0x8b4   : > { %8315 = vmatprep.subr.bf16.mxu0 %v9865_v36  ;;  %v2759_v36 = vld [vmem:[#allocation21 + $0x1c0] sm:$0xff] }
 0x8b5   : > { %v9580_v25 = vcombine.low %v2743_v6, %v2759_v36 }
 0x8b6   : > { %8193 = vmatpush1.bf16.msra.mxu1 %v9858_v11  ;;  %v9581_v11 = vcombine.high %v2743_v6, %v2759_v36  ;;  %v2964_v6 = vld [vmem:[#allocation21 + $0x828] sm:$0xff] }
 0x8b7   : > { %8316 = vmatpush1.bf16.msra.mxu0 %v9864_v20  ;;  %8194 = vmatprep.subr.bf16.mxu1 %v9891_v21  ;;  %v2775_v20 = vld [vmem:[#allocation21 + $0x240] sm:$0xff]  ;;  %v2980_v36 = vld [vmem:[#allocation21 + $0x8a8] sm:$0xff] }
 0x8b8   : > { %8317 = vmatprep.subr.bf16.mxu0 %v9897_v22  ;;  %v2791_v21 = vld [vmem:[#allocation21 + $0x2c0] sm:$0xff]  ;;  %v9574_v22 = vcombine.low %v2740_v16, %v2756_v4 }
 0x8b9   : > { %v9613_v23 = vcombine.high %v2775_v20, %v2791_v21  ;;  %v9612_v34 = vcombine.low %v2775_v20, %v2791_v21  ;;  %v2996_v21 = vld [vmem:[#allocation21 + $0x928] sm:$0xff] }
 0x8ba   : > { %8195 = vmatpush1.bf16.msra.mxu1 %v9890_v29  ;;  %v2820_v29 = vld [vmem:[#allocation21 + $0x3a8] sm:$0xff] }
 0x8bb   : > { %8318 = vmatpush1.bf16.msra.mxu0 %v9896_v31  ;;  %8196 = vmatprep.subr.bf16.mxu1 %v9923_v32  ;;  %v2807_v31 = vld [vmem:[#allocation21 + $0x340] sm:$0xff]  ;;  %v9639_v37 = vcombine.high %v2804_v26, %v2820_v29 }
 0x8bc   : > { %8319 = vmatprep.subr.bf16.mxu0 %v9929_v33  ;;  %v2823_v32 = vld [vmem:[#allocation21 + $0x3c0] sm:$0xff]  ;;  %v9606_v33 = vcombine.low %v2772_v24, %v2788_v10 }
 0x8bd   : > { %v9645_v42 = vcombine.high %v2807_v31, %v2823_v32  ;;  %v9644_v35 = vcombine.low %v2807_v31, %v2823_v32  ;;  %v3028_v32 = vld [vmem:[#allocation21 + $0xa28] sm:$0xff] }
 0x8be   : > { %8197 = vmatpush1.bf16.msra.mxu1 %v9922_v47  ;;  %v2852_v47 = vld [vmem:[#allocation21 + $0x4a8] sm:$0xff] }
 0x8bf   : > { %8320 = vmatpush1.bf16.msra.mxu0 %v9928_v8  ;;  %8198 = vmatprep.subr.bf16.mxu1 %v9955_v48  ;;  %v2839_v8 = vld [vmem:[#allocation21 + $0x440] sm:$0xff]  ;;  %v9671_v51 = vcombine.high %v2836_v45, %v2852_v47 }
 0x8c0   : > { %8321 = vmatprep.subr.bf16.mxu0 %v9961_v50  ;;  %v2855_v48 = vld [vmem:[#allocation21 + $0x4c0] sm:$0xff]  ;;  %v9638_v50 = vcombine.low %v2804_v26, %v2820_v29 }
 0x8c1   : > { %v9677_v54 = vcombine.high %v2839_v8, %v2855_v48  ;;  %v9676_v52 = vcombine.low %v2839_v8, %v2855_v48  ;;  %v3060_v48 = vld [vmem:[#allocation21 + $0xb28] sm:$0xff] }
 0x8c2   : > { %8199 = vmatpush1.bf16.msra.mxu1 %v9954_v38  ;;  %v2884_v38 = vld [vmem:[#allocation21 + $0x5a8] sm:$0xff] }
 0x8c3   : > { %8322 = vmatpush1.bf16.msra.mxu0 %v9960_v58  ;;  %8200 = vmatprep.subr.bf16.mxu1 %v9987_v39  ;;  %v2871_v58 = vld [vmem:[#allocation21 + $0x540] sm:$0xff]  ;;  %v9703_v9 = vcombine.high %v2868_v55, %v2884_v38 }
 0x8c4   : > { %8323 = vmatprep.subr.bf16.mxu0 %v9993_v43  ;;  %v2887_v39 = vld [vmem:[#allocation21 + $0x5c0] sm:$0xff]  ;;  %v9670_v43 = vcombine.low %v2836_v45, %v2852_v47 }
 0x8c5   : > { %v9709_v12 = vcombine.high %v2871_v58, %v2887_v39  ;;  %v9708_v60 = vcombine.low %v2871_v58, %v2887_v39  ;;  %v3092_v39 = vld [vmem:[#allocation21 + $0xc28] sm:$0xff] }
 0x8c6   : > { %8201 = vmatpush1.bf16.msra.mxu1 %v9986_v18  ;;  %v2916_v18 = vld [vmem:[#allocation21 + $0x6a8] sm:$0xff] }
 0x8c7   : > { %8324 = vmatpush1.bf16.msra.mxu0 %v9992_v40  ;;  %8202 = vmatprep.subr.bf16.mxu1 %v10019_v41  ;;  %v2903_v40 = vld [vmem:[#allocation21 + $0x640] sm:$0xff]  ;;  %v9735_v61 = vcombine.high %v2900_v59, %v2916_v18 }
 0x8c8   : > { %8325 = vmatprep.subr.bf16.mxu0 %v10025_v44  ;;  %v2919_v41 = vld [vmem:[#allocation21 + $0x6c0] sm:$0xff]  ;;  %v9702_v44 = vcombine.low %v2868_v55, %v2884_v38 }
 0x8c9   : > { %v9741_v13 = vcombine.high %v2903_v40, %v2919_v41  ;;  %v9740_v16 = vcombine.low %v2903_v40, %v2919_v41  ;;  %v3124_v41 = vld [vmem:[#allocation21 + $0xd28] sm:$0xff] }
 0x8ca   : > { %8203 = vmatpush1.bf16.msra.mxu1 %v10018_v46  ;;  %v2948_v46 = vld [vmem:[#allocation21 + $0x7a8] sm:$0xff] }
 0x8cb   : > { %8326 = vmatpush1.bf16.msra.mxu0 %v10024_v1  ;;  %8254 = vmatprep.subr.bf16.mxu1 %v9543_v2  ;;  %v2935_v1 = vld [vmem:[#allocation21 + $0x740] sm:$0xff]  ;;  %v9767_v4 = vcombine.high %v2932_v0, %v2948_v46  ;;  %v9766_v24 = vcombine.low %v2932_v0, %v2948_v46 }
 0x8cc   : > { %8377 = vmatprep.subr.bf16.mxu0 %v9549_v3  ;;  %v2951_v2 = vld [vmem:[#allocation21 + $0x7c0] sm:$0xff]  ;;  %v9734_v3 = vcombine.low %v2900_v59, %v2916_v18 }
 0x8cd   : > { %8205 = vmatmul.mubr.bf16.vlgmr.msra.gmra.mrb[12].mxu1 %v12275_v30  ;;  %v9772_v10 = vcombine.low %v2935_v1, %v2951_v2 }
 0x8ce   : > { %8328 = vmatmul.mubr.bf16.vlgmr.msra.gmra.mrb[16].mxu0 %v12275_v30  ;;  %8255 = vmatpush1.bf16.msra.mxu1 %v9542_v17  ;;  %v9773_v17 = vcombine.high %v2935_v1, %v2951_v2  ;;  %v3156_v2 = vld [vmem:[#allocation21 + $0xe28] sm:$0xff] }
 0x8cf   : > { %8286 = vmatprep.mubr.bf16.mxu1 %v12273_v28  ;;  %8378 = vmatpush1.bf16.msra.mxu0 %v9548_v7  ;;  %v2967_v7 = vld [vmem:[#allocation21 + $0x840] sm:$0xff] }
 0x8d0   : > { %8409 = vmatprep.mubr.bf16.mxu0 %v12273_v28  ;;  %8256 = vmatprep.subr.bf16.mxu1 %v9575_v19  ;;  %v2983_v19 = vld [vmem:[#allocation21 + $0x8c0] sm:$0xff] }
 0x8d1   : > { %8379 = vmatprep.subr.bf16.mxu0 %v9581_v11  ;;  %v9799_v11 = vcombine.high %v2964_v6, %v2980_v36  ;;  %v9805_v20 = vcombine.high %v2967_v7, %v2983_v19  ;;  %v9804_v26 = vcombine.low %v2967_v7, %v2983_v19  ;;  %v3188_v19 = vld [vmem:[#allocation21 + $0xf28] sm:$0xff] }
 0x8d2   : > { %8257 = vmatpush1.bf16.msra.mxu1 %v9574_v22  ;;  %v3012_v22 = vld [vmem:[#allocation21 + $0x9a8] sm:$0xff] }
 0x8d3   : > { %8380 = vmatpush1.bf16.msra.mxu0 %v9580_v25  ;;  %8258 = vmatprep.subr.bf16.mxu1 %v9607_v27  ;;  %v2999_v25 = vld [vmem:[#allocation21 + $0x940] sm:$0xff]  ;;  %v9831_v29 = vcombine.high %v2996_v21, %v3012_v22 }
 0x8d4   : > { %8381 = vmatprep.subr.bf16.mxu0 %v9613_v23  ;;  %v3015_v27 = vld [vmem:[#allocation21 + $0x9c0] sm:$0xff]  ;;  %v9798_v23 = vcombine.low %v2964_v6, %v2980_v36 }
 0x8d5   : > { %v9837_v31 = vcombine.high %v2999_v25, %v3015_v27  ;;  %v9836_v45 = vcombine.low %v2999_v25, %v3015_v27  ;;  %v2710_v27 = vld [vmem:[#allocation21 + $0x38] sm:$0xff] }
 0x8d6   : > { %8259 = vmatpush1.bf16.msra.mxu1 %v9606_v33  ;;  %v3044_v33 = vld [vmem:[#allocation21 + $0xaa8] sm:$0xff] }
 0x8d7   : > { %8382 = vmatpush1.bf16.msra.mxu0 %v9612_v34  ;;  %8260 = vmatprep.subr.bf16.mxu1 %v9639_v37  ;;  %v3031_v34 = vld [vmem:[#allocation21 + $0xa40] sm:$0xff]  ;;  %v9863_v47 = vcombine.high %v3028_v32, %v3044_v33 }
 0x8d8   : > { %8383 = vmatprep.subr.bf16.mxu0 %v9645_v42  ;;  %v3047_v37 = vld [vmem:[#allocation21 + $0xac0] sm:$0xff]  ;;  %v9830_v42 = vcombine.low %v2996_v21, %v3012_v22 }
 0x8d9   : > { %v9869_v8 = vcombine.high %v3031_v34, %v3047_v37  ;;  %v9868_v55 = vcombine.low %v3031_v34, %v3047_v37  ;;  %v2742_v37 = vld [vmem:[#allocation21 + $0x138] sm:$0xff] }
 0x8da   : > { %8261 = vmatpush1.bf16.msra.mxu1 %v9638_v50  ;;  %v3076_v50 = vld [vmem:[#allocation21 + $0xba8] sm:$0xff] }
 0x8db   : > { %8384 = vmatpush1.bf16.msra.mxu0 %v9644_v35  ;;  %8262 = vmatprep.subr.bf16.mxu1 %v9671_v51  ;;  %v3063_v35 = vld [vmem:[#allocation21 + $0xb40] sm:$0xff]  ;;  %v9895_v38 = vcombine.high %v3060_v48, %v3076_v50 }
 0x8dc   : > { %8385 = vmatprep.subr.bf16.mxu0 %v9677_v54  ;;  %v3079_v51 = vld [vmem:[#allocation21 + $0xbc0] sm:$0xff]  ;;  %v9862_v54 = vcombine.low %v3028_v32, %v3044_v33 }
 0x8dd   : > { %v9901_v58 = vcombine.high %v3063_v35, %v3079_v51  ;;  %v9900_v59 = vcombine.low %v3063_v35, %v3079_v51  ;;  %v2774_v35 = vld [vmem:[#allocation21 + $0x238] sm:$0xff] }
 0x8de   : > { %8263 = vmatpush1.bf16.msra.mxu1 %v9670_v43  ;;  %v3108_v43 = vld [vmem:[#allocation21 + $0xca8] sm:$0xff]  ;;  %v2790_v51 = vld [vmem:[#allocation21 + $0x2b8] sm:$0xff] }
 0x8df   : > { %8386 = vmatpush1.bf16.msra.mxu0 %v9676_v52  ;;  %8264 = vmatprep.subr.bf16.mxu1 %v9703_v9  ;;  %v3095_v52 = vld [vmem:[#allocation21 + $0xc40] sm:$0xff]  ;;  %v9927_v18 = vcombine.high %v3092_v39, %v3108_v43 }
 0x8e0   : > { %8387 = vmatprep.subr.bf16.mxu0 %v9709_v12  ;;  %v3111_v9 = vld [vmem:[#allocation21 + $0xcc0] sm:$0xff]  ;;  %v9894_v12 = vcombine.low %v3060_v48, %v3076_v50 }
 0x8e1   : > { %v9933_v40 = vcombine.high %v3095_v52, %v3111_v9  ;;  %v9932_v0 = vcombine.low %v3095_v52, %v3111_v9  ;;  %v2806_v9 = vld [vmem:[#allocation21 + $0x338] sm:$0xff] }
 0x8e2   : > { %8265 = vmatpush1.bf16.msra.mxu1 %v9702_v44  ;;  %v3140_v44 = vld [vmem:[#allocation21 + $0xda8] sm:$0xff] }
 0x8e3   : > { %8388 = vmatpush1.bf16.msra.mxu0 %v9708_v60  ;;  %8266 = vmatprep.subr.bf16.mxu1 %v9735_v61  ;;  %v3127_v60 = vld [vmem:[#allocation21 + $0xd40] sm:$0xff]  ;;  %v9959_v46 = vcombine.high %v3124_v41, %v3140_v44 }
 0x8e4   : > { %8389 = vmatprep.subr.bf16.mxu0 %v9741_v13  ;;  %v3143_v61 = vld [vmem:[#allocation21 + $0xdc0] sm:$0xff]  ;;  %v9926_v13 = vcombine.low %v3092_v39, %v3108_v43  ;;  %v9611_v43 = vcombine.high %v2774_v35, %v2790_v51 }
 0x8e5   : > { %v9965_v1 = vcombine.high %v3127_v60, %v3143_v61  ;;  %v9964_v6 = vcombine.low %v3127_v60, %v3143_v61  ;;  %v2838_v61 = vld [vmem:[#allocation21 + $0x438] sm:$0xff] }
 0x8e6   : > { %8267 = vmatpush1.bf16.msra.mxu1 %v9734_v3  ;;  %v3172_v3 = vld [vmem:[#allocation21 + $0xea8] sm:$0xff] }
 0x8e7   : > { %8390 = vmatpush1.bf16.msra.mxu0 %v9740_v16  ;;  %8268 = vmatprep.subr.bf16.mxu1 %v9767_v4  ;;  %v3159_v16 = vld [vmem:[#allocation21 + $0xe40] sm:$0xff]  ;;  %v9991_v36 = vcombine.high %v3156_v2, %v3172_v3 }
 0x8e8   : > { %8391 = vmatprep.subr.bf16.mxu0 %v9773_v17  ;;  %v3175_v4 = vld [vmem:[#allocation21 + $0xec0] sm:$0xff]  ;;  %v9958_v17 = vcombine.low %v3124_v41, %v3140_v44 }
 0x8e9   : > { %v9997_v7 = vcombine.high %v3159_v16, %v3175_v4  ;;  %v9996_v21 = vcombine.low %v3159_v16, %v3175_v4  ;;  %v2870_v4 = vld [vmem:[#allocation21 + $0x538] sm:$0xff] }
 0x8ea   : > { %8269 = vmatpush1.bf16.msra.mxu1 %v9766_v24  ;;  %v3204_v24 = vld [vmem:[#allocation21 + $0xfa8] sm:$0xff] }
 0x8eb   : > { %8392 = vmatpush1.bf16.msra.mxu0 %v9772_v10  ;;  %8270 = vmatprep.subr.bf16.mxu1 %v9799_v11  ;;  %v3191_v10 = vld [vmem:[#allocation21 + $0xf40] sm:$0xff]  ;;  %v10023_v22 = vcombine.high %v3188_v19, %v3204_v24 }
 0x8ec   : > { %8393 = vmatprep.subr.bf16.mxu0 %v9805_v20  ;;  %v3207_v11 = vld [vmem:[#allocation21 + $0xfc0] sm:$0xff]  ;;  %v9990_v20 = vcombine.low %v3156_v2, %v3172_v3 }
 0x8ed   : > { %v10029_v25 = vcombine.high %v3191_v10, %v3207_v11  ;;  %v10028_v32 = vcombine.low %v3191_v10, %v3207_v11 }
 0x8ee   : > { %8271 = vmatpush1.bf16.msra.mxu1 %v9798_v23  ;;  %v2726_v23 = vld [vmem:[#allocation21 + $0xb8] sm:$0xff] }
 0x8ef   : > { %8394 = vmatpush1.bf16.msra.mxu0 %v9804_v26  ;;  %8272 = vmatprep.subr.bf16.mxu1 %v9831_v29  ;;  %v2713_v26 = vld [vmem:[#allocation21 + $0x50] sm:$0xff]  ;;  %v9547_v33 = vcombine.high %v2710_v27, %v2726_v23 }
 0x8f0   : > { %8395 = vmatprep.subr.bf16.mxu0 %v9837_v31  ;;  %v2729_v29 = vld [vmem:[#allocation21 + $0xd0] sm:$0xff]  ;;  %v10022_v31 = vcombine.low %v3188_v19, %v3204_v24  ;;  %v12295_v19 = vld [vmem:[#allocation23] sm:$0xff] }
 0x8f1   : > { %v9553_v34 = vcombine.high %v2713_v26, %v2729_v29  ;;  %v9552_v48 = vcombine.low %v2713_v26, %v2729_v29  ;;  %v5336_v29 = vrot.slane %v12295_v19, %v12025_v15 }
 0x8f2   : > { %8273 = vmatpush1.bf16.msra.mxu1 %v9830_v42  ;;  %v2758_v42 = vld [vmem:[#allocation21 + $0x1b8] sm:$0xff] }
 0x8f3   : > { %8396 = vmatpush1.bf16.msra.mxu0 %v9836_v45  ;;  %8274 = vmatprep.subr.bf16.mxu1 %v9863_v47  ;;  %v9546_v45 = vcombine.low %v2710_v27, %v2726_v23  ;;  %v2745_v47 = vld [vmem:[#allocation21 + $0x150] sm:$0xff]  ;;  %v9579_v50 = vcombine.high %v2742_v37, %v2758_v42 }
 0x8f4   : > { %8397 = vmatprep.subr.bf16.mxu0 %v9869_v8  ;;  %v2761_v8 = vld [vmem:[#allocation21 + $0x1d0] sm:$0xff] }
 0x8f5   : > { %v9584_v39 = vcombine.low %v2745_v47, %v2761_v8  ;;  %v2905_v27 = vld [vmem:[#allocation21 + $0x650] sm:$0xff] }
 0x8f6   : > { %8275 = vmatpush1.bf16.msra.mxu1 %v9862_v54  ;;  %v9585_v54 = vcombine.high %v2745_v47, %v2761_v8  ;;  %v2921_v23 = vld [vmem:[#allocation21 + $0x6d0] sm:$0xff]  ;;  %v2950_v47 = vld [vmem:[#allocation21 + $0x7b8] sm:$0xff] }
 0x8f7   : > { %8398 = vmatpush1.bf16.msra.mxu0 %v9868_v55  ;;  %8276 = vmatprep.subr.bf16.mxu1 %v9895_v38  ;;  %v2777_v55 = vld [vmem:[#allocation21 + $0x250] sm:$0xff] }
 0x8f8   : > { %8399 = vmatprep.subr.bf16.mxu0 %v9901_v58  ;;  %v2793_v38 = vld [vmem:[#allocation21 + $0x2d0] sm:$0xff]  ;;  %v9578_v58 = vcombine.low %v2742_v37, %v2758_v42  ;;  %v9745_v42 = vcombine.high %v2905_v27, %v2921_v23 }
 0x8f9   : > { %v9617_v52 = vcombine.high %v2777_v55, %v2793_v38  ;;  %v9616_v41 = vcombine.low %v2777_v55, %v2793_v38 }
 0x8fa   : > { %8277 = vmatpush1.bf16.msra.mxu1 %v9894_v12  ;;  %v2822_v12 = vld [vmem:[#allocation21 + $0x3b8] sm:$0xff] }
 0x8fb   : > { %8400 = vmatpush1.bf16.msra.mxu0 %v9900_v59  ;;  %8278 = vmatprep.subr.bf16.mxu1 %v9927_v18  ;;  %v2809_v59 = vld [vmem:[#allocation21 + $0x350] sm:$0xff]  ;;  %v9643_v44 = vcombine.high %v2806_v9, %v2822_v12 }
 0x8fc   : > { %8401 = vmatprep.subr.bf16.mxu0 %v9933_v40  ;;  %v2825_v18 = vld [vmem:[#allocation21 + $0x3d0] sm:$0xff]  ;;  %v9610_v40 = vcombine.low %v2774_v35, %v2790_v51 }
 0x8fd   : > { %v9649_v60 = vcombine.high %v2809_v59, %v2825_v18  ;;  %v9648_v2 = vcombine.low %v2809_v59, %v2825_v18  ;;  %v2937_v51 = vld [vmem:[#allocation21 + $0x750] sm:$0xff] }
 0x8fe   : > { %8279 = vmatpush1.bf16.msra.mxu1 %v9926_v13  ;;  %v2854_v13 = vld [vmem:[#allocation21 + $0x4b8] sm:$0xff] }
 0x8ff   : > { %8402 = vmatpush1.bf16.msra.mxu0 %v9932_v0  ;;  %8280 = vmatprep.subr.bf16.mxu1 %v9959_v46  ;;  %v2841_v0 = vld [vmem:[#allocation21 + $0x450] sm:$0xff]  ;;  %v9675_v3 = vcombine.high %v2838_v61, %v2854_v13 }
 0x900   : > { %8403 = vmatprep.subr.bf16.mxu0 %v9965_v1  ;;  %v2857_v46 = vld [vmem:[#allocation21 + $0x4d0] sm:$0xff]  ;;  %v9642_v1 = vcombine.low %v2806_v9, %v2822_v12  ;;  %v9744_v12 = vcombine.low %v2905_v27, %v2921_v23 }
 0x901   : > { %v9681_v16 = vcombine.high %v2841_v0, %v2857_v46  ;;  %v9680_v24 = vcombine.low %v2841_v0, %v2857_v46 }
 0x902   : > { %8281 = vmatpush1.bf16.msra.mxu1 %v9958_v17  ;;  %v2886_v17 = vld [vmem:[#allocation21 + $0x5b8] sm:$0xff] }
 0x903   : > { %8404 = vmatpush1.bf16.msra.mxu0 %v9964_v6  ;;  %8282 = vmatprep.subr.bf16.mxu1 %v9991_v36  ;;  %v2873_v6 = vld [vmem:[#allocation21 + $0x550] sm:$0xff]  ;;  %v9707_v10 = vcombine.high %v2870_v4, %v2886_v17  ;;  %v9706_v26 = vcombine.low %v2870_v4, %v2886_v17 }
 0x904   : > { %8405 = vmatprep.subr.bf16.mxu0 %v9997_v7  ;;  %v2889_v36 = vld [vmem:[#allocation21 + $0x5d0] sm:$0xff]  ;;  %v9674_v7 = vcombine.low %v2838_v61, %v2854_v13 }
 0x905   : > { %v9713_v11 = vcombine.high %v2873_v6, %v2889_v36  ;;  %v2969_v61 = vld [vmem:[#allocation21 + $0x850] sm:$0xff] }
 0x906   : > { %8283 = vmatpush1.bf16.msra.mxu1 %v9990_v20  ;;  %v2902_v20 = vld [vmem:[#allocation21 + $0x638] sm:$0xff]  ;;  %v2985_v13 = vld [vmem:[#allocation21 + $0x8d0] sm:$0xff] }
 0x907   : > { %8406 = vmatpush1.bf16.msra.mxu0 %v9996_v21  ;;  %8284 = vmatprep.subr.bf16.mxu1 %v10023_v22  ;;  %v2918_v21 = vld [vmem:[#allocation21 + $0x6b8] sm:$0xff]  ;;  %v5332_v22 = vrot.slane %v12295_v19, %v12017_v5  ;;  %v3001_v4 = vld [vmem:[#allocation21 + $0x950] sm:$0xff] }
 0x908   : > { %8407 = vmatprep.subr.bf16.mxu0 %v10029_v25  ;;  %v5348_v25 = vrot.slane %v12295_v19, %v12097_v56  ;;  %v3017_v17 = vld [vmem:[#allocation21 + $0x9d0] sm:$0xff] }
 0x90a   : > { %8285 = vmatpush1.bf16.msra.mxu1 %v10022_v31  ;;  %v5352_v31 = vrot.slane %v12295_v19, %v12105_v62 }
 0x90b   : > { %8408 = vmatpush1.bf16.msra.mxu0 %v10028_v32  ;;  %8336 = vmatprep.subr.bf16.mxu1 %v9547_v33  ;;  %v9712_v32 = vcombine.low %v2873_v6, %v2889_v36  ;;  %v9739_v33 = vcombine.high %v2902_v20, %v2918_v21  ;;  %v9808_v36 = vcombine.low %v2969_v61, %v2985_v13 }
 0x90c   : > { %8459 = vmatprep.subr.bf16.mxu0 %v9553_v34 }
 0x90d   : > { %8287 = vmatmul.mubr.bf16.vlgmr.msra.gmra.mrb[16].mxu1 %v12275_v30 }
 0x90e   : > { %8410 = vmatmul.mubr.bf16.vlgmr.msra.gmra.mrb[20].mxu0 %v12275_v30  ;;  %8337 = vmatpush1.bf16.msra.mxu1 %v9546_v45  ;;  %v2934_v45 = vld [vmem:[#allocation21 + $0x738] sm:$0xff] }
 0x90f   : > { %8368 = vmatprep.mubr.bf16.mxu1 %v12273_v28  ;;  %8460 = vmatpush1.bf16.msra.mxu0 %v9552_v48  ;;  %v9771_v59 = vcombine.high %v2934_v45, %v2950_v47  ;;  %v9770_v0 = vcombine.low %v2934_v45, %v2950_v47  ;;  %v3094_v45 = vld [vmem:[#allocation21 + $0xc38] sm:$0xff] }
 0x910   : > { %8491 = vmatprep.mubr.bf16.mxu0 %v12273_v28  ;;  %8338 = vmatprep.subr.bf16.mxu1 %v9579_v50  ;;  %v3110_v47 = vld [vmem:[#allocation21 + $0xcb8] sm:$0xff] }
 0x911   : > { %8461 = vmatprep.subr.bf16.mxu0 %v9585_v54  ;;  %v2953_v54 = vld [vmem:[#allocation21 + $0x7d0] sm:$0xff] }
 0x912   : > { %8339 = vmatpush1.bf16.msra.mxu1 %v9578_v58  ;;  %v9776_v46 = vcombine.low %v2937_v51, %v2953_v54 }
 0x913   : > { %8462 = vmatpush1.bf16.msra.mxu0 %v9584_v39  ;;  %8340 = vmatprep.subr.bf16.mxu1 %v9611_v43  ;;  %v9738_v43 = vcombine.low %v2902_v20, %v2918_v21  ;;  %v3033_v20 = vld [vmem:[#allocation21 + $0xa50] sm:$0xff] }
 0x914   : > { %8463 = vmatprep.subr.bf16.mxu0 %v9617_v52  ;;  %v3049_v21 = vld [vmem:[#allocation21 + $0xad0] sm:$0xff] }
 0x915   : > { %v9873_v23 = vcombine.high %v3033_v20, %v3049_v21 }
 0x916   : > { %8341 = vmatpush1.bf16.msra.mxu1 %v9610_v40 }
 0x917   : > { %8464 = vmatpush1.bf16.msra.mxu0 %v9616_v41  ;;  %8342 = vmatprep.subr.bf16.mxu1 %v9643_v44  ;;  %v9777_v41 = vcombine.high %v2937_v51, %v2953_v54  ;;  %v2966_v44 = vld [vmem:[#allocation21 + $0x838] sm:$0xff] }
 0x918   : > { %8465 = vmatprep.subr.bf16.mxu0 %v9649_v60  ;;  %v2982_v60 = vld [vmem:[#allocation21 + $0x8b8] sm:$0xff] }
 0x919   : > { %v9802_v6 = vcombine.low %v2966_v44, %v2982_v60 }
 0x91a   : > { %8343 = vmatpush1.bf16.msra.mxu1 %v9642_v1  ;;  %v9803_v1 = vcombine.high %v2966_v44, %v2982_v60 }
 0x91b   : > { %8466 = vmatpush1.bf16.msra.mxu0 %v9648_v2  ;;  %8344 = vmatprep.subr.bf16.mxu1 %v9675_v3  ;;  %v9809_v2 = vcombine.high %v2969_v61, %v2985_v13  ;;  %v2998_v3 = vld [vmem:[#allocation21 + $0x938] sm:$0xff] }
 0x91c   : > { %8467 = vmatprep.subr.bf16.mxu0 %v9681_v16  ;;  %v3014_v16 = vld [vmem:[#allocation21 + $0x9b8] sm:$0xff] }
 0x91d   : > { %v3158_v61 = vld [vmem:[#allocation21 + $0xe38] sm:$0xff] }
 0x91e   : > { %8345 = vmatpush1.bf16.msra.mxu1 %v9674_v7  ;;  %v9835_v7 = vcombine.high %v2998_v3, %v3014_v16  ;;  %v3174_v13 = vld [vmem:[#allocation21 + $0xeb8] sm:$0xff] }
 0x91f   : > { %8468 = vmatpush1.bf16.msra.mxu0 %v9680_v24  ;;  %8346 = vmatprep.subr.bf16.mxu1 %v9707_v10  ;;  %v9841_v24 = vcombine.high %v3001_v4, %v3017_v17  ;;  %v3030_v10 = vld [vmem:[#allocation21 + $0xa38] sm:$0xff] }
 0x920   : > { %v8083_v34 = vpop.f32.mrb[4].mxu1  ;;  %v8165_v37 = vpop.f32.mrb[8].mxu0  ;;  %8469 = vmatprep.subr.bf16.mxu0 %v9713_v11  ;;  %v3046_v11 = vld [vmem:[#allocation21 + $0xab8] sm:$0xff] }
 0x921   : > { %v12305_v8 = vadd.f32 %v8083_v34, %v5332_v22  ;;  %v12307_v48 = vadd.f32 %v8165_v37, %v5348_v25  ;;  %v8085_v50 = vpop.f32.mrb[5].mxu1  ;;  %v8167_v35 = vpop.f32.mrb[9].mxu0  ;;  %v9834_v22 = vcombine.low %v2998_v3, %v3014_v16  ;;  %v9840_v25 = vcombine.low %v3001_v4, %v3017_v17  ;;  %v3190_v4 = vld [vmem:[#allocation21 + $0xf38] sm:$0xff] }
 0x922   : > { %v12309_v55 = vadd.f32 %v8085_v50, %v5336_v29  ;;  %v12311_v38 = vadd.f32 %v8167_v35, %v5352_v31  ;;  %8347 = vmatpush1.bf16.msra.mxu1 %v9706_v26  ;;  %v8087_v58 = vpop.f32.mrb[6].mxu1  ;;  %v8169_v39 = vpop.f32.mrb[10].mxu0  ;;  %v9867_v27 = vcombine.high %v3030_v10, %v3046_v11  ;;  %v3062_v26 = vld [vmem:[#allocation21 + $0xb38] sm:$0xff]  ;;  %v3065_v31 = vld [vmem:[#allocation21 + $0xb50] sm:$0xff]  ;;  %v9872_v34 = vcombine.low %v3033_v20, %v3049_v21  ;;  %v2712_v20 = vld [vmem:[#allocation21 + $0x48] sm:$0xff] }
 0x923   : > { %8470 = vmatpush1.bf16.msra.mxu0 %v9712_v32  ;;  %v8088_v52 = vpop.f32.mrb[7].mxu1  ;;  %v8170_v9 = vpop.f32.mrb[11].mxu0  ;;  %8348 = vmatprep.subr.bf16.mxu1 %v9739_v33  ;;  %v3078_v29 = vld [vmem:[#allocation21 + $0xbb8] sm:$0xff]  ;;  %v3081_v32 = vld [vmem:[#allocation21 + $0xbd0] sm:$0xff]  ;;  %v9866_v33 = vcombine.low %v3030_v10, %v3046_v11  ;;  %v9931_v58 = vcombine.high %v3094_v45, %v3110_v47  ;;  %v9995_v3 = vcombine.high %v3158_v61, %v3174_v13  ;;  %v2728_v21 = vld [vmem:[#allocation21 + $0xc8] sm:$0xff] }
 0x924   : > { %v8737_v18 = vcombine.low %v12305_v8, %v12309_v55  ;;  %v8754_v40 = vcombine.low %v12307_v48, %v12311_v38  ;;  %8471 = vmatprep.subr.bf16.mxu0 %v9745_v42  ;;  %v9899_v37 = vcombine.high %v3062_v26, %v3078_v29  ;;  %v9905_v42 = vcombine.high %v3065_v31, %v3081_v32  ;;  %v3097_v50 = vld [vmem:[#allocation21 + $0xc50] sm:$0xff]  ;;  %v3142_v52 = vld [vmem:[#allocation21 + $0xdb8] sm:$0xff] }
 0x925   : > { %v3113_v35 = vld [vmem:[#allocation21 + $0xcd0] sm:$0xff]  ;;  %v9898_v51 = vcombine.low %v3062_v26, %v3078_v29  ;;  %v9904_v54 = vcombine.low %v3065_v31, %v3081_v32  ;;  %v3206_v17 = vld [vmem:[#allocation21 + $0xfb8] sm:$0xff]  ;;  %v9551_v26 = vcombine.high %v2712_v20, %v2728_v21  ;;  %v2744_v31 = vld [vmem:[#allocation21 + $0x148] sm:$0xff] }
 0x926   : > { %8349 = vmatpush1.bf16.msra.mxu1 %v9738_v43  ;;  %v9937_v39 = vcombine.high %v3097_v50, %v3113_v35  ;;  %v3126_v43 = vld [vmem:[#allocation21 + $0xd38] sm:$0xff]  ;;  %v3129_v9 = vld [vmem:[#allocation21 + $0xd50] sm:$0xff]  ;;  %v10027_v10 = vcombine.high %v3190_v4, %v3206_v17  ;;  %v2760_v32 = vld [vmem:[#allocation21 + $0x1c8] sm:$0xff] }
 0x927   : > { %8472 = vmatpush1.bf16.msra.mxu0 %v9744_v12  ;;  %8350 = vmatprep.subr.bf16.mxu1 %v9771_v59  ;;  %v3145_v12 = vld [vmem:[#allocation21 + $0xdd0] sm:$0xff]  ;;  %v9930_v59 = vcombine.low %v3094_v45, %v3110_v47  ;;  %v9963_v44 = vcombine.high %v3126_v43, %v3142_v52  ;;  %v9583_v45 = vcombine.high %v2744_v31, %v2760_v32  ;;  %v2776_v47 = vld [vmem:[#allocation21 + $0x248] sm:$0xff] }
 0x928   : > { %8473 = vmatprep.subr.bf16.mxu0 %v9777_v41  ;;  %v9936_v41 = vcombine.low %v3097_v50, %v3113_v35  ;;  %v9969_v60 = vcombine.high %v3129_v9, %v3145_v12  ;;  %v2792_v50 = vld [vmem:[#allocation21 + $0x2c8] sm:$0xff] }
 0x92a   : > { %8351 = vmatpush1.bf16.msra.mxu1 %v9770_v0  ;;  %v3161_v0 = vld [vmem:[#allocation21 + $0xe50] sm:$0xff] }
 0x92b   : > { %8474 = vmatpush1.bf16.msra.mxu0 %v9776_v46  ;;  %8352 = vmatprep.subr.bf16.mxu1 %v9803_v1  ;;  %v3177_v46 = vld [vmem:[#allocation21 + $0xed0] sm:$0xff]  ;;  %v9962_v1 = vcombine.low %v3126_v43, %v3142_v52  ;;  %v9615_v43 = vcombine.high %v2776_v47, %v2792_v50 }
 0x92c   : > { %8475 = vmatprep.subr.bf16.mxu0 %v9809_v2  ;;  %v9968_v2 = vcombine.low %v3129_v9, %v3145_v12  ;;  %v10001_v16 = vcombine.high %v3161_v0, %v3177_v46  ;;  %v2808_v9 = vld [vmem:[#allocation21 + $0x348] sm:$0xff] }
 0x92d   : > { %v2824_v12 = vld [vmem:[#allocation21 + $0x3c8] sm:$0xff] }
 0x92e   : > { %8353 = vmatpush1.bf16.msra.mxu1 %v9802_v6  ;;  %v3193_v6 = vld [vmem:[#allocation21 + $0xf50] sm:$0xff] }
 0x92f   : > { %8476 = vmatpush1.bf16.msra.mxu0 %v9808_v36  ;;  %8354 = vmatprep.subr.bf16.mxu1 %v9835_v7  ;;  %v3209_v36 = vld [vmem:[#allocation21 + $0xfd0] sm:$0xff]  ;;  %v9994_v7 = vcombine.low %v3158_v61, %v3174_v13  ;;  %v9647_v61 = vcombine.high %v2808_v9, %v2824_v12 }
 0x930   : > { %8477 = vmatprep.subr.bf16.mxu0 %v9841_v24  ;;  %v10000_v24 = vcombine.low %v3161_v0, %v3177_v46  ;;  %v10033_v11 = vcombine.high %v3193_v6, %v3209_v36  ;;  %v2840_v0 = vld [vmem:[#allocation21 + $0x448] sm:$0xff] }
 0x931   : > { %v2856_v46 = vld [vmem:[#allocation21 + $0x4c8] sm:$0xff] }
 0x932   : > { %8355 = vmatpush1.bf16.msra.mxu1 %v9834_v22  ;;  %v2715_v22 = vld [vmem:[#allocation21 + $0x60] sm:$0xff] }
 0x933   : > { %8478 = vmatpush1.bf16.msra.mxu0 %v9840_v25  ;;  %8356 = vmatprep.subr.bf16.mxu1 %v9867_v27  ;;  %v2731_v25 = vld [vmem:[#allocation21 + $0xe0] sm:$0xff]  ;;  %v10026_v27 = vcombine.low %v3190_v4, %v3206_v17  ;;  %v9679_v4 = vcombine.high %v2840_v0, %v2856_v46 }
 0x934   : > { %8479 = vmatprep.subr.bf16.mxu0 %v9873_v23  ;;  %v10032_v23 = vcombine.low %v3193_v6, %v3209_v36  ;;  %v9557_v29 = vcombine.high %v2715_v22, %v2731_v25  ;;  %v2872_v6 = vld [vmem:[#allocation21 + $0x548] sm:$0xff] }
 0x935   : > { %v2888_v36 = vld [vmem:[#allocation21 + $0x5c8] sm:$0xff] }
 0x936   : > { %8357 = vmatpush1.bf16.msra.mxu1 %v9866_v33  ;;  %v9550_v33 = vcombine.low %v2712_v20, %v2728_v21  ;;  %v9711_v21 = vcombine.high %v2872_v6, %v2888_v36 }
 0x937   : > { %8480 = vmatpush1.bf16.msra.mxu0 %v9872_v34  ;;  %8358 = vmatprep.subr.bf16.mxu1 %v9899_v37  ;;  %v2747_v34 = vld [vmem:[#allocation21 + $0x160] sm:$0xff] }
 0x938   : > { %8481 = vmatprep.subr.bf16.mxu0 %v9905_v42  ;;  %v2763_v37 = vld [vmem:[#allocation21 + $0x1e0] sm:$0xff]  ;;  %v9556_v42 = vcombine.low %v2715_v22, %v2731_v25  ;;  %v2904_v25 = vld [vmem:[#allocation21 + $0x648] sm:$0xff] }
 0x939   : > { %v9589_v35 = vcombine.high %v2747_v34, %v2763_v37 }
 0x93a   : > { %8359 = vmatpush1.bf16.msra.mxu1 %v9898_v51  ;;  %v2779_v51 = vld [vmem:[#allocation21 + $0x260] sm:$0xff] }
 0x93b   : > { %8482 = vmatpush1.bf16.msra.mxu0 %v9904_v54  ;;  %8360 = vmatprep.subr.bf16.mxu1 %v9931_v58  ;;  %v2795_v54 = vld [vmem:[#allocation21 + $0x2e0] sm:$0xff]  ;;  %v9582_v58 = vcombine.low %v2744_v31, %v2760_v32  ;;  %v5344_v32 = vrot.slane %v12295_v19, %v12028_v14 }
 0x93c   : > { %8483 = vmatprep.subr.bf16.mxu0 %v9937_v39  ;;  %v9588_v39 = vcombine.low %v2747_v34, %v2763_v37  ;;  %v9621_v52 = vcombine.high %v2779_v51, %v2795_v54  ;;  %v2923_v31 = vld [vmem:[#allocation21 + $0x6e0] sm:$0xff]  ;;  %v9710_v34 = vcombine.low %v2872_v6, %v2888_v36  ;;  %v8745_v36 = vrot.slane %v8737_v18, %v12229_v53 }
 0x93d   : > { %v2987_v6 = vld [vmem:[#allocation21 + $0x8e0] sm:$0xff] }
 0x93e   : > { %8361 = vmatpush1.bf16.msra.mxu1 %v9930_v59  ;;  %v2811_v59 = vld [vmem:[#allocation21 + $0x360] sm:$0xff] }
 0x93f   : > { %8484 = vmatpush1.bf16.msra.mxu0 %v9936_v41  ;;  %8362 = vmatprep.subr.bf16.mxu1 %v9963_v44  ;;  %v2827_v41 = vld [vmem:[#allocation21 + $0x3e0] sm:$0xff]  ;;  %v9614_v44 = vcombine.low %v2776_v47, %v2792_v50 }
 0x940   : > { %8485 = vmatprep.subr.bf16.mxu0 %v9969_v60  ;;  %v9620_v60 = vcombine.low %v2779_v51, %v2795_v54  ;;  %v9653_v13 = vcombine.high %v2811_v59, %v2827_v41  ;;  %v2952_v51 = vld [vmem:[#allocation21 + $0x7c8] sm:$0xff] }
 0x942   : > { %8363 = vmatpush1.bf16.msra.mxu1 %v9962_v1  ;;  %v2843_v1 = vld [vmem:[#allocation21 + $0x460] sm:$0xff] }
 0x943   : > { %8486 = vmatpush1.bf16.msra.mxu0 %v9968_v2  ;;  %8364 = vmatprep.subr.bf16.mxu1 %v9995_v3  ;;  %v2859_v2 = vld [vmem:[#allocation21 + $0x4e0] sm:$0xff]  ;;  %v9646_v3 = vcombine.low %v2808_v9, %v2824_v12 }
 0x944   : > { %8487 = vmatprep.subr.bf16.mxu0 %v10001_v16  ;;  %v9652_v16 = vcombine.low %v2811_v59, %v2827_v41  ;;  %v9685_v17 = vcombine.high %v2843_v1, %v2859_v2  ;;  %v9684_v20 = vcombine.low %v2843_v1, %v2859_v2  ;;  %v2955_v9 = vld [vmem:[#allocation21 + $0x7e0] sm:$0xff] }
 0x946   : > { %8365 = vmatpush1.bf16.msra.mxu1 %v9994_v7  ;;  %v2875_v7 = vld [vmem:[#allocation21 + $0x560] sm:$0xff] }
 0x947   : > { %8488 = vmatpush1.bf16.msra.mxu0 %v10000_v24  ;;  %8366 = vmatprep.subr.bf16.mxu1 %v10027_v10  ;;  %v2891_v24 = vld [vmem:[#allocation21 + $0x5e0] sm:$0xff]  ;;  %v9678_v10 = vcombine.low %v2840_v0, %v2856_v46 }
 0x948   : > { %8489 = vmatprep.subr.bf16.mxu0 %v10033_v11  ;;  %v12321_v11 = vld [vmem:[#allocation23 + $0x8] sm:$0xff]  ;;  %v9717_v22 = vcombine.high %v2875_v7, %v2891_v24  ;;  %v9716_v37 = vcombine.low %v2875_v7, %v2891_v24 }
 0x94a   : > { %8367 = vmatpush1.bf16.msra.mxu1 %v10026_v27  ;;  %v2920_v27 = vld [vmem:[#allocation21 + $0x6c8] sm:$0xff] }
 0x94b   : > { %8490 = vmatpush1.bf16.msra.mxu0 %v10032_v23  ;;  %8418 = vmatprep.subr.bf16.mxu1 %v9551_v26  ;;  %v5340_v23 = vrot.slane %v12295_v19, %v12020_v49  ;;  %v5364_v26 = vrot.slane %v12321_v11, %v12017_v5 }
 0x94c   : > { %8541 = vmatprep.subr.bf16.mxu0 %v9557_v29  ;;  %v2907_v29 = vld [vmem:[#allocation21 + $0x660] sm:$0xff] }
 0x94d   : > { %8369 = vmatmul.mubr.bf16.vlgmr.msra.gmra.mrb[20].mxu1 %v12275_v30  ;;  %v9749_v50 = vcombine.high %v2907_v29, %v2923_v31  ;;  %v9748_v0 = vcombine.low %v2907_v29, %v2923_v31  ;;  %v3032_v31 = vld [vmem:[#allocation21 + $0xa48] sm:$0xff] }
 0x94e   : > { %8492 = vmatmul.mubr.bf16.vlgmr.msra.gmra.mrb[24].mxu0 %v12275_v30  ;;  %8419 = vmatpush1.bf16.msra.mxu1 %v9550_v33  ;;  %v5368_v33 = vrot.slane %v12321_v11, %v12025_v15 }
 0x94f   : > { %8450 = vmatprep.mubr.bf16.mxu1 %v12273_v28  ;;  %8542 = vmatpush1.bf16.msra.mxu0 %v9556_v42  ;;  %v9743_v42 = vcombine.high %v2904_v25, %v2920_v27 }
 0x950   : > { %8573 = vmatprep.mubr.bf16.mxu0 %v12273_v28  ;;  %8420 = vmatprep.subr.bf16.mxu1 %v9583_v45 }
 0x951   : > { %8543 = vmatprep.subr.bf16.mxu0 %v9589_v35  ;;  %v2936_v35 = vld [vmem:[#allocation21 + $0x748] sm:$0xff] }
 0x952   : > { %8421 = vmatpush1.bf16.msra.mxu1 %v9582_v58  ;;  %v9775_v46 = vcombine.high %v2936_v35, %v2952_v51  ;;  %v9774_v24 = vcombine.low %v2936_v35, %v2952_v51  ;;  %v3080_v35 = vld [vmem:[#allocation21 + $0xbc8] sm:$0xff]  ;;  %v3067_v51 = vld [vmem:[#allocation21 + $0xb60] sm:$0xff] }
 0x953   : > { %8544 = vmatpush1.bf16.msra.mxu0 %v9588_v39  ;;  %8422 = vmatprep.subr.bf16.mxu1 %v9615_v43 }
 0x954   : > { %8545 = vmatprep.subr.bf16.mxu0 %v9621_v52  ;;  %v2939_v52 = vld [vmem:[#allocation21 + $0x760] sm:$0xff] }
 0x956   : > { %8423 = vmatpush1.bf16.msra.mxu1 %v9614_v44 }
 0x957   : > { %8546 = vmatpush1.bf16.msra.mxu0 %v9620_v60  ;;  %8424 = vmatprep.subr.bf16.mxu1 %v9647_v61  ;;  %v9742_v60 = vcombine.low %v2904_v25, %v2920_v27  ;;  %v3000_v25 = vld [vmem:[#allocation21 + $0x948] sm:$0xff] }
 0x958   : > { %8547 = vmatprep.subr.bf16.mxu0 %v9653_v13  ;;  %v3016_v27 = vld [vmem:[#allocation21 + $0x9c8] sm:$0xff] }
 0x959   : > { %v9839_v55 = vcombine.high %v3000_v25, %v3016_v27 }
 0x95a   : > { %8425 = vmatpush1.bf16.msra.mxu1 %v9646_v3  ;;  %v9781_v3 = vcombine.high %v2939_v52, %v2955_v9 }
 0x95b   : > { %8548 = vmatpush1.bf16.msra.mxu0 %v9652_v16  ;;  %8426 = vmatprep.subr.bf16.mxu1 %v9679_v4  ;;  %v2968_v16 = vld [vmem:[#allocation21 + $0x848] sm:$0xff] }
 0x95c   : > { %8549 = vmatprep.subr.bf16.mxu0 %v9685_v17  ;;  %v2984_v4 = vld [vmem:[#allocation21 + $0x8c8] sm:$0xff]  ;;  %v2971_v17 = vld [vmem:[#allocation21 + $0x860] sm:$0xff] }
 0x95d   : > { %v9806_v29 = vcombine.low %v2968_v16, %v2984_v4  ;;  %v9812_v8 = vcombine.low %v2971_v17, %v2987_v6 }
 0x95e   : > { %8427 = vmatpush1.bf16.msra.mxu1 %v9678_v10  ;;  %v9780_v10 = vcombine.low %v2939_v52, %v2955_v9 }
 0x95f   : > { %8550 = vmatpush1.bf16.msra.mxu0 %v9684_v20  ;;  %8428 = vmatprep.subr.bf16.mxu1 %v9711_v21  ;;  %v9807_v20 = vcombine.high %v2968_v16, %v2984_v4  ;;  %v3131_v16 = vld [vmem:[#allocation21 + $0xd60] sm:$0xff] }
 0x960   : > { %v8124_v45 = vpop.f32.mrb[8].mxu1  ;;  %v8247_v47 = vpop.f32.mrb[12].mxu0  ;;  %8551 = vmatprep.subr.bf16.mxu0 %v9717_v22  ;;  %v9813_v22 = vcombine.high %v2971_v17, %v2987_v6  ;;  %v3147_v4 = vld [vmem:[#allocation21 + $0xde0] sm:$0xff] }
 0x961   : > { %v8125_v54 = vadd.f32 %v8124_v45, %v5340_v23  ;;  %v12331_v58 = vadd.f32 %v8247_v47, %v5364_v26  ;;  %v8126_v39 = vpop.f32.mrb[9].mxu1  ;;  %v8249_v43 = vpop.f32.mrb[13].mxu0  ;;  %v3003_v23 = vld [vmem:[#allocation21 + $0x960] sm:$0xff] }
 0x962   : > { %v8127_v12 = vadd.f32 %v8126_v39, %v5344_v32  ;;  %v12333_v59 = vadd.f32 %v8249_v43, %v5368_v33  ;;  %v8128_v41 = vpop.f32.mrb[10].mxu1  ;;  %v8251_v44 = vpop.f32.mrb[14].mxu0  ;;  %8429 = vmatpush1.bf16.msra.mxu1 %v9710_v34  ;;  %v3019_v26 = vld [vmem:[#allocation21 + $0x9e0] sm:$0xff]  ;;  %v3048_v32 = vld [vmem:[#allocation21 + $0xac8] sm:$0xff] }
 0x963   : > { %8552 = vmatpush1.bf16.msra.mxu0 %v9716_v37  ;;  %v8129_v61 = vpop.f32.mrb[11].mxu1  ;;  %v8252_v13 = vpop.f32.mrb[15].mxu0  ;;  %8430 = vmatprep.subr.bf16.mxu1 %v9743_v42  ;;  %v9845_v18 = vcombine.high %v3003_v23, %v3019_v26  ;;  %v3035_v33 = vld [vmem:[#allocation21 + $0xa60] sm:$0xff]  ;;  %v9838_v37 = vcombine.low %v3000_v25, %v3016_v27  ;;  %v9844_v42 = vcombine.low %v3003_v23, %v3019_v26  ;;  %v3112_v41 = vld [vmem:[#allocation21 + $0xcc8] sm:$0xff] }
 0x964   : > { %v8738_v1 = vcombine.low %v8125_v54, %v8127_v12  ;;  %v8771_v2 = vcombine.low %v12331_v58, %v12333_v59  ;;  %8553 = vmatprep.subr.bf16.mxu0 %v9749_v50  ;;  %v3051_v34 = vld [vmem:[#allocation21 + $0xae0] sm:$0xff]  ;;  %v9871_v45 = vcombine.high %v3032_v31, %v3048_v32  ;;  %v3064_v50 = vld [vmem:[#allocation21 + $0xb48] sm:$0xff]  ;;  %v9870_v39 = vcombine.low %v3032_v31, %v3048_v32 }
 0x965   : > { %v9877_v47 = vcombine.high %v3035_v33, %v3051_v34  ;;  %v3083_v54 = vld [vmem:[#allocation21 + $0xbe0] sm:$0xff]  ;;  %v9876_v43 = vcombine.low %v3035_v33, %v3051_v34  ;;  %v9903_v52 = vcombine.high %v3064_v50, %v3080_v35  ;;  %v3096_v12 = vld [vmem:[#allocation21 + $0xc48] sm:$0xff]  ;;  %v9902_v61 = vcombine.low %v3064_v50, %v3080_v35  ;;  %v2714_v34 = vld [vmem:[#allocation21 + $0x58] sm:$0xff] }
 0x966   : > { %v8752_v7 = vrot.slane %v8738_v1, %v12229_v53  ;;  %8431 = vmatpush1.bf16.msra.mxu1 %v9742_v60  ;;  %v9909_v9 = vcombine.high %v3067_v51, %v3083_v54  ;;  %v3099_v44 = vld [vmem:[#allocation21 + $0xc60] sm:$0xff]  ;;  %v9908_v13 = vcombine.low %v3067_v51, %v3083_v54  ;;  %v3128_v1 = vld [vmem:[#allocation21 + $0xd48] sm:$0xff]  ;;  %v9934_v17 = vcombine.low %v3096_v12, %v3112_v41  ;;  %v2746_v54 = vld [vmem:[#allocation21 + $0x158] sm:$0xff] }
 0x967   : > { %8554 = vmatpush1.bf16.msra.mxu0 %v9748_v0  ;;  %8432 = vmatprep.subr.bf16.mxu1 %v9775_v46  ;;  %v3115_v60 = vld [vmem:[#allocation21 + $0xce0] sm:$0xff]  ;;  %v9935_v0 = vcombine.high %v3096_v12, %v3112_v41  ;;  %v9972_v25 = vcombine.low %v3131_v16, %v3147_v4  ;;  %v3192_v26 = vld [vmem:[#allocation21 + $0xf48] sm:$0xff] }
 0x968   : > { %v8753_v21 = vcombine.low %v8745_v36, %v8752_v7  ;;  %8555 = vmatprep.subr.bf16.mxu0 %v9781_v3  ;;  %v9941_v46 = vcombine.high %v3099_v44, %v3115_v60  ;;  %v3144_v3 = vld [vmem:[#allocation21 + $0xdc8] sm:$0xff]  ;;  %v9940_v6 = vcombine.low %v3099_v44, %v3115_v60  ;;  %v9973_v7 = vcombine.high %v3131_v16, %v3147_v4  ;;  %v2778_v44 = vld [vmem:[#allocation21 + $0x258] sm:$0xff] }
 0x969   : > { %v9967_v36 = vcombine.high %v3128_v1, %v3144_v3  ;;  %v2794_v60 = vld [vmem:[#allocation21 + $0x2d8] sm:$0xff]  ;;  %v3068_v59 = vld [vmem:[#allocation21 + $0xb68] sm:$0xff] }
 0x96a   : > { %8881 = vst [vmem:[#allocation24] sm:$0xff] %v8753_v21  ;;  %8433 = vmatpush1.bf16.msra.mxu1 %v9774_v24  ;;  %v3160_v24 = vld [vmem:[#allocation21 + $0xe48] sm:$0xff]  ;;  %v3179_v21 = vld [vmem:[#allocation21 + $0xee0] sm:$0xff]  ;;  %v2810_v4 = vld [vmem:[#allocation21 + $0x358] sm:$0xff] }
 0x96b   : > { %8556 = vmatpush1.bf16.msra.mxu0 %v9780_v10  ;;  %8434 = vmatprep.subr.bf16.mxu1 %v9807_v20  ;;  %v3176_v10 = vld [vmem:[#allocation21 + $0xec8] sm:$0xff]  ;;  %v3163_v20 = vld [vmem:[#allocation21 + $0xe60] sm:$0xff] }
 0x96c   : > { %8557 = vmatprep.subr.bf16.mxu0 %v9813_v22  ;;  %v9966_v22 = vcombine.low %v3128_v1, %v3144_v3  ;;  %v9999_v27 = vcombine.high %v3160_v24, %v3176_v10  ;;  %v10005_v23 = vcombine.high %v3163_v20, %v3179_v21  ;;  %v10004_v31 = vcombine.low %v3163_v20, %v3179_v21  ;;  %v2842_v21 = vld [vmem:[#allocation21 + $0x458] sm:$0xff] }
 0x96d   : > { %v9619_v3 = vcombine.high %v2778_v44, %v2794_v60 }
 0x96e   : > { %8435 = vmatpush1.bf16.msra.mxu1 %v9806_v29  ;;  %v3208_v29 = vld [vmem:[#allocation21 + $0xfc8] sm:$0xff] }
 0x96f   : > { %8558 = vmatpush1.bf16.msra.mxu0 %v9812_v8  ;;  %8436 = vmatprep.subr.bf16.mxu1 %v9839_v55  ;;  %v3195_v8 = vld [vmem:[#allocation21 + $0xf60] sm:$0xff]  ;;  %v10031_v32 = vcombine.high %v3192_v26, %v3208_v29 }
 0x970   : > { %8559 = vmatprep.subr.bf16.mxu0 %v9845_v18  ;;  %v3211_v55 = vld [vmem:[#allocation21 + $0xfe0] sm:$0xff]  ;;  %v9998_v18 = vcombine.low %v3160_v24, %v3176_v10 }
 0x971   : > { %v10037_v33 = vcombine.high %v3195_v8, %v3211_v55  ;;  %v10036_v50 = vcombine.low %v3195_v8, %v3211_v55  ;;  %v2874_v55 = vld [vmem:[#allocation21 + $0x558] sm:$0xff] }
 0x972   : > { %8437 = vmatpush1.bf16.msra.mxu1 %v9838_v37  ;;  %v2730_v37 = vld [vmem:[#allocation21 + $0xd8] sm:$0xff] }
 0x973   : > { %8560 = vmatpush1.bf16.msra.mxu0 %v9844_v42  ;;  %8438 = vmatprep.subr.bf16.mxu1 %v9871_v45  ;;  %v2717_v42 = vld [vmem:[#allocation21 + $0x70] sm:$0xff]  ;;  %v9555_v35 = vcombine.high %v2714_v34, %v2730_v37 }
 0x974   : > { %8561 = vmatprep.subr.bf16.mxu0 %v9877_v47  ;;  %v2733_v45 = vld [vmem:[#allocation21 + $0xf0] sm:$0xff]  ;;  %v10030_v47 = vcombine.low %v3192_v26, %v3208_v29 }
 0x975   : > { %v9561_v51 = vcombine.high %v2717_v42, %v2733_v45  ;;  %v9560_v12 = vcombine.low %v2717_v42, %v2733_v45  ;;  %v2906_v45 = vld [vmem:[#allocation21 + $0x658] sm:$0xff] }
 0x976   : > { %8439 = vmatpush1.bf16.msra.mxu1 %v9870_v39  ;;  %v2762_v39 = vld [vmem:[#allocation21 + $0x1d8] sm:$0xff] }
 0x977   : > { %8562 = vmatpush1.bf16.msra.mxu0 %v9876_v43  ;;  %8440 = vmatprep.subr.bf16.mxu1 %v9903_v52  ;;  %v9554_v43 = vcombine.low %v2714_v34, %v2730_v37  ;;  %v2749_v52 = vld [vmem:[#allocation21 + $0x170] sm:$0xff]  ;;  %v9587_v41 = vcombine.high %v2746_v54, %v2762_v39 }
 0x978   : > { %8563 = vmatprep.subr.bf16.mxu0 %v9909_v9  ;;  %v2765_v9 = vld [vmem:[#allocation21 + $0x1f0] sm:$0xff] }
 0x979   : > { %v9592_v1 = vcombine.low %v2749_v52, %v2765_v9 }
 0x97a   : > { %8441 = vmatpush1.bf16.msra.mxu1 %v9902_v61  ;;  %v9593_v61 = vcombine.high %v2749_v52, %v2765_v9  ;;  %v5384_v52 = vrot.slane %v12321_v11, %v12105_v62 }
 0x97b   : > { %8564 = vmatpush1.bf16.msra.mxu0 %v9908_v13  ;;  %8442 = vmatprep.subr.bf16.mxu1 %v9935_v0  ;;  %v2781_v13 = vld [vmem:[#allocation21 + $0x270] sm:$0xff] }
 0x97c   : > { %8565 = vmatprep.subr.bf16.mxu0 %v9941_v46  ;;  %v2797_v0 = vld [vmem:[#allocation21 + $0x2f0] sm:$0xff]  ;;  %v9586_v46 = vcombine.low %v2746_v54, %v2762_v39  ;;  %v5380_v54 = vrot.slane %v12321_v11, %v12097_v56  ;;  %v5360_v39 = vrot.slane %v12295_v19, %v12108_v63 }
 0x97d   : > { %v9625_v16 = vcombine.high %v2781_v13, %v2797_v0  ;;  %v9624_v24 = vcombine.low %v2781_v13, %v2797_v0 }
 0x97e   : > { %8443 = vmatpush1.bf16.msra.mxu1 %v9934_v17  ;;  %v2826_v17 = vld [vmem:[#allocation21 + $0x3d8] sm:$0xff] }
 0x97f   : > { %8566 = vmatpush1.bf16.msra.mxu0 %v9940_v6  ;;  %8444 = vmatprep.subr.bf16.mxu1 %v9967_v36  ;;  %v2813_v6 = vld [vmem:[#allocation21 + $0x370] sm:$0xff]  ;;  %v9651_v10 = vcombine.high %v2810_v4, %v2826_v17 }
 0x980   : > { %8567 = vmatprep.subr.bf16.mxu0 %v9973_v7  ;;  %v2829_v36 = vld [vmem:[#allocation21 + $0x3f0] sm:$0xff]  ;;  %v9618_v7 = vcombine.low %v2778_v44, %v2794_v60  ;;  %v2938_v60 = vld [vmem:[#allocation21 + $0x758] sm:$0xff] }
 0x981   : > { %v9657_v20 = vcombine.high %v2813_v6, %v2829_v36  ;;  %v9656_v26 = vcombine.low %v2813_v6, %v2829_v36 }
 0x982   : > { %8445 = vmatpush1.bf16.msra.mxu1 %v9966_v22  ;;  %v2858_v22 = vld [vmem:[#allocation21 + $0x4d8] sm:$0xff] }
 0x983   : > { %8568 = vmatpush1.bf16.msra.mxu0 %v9972_v25  ;;  %8446 = vmatprep.subr.bf16.mxu1 %v9999_v27  ;;  %v2845_v25 = vld [vmem:[#allocation21 + $0x470] sm:$0xff]  ;;  %v9683_v29 = vcombine.high %v2842_v21, %v2858_v22 }
 0x984   : > { %8569 = vmatprep.subr.bf16.mxu0 %v10005_v23  ;;  %v2861_v27 = vld [vmem:[#allocation21 + $0x4f0] sm:$0xff]  ;;  %v9650_v23 = vcombine.low %v2810_v4, %v2826_v17 }
 0x985   : > { %v9689_v8 = vcombine.high %v2845_v25, %v2861_v27  ;;  %v9688_v34 = vcombine.low %v2845_v25, %v2861_v27  ;;  %v2970_v27 = vld [vmem:[#allocation21 + $0x858] sm:$0xff] }
 0x986   : > { %8447 = vmatpush1.bf16.msra.mxu1 %v9998_v18  ;;  %v2890_v18 = vld [vmem:[#allocation21 + $0x5d8] sm:$0xff] }
 0x987   : > { %8570 = vmatpush1.bf16.msra.mxu0 %v10004_v31  ;;  %8448 = vmatprep.subr.bf16.mxu1 %v10031_v32  ;;  %v2877_v31 = vld [vmem:[#allocation21 + $0x570] sm:$0xff]  ;;  %v9715_v37 = vcombine.high %v2874_v55, %v2890_v18 }
 0x988   : > { %8571 = vmatprep.subr.bf16.mxu0 %v10037_v33  ;;  %v2893_v32 = vld [vmem:[#allocation21 + $0x5f0] sm:$0xff]  ;;  %v9682_v33 = vcombine.low %v2842_v21, %v2858_v22 }
 0x989   : > { %v9721_v42 = vcombine.high %v2877_v31, %v2893_v32  ;;  %v9720_v9 = vcombine.low %v2877_v31, %v2893_v32 }
 0x98a   : > { %8449 = vmatpush1.bf16.msra.mxu1 %v10030_v47  ;;  %v2922_v47 = vld [vmem:[#allocation21 + $0x6d8] sm:$0xff] }
 0x98b   : > { %8572 = vmatpush1.bf16.msra.mxu0 %v10036_v50  ;;  %8500 = vmatprep.subr.bf16.mxu1 %v9555_v35  ;;  %v5356_v50 = vrot.slane %v12295_v19, %v12100_v57  ;;  %v2909_v35 = vld [vmem:[#allocation21 + $0x670] sm:$0xff]  ;;  %v9746_v6 = vcombine.low %v2906_v45, %v2922_v47 }
 0x98c   : > { %8623 = vmatprep.subr.bf16.mxu0 %v9561_v51  ;;  %v2925_v51 = vld [vmem:[#allocation21 + $0x6f0] sm:$0xff] }
 0x98d   : > { %8451 = vmatmul.mubr.bf16.vlgmr.msra.gmra.mrb[24].mxu1 %v12275_v30  ;;  %v9753_v44 = vcombine.high %v2909_v35, %v2925_v51 }
 0x98e   : > { %8574 = vmatmul.mubr.bf16.vlgmr.msra.gmra.mrb[28].mxu0 %v12275_v30  ;;  %8501 = vmatpush1.bf16.msra.mxu1 %v9554_v43  ;;  %v9714_v43 = vcombine.low %v2874_v55, %v2890_v18  ;;  %v8762_v55 = vrot.slane %v8754_v40, %v12229_v53 }
 0x98f   : > { %8532 = vmatprep.mubr.bf16.mxu1 %v12273_v28  ;;  %8624 = vmatpush1.bf16.msra.mxu0 %v9560_v12  ;;  %v9747_v12 = vcombine.high %v2906_v45, %v2922_v47  ;;  %v3018_v45 = vld [vmem:[#allocation21 + $0x9d8] sm:$0xff]  ;;  %v3005_v47 = vld [vmem:[#allocation21 + $0x970] sm:$0xff] }
 0x990   : > { %8655 = vmatprep.mubr.bf16.mxu0 %v12273_v28  ;;  %8502 = vmatprep.subr.bf16.mxu1 %v9587_v41 }
 0x991   : > { %8625 = vmatprep.subr.bf16.mxu0 %v9593_v61  ;;  %v2954_v61 = vld [vmem:[#allocation21 + $0x7d8] sm:$0xff] }
 0x992   : > { %8503 = vmatpush1.bf16.msra.mxu1 %v9586_v46  ;;  %v9778_v31 = vcombine.low %v2938_v60, %v2954_v61 }
 0x993   : > { %8626 = vmatpush1.bf16.msra.mxu0 %v9592_v1  ;;  %8504 = vmatprep.subr.bf16.mxu1 %v9619_v3  ;;  %v2941_v1 = vld [vmem:[#allocation21 + $0x770] sm:$0xff] }
 0x994   : > { %8627 = vmatprep.subr.bf16.mxu0 %v9625_v16  ;;  %v2957_v3 = vld [vmem:[#allocation21 + $0x7f0] sm:$0xff] }
 0x995   : > { %v9785_v25 = vcombine.high %v2941_v1, %v2957_v3  ;;  %v9784_v32 = vcombine.low %v2941_v1, %v2957_v3 }
 0x996   : > { %8505 = vmatpush1.bf16.msra.mxu1 %v9618_v7 }
 0x997   : > { %8628 = vmatpush1.bf16.msra.mxu0 %v9624_v24  ;;  %8506 = vmatprep.subr.bf16.mxu1 %v9651_v10  ;;  %v9752_v10 = vcombine.low %v2909_v35, %v2925_v51  ;;  %v3034_v51 = vld [vmem:[#allocation21 + $0xa58] sm:$0xff] }
 0x998   : > { %8629 = vmatprep.subr.bf16.mxu0 %v9657_v20  ;;  %v9779_v20 = vcombine.high %v2938_v60, %v2954_v61  ;;  %v3082_v60 = vld [vmem:[#allocation21 + $0xbd8] sm:$0xff]  ;;  %v3069_v61 = vld [vmem:[#allocation21 + $0xb70] sm:$0xff] }
 0x99a   : > { %8507 = vmatpush1.bf16.msra.mxu1 %v9650_v23  ;;  %v2986_v23 = vld [vmem:[#allocation21 + $0x8d8] sm:$0xff] }
 0x99b   : > { %8630 = vmatpush1.bf16.msra.mxu0 %v9656_v26  ;;  %8508 = vmatprep.subr.bf16.mxu1 %v9683_v29  ;;  %v2973_v29 = vld [vmem:[#allocation21 + $0x870] sm:$0xff]  ;;  %v9810_v35 = vcombine.low %v2970_v27, %v2986_v23 }
 0x99c   : > { %8631 = vmatprep.subr.bf16.mxu0 %v9689_v8  ;;  %v2989_v8 = vld [vmem:[#allocation21 + $0x8f0] sm:$0xff] }
 0x99d   : > { %v9816_v48 = vcombine.low %v2973_v29, %v2989_v8 }
 0x99e   : > { %8509 = vmatpush1.bf16.msra.mxu1 %v9682_v33  ;;  %v9811_v33 = vcombine.high %v2970_v27, %v2986_v23  ;;  %v3149_v27 = vld [vmem:[#allocation21 + $0xdf0] sm:$0xff] }
 0x99f   : > { %8632 = vmatpush1.bf16.msra.mxu0 %v9688_v34  ;;  %8510 = vmatprep.subr.bf16.mxu1 %v9715_v37  ;;  %v9817_v37 = vcombine.high %v2973_v29, %v2989_v8 }
 0x9a0   : > { %v8206_v41 = vpop.f32.mrb[12].mxu1  ;;  %8633 = vmatprep.subr.bf16.mxu0 %v9721_v42  ;;  %v3002_v42 = vld [vmem:[#allocation21 + $0x958] sm:$0xff] }
 0x9a1   : > { %v8207_v13 = vadd.f32 %v8206_v41, %v5356_v50  ;;  %v8329_v0 = vpop.f32.mrb[16].mxu0  ;;  %v8208_v46 = vpop.f32.mrb[13].mxu1  ;;  %v3021_v50 = vld [vmem:[#allocation21 + $0x9f0] sm:$0xff]  ;;  %v9843_v38 = vcombine.high %v3002_v42, %v3018_v45 }
 0x9a2   : > { %v12354_v16 = vadd.f32 %v8329_v0, %v5380_v54  ;;  %v8209_v19 = vadd.f32 %v8208_v46, %v5360_v39  ;;  %v8331_v4 = vpop.f32.mrb[17].mxu0  ;;  %v8210_v17 = vpop.f32.mrb[14].mxu1  ;;  %8511 = vmatpush1.bf16.msra.mxu1 %v9714_v43  ;;  %v9849_v40 = vcombine.high %v3005_v47, %v3021_v50  ;;  %v3050_v54 = vld [vmem:[#allocation21 + $0xad8] sm:$0xff]  ;;  %v3037_v39 = vld [vmem:[#allocation21 + $0xa70] sm:$0xff] }
 0x9a3   : > { %v12356_v36 = vadd.f32 %v8331_v4, %v5384_v52  ;;  %v8333_v7 = vpop.f32.mrb[18].mxu0  ;;  %8634 = vmatpush1.bf16.msra.mxu0 %v9720_v9  ;;  %v8211_v24 = vpop.f32.mrb[15].mxu1  ;;  %8512 = vmatprep.subr.bf16.mxu1 %v9747_v12  ;;  %v3053_v43 = vld [vmem:[#allocation21 + $0xaf0] sm:$0xff]  ;;  %v9842_v52 = vcombine.low %v3002_v42, %v3018_v45  ;;  %v9848_v9 = vcombine.low %v3005_v47, %v3021_v50  ;;  %v3114_v4 = vld [vmem:[#allocation21 + $0xcd8] sm:$0xff] }
 0x9a4   : > { %v8755_v21 = vcombine.low %v8207_v13, %v8209_v19  ;;  %v8334_v22 = vpop.f32.mrb[19].mxu0  ;;  %8635 = vmatprep.subr.bf16.mxu0 %v9753_v44  ;;  %v9875_v12 = vcombine.high %v3034_v51, %v3050_v54  ;;  %v9881_v41 = vcombine.high %v3037_v39, %v3053_v43  ;;  %v3066_v44 = vld [vmem:[#allocation21 + $0xb58] sm:$0xff]  ;;  %v3085_v13 = vld [vmem:[#allocation21 + $0xbf0] sm:$0xff]  ;;  %v9874_v0 = vcombine.low %v3034_v51, %v3050_v54 }
 0x9a5   : > { %v8788_v26 = vcombine.low %v12354_v16, %v12356_v36  ;;  %v9880_v46 = vcombine.low %v3037_v39, %v3053_v43  ;;  %v9907_v1 = vcombine.high %v3066_v44, %v3082_v60  ;;  %v9913_v3 = vcombine.high %v3069_v61, %v3085_v13  ;;  %v3098_v19 = vld [vmem:[#allocation21 + $0xc58] sm:$0xff]  ;;  %v3101_v17 = vld [vmem:[#allocation21 + $0xc70] sm:$0xff]  ;;  %v2716_v39 = vld [vmem:[#allocation21 + $0x68] sm:$0xff] }
 0x9a6   : > { %v8769_v18 = vrot.slane %v8755_v21, %v12229_v53  ;;  %8513 = vmatpush1.bf16.msra.mxu1 %v9746_v6  ;;  %v3117_v6 = vld [vmem:[#allocation21 + $0xcf0] sm:$0xff]  ;;  %v9906_v7 = vcombine.low %v3066_v44, %v3082_v60  ;;  %v9912_v24 = vcombine.low %v3069_v61, %v3085_v13  ;;  %v3130_v21 = vld [vmem:[#allocation21 + $0xd58] sm:$0xff]  ;;  %v9938_v23 = vcombine.low %v3098_v19, %v3114_v4  ;;  %v2732_v43 = vld [vmem:[#allocation21 + $0xe8] sm:$0xff] }
 0x9a7   : > { %8636 = vmatpush1.bf16.msra.mxu0 %v9752_v10  ;;  %8514 = vmatprep.subr.bf16.mxu1 %v9779_v20  ;;  %v9939_v10 = vcombine.high %v3098_v19, %v3114_v4  ;;  %v9945_v20 = vcombine.high %v3101_v17, %v3117_v6  ;;  %v3146_v22 = vld [vmem:[#allocation21 + $0xdd8] sm:$0xff]  ;;  %v9944_v29 = vcombine.low %v3101_v17, %v3117_v6  ;;  %v2764_v44 = vld [vmem:[#allocation21 + $0x1e8] sm:$0xff] }
 0x9a8   : > { %v8770_v34 = vcombine.low %v8762_v55, %v8769_v18  ;;  %8637 = vmatprep.subr.bf16.mxu0 %v9785_v25  ;;  %v3133_v25 = vld [vmem:[#allocation21 + $0xd70] sm:$0xff]  ;;  %v9971_v8 = vcombine.high %v3130_v21, %v3146_v22  ;;  %v3162_v18 = vld [vmem:[#allocation21 + $0xe58] sm:$0xff]  ;;  %v9558_v60 = vcombine.low %v2716_v39, %v2732_v43  ;;  %v2780_v13 = vld [vmem:[#allocation21 + $0x268] sm:$0xff] }
 0x9a9   : > { %v9977_v55 = vcombine.high %v3133_v25, %v3149_v27  ;;  %v3194_v47 = vld [vmem:[#allocation21 + $0xf58] sm:$0xff]  ;;  %v2828_v19 = vld [vmem:[#allocation21 + $0x3e8] sm:$0xff] }
 0x9aa   : > { %8882 = vst [vmem:[#allocation24 + $0x8] sm:$0xff] %v8770_v34  ;;  %8515 = vmatpush1.bf16.msra.mxu1 %v9778_v31  ;;  %v3178_v31 = vld [vmem:[#allocation21 + $0xed8] sm:$0xff]  ;;  %v9970_v34 = vcombine.low %v3130_v21, %v3146_v22  ;;  %v2844_v6 = vld [vmem:[#allocation21 + $0x468] sm:$0xff] }
 0x9ab   : > { %8638 = vmatpush1.bf16.msra.mxu0 %v9784_v32  ;;  %8516 = vmatprep.subr.bf16.mxu1 %v9811_v33  ;;  %v3165_v32 = vld [vmem:[#allocation21 + $0xe70] sm:$0xff]  ;;  %v10003_v42 = vcombine.high %v3162_v18, %v3178_v31  ;;  %v3210_v50 = vld [vmem:[#allocation21 + $0xfd8] sm:$0xff]  ;;  %v2892_v21 = vld [vmem:[#allocation21 + $0x5e8] sm:$0xff] }
 0x9ac   : > { %8639 = vmatprep.subr.bf16.mxu0 %v9817_v37  ;;  %v3181_v33 = vld [vmem:[#allocation21 + $0xef0] sm:$0xff]  ;;  %v9976_v37 = vcombine.low %v3133_v25, %v3149_v27  ;;  %v10035_v51 = vcombine.high %v3194_v47, %v3210_v50  ;;  %v3070_v36 = vld [vmem:[#allocation21 + $0xb78] sm:$0xff] }
 0x9ad   : > { %v10009_v45 = vcombine.high %v3165_v32, %v3181_v33  ;;  %v12368_v25 = vld [vmem:[#allocation23 + $0x10] sm:$0xff] }
 0x9ae   : > { %8517 = vmatpush1.bf16.msra.mxu1 %v9810_v35  ;;  %v3197_v35 = vld [vmem:[#allocation21 + $0xf70] sm:$0xff] }
 0x9af   : > { %8640 = vmatpush1.bf16.msra.mxu0 %v9816_v48  ;;  %8518 = vmatprep.subr.bf16.mxu1 %v9843_v38  ;;  %v3213_v48 = vld [vmem:[#allocation21 + $0xff0] sm:$0xff]  ;;  %v10002_v38 = vcombine.low %v3162_v18, %v3178_v31  ;;  %v5376_v18 = vrot.slane %v12321_v11, %v12028_v14 }
 0x9b0   : > { %8641 = vmatprep.subr.bf16.mxu0 %v9849_v40  ;;  %v10008_v40 = vcombine.low %v3165_v32, %v3181_v33  ;;  %v10041_v54 = vcombine.high %v3197_v35, %v3213_v48  ;;  %v5400_v32 = vrot.slane %v12368_v25, %v12025_v15 }
 0x9b2   : > { %8519 = vmatpush1.bf16.msra.mxu1 %v9842_v52  ;;  %v10034_v52 = vcombine.low %v3194_v47, %v3210_v50 }
 0x9b3   : > { %8642 = vmatpush1.bf16.msra.mxu0 %v9848_v9  ;;  %8520 = vmatprep.subr.bf16.mxu1 %v9875_v12  ;;  %v10040_v9 = vcombine.low %v3197_v35, %v3213_v48  ;;  %v9559_v12 = vcombine.high %v2716_v39, %v2732_v43 }
 0x9b4   : > { %8643 = vmatprep.subr.bf16.mxu0 %v9881_v41  ;;  %v2748_v41 = vld [vmem:[#allocation21 + $0x168] sm:$0xff] }
 0x9b5   : > { %v9591_v61 = vcombine.high %v2748_v41, %v2764_v44 }
 0x9b6   : > { %8521 = vmatpush1.bf16.msra.mxu1 %v9874_v0  ;;  %v2796_v0 = vld [vmem:[#allocation21 + $0x2e8] sm:$0xff] }
 0x9b7   : > { %8644 = vmatpush1.bf16.msra.mxu0 %v9880_v46  ;;  %8522 = vmatprep.subr.bf16.mxu1 %v9907_v1  ;;  %v9590_v46 = vcombine.low %v2748_v41, %v2764_v44  ;;  %v9623_v1 = vcombine.high %v2780_v13, %v2796_v0  ;;  %v9622_v4 = vcombine.low %v2780_v13, %v2796_v0  ;;  %v2988_v41 = vld [vmem:[#allocation21 + $0x8e8] sm:$0xff] }
 0x9b8   : > { %8645 = vmatprep.subr.bf16.mxu0 %v9913_v3  ;;  %v2812_v3 = vld [vmem:[#allocation21 + $0x368] sm:$0xff] }
 0x9b9   : > { %v9655_v17 = vcombine.high %v2812_v3, %v2828_v19 }
 0x9ba   : > { %8523 = vmatpush1.bf16.msra.mxu1 %v9906_v7  ;;  %v2860_v7 = vld [vmem:[#allocation21 + $0x4e8] sm:$0xff] }
 0x9bb   : > { %8646 = vmatpush1.bf16.msra.mxu0 %v9912_v24  ;;  %8524 = vmatprep.subr.bf16.mxu1 %v9939_v10  ;;  %v9654_v24 = vcombine.low %v2812_v3, %v2828_v19  ;;  %v9687_v10 = vcombine.high %v2844_v6, %v2860_v7  ;;  %v9686_v22 = vcombine.low %v2844_v6, %v2860_v7  ;;  %v3020_v3 = vld [vmem:[#allocation21 + $0x9e8] sm:$0xff] }
 0x9bc   : > { %8647 = vmatprep.subr.bf16.mxu0 %v9945_v20  ;;  %v2876_v20 = vld [vmem:[#allocation21 + $0x568] sm:$0xff] }
 0x9bd   : > { %v9719_v27 = vcombine.high %v2876_v20, %v2892_v21  ;;  %v9718_v31 = vcombine.low %v2876_v20, %v2892_v21  ;;  %v3052_v6 = vld [vmem:[#allocation21 + $0xae8] sm:$0xff] }
 0x9be   : > { %8525 = vmatpush1.bf16.msra.mxu1 %v9938_v23  ;;  %v2908_v23 = vld [vmem:[#allocation21 + $0x668] sm:$0xff] }
 0x9bf   : > { %8648 = vmatpush1.bf16.msra.mxu0 %v9944_v29  ;;  %8526 = vmatprep.subr.bf16.mxu1 %v9971_v8  ;;  %v2924_v29 = vld [vmem:[#allocation21 + $0x6e8] sm:$0xff]  ;;  %v5372_v8 = vrot.slane %v12321_v11, %v12020_v49 }
 0x9c0   : > { %8649 = vmatprep.subr.bf16.mxu0 %v9977_v55  ;;  %v5396_v55 = vrot.slane %v12368_v25, %v12017_v5  ;;  %v9751_v33 = vcombine.high %v2908_v23, %v2924_v29  ;;  %v3100_v20 = vld [vmem:[#allocation21 + $0xc68] sm:$0xff] }
 0x9c1   : > { %v3116_v21 = vld [vmem:[#allocation21 + $0xce8] sm:$0xff] }
 0x9c2   : > { %8527 = vmatpush1.bf16.msra.mxu1 %v9970_v34 }
 0x9c3   : > { %8650 = vmatpush1.bf16.msra.mxu0 %v9976_v37  ;;  %8528 = vmatprep.subr.bf16.mxu1 %v10003_v42  ;;  %v2940_v37 = vld [vmem:[#allocation21 + $0x768] sm:$0xff] }
 0x9c4   : > { %8651 = vmatprep.subr.bf16.mxu0 %v10009_v45  ;;  %v2956_v42 = vld [vmem:[#allocation21 + $0x7e8] sm:$0xff] }
 0x9c5   : > { %v9783_v43 = vcombine.high %v2940_v37, %v2956_v42  ;;  %v9782_v13 = vcombine.low %v2940_v37, %v2956_v42  ;;  %v3212_v37 = vld [vmem:[#allocation21 + $0xfe8] sm:$0xff] }
 0x9c6   : > { %8529 = vmatpush1.bf16.msra.mxu1 %v10002_v38 }
 0x9c7   : > { %8652 = vmatpush1.bf16.msra.mxu0 %v10008_v40  ;;  %8530 = vmatprep.subr.bf16.mxu1 %v10035_v51  ;;  %v9750_v51 = vcombine.low %v2908_v23, %v2924_v29  ;;  %v3132_v23 = vld [vmem:[#allocation21 + $0xd68] sm:$0xff] }
 0x9c8   : > { %8653 = vmatprep.subr.bf16.mxu0 %v10041_v54  ;;  %v3148_v29 = vld [vmem:[#allocation21 + $0xde8] sm:$0xff] }
 0x9ca   : > { %8531 = vmatpush1.bf16.msra.mxu1 %v10034_v52 }
 0x9cb   : > { %8654 = vmatpush1.bf16.msra.mxu0 %v10040_v9  ;;  %8582 = vmatprep.subr.bf16.mxu1 %v9559_v12  ;;  %v2972_v12 = vld [vmem:[#allocation21 + $0x868] sm:$0xff] }
 0x9cc   : > { %v9815_v0 = vcombine.high %v2972_v12, %v2988_v41  ;;  %v9814_v19 = vcombine.low %v2972_v12, %v2988_v41  ;;  %v2814_v41 = vld [vmem:[#allocation21 + $0x378] sm:$0xff] }
 0x9cd   : > { %8533 = vmatmul.mubr.bf16.vlgmr.msra.gmra.mrb[28].mxu1 %v12275_v30 }
 0x9ce   : > { %8656 = vmatmul.mubr.bf16.vlgmr.msra.gmra.mrb[32].mxu0 %v12275_v30  ;;  %8583 = vmatpush1.bf16.msra.mxu1 %v9558_v60  ;;  %v8779_v60 = vrot.slane %v8771_v2, %v12229_v53  ;;  %v3084_v2 = vld [vmem:[#allocation21 + $0xbe8] sm:$0xff] }
 0x9cf   : > { %8614 = vmatprep.mubr.bf16.mxu1 %v12273_v28  ;;  %8584 = vmatprep.subr.bf16.mxu1 %v9591_v61 }
 0x9d2   : > { %8585 = vmatpush1.bf16.msra.mxu1 %v9590_v46 }
 0x9d3   : > { %8586 = vmatprep.subr.bf16.mxu1 %v9623_v1  ;;  %v3004_v1 = vld [vmem:[#allocation21 + $0x968] sm:$0xff] }
 0x9d4   : > { %v9846_v7 = vcombine.low %v3004_v1, %v3020_v3 }
 0x9d6   : > { %8587 = vmatpush1.bf16.msra.mxu1 %v9622_v4  ;;  %v9847_v4 = vcombine.high %v3004_v1, %v3020_v3 }
 0x9d7   : > { %8588 = vmatprep.subr.bf16.mxu1 %v9655_v17  ;;  %v3036_v17 = vld [vmem:[#allocation21 + $0xa68] sm:$0xff] }
 0x9d8   : > { %v9879_v58 = vcombine.high %v3036_v17, %v3052_v6 }
 0x9da   : > { %8589 = vmatpush1.bf16.msra.mxu1 %v9654_v24  ;;  %v9878_v24 = vcombine.low %v3036_v17, %v3052_v6  ;;  %v2910_v6 = vld [vmem:[#allocation21 + $0x678] sm:$0xff] }
 0x9db   : > { %8590 = vmatprep.subr.bf16.mxu1 %v9687_v10  ;;  %v9911_v10 = vcombine.high %v3068_v59, %v3084_v2 }
 0x9de   : > { %8591 = vmatpush1.bf16.msra.mxu1 %v9686_v22  ;;  %v9910_v22 = vcombine.low %v3068_v59, %v3084_v2  ;;  %v5412_v2 = vrot.slane %v12368_v25, %v12097_v56 }
 0x9df   : > { %8592 = vmatprep.subr.bf16.mxu1 %v9719_v27  ;;  %v9943_v27 = vcombine.high %v3100_v20, %v3116_v21 }
 0x9e0   : > { %v8288_v34 = vpop.f32.mrb[16].mxu1 }
 0x9e1   : > { %v8289_v45 = vadd.f32 %v8288_v34, %v5372_v8  ;;  %v8411_v47 = vpop.f32.mrb[20].mxu0  ;;  %v8290_v50 = vpop.f32.mrb[17].mxu1  ;;  %v9942_v8 = vcombine.low %v3100_v20, %v3116_v21  ;;  %v3196_v34 = vld [vmem:[#allocation21 + $0xf68] sm:$0xff]  ;;  %v5416_v20 = vrot.slane %v12368_v25, %v12105_v62 }
 0x9e2   : > { %v12378_v35 = vadd.f32 %v8411_v47, %v5396_v55  ;;  %v8291_v48 = vadd.f32 %v8290_v50, %v5376_v18  ;;  %v8413_v38 = vpop.f32.mrb[21].mxu0  ;;  %v8292_v40 = vpop.f32.mrb[18].mxu1  ;;  %8593 = vmatpush1.bf16.msra.mxu1 %v9718_v31  ;;  %v9975_v55 = vcombine.high %v3132_v23, %v3148_v29  ;;  %v3164_v18 = vld [vmem:[#allocation21 + $0xe68] sm:$0xff]  ;;  %v2718_v47 = vld [vmem:[#allocation21 + $0x78] sm:$0xff] }
 0x9e3   : > { %v12380_v11 = vadd.f32 %v8413_v38, %v5400_v32  ;;  %v8415_v54 = vpop.f32.mrb[22].mxu0  ;;  %v8293_v39 = vpop.f32.mrb[19].mxu1  ;;  %8594 = vmatprep.subr.bf16.mxu1 %v9751_v33  ;;  %v3180_v31 = vld [vmem:[#allocation21 + $0xee8] sm:$0xff]  ;;  %v9974_v32 = vcombine.low %v3132_v23, %v3148_v29  ;;  %v2734_v50 = vld [vmem:[#allocation21 + $0xf8] sm:$0xff] }
 0x9e4   : > { %v8772_v52 = vcombine.low %v8289_v45, %v8291_v48  ;;  %v8416_v9 = vpop.f32.mrb[23].mxu0  ;;  %v10007_v33 = vcombine.high %v3164_v18, %v3180_v31  ;;  %v10006_v42 = vcombine.low %v3164_v18, %v3180_v31  ;;  %v10039_v45 = vcombine.high %v3196_v34, %v3212_v37  ;;  %v2750_v40 = vld [vmem:[#allocation21 + $0x178] sm:$0xff] }
 0x9e5   : > { %v8805_v44 = vcombine.low %v12378_v35, %v12380_v11  ;;  %v10038_v48 = vcombine.low %v3196_v34, %v3212_v37  ;;  %v9563_v38 = vcombine.high %v2718_v47, %v2734_v50  ;;  %v9562_v54 = vcombine.low %v2718_v47, %v2734_v50  ;;  %v2958_v23 = vld [vmem:[#allocation21 + $0x7f8] sm:$0xff] }
 0x9e6   : > { %v8786_v61 = vrot.slane %v8772_v52, %v12229_v53  ;;  %8595 = vmatpush1.bf16.msra.mxu1 %v9750_v51  ;;  %v2766_v51 = vld [vmem:[#allocation21 + $0x1f8] sm:$0xff] }
 0x9e7   : > { %8596 = vmatprep.subr.bf16.mxu1 %v9783_v43  ;;  %v9595_v39 = vcombine.high %v2750_v40, %v2766_v51  ;;  %v2782_v43 = vld [vmem:[#allocation21 + $0x278] sm:$0xff]  ;;  %v9594_v9 = vcombine.low %v2750_v40, %v2766_v51 }
 0x9e8   : > { %v8787_v46 = vcombine.low %v8779_v60, %v8786_v61  ;;  %v2798_v52 = vld [vmem:[#allocation21 + $0x2f8] sm:$0xff] }
 0x9e9   : > { %v9627_v12 = vcombine.high %v2782_v43, %v2798_v52  ;;  %v2830_v60 = vld [vmem:[#allocation21 + $0x3f8] sm:$0xff]  ;;  %v9626_v61 = vcombine.low %v2782_v43, %v2798_v52 }
 0x9ea   : > { %8883 = vst [vmem:[#allocation24 + $0x10] sm:$0xff] %v8787_v46  ;;  %8597 = vmatpush1.bf16.msra.mxu1 %v9782_v13  ;;  %v9659_v13 = vcombine.high %v2814_v41, %v2830_v60  ;;  %v2862_v46 = vld [vmem:[#allocation21 + $0x4f8] sm:$0xff]  ;;  %v9658_v1 = vcombine.low %v2814_v41, %v2830_v60 }
 0x9eb   : > { %8598 = vmatprep.subr.bf16.mxu1 %v9815_v0  ;;  %v2846_v0 = vld [vmem:[#allocation21 + $0x478] sm:$0xff] }
 0x9ec   : > { %v9691_v3 = vcombine.high %v2846_v0, %v2862_v46  ;;  %v9690_v17 = vcombine.low %v2846_v0, %v2862_v46  ;;  %v2990_v40 = vld [vmem:[#allocation21 + $0x8f8] sm:$0xff] }
 0x9ed   : > { %v3022_v41 = vld [vmem:[#allocation21 + $0x9f8] sm:$0xff] }
 0x9ee   : > { %8599 = vmatpush1.bf16.msra.mxu1 %v9814_v19  ;;  %v2878_v19 = vld [vmem:[#allocation21 + $0x578] sm:$0xff] }
 0x9ef   : > { %8600 = vmatprep.subr.bf16.mxu1 %v9847_v4  ;;  %v2894_v4 = vld [vmem:[#allocation21 + $0x5f8] sm:$0xff] }
 0x9f0   : > { %v3054_v0 = vld [vmem:[#allocation21 + $0xaf8] sm:$0xff] }
 0x9f2   : > { %8601 = vmatpush1.bf16.msra.mxu1 %v9846_v7  ;;  %v2926_v7 = vld [vmem:[#allocation21 + $0x6f8] sm:$0xff] }
 0x9f3   : > { %8602 = vmatprep.subr.bf16.mxu1 %v9879_v58  ;;  %v10863_v58 = vld [vmem:[#allocation23 + $0x8] sm:$0xff]  ;;  %v9755_v21 = vcombine.high %v2910_v6, %v2926_v7  ;;  %v9754_v34 = vcombine.low %v2910_v6, %v2926_v7  ;;  %v3134_v6 = vld [vmem:[#allocation21 + $0xd78] sm:$0xff] }
 0x9f4   : > { %v5388_v59 = vrot.slane %v10863_v58, %v12100_v57  ;;  %v3150_v7 = vld [vmem:[#allocation21 + $0xdf8] sm:$0xff] }
 0x9f6   : > { %8603 = vmatpush1.bf16.msra.mxu1 %v9878_v24  ;;  %v5392_v24 = vrot.slane %v10863_v58, %v12108_v63 }
 0x9f7   : > { %8604 = vmatprep.subr.bf16.mxu1 %v9911_v10  ;;  %v9722_v10 = vcombine.low %v2878_v19, %v2894_v4 }
 0x9fa   : > { %8605 = vmatpush1.bf16.msra.mxu1 %v9910_v22 }
 0x9fb   : > { %8606 = vmatprep.subr.bf16.mxu1 %v9943_v27  ;;  %v2942_v27 = vld [vmem:[#allocation21 + $0x778] sm:$0xff] }
 0x9fc   : > { %v9787_v47 = vcombine.high %v2942_v27, %v2958_v23  ;;  %v9786_v43 = vcombine.low %v2942_v27, %v2958_v23 }
 0x9fe   : > { %8607 = vmatpush1.bf16.msra.mxu1 %v9942_v8 }
 0x9ff   : > { %8608 = vmatprep.subr.bf16.mxu1 %v9975_v55 }
 0xa02   : > { %8609 = vmatpush1.bf16.msra.mxu1 %v9974_v32 }
 0xa03   : > { %8610 = vmatprep.subr.bf16.mxu1 %v10007_v33 }
 0xa06   : > { %8611 = vmatpush1.bf16.msra.mxu1 %v10006_v42 }
 0xa07   : > { %8612 = vmatprep.subr.bf16.mxu1 %v10039_v45 }
 0xa0a   : > { %8613 = vmatpush1.bf16.msra.mxu1 %v10038_v48 }
 0xa0b   : > { %8664 = vmatprep.subr.bf16.mxu1 %v9563_v38  ;;  %v2974_v38 = vld [vmem:[#allocation21 + $0x878] sm:$0xff] }
 0xa0c   : > { %v9819_v52 = vcombine.high %v2974_v38, %v2990_v40  ;;  %v9818_v60 = vcombine.low %v2974_v38, %v2990_v40 }
 0xa0d   : > { %8615 = vmatmul.mubr.bf16.vlgmr.msra.gmra.mrb[32].mxu1 %v12275_v30 }
 0xa0e   : > { %8665 = vmatpush1.bf16.msra.mxu1 %v9562_v54  ;;  %8696 = vmatprep.mubr.bf16.mxu1 %v12273_v28  ;;  %v9723_v28 = vcombine.high %v2878_v19, %v2894_v4  ;;  %v8796_v54 = vrot.slane %v8788_v26, %v12229_v53  ;;  %v3086_v26 = vld [vmem:[#allocation21 + $0xbf8] sm:$0xff] }
 0xa0f   : > { %8666 = vmatprep.subr.bf16.mxu1 %v9595_v39  ;;  %v3102_v19 = vld [vmem:[#allocation21 + $0xc78] sm:$0xff] }
 0xa10   : > { %v3118_v4 = vld [vmem:[#allocation21 + $0xcf8] sm:$0xff] }
 0xa11   : > { %v9946_v58 = vcombine.low %v3102_v19, %v3118_v4 }
 0xa12   : > { %8667 = vmatpush1.bf16.msra.mxu1 %v9594_v9 }
 0xa13   : > { %8668 = vmatprep.subr.bf16.mxu1 %v9627_v12  ;;  %v3006_v12 = vld [vmem:[#allocation21 + $0x978] sm:$0xff] }
 0xa14   : > { %v9850_v46 = vcombine.low %v3006_v12, %v3022_v41 }
 0xa16   : > { %8669 = vmatpush1.bf16.msra.mxu1 %v9626_v61  ;;  %v9851_v61 = vcombine.high %v3006_v12, %v3022_v41  ;;  %v5420_v41 = vrot.slane %v12368_v25, %v12100_v57 }
 0xa17   : > { %8670 = vmatprep.subr.bf16.mxu1 %v9659_v13  ;;  %v3038_v13 = vld [vmem:[#allocation21 + $0xa78] sm:$0xff] }
 0xa18   : > { %v9883_v16 = vcombine.high %v3038_v13, %v3054_v0 }
 0xa1a   : > { %8671 = vmatpush1.bf16.msra.mxu1 %v9658_v1  ;;  %v9882_v1 = vcombine.low %v3038_v13, %v3054_v0 }
 0xa1b   : > { %8672 = vmatprep.subr.bf16.mxu1 %v9691_v3  ;;  %v9915_v3 = vcombine.high %v3070_v36, %v3086_v26 }
 0xa1e   : > { %8673 = vmatpush1.bf16.msra.mxu1 %v9690_v17  ;;  %v9914_v17 = vcombine.low %v3070_v36, %v3086_v26 }
 0xa1f   : > { %8674 = vmatprep.subr.bf16.mxu1 %v9723_v28  ;;  %v9947_v28 = vcombine.high %v3102_v19, %v3118_v4 }
 0xa20   : > { %v8370_v22 = vpop.f32.mrb[20].mxu1 }
 0xa21   : > { %v8371_v29 = vadd.f32 %v8370_v22, %v5388_v59  ;;  %v8493_v8 = vpop.f32.mrb[24].mxu0  ;;  %v8372_v55 = vpop.f32.mrb[21].mxu1  ;;  %v9979_v59 = vcombine.high %v3134_v6, %v3150_v7  ;;  %v3214_v22 = vld [vmem:[#allocation21 + $0xff8] sm:$0xff] }
 0xa22   : > { %v12397_v18 = vadd.f32 %v8493_v8, %v5412_v2  ;;  %v8373_v31 = vadd.f32 %v8372_v55, %v5392_v24  ;;  %v8495_v32 = vpop.f32.mrb[25].mxu0  ;;  %v8374_v33 = vpop.f32.mrb[22].mxu1  ;;  %8675 = vmatpush1.bf16.msra.mxu1 %v9722_v10  ;;  %v3166_v2 = vld [vmem:[#allocation21 + $0xe78] sm:$0xff]  ;;  %v9978_v10 = vcombine.low %v3134_v6, %v3150_v7  ;;  %v5404_v55 = vrot.slane %v12368_v25, %v12020_v49 }
 0xa23   : > { %v12399_v37 = vadd.f32 %v8495_v32, %v5416_v20  ;;  %v8497_v42 = vpop.f32.mrb[26].mxu0  ;;  %v8375_v45 = vpop.f32.mrb[23].mxu1  ;;  %8676 = vmatprep.subr.bf16.mxu1 %v9755_v21  ;;  %v3182_v24 = vld [vmem:[#allocation21 + $0xef8] sm:$0xff]  ;;  %v5408_v32 = vrot.slane %v12368_v25, %v12028_v14 }
 0xa24   : > { %v8789_v50 = vcombine.low %v8371_v29, %v8373_v31  ;;  %v8498_v48 = vpop.f32.mrb[27].mxu0  ;;  %v10011_v20 = vcombine.high %v3166_v2, %v3182_v24  ;;  %v3198_v21 = vld [vmem:[#allocation21 + $0xf78] sm:$0xff]  ;;  %v10010_v27 = vcombine.low %v3166_v2, %v3182_v24 }
 0xa25   : > { %v8822_v51 = vcombine.low %v12397_v18, %v12399_v37  ;;  %v10043_v23 = vcombine.high %v3198_v21, %v3214_v22  ;;  %v10042_v29 = vcombine.low %v3198_v21, %v3214_v22  ;;  %v12409_v8 = vld [vmem:[#allocation23 + $0x18] sm:$0xff] }
 0xa26   : > { %v8803_v39 = vrot.slane %v8789_v50, %v12229_v53  ;;  %8677 = vmatpush1.bf16.msra.mxu1 %v9754_v34  ;;  %v5428_v31 = vrot.slane %v12409_v8, %v12017_v5  ;;  %v5432_v33 = vrot.slane %v12409_v8, %v12025_v15  ;;  %v5448_v13 = vrot.slane %v12409_v8, %v12105_v62 }
 0xa27   : > { %8678 = vmatprep.subr.bf16.mxu1 %v9787_v47  ;;  %v5436_v6 = vrot.slane %v12409_v8, %v12020_v49  ;;  %v5440_v7 = vrot.slane %v12409_v8, %v12028_v14  ;;  %v5452_v22 = vrot.slane %v12409_v8, %v12100_v57  ;;  %v5456_v49 = vrot.slane %v12409_v8, %v12108_v63 }
 0xa28   : > { %v8804_v9 = vcombine.low %v8796_v54, %v8803_v39 }
 0xa2a   : > { %8884 = vst [vmem:[#allocation24 + $0x18] sm:$0xff] %v8804_v9  ;;  %8679 = vmatpush1.bf16.msra.mxu1 %v9786_v43  ;;  %v8813_v9 = vrot.slane %v8805_v44, %v12229_v53 }
 0xa2b   : > { %8680 = vmatprep.subr.bf16.mxu1 %v9819_v52 }
 0xa2e   : > { %8681 = vmatpush1.bf16.msra.mxu1 %v9818_v60  ;;  %v5444_v60 = vrot.slane %v12409_v8, %v12097_v56 }
 0xa2f   : > { %8682 = vmatprep.subr.bf16.mxu1 %v9851_v61  ;;  %v5424_v61 = vrot.slane %v12368_v25, %v12108_v63  ;;  %v8830_v25 = vrot.slane %v8822_v51, %v12229_v53 }
 0xa32   : > { %8683 = vmatpush1.bf16.msra.mxu1 %v9850_v46 }
 0xa33   : > { %8684 = vmatprep.subr.bf16.mxu1 %v9883_v16 }
 0xa36   : > { %8685 = vmatpush1.bf16.msra.mxu1 %v9882_v1 }
 0xa37   : > { %8686 = vmatprep.subr.bf16.mxu1 %v9915_v3 }
 0xa3a   : > { %8687 = vmatpush1.bf16.msra.mxu1 %v9914_v17 }
 0xa3b   : > { %8688 = vmatprep.subr.bf16.mxu1 %v9947_v28 }
 0xa3e   : > { %8689 = vmatpush1.bf16.msra.mxu1 %v9946_v58 }
 0xa3f   : > { %8690 = vmatprep.subr.bf16.mxu1 %v9979_v59 }
 0xa42   : > { %8691 = vmatpush1.bf16.msra.mxu1 %v9978_v10 }
 0xa43   : > { %8692 = vmatprep.subr.bf16.mxu1 %v10011_v20 }
 0xa46   : > { %8693 = vmatpush1.bf16.msra.mxu1 %v10010_v27 }
 0xa47   : > { %8694 = vmatprep.subr.bf16.mxu1 %v10043_v23 }
 0xa4a   : > { %8695 = vmatpush1.bf16.msra.mxu1 %v10042_v29 }
 0xa4d   : > { %8697 = vmatmul.mubr.bf16.vlgmr.msra.gmra.mrb[36].mxu1 %v12275_v30 }
 0xa60   : > { %v8452_v34 = vpop.f32.mrb[24].mxu1 }
 0xa61   : > { %v8453_v42 = vadd.f32 %v8452_v34, %v5404_v55  ;;  %v8575_v45 = vpop.f32.mrb[28].mxu0  ;;  %v8454_v47 = vpop.f32.mrb[25].mxu1 }
 0xa62   : > { %v8576_v50 = vadd.f32 %v8575_v45, %v5428_v31  ;;  %v8455_v30 = vadd.f32 %v8454_v47, %v5408_v32  ;;  %v8577_v48 = vpop.f32.mrb[29].mxu0  ;;  %v8456_v38 = vpop.f32.mrb[26].mxu1 }
 0xa63   : > { %v8578_v40 = vadd.f32 %v8577_v48, %v5432_v33  ;;  %v8579_v54 = vpop.f32.mrb[30].mxu0  ;;  %v8457_v39 = vpop.f32.mrb[27].mxu1 }
 0xa64   : > { %v8806_v43 = vcombine.low %v8453_v42, %v8455_v30  ;;  %v8580_v52 = vpop.f32.mrb[31].mxu0 }
 0xa65   : > { %v8839_v5 = vcombine.low %v8576_v50, %v8578_v40 }
 0xa66   : > { %v8820_v15 = vrot.slane %v8806_v43, %v12229_v53 }
 0xa67   : > { %v8847_v18 = vrot.slane %v8839_v5, %v12229_v53 }
 0xa68   : > { %v8821_v12 = vcombine.low %v8813_v9, %v8820_v15 }
 0xa6a   : > { %8885 = vst [vmem:[#allocation24 + $0x20] sm:$0xff] %v8821_v12 }
 0xaa0   : > { %v8534_v0 = vpop.f32.mrb[28].mxu1 }
 0xaa1   : > { %v8535_v46 = vadd.f32 %v8534_v0, %v5420_v41  ;;  %v8657_v35 = vpop.f32.mrb[32].mxu0  ;;  %v8536_v11 = vpop.f32.mrb[29].mxu1 }
 0xaa2   : > { %v8658_v44 = vadd.f32 %v8657_v35, %v5444_v60  ;;  %v8537_v16 = vadd.f32 %v8536_v11, %v5424_v61  ;;  %v8659_v36 = vpop.f32.mrb[33].mxu0  ;;  %v8538_v26 = vpop.f32.mrb[30].mxu1 }
 0xaa3   : > { %v8660_v1 = vadd.f32 %v8659_v36, %v5448_v13  ;;  %v8661_v3 = vpop.f32.mrb[34].mxu0  ;;  %v8539_v19 = vpop.f32.mrb[31].mxu1 }
 0xaa4   : > { %v8823_v4 = vcombine.low %v8535_v46, %v8537_v16  ;;  %v8662_v17 = vpop.f32.mrb[35].mxu0 }
 0xaa5   : > { %v8856_v56 = vcombine.low %v8658_v44, %v8660_v1 }
 0xaa6   : > { %v8837_v62 = vrot.slane %v8823_v4, %v12229_v53 }
 0xaa7   : > { %v8864_v33 = vrot.slane %v8856_v56, %v12229_v53 }
 0xaa8   : > { %v8838_v28 = vcombine.low %v8830_v25, %v8837_v62 }
 0xaaa   : > { %8886 = vst [vmem:[#allocation24 + $0x28] sm:$0xff] %v8838_v28 }
 0xae0   : > { %v8616_v58 = vpop.f32.mrb[32].mxu1 }
 0xae1   : > { %v8617_v59 = vadd.f32 %v8616_v58, %v5436_v6  ;;  %v8618_v2 = vpop.f32.mrb[33].mxu1 }
 0xae2   : > { %v8619_v24 = vadd.f32 %v8618_v2, %v5440_v7  ;;  %v8620_v10 = vpop.f32.mrb[34].mxu1 }
 0xae3   : > { %v8621_v20 = vpop.f32.mrb[35].mxu1 }
 0xae4   : > { %v8840_v21 = vcombine.low %v8617_v59, %v8619_v24 }
 0xae6   : > { %v8854_v37 = vrot.slane %v8840_v21, %v12229_v53 }
 0xae8   : > { %v8855_v51 = vcombine.low %v8847_v18, %v8854_v37 }
 0xaea   : > { %8887 = vst [vmem:[#allocation24 + $0x30] sm:$0xff] %v8855_v51 }
 0xb20   : > { %v8698_v14 = vpop.f32.mrb[36].mxu1 }
 0xb21   : > { %v8699_v27 = vadd.f32 %v8698_v14, %v5452_v22  ;;  %v8700_v23 = vpop.f32.mrb[37].mxu1 }
 0xb22   : > { %v8701_v29 = vadd.f32 %v8700_v23, %v5456_v49  ;;  %v8702_v55 = vpop.f32.mrb[38].mxu1 }
 0xb23   : > { %v8703_v31 = vpop.f32.mrb[39].mxu1 }
 0xb24   : > { %v8857_v32 = vcombine.low %v8699_v27, %v8701_v29 }
 0xb26   : > { %v8871_v34 = vrot.slane %v8857_v32, %v12229_v53 }
 0xb28   : > { %v8872_v42 = vcombine.low %v8864_v33, %v8871_v34 }
 0xb2a   : > { %8888 = vst [vmem:[#allocation24 + $0x38] sm:$0xff] %v8872_v42 }
 0xb2b PF: > { %s12579_s26 = sld [smem:[#allocation37_spill]]  ;;  %s11379_s1 = smov [#allocation24]  }
 0xb2c   : > { %s8896_s15 = sshll.u32 %s11379_s1, 4  ;;  %s8897_s15 = int_to_ptr.vmem [resolvable:$true] %s8896_s15 }
 0xb2d   : > { %s11230_s23 = scalar_lea.vmem %s8897_s15, 1024  ;;  %p11237_p9 = scmp.lt.s32.totalorder %s8897_s15, %s8897_s15 }
 0xb2e   : > { %p11231_p1 = scmp.ne.s32.totalorder %s8897_s15, %s11230_s23  ;;  %p11238_p7 = scmp.lt.s32.totalorder %s11230_s23, %s11230_s23 }
 0xb30   : > { %p11239_p2 = por %p11238_p7, %p11237_p9 }
 0xb31   : > { %s12580_s18 = sadd.s32 4294967295, %s12579_s26  }
 0xb32   : > { %p12451_p10 = scmp.eq.s32.totalorder %s12580_s18, 7 }
 0xb34   : > { %p11232_p3 = pnand %p11231_p1, %p12451_p10 }
 0xb36   : > { %p11233_p11 = pneg %p11232_p3 }
 0xb38   : > { %p11240_p6 = pnand %p11239_p2, %p11233_p11 }
 0xb3a   : > { %11243 = shalt.err (!%p11240_p6)
}
 0xb3b   : > { %s12582_s4 = sld [smem:[#allocation45_spill]] }
 0xb41   : > { %s11244_s2 = scalar_lea.hbm %s12582_s4, 1024 }
 0xb42   : > { %p11245_p12 = scmp.ne.s32.totalorder %s12582_s4, %s11244_s2  ;;  %p11250_p0 = scmp.lt.u32.totalorder %s11244_s2, %s12582_s4 }
 0xb44   : > { %p11246_p13 = pnand %p11245_p12, %p12451_p10 }
 0xb46   : > { %p11247_p5 = pneg %p11246_p13 }
 0xb48   : > { %p11252_p4 = pnand %p11250_p0, %p11247_p5 }
 0xb4a   : > { %11255 = shalt.err (!%p11252_p4)
}
 0xb4b   : > { %10207 = dma.vmem_to_hbm [thread:$0]  (%p12451_p10), %s8897_s15, 1024, %s12582_s4, [#allocation5]  }
 0xb4c   : > { %11317 = dma.done.wait (%p12451_p10), [#allocation5], 1024  }
 0xb4d   : > { %11319 = vsyncadd (%p12451_p10), [#allocation5], 4294966272 }
 0xb4e PF: > { %s12583_s26 = sld [smem:[#allocation37_spill]]  ;;  %s12584_s25 = sld [smem:[#allocation34_spill]] }
 0xb4f   : > { %s12585_s18 = smov %s12593_s28  ;;  %s12588_s28 = smov %s11342_s30 }
 0xb50   : > { %s12589_s29 = smov %s11346_s14  ;;  %s12590_s30 = smov %s12585_s18 }
 0xb51   : > { %s12591_s14 = smov %s12597_s21 }
 0xb54   : > { %s33_s15 = sadd.s32 1, %s12583_s26   ;;  %s12586_s26 = smov %s11330_s27 }
 0xb55   : > { %p30_p8 = scmp.ge.s32.totalorder %s33_s15, 10   ;;  %s12587_s27 = smov %s11789_s20 }
 0xb57   :  { %32 = sbr.rel (!%p30_p8) target bundleno = 19 (0x13), region = 175 }
 0xb5e   :  { %8909 = vsyncpa [#allocation4], 1 }
 0xb5f   :  { %8911 = vsyncpa [#allocation4 + $0x1], 1 }
 0xb60   :  { %8912 = vsyncpa [#allocation7], 1 }
 0xb61   :  { %8913 = vsyncpa [#allocation10], 1 }
 0xb62   :  { %8914 = vsyncpa [#allocation13], 1 }
 0xb63   :  { %8915 = vsyncpa [#allocation16], 1 }
 0xb64   :  { %8916 = vsyncpa [#allocation19], 1 }
 0xb65   :  { %8917 = vsyncpa [#allocation22], 1 }
 0xb66   :  { %8918 = vsyncpa [#allocation5], 1 }
 0xb67   :  { %8920 = vsyncpa [#allocation5 + $0x1], 1 }

</bundles_post_ra>
